<compile_context>
chip_gen: v7x
topology: tpu7x:2x2x1
jax: 0.10.0
libtpu: 0.0.40
codegen_flags: <defaults>
</compile_context>

<pallas_src>
import math
import jax
import jax.numpy as jnp
from jax.experimental import pallas as pl
from jax.experimental.pallas import tpu as pltpu  # noqa: F401  (TPU backend)

# ---------------- small config (bert-base scaled down) ----------------------
B = 2              # batch
S = 8              # sequence length
H = 64             # hidden size          (bert-base: 768)
NH = 8             # attention heads      (matches nn.MultiheadAttention(num_heads=8))
HD = H // NH       # head dim
INTER = 128        # FFN intermediate     (bert-base: 3072)
L = 2              # encoder layers       (bert-base: 12)
VOCAB = 100
MAX_POS = 32
TYPE_VOCAB = 2
NUM_CLASSES = 5
CPAD = 128         # classifier output padded to a full 128-lane width
T = B * S          # flattened token count processed as one slab
LN_EPS = 1e-12
NEG_INF = -10000.0     # HF BERT additive padding-mask constant
BLOCK_NEG = -1e9       # separates independent attention contexts in the fused (T,T) mask
SCALE = 1.0 / math.sqrt(HD)


# ---------------- in-kernel helpers (traced inside the Pallas kernel) -------
def _linear(x, w, b):
    # y = x @ w.T + b   (torch nn.Linear convention W[out, in])
    y = jax.lax.dot_general(x, w, (((1,), (1,)), ((), ())),
                            preferred_element_type=jnp.float32)
    return y + b


def _layer_norm(x, g, b):
    mu = jnp.mean(x, axis=-1, keepdims=True)
    var = jnp.mean(jnp.square(x - mu), axis=-1, keepdims=True)
    return (x - mu) * jax.lax.rsqrt(var + LN_EPS) * g + b


def _gelu(x):
    # TODO(synk): HF BERT uses the exact erf-based GELU; tanh approximation used
    # here for robust EUP-friendly TPU lowering.
    c = 0.7978845608028654
    return 0.5 * x * (1.0 + jnp.tanh(c * (x + 0.044715 * x * x * x)))


def _softmax(x):
    m = jnp.max(x, axis=-1, keepdims=True)
    e = jnp.exp(x - m)
    return e * pl.reciprocal(jnp.sum(e, axis=-1, keepdims=True), approx=True)


def _mha(x, wq, bq, wk, bk, wv, bv, wo, bo, mask2d, base):
    """Multi-head attention on the full (T, H) token slab.

    Head weights are pre-split in the wrapper and stacked along the leading
    axis (stacks indexed at `base + h`), so there is no in-kernel lane slicing.
    `mask2d` is a (T, T) additive mask encoding which tokens share an attention
    context (batch row for the encoder, sequence column for the cross-batch
    MHA) plus the padding mask; masked entries underflow to exactly 0 after
    exp, so this is equivalent to independent per-context softmax attention.
    Per-head output projections accumulate into a single (T, H) result, which
    equals concat(heads) @ Wo.T.
    """
    out = None
    for h in range(NH):                        # static unroll, NH = 8
        i = base + h
        q = _linear(x, wq[i], bq[i])           # (T, HD)
        k = _linear(x, wk[i], bk[i])           # (T, HD)
        v = _linear(x, wv[i], bv[i])           # (T, HD)
        s = jax.lax.dot_general(q, k, (((1,), (1,)), ((), ())),
                                preferred_element_type=jnp.float32) * SCALE
        p = _softmax(s + mask2d)               # (T, T)
        ctx = jnp.dot(p, v, preferred_element_type=jnp.float32)       # (T, HD)
        o = jax.lax.dot_general(ctx, wo[i], (((1,), (1,)), ((), ())),
                                preferred_element_type=jnp.float32)   # (T, H)
        out = o if out is None else out + o
    return out + bo


# ---------------- the single fused Pallas kernel ----------------------------
def _fused_bert_kernel(emb_ref, enc_mask_ref, cross_mask_ref,
                       eg_ref, eb_ref,
                       wq_ref, bq_ref, wk_ref, bk_ref, wv_ref, bv_ref,
                       wo_ref, bo_ref, g1_ref, b1_ref,
                       wi_ref, bi_ref, wf_ref, bf_ref, g2_ref, b2_ref,
                       mwq_ref, mbq_ref, mwk_ref, mbk_ref, mwv_ref, mbv_ref,
                       mwo_ref, mbo_ref, cw_ref, cb_ref,
                       out_ref):
    # embedding LayerNorm on the whole (T, H) slab
    x = _layer_norm(emb_ref[...].astype(jnp.float32), eg_ref[...], eb_ref[...])
    enc_mask = enc_mask_ref[...]               # load once, reuse across layers

    # L encoder layers, weights stacked along a leading axis
    for l in range(L):                         # static unroll, L = 2
        attn = _mha(x, wq_ref, bq_ref, wk_ref, bk_ref, wv_ref, bv_ref,
                    wo_ref, bo_ref[l], enc_mask, base=l * NH)
        h1 = _layer_norm(x + attn, g1_ref[l], b1_ref[l])
        inter = _gelu(_linear(h1, wi_ref[l], bi_ref[l]))   # (T, INTER)
        ff = _linear(inter, wf_ref[l], bf_ref[l])          # (T, H)
        x = _layer_norm(h1 + ff, g2_ref[l], b2_ref[l])

    # extra nn.MultiheadAttention: attention over the *batch* axis (no mask)
    att = _mha(x, mwq_ref, mbq_ref, mwk_ref, mbk_ref, mwv_ref, mbv_ref,
               mwo_ref, mbo_ref[...], cross_mask_ref[...], base=0)

    # classifier applied to the whole slab -> lane-dense (T, 128) store.
    # dropout(0.3) is identity in eval mode.  The wrapper selects rows b*S
    # (== attention_output[:, 0, :]) and the first NUM_CLASSES lanes.
    out_ref[...] = _linear(att, cw_ref[...], cb_ref[...]).astype(out_ref.dtype)


# ---------------- full forward ------------------------------------------------
def improved_bert_forward(packed, input_ids, attention_mask):
    # --- BERT embeddings (gathers are plain-JAX glue) ---
    pos_ids = jnp.arange(S, dtype=jnp.int32)[None, :]
    emb = (packed['word_emb'][input_ids]
           + packed['pos_emb'][pos_ids]
           + packed['type_emb'][jnp.zeros_like(input_ids)])       # (B, S, H)
    emb2 = emb.reshape(T, H)
    # (BERT embedding dropout p=0.1 -> eval mode identity)

    # --- fused (T, T) additive masks, built once in plain JAX ---
    rows = jnp.arange(T)
    batch_id = rows // S
    col_id = rows % S
    key_pad = (1.0 - attention_mask.astype(jnp.float32).reshape(T)) * NEG_INF
    enc_mask = jnp.where(batch_id[:, None] == batch_id[None, :],
                         key_pad[None, :], BLOCK_NEG).astype(jnp.float32)
    cross_mask = jnp.where(col_id[:, None] == col_id[None, :],
                           jnp.float32(0.0), BLOCK_NEG).astype(jnp.float32)

    out = pl.pallas_call(
        _fused_bert_kernel,
        out_shape=jax.ShapeDtypeStruct((T, CPAD), jnp.float32),
    )(emb2, enc_mask, cross_mask,
      packed['emb_ln_g'], packed['emb_ln_b'],
      packed['wq'], packed['bq'], packed['wk'], packed['bk'],
      packed['wv'], packed['bv'], packed['wo'], packed['bo'],
      packed['g1'], packed['b1'],
      packed['wi'], packed['bi'], packed['wf'], packed['bf'],
      packed['g2'], packed['b2'],
      packed['mwq'], packed['mbq'], packed['mwk'], packed['mbk'],
      packed['mwv'], packed['mbv'], packed['mwo'], packed['mbo'],
      packed['cls_w'], packed['cls_b'])

    # attention_output[:, 0, :] -> rows 0, S, 2S, ...; logits in lanes 0..NUM_CLASSES
    return out.reshape(B, S, CPAD)[:, 0, :NUM_CLASSES]


# ---------------- deterministic synthetic parameters (torch conventions) ------
def init_params(seed=0):
    keys = iter(jax.random.split(jax.random.PRNGKey(seed), 64))
    nrm = lambda shape, s=0.02: s * jax.random.normal(next(keys), shape, jnp.float32)
    zeros = lambda shape: jnp.zeros(shape, jnp.float32)
    ones = lambda shape: jnp.ones(shape, jnp.float32)

    layers = []
    for _ in range(L):
        layers.append(dict(
            wq=nrm((H, H)), bq=zeros((H,)),
            wk=nrm((H, H)), bk=zeros((H,)),
            wv=nrm((H, H)), bv=zeros((H,)),
            wo=nrm((H, H)), bo=zeros((H,)),
            g1=ones((H,)), b1=zeros((H,)),
            wi=nrm((INTER, H)), bi=zeros((INTER,)),
            wf=nrm((H, INTER)), bf=zeros((H,)),
            g2=ones((H,)), b2=zeros((H,)),
        ))

    in_proj_w = nrm((3 * H, H))          # torch MHA combined in_proj_weight
    in_proj_b = zeros((3 * H,))
    mha = dict(wq=in_proj_w[0:H],        bq=in_proj_b[0:H],
               wk=in_proj_w[H:2 * H],    bk=in_proj_b[H:2 * H],
               wv=in_proj_w[2 * H:],     bv=in_proj_b[2 * H:],
               wo=nrm((H, H)),           bo=zeros((H,)))

    return dict(word_emb=nrm((VOCAB, H)), pos_emb=nrm((MAX_POS, H)),
                type_emb=nrm((TYPE_VOCAB, H)),
                emb_ln_g=ones((H,)), emb_ln_b=zeros((H,)),
                layers=layers, mha=mha,
                cls_w=nrm((NUM_CLASSES, H)), cls_b=zeros((NUM_CLASSES,)))


# ---------------- pack torch-layout params into the fused-kernel layout -------
def _split_heads_w(w):    # (H, H) -> (NH, HD, H): rows of head h
    return w.reshape(NH, HD, H)


def _split_heads_b(b):    # (H,) -> (NH, 1, HD)
    return b.reshape(NH, HD)[:, None, :]


def _split_heads_wo(w):   # (H, H) -> (NH, H, HD): head h -> Wo[:, h*HD:(h+1)*HD]
    return jnp.transpose(w.reshape(H, NH, HD), (1, 0, 2))


def pack_params(p):
    """Stack layer weights along a leading axis, pre-split attention heads,
    keep small params 2-D/3-D for clean VMEM tiling, pad the classifier to a
    lane-dense 128-wide output.  Plain-JAX, done once outside the kernel."""
    ls = p['layers']
    cat = lambda fn, name: jnp.concatenate([fn(l[name]) for l in ls], axis=0)
    row = lambda name: jnp.stack([l[name][None, :] for l in ls], axis=0)   # (L,1,X)
    return dict(
        word_emb=p['word_emb'], pos_emb=p['pos_emb'], type_emb=p['type_emb'],
        emb_ln_g=p['emb_ln_g'][None, :], emb_ln_b=p['emb_ln_b'][None, :],
        wq=cat(_split_heads_w, 'wq'), bq=cat(_split_heads_b, 'bq'),
        wk=cat(_split_heads_w, 'wk'), bk=cat(_split_heads_b, 'bk'),
        wv=cat(_split_heads_w, 'wv'), bv=cat(_split_heads_b, 'bv'),
        wo=cat(_split_heads_wo, 'wo'), bo=row('bo'),
        g1=row('g1'), b1=row('b1'), g2=row('g2'), b2=row('b2'),
        wi=jnp.stack([l['wi'] for l in ls], axis=0), bi=row('bi'),
        wf=jnp.stack([l['wf'] for l in ls], axis=0), bf=row('bf'),
        mwq=_split_heads_w(p['mha']['wq']), mbq=_split_heads_b(p['mha']['bq']),
        mwk=_split_heads_w(p['mha']['wk']), mbk=_split_heads_b(p['mha']['bk']),
        mwv=_split_heads_w(p['mha']['wv']), mbv=_split_heads_b(p['mha']['bv']),
        mwo=_split_heads_wo(p['mha']['wo']), mbo=p['mha']['bo'][None, :],
        cls_w=jnp.zeros((CPAD, H), jnp.float32).at[:NUM_CLASSES].set(p['cls_w']),
        cls_b=jnp.zeros((1, CPAD), jnp.float32).at[0, :NUM_CLASSES].set(p['cls_b']),
    )


if __name__ == "__main__":
    params = init_params(0)
    packed = pack_params(params)

    k1, _ = jax.random.split(jax.random.PRNGKey(0))
    input_ids = jax.random.randint(k1, (B, S), 0, VOCAB, dtype=jnp.int32)
    attention_mask = jnp.ones((B, S), jnp.float32).at[1, S - 2:].set(0.0)  # pad 2 tokens

    fwd = jax.jit(improved_bert_forward)
    logits = fwd(packed, input_ids, attention_mask)
    jax.block_until_ready(logits)
    assert logits.shape == (B, NUM_CLASSES)
    print("KERNEL_OK")
</pallas_src>

<mosaic_0001>
module attributes {stable_mosaic.version = 11 : i64} {
  func.func @_fused_bert_kernel(%arg0: memref<16x64xf32, #tpu.memory_space<vmem>>, %arg1: memref<16x16xf32, #tpu.memory_space<vmem>>, %arg2: memref<16x16xf32, #tpu.memory_space<vmem>>, %arg3: memref<1x64xf32, #tpu.memory_space<vmem>>, %arg4: memref<1x64xf32, #tpu.memory_space<vmem>>, %arg5: memref<16x8x64xf32, #tpu.memory_space<vmem>>, %arg6: memref<16x1x8xf32, #tpu.memory_space<vmem>>, %arg7: memref<16x8x64xf32, #tpu.memory_space<vmem>>, %arg8: memref<16x1x8xf32, #tpu.memory_space<vmem>>, %arg9: memref<16x8x64xf32, #tpu.memory_space<vmem>>, %arg10: memref<16x1x8xf32, #tpu.memory_space<vmem>>, %arg11: memref<16x64x8xf32, #tpu.memory_space<vmem>>, %arg12: memref<2x1x64xf32, #tpu.memory_space<vmem>>, %arg13: memref<2x1x64xf32, #tpu.memory_space<vmem>>, %arg14: memref<2x1x64xf32, #tpu.memory_space<vmem>>, %arg15: memref<2x128x64xf32, #tpu.memory_space<vmem>>, %arg16: memref<2x1x128xf32, #tpu.memory_space<vmem>>, %arg17: memref<2x64x128xf32, #tpu.memory_space<vmem>>, %arg18: memref<2x1x64xf32, #tpu.memory_space<vmem>>, %arg19: memref<2x1x64xf32, #tpu.memory_space<vmem>>, %arg20: memref<2x1x64xf32, #tpu.memory_space<vmem>>, %arg21: memref<8x8x64xf32, #tpu.memory_space<vmem>>, %arg22: memref<8x1x8xf32, #tpu.memory_space<vmem>>, %arg23: memref<8x8x64xf32, #tpu.memory_space<vmem>>, %arg24: memref<8x1x8xf32, #tpu.memory_space<vmem>>, %arg25: memref<8x8x64xf32, #tpu.memory_space<vmem>>, %arg26: memref<8x1x8xf32, #tpu.memory_space<vmem>>, %arg27: memref<8x64x8xf32, #tpu.memory_space<vmem>>, %arg28: memref<1x64xf32, #tpu.memory_space<vmem>>, %arg29: memref<128x64xf32, #tpu.memory_space<vmem>>, %arg30: memref<1x128xf32, #tpu.memory_space<vmem>>, %arg31: memref<16x128xf32, #tpu.memory_space<vmem>>) attributes {dimension_semantics = [], scalar_prefetch = 0 : i64, scratch_operands = 0 : i64, tpu.core_type = #tpu.core_type<tc>} {
    %c0 = arith.constant 0 : index
    %c0_0 = arith.constant 0 : index
    %0 = vector.load %arg0[%c0, %c0_0] : memref<16x64xf32, #tpu.memory_space<vmem>>, vector<16x64xf32>
    %c0_1 = arith.constant 0 : index
    %c0_2 = arith.constant 0 : index
    %1 = vector.load %arg3[%c0_1, %c0_2] : memref<1x64xf32, #tpu.memory_space<vmem>>, vector<1x64xf32>
    %c0_3 = arith.constant 0 : index
    %c0_4 = arith.constant 0 : index
    %2 = vector.load %arg4[%c0_3, %c0_4] : memref<1x64xf32, #tpu.memory_space<vmem>>, vector<1x64xf32>
    %cst = arith.constant dense<0.000000e+00> : vector<16xf32>
    %3 = vector.multi_reduction <add>, %0, %cst [1] : vector<16x64xf32> to vector<16xf32>
    %4 = vector.shape_cast %3 : vector<16xf32> to vector<16x1xf32>
    %cst_5 = arith.constant 6.400000e+01 : f32
    %5 = vector.broadcast %cst_5 : f32 to vector<16x1xf32>
    %6 = arith.divf %4, %5 : vector<16x1xf32>
    %7 = vector.broadcast %6 : vector<16x1xf32> to vector<16x64xf32>
    %8 = arith.subf %0, %7 : vector<16x64xf32>
    %9 = arith.mulf %8, %8 : vector<16x64xf32>
    %cst_6 = arith.constant dense<0.000000e+00> : vector<16xf32>
    %10 = vector.multi_reduction <add>, %9, %cst_6 [1] : vector<16x64xf32> to vector<16xf32>
    %11 = vector.shape_cast %10 : vector<16xf32> to vector<16x1xf32>
    %cst_7 = arith.constant 6.400000e+01 : f32
    %12 = vector.broadcast %cst_7 : f32 to vector<16x1xf32>
    %13 = arith.divf %11, %12 : vector<16x1xf32>
    %14 = vector.broadcast %6 : vector<16x1xf32> to vector<16x64xf32>
    %15 = arith.subf %0, %14 : vector<16x64xf32>
    %cst_8 = arith.constant 9.99999996E-13 : f32
    %16 = vector.broadcast %cst_8 : f32 to vector<16x1xf32>
    %17 = arith.addf %13, %16 : vector<16x1xf32>
    %18 = math.rsqrt %17 : vector<16x1xf32>
    %19 = vector.broadcast %18 : vector<16x1xf32> to vector<16x64xf32>
    %20 = arith.mulf %15, %19 : vector<16x64xf32>
    %21 = vector.broadcast %1 : vector<1x64xf32> to vector<16x64xf32>
    %22 = arith.mulf %20, %21 : vector<16x64xf32>
    %23 = vector.broadcast %2 : vector<1x64xf32> to vector<16x64xf32>
    %24 = arith.addf %22, %23 : vector<16x64xf32>
    %c0_9 = arith.constant 0 : index
    %c0_10 = arith.constant 0 : index
    %25 = vector.load %arg1[%c0_9, %c0_10] : memref<16x16xf32, #tpu.memory_space<vmem>>, vector<16x16xf32>
    %c0_11 = arith.constant 0 : index
    %c0_12 = arith.constant 0 : index
    %c0_13 = arith.constant 0 : index
    %26 = vector.load %arg12[%c0_11, %c0_12, %c0_13] : memref<2x1x64xf32, #tpu.memory_space<vmem>>, vector<1x1x64xf32>
    %27 = vector.shape_cast %26 : vector<1x1x64xf32> to vector<1x64xf32>
    %c0_14 = arith.constant 0 : index
    %c0_15 = arith.constant 0 : index
    %c0_16 = arith.constant 0 : index
    %28 = vector.load %arg5[%c0_14, %c0_15, %c0_16] : memref<16x8x64xf32, #tpu.memory_space<vmem>>, vector<1x8x64xf32>
    %29 = vector.shape_cast %28 : vector<1x8x64xf32> to vector<8x64xf32>
    %c0_17 = arith.constant 0 : index
    %c0_18 = arith.constant 0 : index
    %c0_19 = arith.constant 0 : index
    %30 = vector.load %arg6[%c0_17, %c0_18, %c0_19] : memref<16x1x8xf32, #tpu.memory_space<vmem>>, vector<1x1x8xf32>
    %31 = vector.shape_cast %30 : vector<1x1x8xf32> to vector<1x8xf32>
    %cst_20 = arith.constant dense<0.000000e+00> : vector<16x8xf32>
    %32 = tpu.matmul %24, %29, %cst_20 {dimension_numbers = #tpu.dot_dimension_numbers<[1], [1], [0], [0], [0, 0, 1, 0], [], []>} : vector<16x64xf32>, vector<8x64xf32>, vector<16x8xf32> -> vector<16x8xf32>
    %33 = vector.broadcast %31 : vector<1x8xf32> to vector<16x8xf32>
    %34 = arith.addf %32, %33 : vector<16x8xf32>
    %c0_21 = arith.constant 0 : index
    %c0_22 = arith.constant 0 : index
    %c0_23 = arith.constant 0 : index
    %35 = vector.load %arg7[%c0_21, %c0_22, %c0_23] : memref<16x8x64xf32, #tpu.memory_space<vmem>>, vector<1x8x64xf32>
    %36 = vector.shape_cast %35 : vector<1x8x64xf32> to vector<8x64xf32>
    %c0_24 = arith.constant 0 : index
    %c0_25 = arith.constant 0 : index
    %c0_26 = arith.constant 0 : index
    %37 = vector.load %arg8[%c0_24, %c0_25, %c0_26] : memref<16x1x8xf32, #tpu.memory_space<vmem>>, vector<1x1x8xf32>
    %38 = vector.shape_cast %37 : vector<1x1x8xf32> to vector<1x8xf32>
    %cst_27 = arith.constant dense<0.000000e+00> : vector<16x8xf32>
    %39 = tpu.matmul %24, %36, %cst_27 {dimension_numbers = #tpu.dot_dimension_numbers<[1], [1], [0], [0], [0, 0, 1, 0], [], []>} : vector<16x64xf32>, vector<8x64xf32>, vector<16x8xf32> -> vector<16x8xf32>
    %40 = vector.broadcast %38 : vector<1x8xf32> to vector<16x8xf32>
    %41 = arith.addf %39, %40 : vector<16x8xf32>
    %c0_28 = arith.constant 0 : index
    %c0_29 = arith.constant 0 : index
    %c0_30 = arith.constant 0 : index
    %42 = vector.load %arg9[%c0_28, %c0_29, %c0_30] : memref<16x8x64xf32, #tpu.memory_space<vmem>>, vector<1x8x64xf32>
    %43 = vector.shape_cast %42 : vector<1x8x64xf32> to vector<8x64xf32>
    %c0_31 = arith.constant 0 : index
    %c0_32 = arith.constant 0 : index
    %c0_33 = arith.constant 0 : index
    %44 = vector.load %arg10[%c0_31, %c0_32, %c0_33] : memref<16x1x8xf32, #tpu.memory_space<vmem>>, vector<1x1x8xf32>
    %45 = vector.shape_cast %44 : vector<1x1x8xf32> to vector<1x8xf32>
    %cst_34 = arith.constant dense<0.000000e+00> : vector<16x8xf32>
    %46 = tpu.matmul %24, %43, %cst_34 {dimension_numbers = #tpu.dot_dimension_numbers<[1], [1], [0], [0], [0, 0, 1, 0], [], []>} : vector<16x64xf32>, vector<8x64xf32>, vector<16x8xf32> -> vector<16x8xf32>
    %47 = vector.broadcast %45 : vector<1x8xf32> to vector<16x8xf32>
    %48 = arith.addf %46, %47 : vector<16x8xf32>
    %cst_35 = arith.constant dense<0.000000e+00> : vector<16x16xf32>
    %49 = tpu.matmul %34, %41, %cst_35 {dimension_numbers = #tpu.dot_dimension_numbers<[1], [1], [0], [0], [0, 0, 1, 0], [], []>} : vector<16x8xf32>, vector<16x8xf32>, vector<16x16xf32> -> vector<16x16xf32>
    %cst_36 = arith.constant 0.353553385 : f32
    %50 = vector.broadcast %cst_36 : f32 to vector<16x16xf32>
    %51 = arith.mulf %49, %50 : vector<16x16xf32>
    %52 = arith.addf %51, %25 : vector<16x16xf32>
    %cst_37 = arith.constant dense<0xFF800000> : vector<16xf32>
    %53 = vector.multi_reduction <maximumf>, %52, %cst_37 [1] : vector<16x16xf32> to vector<16xf32>
    %54 = vector.shape_cast %53 : vector<16xf32> to vector<16x1xf32>
    %55 = vector.broadcast %54 : vector<16x1xf32> to vector<16x16xf32>
    %56 = arith.subf %52, %55 : vector<16x16xf32>
    %57 = math.exp %56 : vector<16x16xf32>
    %cst_38 = arith.constant dense<0.000000e+00> : vector<16xf32>
    %58 = vector.multi_reduction <add>, %57, %cst_38 [1] : vector<16x16xf32> to vector<16xf32>
    %59 = vector.shape_cast %58 : vector<16xf32> to vector<16x1xf32>
    %60 = tpu.reciprocal %59 {approx = true} : vector<16x1xf32> -> vector<16x1xf32>
    %61 = vector.broadcast %60 : vector<16x1xf32> to vector<16x16xf32>
    %62 = arith.mulf %57, %61 : vector<16x16xf32>
    %cst_39 = arith.constant dense<0.000000e+00> : vector<16x8xf32>
    %63 = tpu.matmul %62, %48, %cst_39 {dimension_numbers = #tpu.dot_dimension_numbers<[1], [0], [0], [1], [0, 0, 1, 1], [], []>} : vector<16x16xf32>, vector<16x8xf32>, vector<16x8xf32> -> vector<16x8xf32>
    %c0_40 = arith.constant 0 : index
    %c0_41 = arith.constant 0 : index
    %c0_42 = arith.constant 0 : index
    %64 = vector.load %arg11[%c0_40, %c0_41, %c0_42] : memref<16x64x8xf32, #tpu.memory_space<vmem>>, vector<1x64x8xf32>
    %65 = vector.shape_cast %64 : vector<1x64x8xf32> to vector<64x8xf32>
    %cst_43 = arith.constant dense<0.000000e+00> : vector<16x64xf32>
    %66 = tpu.matmul %63, %65, %cst_43 {dimension_numbers = #tpu.dot_dimension_numbers<[1], [1], [0], [0], [0, 0, 1, 0], [], []>} : vector<16x8xf32>, vector<64x8xf32>, vector<16x64xf32> -> vector<16x64xf32>
    %c1 = arith.constant 1 : index
    %c0_44 = arith.constant 0 : index
    %c0_45 = arith.constant 0 : index
    %67 = vector.load %arg5[%c1, %c0_44, %c0_45] : memref<16x8x64xf32, #tpu.memory_space<vmem>>, vector<1x8x64xf32>
    %68 = vector.shape_cast %67 : vector<1x8x64xf32> to vector<8x64xf32>
    %c1_46 = arith.constant 1 : index
    %c0_47 = arith.constant 0 : index
    %c0_48 = arith.constant 0 : index
    %69 = vector.load %arg6[%c1_46, %c0_47, %c0_48] : memref<16x1x8xf32, #tpu.memory_space<vmem>>, vector<1x1x8xf32>
    %70 = vector.shape_cast %69 : vector<1x1x8xf32> to vector<1x8xf32>
    %cst_49 = arith.constant dense<0.000000e+00> : vector<16x8xf32>
    %71 = tpu.matmul %24, %68, %cst_49 {dimension_numbers = #tpu.dot_dimension_numbers<[1], [1], [0], [0], [0, 0, 1, 0], [], []>} : vector<16x64xf32>, vector<8x64xf32>, vector<16x8xf32> -> vector<16x8xf32>
    %72 = vector.broadcast %70 : vector<1x8xf32> to vector<16x8xf32>
    %73 = arith.addf %71, %72 : vector<16x8xf32>
    %c1_50 = arith.constant 1 : index
    %c0_51 = arith.constant 0 : index
    %c0_52 = arith.constant 0 : index
    %74 = vector.load %arg7[%c1_50, %c0_51, %c0_52] : memref<16x8x64xf32, #tpu.memory_space<vmem>>, vector<1x8x64xf32>
    %75 = vector.shape_cast %74 : vector<1x8x64xf32> to vector<8x64xf32>
    %c1_53 = arith.constant 1 : index
    %c0_54 = arith.constant 0 : index
    %c0_55 = arith.constant 0 : index
    %76 = vector.load %arg8[%c1_53, %c0_54, %c0_55] : memref<16x1x8xf32, #tpu.memory_space<vmem>>, vector<1x1x8xf32>
    %77 = vector.shape_cast %76 : vector<1x1x8xf32> to vector<1x8xf32>
    %cst_56 = arith.constant dense<0.000000e+00> : vector<16x8xf32>
    %78 = tpu.matmul %24, %75, %cst_56 {dimension_numbers = #tpu.dot_dimension_numbers<[1], [1], [0], [0], [0, 0, 1, 0], [], []>} : vector<16x64xf32>, vector<8x64xf32>, vector<16x8xf32> -> vector<16x8xf32>
    %79 = vector.broadcast %77 : vector<1x8xf32> to vector<16x8xf32>
    %80 = arith.addf %78, %79 : vector<16x8xf32>
    %c1_57 = arith.constant 1 : index
    %c0_58 = arith.constant 0 : index
    %c0_59 = arith.constant 0 : index
    %81 = vector.load %arg9[%c1_57, %c0_58, %c0_59] : memref<16x8x64xf32, #tpu.memory_space<vmem>>, vector<1x8x64xf32>
    %82 = vector.shape_cast %81 : vector<1x8x64xf32> to vector<8x64xf32>
    %c1_60 = arith.constant 1 : index
    %c0_61 = arith.constant 0 : index
    %c0_62 = arith.constant 0 : index
    %83 = vector.load %arg10[%c1_60, %c0_61, %c0_62] : memref<16x1x8xf32, #tpu.memory_space<vmem>>, vector<1x1x8xf32>
    %84 = vector.shape_cast %83 : vector<1x1x8xf32> to vector<1x8xf32>
    %cst_63 = arith.constant dense<0.000000e+00> : vector<16x8xf32>
    %85 = tpu.matmul %24, %82, %cst_63 {dimension_numbers = #tpu.dot_dimension_numbers<[1], [1], [0], [0], [0, 0, 1, 0], [], []>} : vector<16x64xf32>, vector<8x64xf32>, vector<16x8xf32> -> vector<16x8xf32>
    %86 = vector.broadcast %84 : vector<1x8xf32> to vector<16x8xf32>
    %87 = arith.addf %85, %86 : vector<16x8xf32>
    %cst_64 = arith.constant dense<0.000000e+00> : vector<16x16xf32>
    %88 = tpu.matmul %73, %80, %cst_64 {dimension_numbers = #tpu.dot_dimension_numbers<[1], [1], [0], [0], [0, 0, 1, 0], [], []>} : vector<16x8xf32>, vector<16x8xf32>, vector<16x16xf32> -> vector<16x16xf32>
    %cst_65 = arith.constant 0.353553385 : f32
    %89 = vector.broadcast %cst_65 : f32 to vector<16x16xf32>
    %90 = arith.mulf %88, %89 : vector<16x16xf32>
    %91 = arith.addf %90, %25 : vector<16x16xf32>
    %cst_66 = arith.constant dense<0xFF800000> : vector<16xf32>
    %92 = vector.multi_reduction <maximumf>, %91, %cst_66 [1] : vector<16x16xf32> to vector<16xf32>
    %93 = vector.shape_cast %92 : vector<16xf32> to vector<16x1xf32>
    %94 = vector.broadcast %93 : vector<16x1xf32> to vector<16x16xf32>
    %95 = arith.subf %91, %94 : vector<16x16xf32>
    %96 = math.exp %95 : vector<16x16xf32>
    %cst_67 = arith.constant dense<0.000000e+00> : vector<16xf32>
    %97 = vector.multi_reduction <add>, %96, %cst_67 [1] : vector<16x16xf32> to vector<16xf32>
    %98 = vector.shape_cast %97 : vector<16xf32> to vector<16x1xf32>
    %99 = tpu.reciprocal %98 {approx = true} : vector<16x1xf32> -> vector<16x1xf32>
    %100 = vector.broadcast %99 : vector<16x1xf32> to vector<16x16xf32>
    %101 = arith.mulf %96, %100 : vector<16x16xf32>
    %cst_68 = arith.constant dense<0.000000e+00> : vector<16x8xf32>
    %102 = tpu.matmul %101, %87, %cst_68 {dimension_numbers = #tpu.dot_dimension_numbers<[1], [0], [0], [1], [0, 0, 1, 1], [], []>} : vector<16x16xf32>, vector<16x8xf32>, vector<16x8xf32> -> vector<16x8xf32>
    %c1_69 = arith.constant 1 : index
    %c0_70 = arith.constant 0 : index
    %c0_71 = arith.constant 0 : index
    %103 = vector.load %arg11[%c1_69, %c0_70, %c0_71] : memref<16x64x8xf32, #tpu.memory_space<vmem>>, vector<1x64x8xf32>
    %104 = vector.shape_cast %103 : vector<1x64x8xf32> to vector<64x8xf32>
    %cst_72 = arith.constant dense<0.000000e+00> : vector<16x64xf32>
    %105 = tpu.matmul %102, %104, %cst_72 {dimension_numbers = #tpu.dot_dimension_numbers<[1], [1], [0], [0], [0, 0, 1, 0], [], []>} : vector<16x8xf32>, vector<64x8xf32>, vector<16x64xf32> -> vector<16x64xf32>
    %106 = arith.addf %66, %105 : vector<16x64xf32>
    %c2 = arith.constant 2 : index
    %c0_73 = arith.constant 0 : index
    %c0_74 = arith.constant 0 : index
    %107 = vector.load %arg5[%c2, %c0_73, %c0_74] : memref<16x8x64xf32, #tpu.memory_space<vmem>>, vector<1x8x64xf32>
    %108 = vector.shape_cast %107 : vector<1x8x64xf32> to vector<8x64xf32>
    %c2_75 = arith.constant 2 : index
    %c0_76 = arith.constant 0 : index
    %c0_77 = arith.constant 0 : index
    %109 = vector.load %arg6[%c2_75, %c0_76, %c0_77] : memref<16x1x8xf32, #tpu.memory_space<vmem>>, vector<1x1x8xf32>
    %110 = vector.shape_cast %109 : vector<1x1x8xf32> to vector<1x8xf32>
    %cst_78 = arith.constant dense<0.000000e+00> : vector<16x8xf32>
    %111 = tpu.matmul %24, %108, %cst_78 {dimension_numbers = #tpu.dot_dimension_numbers<[1], [1], [0], [0], [0, 0, 1, 0], [], []>} : vector<16x64xf32>, vector<8x64xf32>, vector<16x8xf32> -> vector<16x8xf32>
    %112 = vector.broadcast %110 : vector<1x8xf32> to vector<16x8xf32>
    %113 = arith.addf %111, %112 : vector<16x8xf32>
    %c2_79 = arith.constant 2 : index
    %c0_80 = arith.constant 0 : index
    %c0_81 = arith.constant 0 : index
    %114 = vector.load %arg7[%c2_79, %c0_80, %c0_81] : memref<16x8x64xf32, #tpu.memory_space<vmem>>, vector<1x8x64xf32>
    %115 = vector.shape_cast %114 : vector<1x8x64xf32> to vector<8x64xf32>
    %c2_82 = arith.constant 2 : index
    %c0_83 = arith.constant 0 : index
    %c0_84 = arith.constant 0 : index
    %116 = vector.load %arg8[%c2_82, %c0_83, %c0_84] : memref<16x1x8xf32, #tpu.memory_space<vmem>>, vector<1x1x8xf32>
    %117 = vector.shape_cast %116 : vector<1x1x8xf32> to vector<1x8xf32>
    %cst_85 = arith.constant dense<0.000000e+00> : vector<16x8xf32>
    %118 = tpu.matmul %24, %115, %cst_85 {dimension_numbers = #tpu.dot_dimension_numbers<[1], [1], [0], [0], [0, 0, 1, 0], [], []>} : vector<16x64xf32>, vector<8x64xf32>, vector<16x8xf32> -> vector<16x8xf32>
    %119 = vector.broadcast %117 : vector<1x8xf32> to vector<16x8xf32>
    %120 = arith.addf %118, %119 : vector<16x8xf32>
    %c2_86 = arith.constant 2 : index
    %c0_87 = arith.constant 0 : index
    %c0_88 = arith.constant 0 : index
    %121 = vector.load %arg9[%c2_86, %c0_87, %c0_88] : memref<16x8x64xf32, #tpu.memory_space<vmem>>, vector<1x8x64xf32>
    %122 = vector.shape_cast %121 : vector<1x8x64xf32> to vector<8x64xf32>
    %c2_89 = arith.constant 2 : index
    %c0_90 = arith.constant 0 : index
    %c0_91 = arith.constant 0 : index
    %123 = vector.load %arg10[%c2_89, %c0_90, %c0_91] : memref<16x1x8xf32, #tpu.memory_space<vmem>>, vector<1x1x8xf32>
    %124 = vector.shape_cast %123 : vector<1x1x8xf32> to vector<1x8xf32>
    %cst_92 = arith.constant dense<0.000000e+00> : vector<16x8xf32>
    %125 = tpu.matmul %24, %122, %cst_92 {dimension_numbers = #tpu.dot_dimension_numbers<[1], [1], [0], [0], [0, 0, 1, 0], [], []>} : vector<16x64xf32>, vector<8x64xf32>, vector<16x8xf32> -> vector<16x8xf32>
    %126 = vector.broadcast %124 : vector<1x8xf32> to vector<16x8xf32>
    %127 = arith.addf %125, %126 : vector<16x8xf32>
    %cst_93 = arith.constant dense<0.000000e+00> : vector<16x16xf32>
    %128 = tpu.matmul %113, %120, %cst_93 {dimension_numbers = #tpu.dot_dimension_numbers<[1], [1], [0], [0], [0, 0, 1, 0], [], []>} : vector<16x8xf32>, vector<16x8xf32>, vector<16x16xf32> -> vector<16x16xf32>
    %cst_94 = arith.constant 0.353553385 : f32
    %129 = vector.broadcast %cst_94 : f32 to vector<16x16xf32>
    %130 = arith.mulf %128, %129 : vector<16x16xf32>
    %131 = arith.addf %130, %25 : vector<16x16xf32>
    %cst_95 = arith.constant dense<0xFF800000> : vector<16xf32>
    %132 = vector.multi_reduction <maximumf>, %131, %cst_95 [1] : vector<16x16xf32> to vector<16xf32>
    %133 = vector.shape_cast %132 : vector<16xf32> to vector<16x1xf32>
    %134 = vector.broadcast %133 : vector<16x1xf32> to vector<16x16xf32>
    %135 = arith.subf %131, %134 : vector<16x16xf32>
    %136 = math.exp %135 : vector<16x16xf32>
    %cst_96 = arith.constant dense<0.000000e+00> : vector<16xf32>
    %137 = vector.multi_reduction <add>, %136, %cst_96 [1] : vector<16x16xf32> to vector<16xf32>
    %138 = vector.shape_cast %137 : vector<16xf32> to vector<16x1xf32>
    %139 = tpu.reciprocal %138 {approx = true} : vector<16x1xf32> -> vector<16x1xf32>
    %140 = vector.broadcast %139 : vector<16x1xf32> to vector<16x16xf32>
    %141 = arith.mulf %136, %140 : vector<16x16xf32>
    %cst_97 = arith.constant dense<0.000000e+00> : vector<16x8xf32>
    %142 = tpu.matmul %141, %127, %cst_97 {dimension_numbers = #tpu.dot_dimension_numbers<[1], [0], [0], [1], [0, 0, 1, 1], [], []>} : vector<16x16xf32>, vector<16x8xf32>, vector<16x8xf32> -> vector<16x8xf32>
    %c2_98 = arith.constant 2 : index
    %c0_99 = arith.constant 0 : index
    %c0_100 = arith.constant 0 : index
    %143 = vector.load %arg11[%c2_98, %c0_99, %c0_100] : memref<16x64x8xf32, #tpu.memory_space<vmem>>, vector<1x64x8xf32>
    %144 = vector.shape_cast %143 : vector<1x64x8xf32> to vector<64x8xf32>
    %cst_101 = arith.constant dense<0.000000e+00> : vector<16x64xf32>
    %145 = tpu.matmul %142, %144, %cst_101 {dimension_numbers = #tpu.dot_dimension_numbers<[1], [1], [0], [0], [0, 0, 1, 0], [], []>} : vector<16x8xf32>, vector<64x8xf32>, vector<16x64xf32> -> vector<16x64xf32>
    %146 = arith.addf %106, %145 : vector<16x64xf32>
    %c3 = arith.constant 3 : index
    %c0_102 = arith.constant 0 : index
    %c0_103 = arith.constant 0 : index
    %147 = vector.load %arg5[%c3, %c0_102, %c0_103] : memref<16x8x64xf32, #tpu.memory_space<vmem>>, vector<1x8x64xf32>
    %148 = vector.shape_cast %147 : vector<1x8x64xf32> to vector<8x64xf32>
    %c3_104 = arith.constant 3 : index
    %c0_105 = arith.constant 0 : index
    %c0_106 = arith.constant 0 : index
    %149 = vector.load %arg6[%c3_104, %c0_105, %c0_106] : memref<16x1x8xf32, #tpu.memory_space<vmem>>, vector<1x1x8xf32>
    %150 = vector.shape_cast %149 : vector<1x1x8xf32> to vector<1x8xf32>
    %cst_107 = arith.constant dense<0.000000e+00> : vector<16x8xf32>
    %151 = tpu.matmul %24, %148, %cst_107 {dimension_numbers = #tpu.dot_dimension_numbers<[1], [1], [0], [0], [0, 0, 1, 0], [], []>} : vector<16x64xf32>, vector<8x64xf32>, vector<16x8xf32> -> vector<16x8xf32>
    %152 = vector.broadcast %150 : vector<1x8xf32> to vector<16x8xf32>
    %153 = arith.addf %151, %152 : vector<16x8xf32>
    %c3_108 = arith.constant 3 : index
    %c0_109 = arith.constant 0 : index
    %c0_110 = arith.constant 0 : index
    %154 = vector.load %arg7[%c3_108, %c0_109, %c0_110] : memref<16x8x64xf32, #tpu.memory_space<vmem>>, vector<1x8x64xf32>
    %155 = vector.shape_cast %154 : vector<1x8x64xf32> to vector<8x64xf32>
    %c3_111 = arith.constant 3 : index
    %c0_112 = arith.constant 0 : index
    %c0_113 = arith.constant 0 : index
    %156 = vector.load %arg8[%c3_111, %c0_112, %c0_113] : memref<16x1x8xf32, #tpu.memory_space<vmem>>, vector<1x1x8xf32>
    %157 = vector.shape_cast %156 : vector<1x1x8xf32> to vector<1x8xf32>
    %cst_114 = arith.constant dense<0.000000e+00> : vector<16x8xf32>
    %158 = tpu.matmul %24, %155, %cst_114 {dimension_numbers = #tpu.dot_dimension_numbers<[1], [1], [0], [0], [0, 0, 1, 0], [], []>} : vector<16x64xf32>, vector<8x64xf32>, vector<16x8xf32> -> vector<16x8xf32>
    %159 = vector.broadcast %157 : vector<1x8xf32> to vector<16x8xf32>
    %160 = arith.addf %158, %159 : vector<16x8xf32>
    %c3_115 = arith.constant 3 : index
    %c0_116 = arith.constant 0 : index
    %c0_117 = arith.constant 0 : index
    %161 = vector.load %arg9[%c3_115, %c0_116, %c0_117] : memref<16x8x64xf32, #tpu.memory_space<vmem>>, vector<1x8x64xf32>
    %162 = vector.shape_cast %161 : vector<1x8x64xf32> to vector<8x64xf32>
    %c3_118 = arith.constant 3 : index
    %c0_119 = arith.constant 0 : index
    %c0_120 = arith.constant 0 : index
    %163 = vector.load %arg10[%c3_118, %c0_119, %c0_120] : memref<16x1x8xf32, #tpu.memory_space<vmem>>, vector<1x1x8xf32>
    %164 = vector.shape_cast %163 : vector<1x1x8xf32> to vector<1x8xf32>
    %cst_121 = arith.constant dense<0.000000e+00> : vector<16x8xf32>
    %165 = tpu.matmul %24, %162, %cst_121 {dimension_numbers = #tpu.dot_dimension_numbers<[1], [1], [0], [0], [0, 0, 1, 0], [], []>} : vector<16x64xf32>, vector<8x64xf32>, vector<16x8xf32> -> vector<16x8xf32>
    %166 = vector.broadcast %164 : vector<1x8xf32> to vector<16x8xf32>
    %167 = arith.addf %165, %166 : vector<16x8xf32>
    %cst_122 = arith.constant dense<0.000000e+00> : vector<16x16xf32>
    %168 = tpu.matmul %153, %160, %cst_122 {dimension_numbers = #tpu.dot_dimension_numbers<[1], [1], [0], [0], [0, 0, 1, 0], [], []>} : vector<16x8xf32>, vector<16x8xf32>, vector<16x16xf32> -> vector<16x16xf32>
    %cst_123 = arith.constant 0.353553385 : f32
    %169 = vector.broadcast %cst_123 : f32 to vector<16x16xf32>
    %170 = arith.mulf %168, %169 : vector<16x16xf32>
    %171 = arith.addf %170, %25 : vector<16x16xf32>
    %cst_124 = arith.constant dense<0xFF800000> : vector<16xf32>
    %172 = vector.multi_reduction <maximumf>, %171, %cst_124 [1] : vector<16x16xf32> to vector<16xf32>
    %173 = vector.shape_cast %172 : vector<16xf32> to vector<16x1xf32>
    %174 = vector.broadcast %173 : vector<16x1xf32> to vector<16x16xf32>
    %175 = arith.subf %171, %174 : vector<16x16xf32>
    %176 = math.exp %175 : vector<16x16xf32>
    %cst_125 = arith.constant dense<0.000000e+00> : vector<16xf32>
    %177 = vector.multi_reduction <add>, %176, %cst_125 [1] : vector<16x16xf32> to vector<16xf32>
    %178 = vector.shape_cast %177 : vector<16xf32> to vector<16x1xf32>
    %179 = tpu.reciprocal %178 {approx = true} : vector<16x1xf32> -> vector<16x1xf32>
    %180 = vector.broadcast %179 : vector<16x1xf32> to vector<16x16xf32>
    %181 = arith.mulf %176, %180 : vector<16x16xf32>
    %cst_126 = arith.constant dense<0.000000e+00> : vector<16x8xf32>
    %182 = tpu.matmul %181, %167, %cst_126 {dimension_numbers = #tpu.dot_dimension_numbers<[1], [0], [0], [1], [0, 0, 1, 1], [], []>} : vector<16x16xf32>, vector<16x8xf32>, vector<16x8xf32> -> vector<16x8xf32>
    %c3_127 = arith.constant 3 : index
    %c0_128 = arith.constant 0 : index
    %c0_129 = arith.constant 0 : index
    %183 = vector.load %arg11[%c3_127, %c0_128, %c0_129] : memref<16x64x8xf32, #tpu.memory_space<vmem>>, vector<1x64x8xf32>
    %184 = vector.shape_cast %183 : vector<1x64x8xf32> to vector<64x8xf32>
    %cst_130 = arith.constant dense<0.000000e+00> : vector<16x64xf32>
    %185 = tpu.matmul %182, %184, %cst_130 {dimension_numbers = #tpu.dot_dimension_numbers<[1], [1], [0], [0], [0, 0, 1, 0], [], []>} : vector<16x8xf32>, vector<64x8xf32>, vector<16x64xf32> -> vector<16x64xf32>
    %186 = arith.addf %146, %185 : vector<16x64xf32>
    %c4 = arith.constant 4 : index
    %c0_131 = arith.constant 0 : index
    %c0_132 = arith.constant 0 : index
    %187 = vector.load %arg5[%c4, %c0_131, %c0_132] : memref<16x8x64xf32, #tpu.memory_space<vmem>>, vector<1x8x64xf32>
    %188 = vector.shape_cast %187 : vector<1x8x64xf32> to vector<8x64xf32>
    %c4_133 = arith.constant 4 : index
    %c0_134 = arith.constant 0 : index
    %c0_135 = arith.constant 0 : index
    %189 = vector.load %arg6[%c4_133, %c0_134, %c0_135] : memref<16x1x8xf32, #tpu.memory_space<vmem>>, vector<1x1x8xf32>
    %190 = vector.shape_cast %189 : vector<1x1x8xf32> to vector<1x8xf32>
    %cst_136 = arith.constant dense<0.000000e+00> : vector<16x8xf32>
    %191 = tpu.matmul %24, %188, %cst_136 {dimension_numbers = #tpu.dot_dimension_numbers<[1], [1], [0], [0], [0, 0, 1, 0], [], []>} : vector<16x64xf32>, vector<8x64xf32>, vector<16x8xf32> -> vector<16x8xf32>
    %192 = vector.broadcast %190 : vector<1x8xf32> to vector<16x8xf32>
    %193 = arith.addf %191, %192 : vector<16x8xf32>
    %c4_137 = arith.constant 4 : index
    %c0_138 = arith.constant 0 : index
    %c0_139 = arith.constant 0 : index
    %194 = vector.load %arg7[%c4_137, %c0_138, %c0_139] : memref<16x8x64xf32, #tpu.memory_space<vmem>>, vector<1x8x64xf32>
    %195 = vector.shape_cast %194 : vector<1x8x64xf32> to vector<8x64xf32>
    %c4_140 = arith.constant 4 : index
    %c0_141 = arith.constant 0 : index
    %c0_142 = arith.constant 0 : index
    %196 = vector.load %arg8[%c4_140, %c0_141, %c0_142] : memref<16x1x8xf32, #tpu.memory_space<vmem>>, vector<1x1x8xf32>
    %197 = vector.shape_cast %196 : vector<1x1x8xf32> to vector<1x8xf32>
    %cst_143 = arith.constant dense<0.000000e+00> : vector<16x8xf32>
    %198 = tpu.matmul %24, %195, %cst_143 {dimension_numbers = #tpu.dot_dimension_numbers<[1], [1], [0], [0], [0, 0, 1, 0], [], []>} : vector<16x64xf32>, vector<8x64xf32>, vector<16x8xf32> -> vector<16x8xf32>
    %199 = vector.broadcast %197 : vector<1x8xf32> to vector<16x8xf32>
    %200 = arith.addf %198, %199 : vector<16x8xf32>
    %c4_144 = arith.constant 4 : index
    %c0_145 = arith.constant 0 : index
    %c0_146 = arith.constant 0 : index
    %201 = vector.load %arg9[%c4_144, %c0_145, %c0_146] : memref<16x8x64xf32, #tpu.memory_space<vmem>>, vector<1x8x64xf32>
    %202 = vector.shape_cast %201 : vector<1x8x64xf32> to vector<8x64xf32>
    %c4_147 = arith.constant 4 : index
    %c0_148 = arith.constant 0 : index
    %c0_149 = arith.constant 0 : index
    %203 = vector.load %arg10[%c4_147, %c0_148, %c0_149] : memref<16x1x8xf32, #tpu.memory_space<vmem>>, vector<1x1x8xf32>
    %204 = vector.shape_cast %203 : vector<1x1x8xf32> to vector<1x8xf32>
    %cst_150 = arith.constant dense<0.000000e+00> : vector<16x8xf32>
    %205 = tpu.matmul %24, %202, %cst_150 {dimension_numbers = #tpu.dot_dimension_numbers<[1], [1], [0], [0], [0, 0, 1, 0], [], []>} : vector<16x64xf32>, vector<8x64xf32>, vector<16x8xf32> -> vector<16x8xf32>
    %206 = vector.broadcast %204 : vector<1x8xf32> to vector<16x8xf32>
    %207 = arith.addf %205, %206 : vector<16x8xf32>
    %cst_151 = arith.constant dense<0.000000e+00> : vector<16x16xf32>
    %208 = tpu.matmul %193, %200, %cst_151 {dimension_numbers = #tpu.dot_dimension_numbers<[1], [1], [0], [0], [0, 0, 1, 0], [], []>} : vector<16x8xf32>, vector<16x8xf32>, vector<16x16xf32> -> vector<16x16xf32>
    %cst_152 = arith.constant 0.353553385 : f32
    %209 = vector.broadcast %cst_152 : f32 to vector<16x16xf32>
    %210 = arith.mulf %208, %209 : vector<16x16xf32>
    %211 = arith.addf %210, %25 : vector<16x16xf32>
    %cst_153 = arith.constant dense<0xFF800000> : vector<16xf32>
    %212 = vector.multi_reduction <maximumf>, %211, %cst_153 [1] : vector<16x16xf32> to vector<16xf32>
    %213 = vector.shape_cast %212 : vector<16xf32> to vector<16x1xf32>
    %214 = vector.broadcast %213 : vector<16x1xf32> to vector<16x16xf32>
    %215 = arith.subf %211, %214 : vector<16x16xf32>
    %216 = math.exp %215 : vector<16x16xf32>
    %cst_154 = arith.constant dense<0.000000e+00> : vector<16xf32>
    %217 = vector.multi_reduction <add>, %216, %cst_154 [1] : vector<16x16xf32> to vector<16xf32>
    %218 = vector.shape_cast %217 : vector<16xf32> to vector<16x1xf32>
    %219 = tpu.reciprocal %218 {approx = true} : vector<16x1xf32> -> vector<16x1xf32>
    %220 = vector.broadcast %219 : vector<16x1xf32> to vector<16x16xf32>
    %221 = arith.mulf %216, %220 : vector<16x16xf32>
    %cst_155 = arith.constant dense<0.000000e+00> : vector<16x8xf32>
    %222 = tpu.matmul %221, %207, %cst_155 {dimension_numbers = #tpu.dot_dimension_numbers<[1], [0], [0], [1], [0, 0, 1, 1], [], []>} : vector<16x16xf32>, vector<16x8xf32>, vector<16x8xf32> -> vector<16x8xf32>
    %c4_156 = arith.constant 4 : index
    %c0_157 = arith.constant 0 : index
    %c0_158 = arith.constant 0 : index
    %223 = vector.load %arg11[%c4_156, %c0_157, %c0_158] : memref<16x64x8xf32, #tpu.memory_space<vmem>>, vector<1x64x8xf32>
    %224 = vector.shape_cast %223 : vector<1x64x8xf32> to vector<64x8xf32>
    %cst_159 = arith.constant dense<0.000000e+00> : vector<16x64xf32>
    %225 = tpu.matmul %222, %224, %cst_159 {dimension_numbers = #tpu.dot_dimension_numbers<[1], [1], [0], [0], [0, 0, 1, 0], [], []>} : vector<16x8xf32>, vector<64x8xf32>, vector<16x64xf32> -> vector<16x64xf32>
    %226 = arith.addf %186, %225 : vector<16x64xf32>
    %c5 = arith.constant 5 : index
    %c0_160 = arith.constant 0 : index
    %c0_161 = arith.constant 0 : index
    %227 = vector.load %arg5[%c5, %c0_160, %c0_161] : memref<16x8x64xf32, #tpu.memory_space<vmem>>, vector<1x8x64xf32>
    %228 = vector.shape_cast %227 : vector<1x8x64xf32> to vector<8x64xf32>
    %c5_162 = arith.constant 5 : index
    %c0_163 = arith.constant 0 : index
    %c0_164 = arith.constant 0 : index
    %229 = vector.load %arg6[%c5_162, %c0_163, %c0_164] : memref<16x1x8xf32, #tpu.memory_space<vmem>>, vector<1x1x8xf32>
    %230 = vector.shape_cast %229 : vector<1x1x8xf32> to vector<1x8xf32>
    %cst_165 = arith.constant dense<0.000000e+00> : vector<16x8xf32>
    %231 = tpu.matmul %24, %228, %cst_165 {dimension_numbers = #tpu.dot_dimension_numbers<[1], [1], [0], [0], [0, 0, 1, 0], [], []>} : vector<16x64xf32>, vector<8x64xf32>, vector<16x8xf32> -> vector<16x8xf32>
    %232 = vector.broadcast %230 : vector<1x8xf32> to vector<16x8xf32>
    %233 = arith.addf %231, %232 : vector<16x8xf32>
    %c5_166 = arith.constant 5 : index
    %c0_167 = arith.constant 0 : index
    %c0_168 = arith.constant 0 : index
    %234 = vector.load %arg7[%c5_166, %c0_167, %c0_168] : memref<16x8x64xf32, #tpu.memory_space<vmem>>, vector<1x8x64xf32>
    %235 = vector.shape_cast %234 : vector<1x8x64xf32> to vector<8x64xf32>
    %c5_169 = arith.constant 5 : index
    %c0_170 = arith.constant 0 : index
    %c0_171 = arith.constant 0 : index
    %236 = vector.load %arg8[%c5_169, %c0_170, %c0_171] : memref<16x1x8xf32, #tpu.memory_space<vmem>>, vector<1x1x8xf32>
    %237 = vector.shape_cast %236 : vector<1x1x8xf32> to vector<1x8xf32>
    %cst_172 = arith.constant dense<0.000000e+00> : vector<16x8xf32>
    %238 = tpu.matmul %24, %235, %cst_172 {dimension_numbers = #tpu.dot_dimension_numbers<[1], [1], [0], [0], [0, 0, 1, 0], [], []>} : vector<16x64xf32>, vector<8x64xf32>, vector<16x8xf32> -> vector<16x8xf32>
    %239 = vector.broadcast %237 : vector<1x8xf32> to vector<16x8xf32>
    %240 = arith.addf %238, %239 : vector<16x8xf32>
    %c5_173 = arith.constant 5 : index
    %c0_174 = arith.constant 0 : index
    %c0_175 = arith.constant 0 : index
    %241 = vector.load %arg9[%c5_173, %c0_174, %c0_175] : memref<16x8x64xf32, #tpu.memory_space<vmem>>, vector<1x8x64xf32>
    %242 = vector.shape_cast %241 : vector<1x8x64xf32> to vector<8x64xf32>
    %c5_176 = arith.constant 5 : index
    %c0_177 = arith.constant 0 : index
    %c0_178 = arith.constant 0 : index
    %243 = vector.load %arg10[%c5_176, %c0_177, %c0_178] : memref<16x1x8xf32, #tpu.memory_space<vmem>>, vector<1x1x8xf32>
    %244 = vector.shape_cast %243 : vector<1x1x8xf32> to vector<1x8xf32>
    %cst_179 = arith.constant dense<0.000000e+00> : vector<16x8xf32>
    %245 = tpu.matmul %24, %242, %cst_179 {dimension_numbers = #tpu.dot_dimension_numbers<[1], [1], [0], [0], [0, 0, 1, 0], [], []>} : vector<16x64xf32>, vector<8x64xf32>, vector<16x8xf32> -> vector<16x8xf32>
    %246 = vector.broadcast %244 : vector<1x8xf32> to vector<16x8xf32>
    %247 = arith.addf %245, %246 : vector<16x8xf32>
    %cst_180 = arith.constant dense<0.000000e+00> : vector<16x16xf32>
    %248 = tpu.matmul %233, %240, %cst_180 {dimension_numbers = #tpu.dot_dimension_numbers<[1], [1], [0], [0], [0, 0, 1, 0], [], []>} : vector<16x8xf32>, vector<16x8xf32>, vector<16x16xf32> -> vector<16x16xf32>
    %cst_181 = arith.constant 0.353553385 : f32
    %249 = vector.broadcast %cst_181 : f32 to vector<16x16xf32>
    %250 = arith.mulf %248, %249 : vector<16x16xf32>
    %251 = arith.addf %250, %25 : vector<16x16xf32>
    %cst_182 = arith.constant dense<0xFF800000> : vector<16xf32>
    %252 = vector.multi_reduction <maximumf>, %251, %cst_182 [1] : vector<16x16xf32> to vector<16xf32>
    %253 = vector.shape_cast %252 : vector<16xf32> to vector<16x1xf32>
    %254 = vector.broadcast %253 : vector<16x1xf32> to vector<16x16xf32>
    %255 = arith.subf %251, %254 : vector<16x16xf32>
    %256 = math.exp %255 : vector<16x16xf32>
    %cst_183 = arith.constant dense<0.000000e+00> : vector<16xf32>
    %257 = vector.multi_reduction <add>, %256, %cst_183 [1] : vector<16x16xf32> to vector<16xf32>
    %258 = vector.shape_cast %257 : vector<16xf32> to vector<16x1xf32>
    %259 = tpu.reciprocal %258 {approx = true} : vector<16x1xf32> -> vector<16x1xf32>
    %260 = vector.broadcast %259 : vector<16x1xf32> to vector<16x16xf32>
    %261 = arith.mulf %256, %260 : vector<16x16xf32>
    %cst_184 = arith.constant dense<0.000000e+00> : vector<16x8xf32>
    %262 = tpu.matmul %261, %247, %cst_184 {dimension_numbers = #tpu.dot_dimension_numbers<[1], [0], [0], [1], [0, 0, 1, 1], [], []>} : vector<16x16xf32>, vector<16x8xf32>, vector<16x8xf32> -> vector<16x8xf32>
    %c5_185 = arith.constant 5 : index
    %c0_186 = arith.constant 0 : index
    %c0_187 = arith.constant 0 : index
    %263 = vector.load %arg11[%c5_185, %c0_186, %c0_187] : memref<16x64x8xf32, #tpu.memory_space<vmem>>, vector<1x64x8xf32>
    %264 = vector.shape_cast %263 : vector<1x64x8xf32> to vector<64x8xf32>
    %cst_188 = arith.constant dense<0.000000e+00> : vector<16x64xf32>
    %265 = tpu.matmul %262, %264, %cst_188 {dimension_numbers = #tpu.dot_dimension_numbers<[1], [1], [0], [0], [0, 0, 1, 0], [], []>} : vector<16x8xf32>, vector<64x8xf32>, vector<16x64xf32> -> vector<16x64xf32>
    %266 = arith.addf %226, %265 : vector<16x64xf32>
    %c6 = arith.constant 6 : index
    %c0_189 = arith.constant 0 : index
    %c0_190 = arith.constant 0 : index
    %267 = vector.load %arg5[%c6, %c0_189, %c0_190] : memref<16x8x64xf32, #tpu.memory_space<vmem>>, vector<1x8x64xf32>
    %268 = vector.shape_cast %267 : vector<1x8x64xf32> to vector<8x64xf32>
    %c6_191 = arith.constant 6 : index
    %c0_192 = arith.constant 0 : index
    %c0_193 = arith.constant 0 : index
    %269 = vector.load %arg6[%c6_191, %c0_192, %c0_193] : memref<16x1x8xf32, #tpu.memory_space<vmem>>, vector<1x1x8xf32>
    %270 = vector.shape_cast %269 : vector<1x1x8xf32> to vector<1x8xf32>
    %cst_194 = arith.constant dense<0.000000e+00> : vector<16x8xf32>
    %271 = tpu.matmul %24, %268, %cst_194 {dimension_numbers = #tpu.dot_dimension_numbers<[1], [1], [0], [0], [0, 0, 1, 0], [], []>} : vector<16x64xf32>, vector<8x64xf32>, vector<16x8xf32> -> vector<16x8xf32>
    %272 = vector.broadcast %270 : vector<1x8xf32> to vector<16x8xf32>
    %273 = arith.addf %271, %272 : vector<16x8xf32>
    %c6_195 = arith.constant 6 : index
    %c0_196 = arith.constant 0 : index
    %c0_197 = arith.constant 0 : index
    %274 = vector.load %arg7[%c6_195, %c0_196, %c0_197] : memref<16x8x64xf32, #tpu.memory_space<vmem>>, vector<1x8x64xf32>
    %275 = vector.shape_cast %274 : vector<1x8x64xf32> to vector<8x64xf32>
    %c6_198 = arith.constant 6 : index
    %c0_199 = arith.constant 0 : index
    %c0_200 = arith.constant 0 : index
    %276 = vector.load %arg8[%c6_198, %c0_199, %c0_200] : memref<16x1x8xf32, #tpu.memory_space<vmem>>, vector<1x1x8xf32>
    %277 = vector.shape_cast %276 : vector<1x1x8xf32> to vector<1x8xf32>
    %cst_201 = arith.constant dense<0.000000e+00> : vector<16x8xf32>
    %278 = tpu.matmul %24, %275, %cst_201 {dimension_numbers = #tpu.dot_dimension_numbers<[1], [1], [0], [0], [0, 0, 1, 0], [], []>} : vector<16x64xf32>, vector<8x64xf32>, vector<16x8xf32> -> vector<16x8xf32>
    %279 = vector.broadcast %277 : vector<1x8xf32> to vector<16x8xf32>
    %280 = arith.addf %278, %279 : vector<16x8xf32>
    %c6_202 = arith.constant 6 : index
    %c0_203 = arith.constant 0 : index
    %c0_204 = arith.constant 0 : index
    %281 = vector.load %arg9[%c6_202, %c0_203, %c0_204] : memref<16x8x64xf32, #tpu.memory_space<vmem>>, vector<1x8x64xf32>
    %282 = vector.shape_cast %281 : vector<1x8x64xf32> to vector<8x64xf32>
    %c6_205 = arith.constant 6 : index
    %c0_206 = arith.constant 0 : index
    %c0_207 = arith.constant 0 : index
    %283 = vector.load %arg10[%c6_205, %c0_206, %c0_207] : memref<16x1x8xf32, #tpu.memory_space<vmem>>, vector<1x1x8xf32>
    %284 = vector.shape_cast %283 : vector<1x1x8xf32> to vector<1x8xf32>
    %cst_208 = arith.constant dense<0.000000e+00> : vector<16x8xf32>
    %285 = tpu.matmul %24, %282, %cst_208 {dimension_numbers = #tpu.dot_dimension_numbers<[1], [1], [0], [0], [0, 0, 1, 0], [], []>} : vector<16x64xf32>, vector<8x64xf32>, vector<16x8xf32> -> vector<16x8xf32>
    %286 = vector.broadcast %284 : vector<1x8xf32> to vector<16x8xf32>
    %287 = arith.addf %285, %286 : vector<16x8xf32>
    %cst_209 = arith.constant dense<0.000000e+00> : vector<16x16xf32>
    %288 = tpu.matmul %273, %280, %cst_209 {dimension_numbers = #tpu.dot_dimension_numbers<[1], [1], [0], [0], [0, 0, 1, 0], [], []>} : vector<16x8xf32>, vector<16x8xf32>, vector<16x16xf32> -> vector<16x16xf32>
    %cst_210 = arith.constant 0.353553385 : f32
    %289 = vector.broadcast %cst_210 : f32 to vector<16x16xf32>
    %290 = arith.mulf %288, %289 : vector<16x16xf32>
    %291 = arith.addf %290, %25 : vector<16x16xf32>
    %cst_211 = arith.constant dense<0xFF800000> : vector<16xf32>
    %292 = vector.multi_reduction <maximumf>, %291, %cst_211 [1] : vector<16x16xf32> to vector<16xf32>
    %293 = vector.shape_cast %292 : vector<16xf32> to vector<16x1xf32>
    %294 = vector.broadcast %293 : vector<16x1xf32> to vector<16x16xf32>
    %295 = arith.subf %291, %294 : vector<16x16xf32>
    %296 = math.exp %295 : vector<16x16xf32>
    %cst_212 = arith.constant dense<0.000000e+00> : vector<16xf32>
    %297 = vector.multi_reduction <add>, %296, %cst_212 [1] : vector<16x16xf32> to vector<16xf32>
    %298 = vector.shape_cast %297 : vector<16xf32> to vector<16x1xf32>
    %299 = tpu.reciprocal %298 {approx = true} : vector<16x1xf32> -> vector<16x1xf32>
    %300 = vector.broadcast %299 : vector<16x1xf32> to vector<16x16xf32>
    %301 = arith.mulf %296, %300 : vector<16x16xf32>
    %cst_213 = arith.constant dense<0.000000e+00> : vector<16x8xf32>
    %302 = tpu.matmul %301, %287, %cst_213 {dimension_numbers = #tpu.dot_dimension_numbers<[1], [0], [0], [1], [0, 0, 1, 1], [], []>} : vector<16x16xf32>, vector<16x8xf32>, vector<16x8xf32> -> vector<16x8xf32>
    %c6_214 = arith.constant 6 : index
    %c0_215 = arith.constant 0 : index
    %c0_216 = arith.constant 0 : index
    %303 = vector.load %arg11[%c6_214, %c0_215, %c0_216] : memref<16x64x8xf32, #tpu.memory_space<vmem>>, vector<1x64x8xf32>
    %304 = vector.shape_cast %303 : vector<1x64x8xf32> to vector<64x8xf32>
    %cst_217 = arith.constant dense<0.000000e+00> : vector<16x64xf32>
    %305 = tpu.matmul %302, %304, %cst_217 {dimension_numbers = #tpu.dot_dimension_numbers<[1], [1], [0], [0], [0, 0, 1, 0], [], []>} : vector<16x8xf32>, vector<64x8xf32>, vector<16x64xf32> -> vector<16x64xf32>
    %306 = arith.addf %266, %305 : vector<16x64xf32>
    %c7 = arith.constant 7 : index
    %c0_218 = arith.constant 0 : index
    %c0_219 = arith.constant 0 : index
    %307 = vector.load %arg5[%c7, %c0_218, %c0_219] : memref<16x8x64xf32, #tpu.memory_space<vmem>>, vector<1x8x64xf32>
    %308 = vector.shape_cast %307 : vector<1x8x64xf32> to vector<8x64xf32>
    %c7_220 = arith.constant 7 : index
    %c0_221 = arith.constant 0 : index
    %c0_222 = arith.constant 0 : index
    %309 = vector.load %arg6[%c7_220, %c0_221, %c0_222] : memref<16x1x8xf32, #tpu.memory_space<vmem>>, vector<1x1x8xf32>
    %310 = vector.shape_cast %309 : vector<1x1x8xf32> to vector<1x8xf32>
    %cst_223 = arith.constant dense<0.000000e+00> : vector<16x8xf32>
    %311 = tpu.matmul %24, %308, %cst_223 {dimension_numbers = #tpu.dot_dimension_numbers<[1], [1], [0], [0], [0, 0, 1, 0], [], []>} : vector<16x64xf32>, vector<8x64xf32>, vector<16x8xf32> -> vector<16x8xf32>
    %312 = vector.broadcast %310 : vector<1x8xf32> to vector<16x8xf32>
    %313 = arith.addf %311, %312 : vector<16x8xf32>
    %c7_224 = arith.constant 7 : index
    %c0_225 = arith.constant 0 : index
    %c0_226 = arith.constant 0 : index
    %314 = vector.load %arg7[%c7_224, %c0_225, %c0_226] : memref<16x8x64xf32, #tpu.memory_space<vmem>>, vector<1x8x64xf32>
    %315 = vector.shape_cast %314 : vector<1x8x64xf32> to vector<8x64xf32>
    %c7_227 = arith.constant 7 : index
    %c0_228 = arith.constant 0 : index
    %c0_229 = arith.constant 0 : index
    %316 = vector.load %arg8[%c7_227, %c0_228, %c0_229] : memref<16x1x8xf32, #tpu.memory_space<vmem>>, vector<1x1x8xf32>
    %317 = vector.shape_cast %316 : vector<1x1x8xf32> to vector<1x8xf32>
    %cst_230 = arith.constant dense<0.000000e+00> : vector<16x8xf32>
    %318 = tpu.matmul %24, %315, %cst_230 {dimension_numbers = #tpu.dot_dimension_numbers<[1], [1], [0], [0], [0, 0, 1, 0], [], []>} : vector<16x64xf32>, vector<8x64xf32>, vector<16x8xf32> -> vector<16x8xf32>
    %319 = vector.broadcast %317 : vector<1x8xf32> to vector<16x8xf32>
    %320 = arith.addf %318, %319 : vector<16x8xf32>
    %c7_231 = arith.constant 7 : index
    %c0_232 = arith.constant 0 : index
    %c0_233 = arith.constant 0 : index
    %321 = vector.load %arg9[%c7_231, %c0_232, %c0_233] : memref<16x8x64xf32, #tpu.memory_space<vmem>>, vector<1x8x64xf32>
    %322 = vector.shape_cast %321 : vector<1x8x64xf32> to vector<8x64xf32>
    %c7_234 = arith.constant 7 : index
    %c0_235 = arith.constant 0 : index
    %c0_236 = arith.constant 0 : index
    %323 = vector.load %arg10[%c7_234, %c0_235, %c0_236] : memref<16x1x8xf32, #tpu.memory_space<vmem>>, vector<1x1x8xf32>
    %324 = vector.shape_cast %323 : vector<1x1x8xf32> to vector<1x8xf32>
    %cst_237 = arith.constant dense<0.000000e+00> : vector<16x8xf32>
    %325 = tpu.matmul %24, %322, %cst_237 {dimension_numbers = #tpu.dot_dimension_numbers<[1], [1], [0], [0], [0, 0, 1, 0], [], []>} : vector<16x64xf32>, vector<8x64xf32>, vector<16x8xf32> -> vector<16x8xf32>
    %326 = vector.broadcast %324 : vector<1x8xf32> to vector<16x8xf32>
    %327 = arith.addf %325, %326 : vector<16x8xf32>
    %cst_238 = arith.constant dense<0.000000e+00> : vector<16x16xf32>
    %328 = tpu.matmul %313, %320, %cst_238 {dimension_numbers = #tpu.dot_dimension_numbers<[1], [1], [0], [0], [0, 0, 1, 0], [], []>} : vector<16x8xf32>, vector<16x8xf32>, vector<16x16xf32> -> vector<16x16xf32>
    %cst_239 = arith.constant 0.353553385 : f32
    %329 = vector.broadcast %cst_239 : f32 to vector<16x16xf32>
    %330 = arith.mulf %328, %329 : vector<16x16xf32>
    %331 = arith.addf %330, %25 : vector<16x16xf32>
    %cst_240 = arith.constant dense<0xFF800000> : vector<16xf32>
    %332 = vector.multi_reduction <maximumf>, %331, %cst_240 [1] : vector<16x16xf32> to vector<16xf32>
    %333 = vector.shape_cast %332 : vector<16xf32> to vector<16x1xf32>
    %334 = vector.broadcast %333 : vector<16x1xf32> to vector<16x16xf32>
    %335 = arith.subf %331, %334 : vector<16x16xf32>
    %336 = math.exp %335 : vector<16x16xf32>
    %cst_241 = arith.constant dense<0.000000e+00> : vector<16xf32>
    %337 = vector.multi_reduction <add>, %336, %cst_241 [1] : vector<16x16xf32> to vector<16xf32>
    %338 = vector.shape_cast %337 : vector<16xf32> to vector<16x1xf32>
    %339 = tpu.reciprocal %338 {approx = true} : vector<16x1xf32> -> vector<16x1xf32>
    %340 = vector.broadcast %339 : vector<16x1xf32> to vector<16x16xf32>
    %341 = arith.mulf %336, %340 : vector<16x16xf32>
    %cst_242 = arith.constant dense<0.000000e+00> : vector<16x8xf32>
    %342 = tpu.matmul %341, %327, %cst_242 {dimension_numbers = #tpu.dot_dimension_numbers<[1], [0], [0], [1], [0, 0, 1, 1], [], []>} : vector<16x16xf32>, vector<16x8xf32>, vector<16x8xf32> -> vector<16x8xf32>
    %c7_243 = arith.constant 7 : index
    %c0_244 = arith.constant 0 : index
    %c0_245 = arith.constant 0 : index
    %343 = vector.load %arg11[%c7_243, %c0_244, %c0_245] : memref<16x64x8xf32, #tpu.memory_space<vmem>>, vector<1x64x8xf32>
    %344 = vector.shape_cast %343 : vector<1x64x8xf32> to vector<64x8xf32>
    %cst_246 = arith.constant dense<0.000000e+00> : vector<16x64xf32>
    %345 = tpu.matmul %342, %344, %cst_246 {dimension_numbers = #tpu.dot_dimension_numbers<[1], [1], [0], [0], [0, 0, 1, 0], [], []>} : vector<16x8xf32>, vector<64x8xf32>, vector<16x64xf32> -> vector<16x64xf32>
    %346 = arith.addf %306, %345 : vector<16x64xf32>
    %347 = vector.broadcast %27 : vector<1x64xf32> to vector<16x64xf32>
    %348 = arith.addf %346, %347 : vector<16x64xf32>
    %349 = arith.addf %24, %348 : vector<16x64xf32>
    %c0_247 = arith.constant 0 : index
    %c0_248 = arith.constant 0 : index
    %c0_249 = arith.constant 0 : index
    %350 = vector.load %arg13[%c0_247, %c0_248, %c0_249] : memref<2x1x64xf32, #tpu.memory_space<vmem>>, vector<1x1x64xf32>
    %351 = vector.shape_cast %350 : vector<1x1x64xf32> to vector<1x64xf32>
    %c0_250 = arith.constant 0 : index
    %c0_251 = arith.constant 0 : index
    %c0_252 = arith.constant 0 : index
    %352 = vector.load %arg14[%c0_250, %c0_251, %c0_252] : memref<2x1x64xf32, #tpu.memory_space<vmem>>, vector<1x1x64xf32>
    %353 = vector.shape_cast %352 : vector<1x1x64xf32> to vector<1x64xf32>
    %cst_253 = arith.constant dense<0.000000e+00> : vector<16xf32>
    %354 = vector.multi_reduction <add>, %349, %cst_253 [1] : vector<16x64xf32> to vector<16xf32>
    %355 = vector.shape_cast %354 : vector<16xf32> to vector<16x1xf32>
    %cst_254 = arith.constant 6.400000e+01 : f32
    %356 = vector.broadcast %cst_254 : f32 to vector<16x1xf32>
    %357 = arith.divf %355, %356 : vector<16x1xf32>
    %358 = vector.broadcast %357 : vector<16x1xf32> to vector<16x64xf32>
    %359 = arith.subf %349, %358 : vector<16x64xf32>
    %360 = arith.mulf %359, %359 : vector<16x64xf32>
    %cst_255 = arith.constant dense<0.000000e+00> : vector<16xf32>
    %361 = vector.multi_reduction <add>, %360, %cst_255 [1] : vector<16x64xf32> to vector<16xf32>
    %362 = vector.shape_cast %361 : vector<16xf32> to vector<16x1xf32>
    %cst_256 = arith.constant 6.400000e+01 : f32
    %363 = vector.broadcast %cst_256 : f32 to vector<16x1xf32>
    %364 = arith.divf %362, %363 : vector<16x1xf32>
    %365 = vector.broadcast %357 : vector<16x1xf32> to vector<16x64xf32>
    %366 = arith.subf %349, %365 : vector<16x64xf32>
    %cst_257 = arith.constant 9.99999996E-13 : f32
    %367 = vector.broadcast %cst_257 : f32 to vector<16x1xf32>
    %368 = arith.addf %364, %367 : vector<16x1xf32>
    %369 = math.rsqrt %368 : vector<16x1xf32>
    %370 = vector.broadcast %369 : vector<16x1xf32> to vector<16x64xf32>
    %371 = arith.mulf %366, %370 : vector<16x64xf32>
    %372 = vector.broadcast %351 : vector<1x64xf32> to vector<16x64xf32>
    %373 = arith.mulf %371, %372 : vector<16x64xf32>
    %374 = vector.broadcast %353 : vector<1x64xf32> to vector<16x64xf32>
    %375 = arith.addf %373, %374 : vector<16x64xf32>
    %c0_258 = arith.constant 0 : index
    %c0_259 = arith.constant 0 : index
    %c0_260 = arith.constant 0 : index
    %376 = vector.load %arg15[%c0_258, %c0_259, %c0_260] : memref<2x128x64xf32, #tpu.memory_space<vmem>>, vector<1x128x64xf32>
    %377 = vector.shape_cast %376 : vector<1x128x64xf32> to vector<128x64xf32>
    %c0_261 = arith.constant 0 : index
    %c0_262 = arith.constant 0 : index
    %c0_263 = arith.constant 0 : index
    %378 = vector.load %arg16[%c0_261, %c0_262, %c0_263] : memref<2x1x128xf32, #tpu.memory_space<vmem>>, vector<1x1x128xf32>
    %379 = vector.shape_cast %378 : vector<1x1x128xf32> to vector<1x128xf32>
    %cst_264 = arith.constant dense<0.000000e+00> : vector<16x128xf32>
    %380 = tpu.matmul %375, %377, %cst_264 {dimension_numbers = #tpu.dot_dimension_numbers<[1], [1], [0], [0], [0, 0, 1, 0], [], []>} : vector<16x64xf32>, vector<128x64xf32>, vector<16x128xf32> -> vector<16x128xf32>
    %381 = vector.broadcast %379 : vector<1x128xf32> to vector<16x128xf32>
    %382 = arith.addf %380, %381 : vector<16x128xf32>
    %cst_265 = arith.constant 5.000000e-01 : f32
    %383 = vector.broadcast %cst_265 : f32 to vector<16x128xf32>
    %384 = arith.mulf %383, %382 : vector<16x128xf32>
    %cst_266 = arith.constant 4.471500e-02 : f32
    %385 = vector.broadcast %cst_266 : f32 to vector<16x128xf32>
    %386 = arith.mulf %385, %382 : vector<16x128xf32>
    %387 = arith.mulf %386, %382 : vector<16x128xf32>
    %388 = arith.mulf %387, %382 : vector<16x128xf32>
    %389 = arith.addf %382, %388 : vector<16x128xf32>
    %cst_267 = arith.constant 0.797884583 : f32
    %390 = vector.broadcast %cst_267 : f32 to vector<16x128xf32>
    %391 = arith.mulf %390, %389 : vector<16x128xf32>
    %392 = math.tanh %391 : vector<16x128xf32>
    %cst_268 = arith.constant 1.000000e+00 : f32
    %393 = vector.broadcast %cst_268 : f32 to vector<16x128xf32>
    %394 = arith.addf %393, %392 : vector<16x128xf32>
    %395 = arith.mulf %384, %394 : vector<16x128xf32>
    %c0_269 = arith.constant 0 : index
    %c0_270 = arith.constant 0 : index
    %c0_271 = arith.constant 0 : index
    %396 = vector.load %arg17[%c0_269, %c0_270, %c0_271] : memref<2x64x128xf32, #tpu.memory_space<vmem>>, vector<1x64x128xf32>
    %397 = vector.shape_cast %396 : vector<1x64x128xf32> to vector<64x128xf32>
    %c0_272 = arith.constant 0 : index
    %c0_273 = arith.constant 0 : index
    %c0_274 = arith.constant 0 : index
    %398 = vector.load %arg18[%c0_272, %c0_273, %c0_274] : memref<2x1x64xf32, #tpu.memory_space<vmem>>, vector<1x1x64xf32>
    %399 = vector.shape_cast %398 : vector<1x1x64xf32> to vector<1x64xf32>
    %cst_275 = arith.constant dense<0.000000e+00> : vector<16x64xf32>
    %400 = tpu.matmul %395, %397, %cst_275 {dimension_numbers = #tpu.dot_dimension_numbers<[1], [1], [0], [0], [0, 0, 1, 0], [], []>} : vector<16x128xf32>, vector<64x128xf32>, vector<16x64xf32> -> vector<16x64xf32>
    %401 = vector.broadcast %399 : vector<1x64xf32> to vector<16x64xf32>
    %402 = arith.addf %400, %401 : vector<16x64xf32>
    %403 = arith.addf %375, %402 : vector<16x64xf32>
    %c0_276 = arith.constant 0 : index
    %c0_277 = arith.constant 0 : index
    %c0_278 = arith.constant 0 : index
    %404 = vector.load %arg19[%c0_276, %c0_277, %c0_278] : memref<2x1x64xf32, #tpu.memory_space<vmem>>, vector<1x1x64xf32>
    %405 = vector.shape_cast %404 : vector<1x1x64xf32> to vector<1x64xf32>
    %c0_279 = arith.constant 0 : index
    %c0_280 = arith.constant 0 : index
    %c0_281 = arith.constant 0 : index
    %406 = vector.load %arg20[%c0_279, %c0_280, %c0_281] : memref<2x1x64xf32, #tpu.memory_space<vmem>>, vector<1x1x64xf32>
    %407 = vector.shape_cast %406 : vector<1x1x64xf32> to vector<1x64xf32>
    %cst_282 = arith.constant dense<0.000000e+00> : vector<16xf32>
    %408 = vector.multi_reduction <add>, %403, %cst_282 [1] : vector<16x64xf32> to vector<16xf32>
    %409 = vector.shape_cast %408 : vector<16xf32> to vector<16x1xf32>
    %cst_283 = arith.constant 6.400000e+01 : f32
    %410 = vector.broadcast %cst_283 : f32 to vector<16x1xf32>
    %411 = arith.divf %409, %410 : vector<16x1xf32>
    %412 = vector.broadcast %411 : vector<16x1xf32> to vector<16x64xf32>
    %413 = arith.subf %403, %412 : vector<16x64xf32>
    %414 = arith.mulf %413, %413 : vector<16x64xf32>
    %cst_284 = arith.constant dense<0.000000e+00> : vector<16xf32>
    %415 = vector.multi_reduction <add>, %414, %cst_284 [1] : vector<16x64xf32> to vector<16xf32>
    %416 = vector.shape_cast %415 : vector<16xf32> to vector<16x1xf32>
    %cst_285 = arith.constant 6.400000e+01 : f32
    %417 = vector.broadcast %cst_285 : f32 to vector<16x1xf32>
    %418 = arith.divf %416, %417 : vector<16x1xf32>
    %419 = vector.broadcast %411 : vector<16x1xf32> to vector<16x64xf32>
    %420 = arith.subf %403, %419 : vector<16x64xf32>
    %cst_286 = arith.constant 9.99999996E-13 : f32
    %421 = vector.broadcast %cst_286 : f32 to vector<16x1xf32>
    %422 = arith.addf %418, %421 : vector<16x1xf32>
    %423 = math.rsqrt %422 : vector<16x1xf32>
    %424 = vector.broadcast %423 : vector<16x1xf32> to vector<16x64xf32>
    %425 = arith.mulf %420, %424 : vector<16x64xf32>
    %426 = vector.broadcast %405 : vector<1x64xf32> to vector<16x64xf32>
    %427 = arith.mulf %425, %426 : vector<16x64xf32>
    %428 = vector.broadcast %407 : vector<1x64xf32> to vector<16x64xf32>
    %429 = arith.addf %427, %428 : vector<16x64xf32>
    %c1_287 = arith.constant 1 : index
    %c0_288 = arith.constant 0 : index
    %c0_289 = arith.constant 0 : index
    %430 = vector.load %arg12[%c1_287, %c0_288, %c0_289] : memref<2x1x64xf32, #tpu.memory_space<vmem>>, vector<1x1x64xf32>
    %431 = vector.shape_cast %430 : vector<1x1x64xf32> to vector<1x64xf32>
    %c8 = arith.constant 8 : index
    %c0_290 = arith.constant 0 : index
    %c0_291 = arith.constant 0 : index
    %432 = vector.load %arg5[%c8, %c0_290, %c0_291] : memref<16x8x64xf32, #tpu.memory_space<vmem>>, vector<1x8x64xf32>
    %433 = vector.shape_cast %432 : vector<1x8x64xf32> to vector<8x64xf32>
    %c8_292 = arith.constant 8 : index
    %c0_293 = arith.constant 0 : index
    %c0_294 = arith.constant 0 : index
    %434 = vector.load %arg6[%c8_292, %c0_293, %c0_294] : memref<16x1x8xf32, #tpu.memory_space<vmem>>, vector<1x1x8xf32>
    %435 = vector.shape_cast %434 : vector<1x1x8xf32> to vector<1x8xf32>
    %cst_295 = arith.constant dense<0.000000e+00> : vector<16x8xf32>
    %436 = tpu.matmul %429, %433, %cst_295 {dimension_numbers = #tpu.dot_dimension_numbers<[1], [1], [0], [0], [0, 0, 1, 0], [], []>} : vector<16x64xf32>, vector<8x64xf32>, vector<16x8xf32> -> vector<16x8xf32>
    %437 = vector.broadcast %435 : vector<1x8xf32> to vector<16x8xf32>
    %438 = arith.addf %436, %437 : vector<16x8xf32>
    %c8_296 = arith.constant 8 : index
    %c0_297 = arith.constant 0 : index
    %c0_298 = arith.constant 0 : index
    %439 = vector.load %arg7[%c8_296, %c0_297, %c0_298] : memref<16x8x64xf32, #tpu.memory_space<vmem>>, vector<1x8x64xf32>
    %440 = vector.shape_cast %439 : vector<1x8x64xf32> to vector<8x64xf32>
    %c8_299 = arith.constant 8 : index
    %c0_300 = arith.constant 0 : index
    %c0_301 = arith.constant 0 : index
    %441 = vector.load %arg8[%c8_299, %c0_300, %c0_301] : memref<16x1x8xf32, #tpu.memory_space<vmem>>, vector<1x1x8xf32>
    %442 = vector.shape_cast %441 : vector<1x1x8xf32> to vector<1x8xf32>
    %cst_302 = arith.constant dense<0.000000e+00> : vector<16x8xf32>
    %443 = tpu.matmul %429, %440, %cst_302 {dimension_numbers = #tpu.dot_dimension_numbers<[1], [1], [0], [0], [0, 0, 1, 0], [], []>} : vector<16x64xf32>, vector<8x64xf32>, vector<16x8xf32> -> vector<16x8xf32>
    %444 = vector.broadcast %442 : vector<1x8xf32> to vector<16x8xf32>
    %445 = arith.addf %443, %444 : vector<16x8xf32>
    %c8_303 = arith.constant 8 : index
    %c0_304 = arith.constant 0 : index
    %c0_305 = arith.constant 0 : index
    %446 = vector.load %arg9[%c8_303, %c0_304, %c0_305] : memref<16x8x64xf32, #tpu.memory_space<vmem>>, vector<1x8x64xf32>
    %447 = vector.shape_cast %446 : vector<1x8x64xf32> to vector<8x64xf32>
    %c8_306 = arith.constant 8 : index
    %c0_307 = arith.constant 0 : index
    %c0_308 = arith.constant 0 : index
    %448 = vector.load %arg10[%c8_306, %c0_307, %c0_308] : memref<16x1x8xf32, #tpu.memory_space<vmem>>, vector<1x1x8xf32>
    %449 = vector.shape_cast %448 : vector<1x1x8xf32> to vector<1x8xf32>
    %cst_309 = arith.constant dense<0.000000e+00> : vector<16x8xf32>
    %450 = tpu.matmul %429, %447, %cst_309 {dimension_numbers = #tpu.dot_dimension_numbers<[1], [1], [0], [0], [0, 0, 1, 0], [], []>} : vector<16x64xf32>, vector<8x64xf32>, vector<16x8xf32> -> vector<16x8xf32>
    %451 = vector.broadcast %449 : vector<1x8xf32> to vector<16x8xf32>
    %452 = arith.addf %450, %451 : vector<16x8xf32>
    %cst_310 = arith.constant dense<0.000000e+00> : vector<16x16xf32>
    %453 = tpu.matmul %438, %445, %cst_310 {dimension_numbers = #tpu.dot_dimension_numbers<[1], [1], [0], [0], [0, 0, 1, 0], [], []>} : vector<16x8xf32>, vector<16x8xf32>, vector<16x16xf32> -> vector<16x16xf32>
    %cst_311 = arith.constant 0.353553385 : f32
    %454 = vector.broadcast %cst_311 : f32 to vector<16x16xf32>
    %455 = arith.mulf %453, %454 : vector<16x16xf32>
    %456 = arith.addf %455, %25 : vector<16x16xf32>
    %cst_312 = arith.constant dense<0xFF800000> : vector<16xf32>
    %457 = vector.multi_reduction <maximumf>, %456, %cst_312 [1] : vector<16x16xf32> to vector<16xf32>
    %458 = vector.shape_cast %457 : vector<16xf32> to vector<16x1xf32>
    %459 = vector.broadcast %458 : vector<16x1xf32> to vector<16x16xf32>
    %460 = arith.subf %456, %459 : vector<16x16xf32>
    %461 = math.exp %460 : vector<16x16xf32>
    %cst_313 = arith.constant dense<0.000000e+00> : vector<16xf32>
    %462 = vector.multi_reduction <add>, %461, %cst_313 [1] : vector<16x16xf32> to vector<16xf32>
    %463 = vector.shape_cast %462 : vector<16xf32> to vector<16x1xf32>
    %464 = tpu.reciprocal %463 {approx = true} : vector<16x1xf32> -> vector<16x1xf32>
    %465 = vector.broadcast %464 : vector<16x1xf32> to vector<16x16xf32>
    %466 = arith.mulf %461, %465 : vector<16x16xf32>
    %cst_314 = arith.constant dense<0.000000e+00> : vector<16x8xf32>
    %467 = tpu.matmul %466, %452, %cst_314 {dimension_numbers = #tpu.dot_dimension_numbers<[1], [0], [0], [1], [0, 0, 1, 1], [], []>} : vector<16x16xf32>, vector<16x8xf32>, vector<16x8xf32> -> vector<16x8xf32>
    %c8_315 = arith.constant 8 : index
    %c0_316 = arith.constant 0 : index
    %c0_317 = arith.constant 0 : index
    %468 = vector.load %arg11[%c8_315, %c0_316, %c0_317] : memref<16x64x8xf32, #tpu.memory_space<vmem>>, vector<1x64x8xf32>
    %469 = vector.shape_cast %468 : vector<1x64x8xf32> to vector<64x8xf32>
    %cst_318 = arith.constant dense<0.000000e+00> : vector<16x64xf32>
    %470 = tpu.matmul %467, %469, %cst_318 {dimension_numbers = #tpu.dot_dimension_numbers<[1], [1], [0], [0], [0, 0, 1, 0], [], []>} : vector<16x8xf32>, vector<64x8xf32>, vector<16x64xf32> -> vector<16x64xf32>
    %c9 = arith.constant 9 : index
    %c0_319 = arith.constant 0 : index
    %c0_320 = arith.constant 0 : index
    %471 = vector.load %arg5[%c9, %c0_319, %c0_320] : memref<16x8x64xf32, #tpu.memory_space<vmem>>, vector<1x8x64xf32>
    %472 = vector.shape_cast %471 : vector<1x8x64xf32> to vector<8x64xf32>
    %c9_321 = arith.constant 9 : index
    %c0_322 = arith.constant 0 : index
    %c0_323 = arith.constant 0 : index
    %473 = vector.load %arg6[%c9_321, %c0_322, %c0_323] : memref<16x1x8xf32, #tpu.memory_space<vmem>>, vector<1x1x8xf32>
    %474 = vector.shape_cast %473 : vector<1x1x8xf32> to vector<1x8xf32>
    %cst_324 = arith.constant dense<0.000000e+00> : vector<16x8xf32>
    %475 = tpu.matmul %429, %472, %cst_324 {dimension_numbers = #tpu.dot_dimension_numbers<[1], [1], [0], [0], [0, 0, 1, 0], [], []>} : vector<16x64xf32>, vector<8x64xf32>, vector<16x8xf32> -> vector<16x8xf32>
    %476 = vector.broadcast %474 : vector<1x8xf32> to vector<16x8xf32>
    %477 = arith.addf %475, %476 : vector<16x8xf32>
    %c9_325 = arith.constant 9 : index
    %c0_326 = arith.constant 0 : index
    %c0_327 = arith.constant 0 : index
    %478 = vector.load %arg7[%c9_325, %c0_326, %c0_327] : memref<16x8x64xf32, #tpu.memory_space<vmem>>, vector<1x8x64xf32>
    %479 = vector.shape_cast %478 : vector<1x8x64xf32> to vector<8x64xf32>
    %c9_328 = arith.constant 9 : index
    %c0_329 = arith.constant 0 : index
    %c0_330 = arith.constant 0 : index
    %480 = vector.load %arg8[%c9_328, %c0_329, %c0_330] : memref<16x1x8xf32, #tpu.memory_space<vmem>>, vector<1x1x8xf32>
    %481 = vector.shape_cast %480 : vector<1x1x8xf32> to vector<1x8xf32>
    %cst_331 = arith.constant dense<0.000000e+00> : vector<16x8xf32>
    %482 = tpu.matmul %429, %479, %cst_331 {dimension_numbers = #tpu.dot_dimension_numbers<[1], [1], [0], [0], [0, 0, 1, 0], [], []>} : vector<16x64xf32>, vector<8x64xf32>, vector<16x8xf32> -> vector<16x8xf32>
    %483 = vector.broadcast %481 : vector<1x8xf32> to vector<16x8xf32>
    %484 = arith.addf %482, %483 : vector<16x8xf32>
    %c9_332 = arith.constant 9 : index
    %c0_333 = arith.constant 0 : index
    %c0_334 = arith.constant 0 : index
    %485 = vector.load %arg9[%c9_332, %c0_333, %c0_334] : memref<16x8x64xf32, #tpu.memory_space<vmem>>, vector<1x8x64xf32>
    %486 = vector.shape_cast %485 : vector<1x8x64xf32> to vector<8x64xf32>
    %c9_335 = arith.constant 9 : index
    %c0_336 = arith.constant 0 : index
    %c0_337 = arith.constant 0 : index
    %487 = vector.load %arg10[%c9_335, %c0_336, %c0_337] : memref<16x1x8xf32, #tpu.memory_space<vmem>>, vector<1x1x8xf32>
    %488 = vector.shape_cast %487 : vector<1x1x8xf32> to vector<1x8xf32>
    %cst_338 = arith.constant dense<0.000000e+00> : vector<16x8xf32>
    %489 = tpu.matmul %429, %486, %cst_338 {dimension_numbers = #tpu.dot_dimension_numbers<[1], [1], [0], [0], [0, 0, 1, 0], [], []>} : vector<16x64xf32>, vector<8x64xf32>, vector<16x8xf32> -> vector<16x8xf32>
    %490 = vector.broadcast %488 : vector<1x8xf32> to vector<16x8xf32>
    %491 = arith.addf %489, %490 : vector<16x8xf32>
    %cst_339 = arith.constant dense<0.000000e+00> : vector<16x16xf32>
    %492 = tpu.matmul %477, %484, %cst_339 {dimension_numbers = #tpu.dot_dimension_numbers<[1], [1], [0], [0], [0, 0, 1, 0], [], []>} : vector<16x8xf32>, vector<16x8xf32>, vector<16x16xf32> -> vector<16x16xf32>
    %cst_340 = arith.constant 0.353553385 : f32
    %493 = vector.broadcast %cst_340 : f32 to vector<16x16xf32>
    %494 = arith.mulf %492, %493 : vector<16x16xf32>
    %495 = arith.addf %494, %25 : vector<16x16xf32>
    %cst_341 = arith.constant dense<0xFF800000> : vector<16xf32>
    %496 = vector.multi_reduction <maximumf>, %495, %cst_341 [1] : vector<16x16xf32> to vector<16xf32>
    %497 = vector.shape_cast %496 : vector<16xf32> to vector<16x1xf32>
    %498 = vector.broadcast %497 : vector<16x1xf32> to vector<16x16xf32>
    %499 = arith.subf %495, %498 : vector<16x16xf32>
    %500 = math.exp %499 : vector<16x16xf32>
    %cst_342 = arith.constant dense<0.000000e+00> : vector<16xf32>
    %501 = vector.multi_reduction <add>, %500, %cst_342 [1] : vector<16x16xf32> to vector<16xf32>
    %502 = vector.shape_cast %501 : vector<16xf32> to vector<16x1xf32>
    %503 = tpu.reciprocal %502 {approx = true} : vector<16x1xf32> -> vector<16x1xf32>
    %504 = vector.broadcast %503 : vector<16x1xf32> to vector<16x16xf32>
    %505 = arith.mulf %500, %504 : vector<16x16xf32>
    %cst_343 = arith.constant dense<0.000000e+00> : vector<16x8xf32>
    %506 = tpu.matmul %505, %491, %cst_343 {dimension_numbers = #tpu.dot_dimension_numbers<[1], [0], [0], [1], [0, 0, 1, 1], [], []>} : vector<16x16xf32>, vector<16x8xf32>, vector<16x8xf32> -> vector<16x8xf32>
    %c9_344 = arith.constant 9 : index
    %c0_345 = arith.constant 0 : index
    %c0_346 = arith.constant 0 : index
    %507 = vector.load %arg11[%c9_344, %c0_345, %c0_346] : memref<16x64x8xf32, #tpu.memory_space<vmem>>, vector<1x64x8xf32>
    %508 = vector.shape_cast %507 : vector<1x64x8xf32> to vector<64x8xf32>
    %cst_347 = arith.constant dense<0.000000e+00> : vector<16x64xf32>
    %509 = tpu.matmul %506, %508, %cst_347 {dimension_numbers = #tpu.dot_dimension_numbers<[1], [1], [0], [0], [0, 0, 1, 0], [], []>} : vector<16x8xf32>, vector<64x8xf32>, vector<16x64xf32> -> vector<16x64xf32>
    %510 = arith.addf %470, %509 : vector<16x64xf32>
    %c10 = arith.constant 10 : index
    %c0_348 = arith.constant 0 : index
    %c0_349 = arith.constant 0 : index
    %511 = vector.load %arg5[%c10, %c0_348, %c0_349] : memref<16x8x64xf32, #tpu.memory_space<vmem>>, vector<1x8x64xf32>
    %512 = vector.shape_cast %511 : vector<1x8x64xf32> to vector<8x64xf32>
    %c10_350 = arith.constant 10 : index
    %c0_351 = arith.constant 0 : index
    %c0_352 = arith.constant 0 : index
    %513 = vector.load %arg6[%c10_350, %c0_351, %c0_352] : memref<16x1x8xf32, #tpu.memory_space<vmem>>, vector<1x1x8xf32>
    %514 = vector.shape_cast %513 : vector<1x1x8xf32> to vector<1x8xf32>
    %cst_353 = arith.constant dense<0.000000e+00> : vector<16x8xf32>
    %515 = tpu.matmul %429, %512, %cst_353 {dimension_numbers = #tpu.dot_dimension_numbers<[1], [1], [0], [0], [0, 0, 1, 0], [], []>} : vector<16x64xf32>, vector<8x64xf32>, vector<16x8xf32> -> vector<16x8xf32>
    %516 = vector.broadcast %514 : vector<1x8xf32> to vector<16x8xf32>
    %517 = arith.addf %515, %516 : vector<16x8xf32>
    %c10_354 = arith.constant 10 : index
    %c0_355 = arith.constant 0 : index
    %c0_356 = arith.constant 0 : index
    %518 = vector.load %arg7[%c10_354, %c0_355, %c0_356] : memref<16x8x64xf32, #tpu.memory_space<vmem>>, vector<1x8x64xf32>
    %519 = vector.shape_cast %518 : vector<1x8x64xf32> to vector<8x64xf32>
    %c10_357 = arith.constant 10 : index
    %c0_358 = arith.constant 0 : index
    %c0_359 = arith.constant 0 : index
    %520 = vector.load %arg8[%c10_357, %c0_358, %c0_359] : memref<16x1x8xf32, #tpu.memory_space<vmem>>, vector<1x1x8xf32>
    %521 = vector.shape_cast %520 : vector<1x1x8xf32> to vector<1x8xf32>
    %cst_360 = arith.constant dense<0.000000e+00> : vector<16x8xf32>
    %522 = tpu.matmul %429, %519, %cst_360 {dimension_numbers = #tpu.dot_dimension_numbers<[1], [1], [0], [0], [0, 0, 1, 0], [], []>} : vector<16x64xf32>, vector<8x64xf32>, vector<16x8xf32> -> vector<16x8xf32>
    %523 = vector.broadcast %521 : vector<1x8xf32> to vector<16x8xf32>
    %524 = arith.addf %522, %523 : vector<16x8xf32>
    %c10_361 = arith.constant 10 : index
    %c0_362 = arith.constant 0 : index
    %c0_363 = arith.constant 0 : index
    %525 = vector.load %arg9[%c10_361, %c0_362, %c0_363] : memref<16x8x64xf32, #tpu.memory_space<vmem>>, vector<1x8x64xf32>
    %526 = vector.shape_cast %525 : vector<1x8x64xf32> to vector<8x64xf32>
    %c10_364 = arith.constant 10 : index
    %c0_365 = arith.constant 0 : index
    %c0_366 = arith.constant 0 : index
    %527 = vector.load %arg10[%c10_364, %c0_365, %c0_366] : memref<16x1x8xf32, #tpu.memory_space<vmem>>, vector<1x1x8xf32>
    %528 = vector.shape_cast %527 : vector<1x1x8xf32> to vector<1x8xf32>
    %cst_367 = arith.constant dense<0.000000e+00> : vector<16x8xf32>
    %529 = tpu.matmul %429, %526, %cst_367 {dimension_numbers = #tpu.dot_dimension_numbers<[1], [1], [0], [0], [0, 0, 1, 0], [], []>} : vector<16x64xf32>, vector<8x64xf32>, vector<16x8xf32> -> vector<16x8xf32>
    %530 = vector.broadcast %528 : vector<1x8xf32> to vector<16x8xf32>
    %531 = arith.addf %529, %530 : vector<16x8xf32>
    %cst_368 = arith.constant dense<0.000000e+00> : vector<16x16xf32>
    %532 = tpu.matmul %517, %524, %cst_368 {dimension_numbers = #tpu.dot_dimension_numbers<[1], [1], [0], [0], [0, 0, 1, 0], [], []>} : vector<16x8xf32>, vector<16x8xf32>, vector<16x16xf32> -> vector<16x16xf32>
    %cst_369 = arith.constant 0.353553385 : f32
    %533 = vector.broadcast %cst_369 : f32 to vector<16x16xf32>
    %534 = arith.mulf %532, %533 : vector<16x16xf32>
    %535 = arith.addf %534, %25 : vector<16x16xf32>
    %cst_370 = arith.constant dense<0xFF800000> : vector<16xf32>
    %536 = vector.multi_reduction <maximumf>, %535, %cst_370 [1] : vector<16x16xf32> to vector<16xf32>
    %537 = vector.shape_cast %536 : vector<16xf32> to vector<16x1xf32>
    %538 = vector.broadcast %537 : vector<16x1xf32> to vector<16x16xf32>
    %539 = arith.subf %535, %538 : vector<16x16xf32>
    %540 = math.exp %539 : vector<16x16xf32>
    %cst_371 = arith.constant dense<0.000000e+00> : vector<16xf32>
    %541 = vector.multi_reduction <add>, %540, %cst_371 [1] : vector<16x16xf32> to vector<16xf32>
    %542 = vector.shape_cast %541 : vector<16xf32> to vector<16x1xf32>
    %543 = tpu.reciprocal %542 {approx = true} : vector<16x1xf32> -> vector<16x1xf32>
    %544 = vector.broadcast %543 : vector<16x1xf32> to vector<16x16xf32>
    %545 = arith.mulf %540, %544 : vector<16x16xf32>
    %cst_372 = arith.constant dense<0.000000e+00> : vector<16x8xf32>
    %546 = tpu.matmul %545, %531, %cst_372 {dimension_numbers = #tpu.dot_dimension_numbers<[1], [0], [0], [1], [0, 0, 1, 1], [], []>} : vector<16x16xf32>, vector<16x8xf32>, vector<16x8xf32> -> vector<16x8xf32>
    %c10_373 = arith.constant 10 : index
    %c0_374 = arith.constant 0 : index
    %c0_375 = arith.constant 0 : index
    %547 = vector.load %arg11[%c10_373, %c0_374, %c0_375] : memref<16x64x8xf32, #tpu.memory_space<vmem>>, vector<1x64x8xf32>
    %548 = vector.shape_cast %547 : vector<1x64x8xf32> to vector<64x8xf32>
    %cst_376 = arith.constant dense<0.000000e+00> : vector<16x64xf32>
    %549 = tpu.matmul %546, %548, %cst_376 {dimension_numbers = #tpu.dot_dimension_numbers<[1], [1], [0], [0], [0, 0, 1, 0], [], []>} : vector<16x8xf32>, vector<64x8xf32>, vector<16x64xf32> -> vector<16x64xf32>
    %550 = arith.addf %510, %549 : vector<16x64xf32>
    %c11 = arith.constant 11 : index
    %c0_377 = arith.constant 0 : index
    %c0_378 = arith.constant 0 : index
    %551 = vector.load %arg5[%c11, %c0_377, %c0_378] : memref<16x8x64xf32, #tpu.memory_space<vmem>>, vector<1x8x64xf32>
    %552 = vector.shape_cast %551 : vector<1x8x64xf32> to vector<8x64xf32>
    %c11_379 = arith.constant 11 : index
    %c0_380 = arith.constant 0 : index
    %c0_381 = arith.constant 0 : index
    %553 = vector.load %arg6[%c11_379, %c0_380, %c0_381] : memref<16x1x8xf32, #tpu.memory_space<vmem>>, vector<1x1x8xf32>
    %554 = vector.shape_cast %553 : vector<1x1x8xf32> to vector<1x8xf32>
    %cst_382 = arith.constant dense<0.000000e+00> : vector<16x8xf32>
    %555 = tpu.matmul %429, %552, %cst_382 {dimension_numbers = #tpu.dot_dimension_numbers<[1], [1], [0], [0], [0, 0, 1, 0], [], []>} : vector<16x64xf32>, vector<8x64xf32>, vector<16x8xf32> -> vector<16x8xf32>
    %556 = vector.broadcast %554 : vector<1x8xf32> to vector<16x8xf32>
    %557 = arith.addf %555, %556 : vector<16x8xf32>
    %c11_383 = arith.constant 11 : index
    %c0_384 = arith.constant 0 : index
    %c0_385 = arith.constant 0 : index
    %558 = vector.load %arg7[%c11_383, %c0_384, %c0_385] : memref<16x8x64xf32, #tpu.memory_space<vmem>>, vector<1x8x64xf32>
    %559 = vector.shape_cast %558 : vector<1x8x64xf32> to vector<8x64xf32>
    %c11_386 = arith.constant 11 : index
    %c0_387 = arith.constant 0 : index
    %c0_388 = arith.constant 0 : index
    %560 = vector.load %arg8[%c11_386, %c0_387, %c0_388] : memref<16x1x8xf32, #tpu.memory_space<vmem>>, vector<1x1x8xf32>
    %561 = vector.shape_cast %560 : vector<1x1x8xf32> to vector<1x8xf32>
    %cst_389 = arith.constant dense<0.000000e+00> : vector<16x8xf32>
    %562 = tpu.matmul %429, %559, %cst_389 {dimension_numbers = #tpu.dot_dimension_numbers<[1], [1], [0], [0], [0, 0, 1, 0], [], []>} : vector<16x64xf32>, vector<8x64xf32>, vector<16x8xf32> -> vector<16x8xf32>
    %563 = vector.broadcast %561 : vector<1x8xf32> to vector<16x8xf32>
    %564 = arith.addf %562, %563 : vector<16x8xf32>
    %c11_390 = arith.constant 11 : index
    %c0_391 = arith.constant 0 : index
    %c0_392 = arith.constant 0 : index
    %565 = vector.load %arg9[%c11_390, %c0_391, %c0_392] : memref<16x8x64xf32, #tpu.memory_space<vmem>>, vector<1x8x64xf32>
    %566 = vector.shape_cast %565 : vector<1x8x64xf32> to vector<8x64xf32>
    %c11_393 = arith.constant 11 : index
    %c0_394 = arith.constant 0 : index
    %c0_395 = arith.constant 0 : index
    %567 = vector.load %arg10[%c11_393, %c0_394, %c0_395] : memref<16x1x8xf32, #tpu.memory_space<vmem>>, vector<1x1x8xf32>
    %568 = vector.shape_cast %567 : vector<1x1x8xf32> to vector<1x8xf32>
    %cst_396 = arith.constant dense<0.000000e+00> : vector<16x8xf32>
    %569 = tpu.matmul %429, %566, %cst_396 {dimension_numbers = #tpu.dot_dimension_numbers<[1], [1], [0], [0], [0, 0, 1, 0], [], []>} : vector<16x64xf32>, vector<8x64xf32>, vector<16x8xf32> -> vector<16x8xf32>
    %570 = vector.broadcast %568 : vector<1x8xf32> to vector<16x8xf32>
    %571 = arith.addf %569, %570 : vector<16x8xf32>
    %cst_397 = arith.constant dense<0.000000e+00> : vector<16x16xf32>
    %572 = tpu.matmul %557, %564, %cst_397 {dimension_numbers = #tpu.dot_dimension_numbers<[1], [1], [0], [0], [0, 0, 1, 0], [], []>} : vector<16x8xf32>, vector<16x8xf32>, vector<16x16xf32> -> vector<16x16xf32>
    %cst_398 = arith.constant 0.353553385 : f32
    %573 = vector.broadcast %cst_398 : f32 to vector<16x16xf32>
    %574 = arith.mulf %572, %573 : vector<16x16xf32>
    %575 = arith.addf %574, %25 : vector<16x16xf32>
    %cst_399 = arith.constant dense<0xFF800000> : vector<16xf32>
    %576 = vector.multi_reduction <maximumf>, %575, %cst_399 [1] : vector<16x16xf32> to vector<16xf32>
    %577 = vector.shape_cast %576 : vector<16xf32> to vector<16x1xf32>
    %578 = vector.broadcast %577 : vector<16x1xf32> to vector<16x16xf32>
    %579 = arith.subf %575, %578 : vector<16x16xf32>
    %580 = math.exp %579 : vector<16x16xf32>
    %cst_400 = arith.constant dense<0.000000e+00> : vector<16xf32>
    %581 = vector.multi_reduction <add>, %580, %cst_400 [1] : vector<16x16xf32> to vector<16xf32>
    %582 = vector.shape_cast %581 : vector<16xf32> to vector<16x1xf32>
    %583 = tpu.reciprocal %582 {approx = true} : vector<16x1xf32> -> vector<16x1xf32>
    %584 = vector.broadcast %583 : vector<16x1xf32> to vector<16x16xf32>
    %585 = arith.mulf %580, %584 : vector<16x16xf32>
    %cst_401 = arith.constant dense<0.000000e+00> : vector<16x8xf32>
    %586 = tpu.matmul %585, %571, %cst_401 {dimension_numbers = #tpu.dot_dimension_numbers<[1], [0], [0], [1], [0, 0, 1, 1], [], []>} : vector<16x16xf32>, vector<16x8xf32>, vector<16x8xf32> -> vector<16x8xf32>
    %c11_402 = arith.constant 11 : index
    %c0_403 = arith.constant 0 : index
    %c0_404 = arith.constant 0 : index
    %587 = vector.load %arg11[%c11_402, %c0_403, %c0_404] : memref<16x64x8xf32, #tpu.memory_space<vmem>>, vector<1x64x8xf32>
    %588 = vector.shape_cast %587 : vector<1x64x8xf32> to vector<64x8xf32>
    %cst_405 = arith.constant dense<0.000000e+00> : vector<16x64xf32>
    %589 = tpu.matmul %586, %588, %cst_405 {dimension_numbers = #tpu.dot_dimension_numbers<[1], [1], [0], [0], [0, 0, 1, 0], [], []>} : vector<16x8xf32>, vector<64x8xf32>, vector<16x64xf32> -> vector<16x64xf32>
    %590 = arith.addf %550, %589 : vector<16x64xf32>
    %c12 = arith.constant 12 : index
    %c0_406 = arith.constant 0 : index
    %c0_407 = arith.constant 0 : index
    %591 = vector.load %arg5[%c12, %c0_406, %c0_407] : memref<16x8x64xf32, #tpu.memory_space<vmem>>, vector<1x8x64xf32>
    %592 = vector.shape_cast %591 : vector<1x8x64xf32> to vector<8x64xf32>
    %c12_408 = arith.constant 12 : index
    %c0_409 = arith.constant 0 : index
    %c0_410 = arith.constant 0 : index
    %593 = vector.load %arg6[%c12_408, %c0_409, %c0_410] : memref<16x1x8xf32, #tpu.memory_space<vmem>>, vector<1x1x8xf32>
    %594 = vector.shape_cast %593 : vector<1x1x8xf32> to vector<1x8xf32>
    %cst_411 = arith.constant dense<0.000000e+00> : vector<16x8xf32>
    %595 = tpu.matmul %429, %592, %cst_411 {dimension_numbers = #tpu.dot_dimension_numbers<[1], [1], [0], [0], [0, 0, 1, 0], [], []>} : vector<16x64xf32>, vector<8x64xf32>, vector<16x8xf32> -> vector<16x8xf32>
    %596 = vector.broadcast %594 : vector<1x8xf32> to vector<16x8xf32>
    %597 = arith.addf %595, %596 : vector<16x8xf32>
    %c12_412 = arith.constant 12 : index
    %c0_413 = arith.constant 0 : index
    %c0_414 = arith.constant 0 : index
    %598 = vector.load %arg7[%c12_412, %c0_413, %c0_414] : memref<16x8x64xf32, #tpu.memory_space<vmem>>, vector<1x8x64xf32>
    %599 = vector.shape_cast %598 : vector<1x8x64xf32> to vector<8x64xf32>
    %c12_415 = arith.constant 12 : index
    %c0_416 = arith.constant 0 : index
    %c0_417 = arith.constant 0 : index
    %600 = vector.load %arg8[%c12_415, %c0_416, %c0_417] : memref<16x1x8xf32, #tpu.memory_space<vmem>>, vector<1x1x8xf32>
    %601 = vector.shape_cast %600 : vector<1x1x8xf32> to vector<1x8xf32>
    %cst_418 = arith.constant dense<0.000000e+00> : vector<16x8xf32>
    %602 = tpu.matmul %429, %599, %cst_418 {dimension_numbers = #tpu.dot_dimension_numbers<[1], [1], [0], [0], [0, 0, 1, 0], [], []>} : vector<16x64xf32>, vector<8x64xf32>, vector<16x8xf32> -> vector<16x8xf32>
    %603 = vector.broadcast %601 : vector<1x8xf32> to vector<16x8xf32>
    %604 = arith.addf %602, %603 : vector<16x8xf32>
    %c12_419 = arith.constant 12 : index
    %c0_420 = arith.constant 0 : index
    %c0_421 = arith.constant 0 : index
    %605 = vector.load %arg9[%c12_419, %c0_420, %c0_421] : memref<16x8x64xf32, #tpu.memory_space<vmem>>, vector<1x8x64xf32>
    %606 = vector.shape_cast %605 : vector<1x8x64xf32> to vector<8x64xf32>
    %c12_422 = arith.constant 12 : index
    %c0_423 = arith.constant 0 : index
    %c0_424 = arith.constant 0 : index
    %607 = vector.load %arg10[%c12_422, %c0_423, %c0_424] : memref<16x1x8xf32, #tpu.memory_space<vmem>>, vector<1x1x8xf32>
    %608 = vector.shape_cast %607 : vector<1x1x8xf32> to vector<1x8xf32>
    %cst_425 = arith.constant dense<0.000000e+00> : vector<16x8xf32>
    %609 = tpu.matmul %429, %606, %cst_425 {dimension_numbers = #tpu.dot_dimension_numbers<[1], [1], [0], [0], [0, 0, 1, 0], [], []>} : vector<16x64xf32>, vector<8x64xf32>, vector<16x8xf32> -> vector<16x8xf32>
    %610 = vector.broadcast %608 : vector<1x8xf32> to vector<16x8xf32>
    %611 = arith.addf %609, %610 : vector<16x8xf32>
    %cst_426 = arith.constant dense<0.000000e+00> : vector<16x16xf32>
    %612 = tpu.matmul %597, %604, %cst_426 {dimension_numbers = #tpu.dot_dimension_numbers<[1], [1], [0], [0], [0, 0, 1, 0], [], []>} : vector<16x8xf32>, vector<16x8xf32>, vector<16x16xf32> -> vector<16x16xf32>
    %cst_427 = arith.constant 0.353553385 : f32
    %613 = vector.broadcast %cst_427 : f32 to vector<16x16xf32>
    %614 = arith.mulf %612, %613 : vector<16x16xf32>
    %615 = arith.addf %614, %25 : vector<16x16xf32>
    %cst_428 = arith.constant dense<0xFF800000> : vector<16xf32>
    %616 = vector.multi_reduction <maximumf>, %615, %cst_428 [1] : vector<16x16xf32> to vector<16xf32>
    %617 = vector.shape_cast %616 : vector<16xf32> to vector<16x1xf32>
    %618 = vector.broadcast %617 : vector<16x1xf32> to vector<16x16xf32>
    %619 = arith.subf %615, %618 : vector<16x16xf32>
    %620 = math.exp %619 : vector<16x16xf32>
    %cst_429 = arith.constant dense<0.000000e+00> : vector<16xf32>
    %621 = vector.multi_reduction <add>, %620, %cst_429 [1] : vector<16x16xf32> to vector<16xf32>
    %622 = vector.shape_cast %621 : vector<16xf32> to vector<16x1xf32>
    %623 = tpu.reciprocal %622 {approx = true} : vector<16x1xf32> -> vector<16x1xf32>
    %624 = vector.broadcast %623 : vector<16x1xf32> to vector<16x16xf32>
    %625 = arith.mulf %620, %624 : vector<16x16xf32>
    %cst_430 = arith.constant dense<0.000000e+00> : vector<16x8xf32>
    %626 = tpu.matmul %625, %611, %cst_430 {dimension_numbers = #tpu.dot_dimension_numbers<[1], [0], [0], [1], [0, 0, 1, 1], [], []>} : vector<16x16xf32>, vector<16x8xf32>, vector<16x8xf32> -> vector<16x8xf32>
    %c12_431 = arith.constant 12 : index
    %c0_432 = arith.constant 0 : index
    %c0_433 = arith.constant 0 : index
    %627 = vector.load %arg11[%c12_431, %c0_432, %c0_433] : memref<16x64x8xf32, #tpu.memory_space<vmem>>, vector<1x64x8xf32>
    %628 = vector.shape_cast %627 : vector<1x64x8xf32> to vector<64x8xf32>
    %cst_434 = arith.constant dense<0.000000e+00> : vector<16x64xf32>
    %629 = tpu.matmul %626, %628, %cst_434 {dimension_numbers = #tpu.dot_dimension_numbers<[1], [1], [0], [0], [0, 0, 1, 0], [], []>} : vector<16x8xf32>, vector<64x8xf32>, vector<16x64xf32> -> vector<16x64xf32>
    %630 = arith.addf %590, %629 : vector<16x64xf32>
    %c13 = arith.constant 13 : index
    %c0_435 = arith.constant 0 : index
    %c0_436 = arith.constant 0 : index
    %631 = vector.load %arg5[%c13, %c0_435, %c0_436] : memref<16x8x64xf32, #tpu.memory_space<vmem>>, vector<1x8x64xf32>
    %632 = vector.shape_cast %631 : vector<1x8x64xf32> to vector<8x64xf32>
    %c13_437 = arith.constant 13 : index
    %c0_438 = arith.constant 0 : index
    %c0_439 = arith.constant 0 : index
    %633 = vector.load %arg6[%c13_437, %c0_438, %c0_439] : memref<16x1x8xf32, #tpu.memory_space<vmem>>, vector<1x1x8xf32>
    %634 = vector.shape_cast %633 : vector<1x1x8xf32> to vector<1x8xf32>
    %cst_440 = arith.constant dense<0.000000e+00> : vector<16x8xf32>
    %635 = tpu.matmul %429, %632, %cst_440 {dimension_numbers = #tpu.dot_dimension_numbers<[1], [1], [0], [0], [0, 0, 1, 0], [], []>} : vector<16x64xf32>, vector<8x64xf32>, vector<16x8xf32> -> vector<16x8xf32>
    %636 = vector.broadcast %634 : vector<1x8xf32> to vector<16x8xf32>
    %637 = arith.addf %635, %636 : vector<16x8xf32>
    %c13_441 = arith.constant 13 : index
    %c0_442 = arith.constant 0 : index
    %c0_443 = arith.constant 0 : index
    %638 = vector.load %arg7[%c13_441, %c0_442, %c0_443] : memref<16x8x64xf32, #tpu.memory_space<vmem>>, vector<1x8x64xf32>
    %639 = vector.shape_cast %638 : vector<1x8x64xf32> to vector<8x64xf32>
    %c13_444 = arith.constant 13 : index
    %c0_445 = arith.constant 0 : index
    %c0_446 = arith.constant 0 : index
    %640 = vector.load %arg8[%c13_444, %c0_445, %c0_446] : memref<16x1x8xf32, #tpu.memory_space<vmem>>, vector<1x1x8xf32>
    %641 = vector.shape_cast %640 : vector<1x1x8xf32> to vector<1x8xf32>
    %cst_447 = arith.constant dense<0.000000e+00> : vector<16x8xf32>
    %642 = tpu.matmul %429, %639, %cst_447 {dimension_numbers = #tpu.dot_dimension_numbers<[1], [1], [0], [0], [0, 0, 1, 0], [], []>} : vector<16x64xf32>, vector<8x64xf32>, vector<16x8xf32> -> vector<16x8xf32>
    %643 = vector.broadcast %641 : vector<1x8xf32> to vector<16x8xf32>
    %644 = arith.addf %642, %643 : vector<16x8xf32>
    %c13_448 = arith.constant 13 : index
    %c0_449 = arith.constant 0 : index
    %c0_450 = arith.constant 0 : index
    %645 = vector.load %arg9[%c13_448, %c0_449, %c0_450] : memref<16x8x64xf32, #tpu.memory_space<vmem>>, vector<1x8x64xf32>
    %646 = vector.shape_cast %645 : vector<1x8x64xf32> to vector<8x64xf32>
    %c13_451 = arith.constant 13 : index
    %c0_452 = arith.constant 0 : index
    %c0_453 = arith.constant 0 : index
    %647 = vector.load %arg10[%c13_451, %c0_452, %c0_453] : memref<16x1x8xf32, #tpu.memory_space<vmem>>, vector<1x1x8xf32>
    %648 = vector.shape_cast %647 : vector<1x1x8xf32> to vector<1x8xf32>
    %cst_454 = arith.constant dense<0.000000e+00> : vector<16x8xf32>
    %649 = tpu.matmul %429, %646, %cst_454 {dimension_numbers = #tpu.dot_dimension_numbers<[1], [1], [0], [0], [0, 0, 1, 0], [], []>} : vector<16x64xf32>, vector<8x64xf32>, vector<16x8xf32> -> vector<16x8xf32>
    %650 = vector.broadcast %648 : vector<1x8xf32> to vector<16x8xf32>
    %651 = arith.addf %649, %650 : vector<16x8xf32>
    %cst_455 = arith.constant dense<0.000000e+00> : vector<16x16xf32>
    %652 = tpu.matmul %637, %644, %cst_455 {dimension_numbers = #tpu.dot_dimension_numbers<[1], [1], [0], [0], [0, 0, 1, 0], [], []>} : vector<16x8xf32>, vector<16x8xf32>, vector<16x16xf32> -> vector<16x16xf32>
    %cst_456 = arith.constant 0.353553385 : f32
    %653 = vector.broadcast %cst_456 : f32 to vector<16x16xf32>
    %654 = arith.mulf %652, %653 : vector<16x16xf32>
    %655 = arith.addf %654, %25 : vector<16x16xf32>
    %cst_457 = arith.constant dense<0xFF800000> : vector<16xf32>
    %656 = vector.multi_reduction <maximumf>, %655, %cst_457 [1] : vector<16x16xf32> to vector<16xf32>
    %657 = vector.shape_cast %656 : vector<16xf32> to vector<16x1xf32>
    %658 = vector.broadcast %657 : vector<16x1xf32> to vector<16x16xf32>
    %659 = arith.subf %655, %658 : vector<16x16xf32>
    %660 = math.exp %659 : vector<16x16xf32>
    %cst_458 = arith.constant dense<0.000000e+00> : vector<16xf32>
    %661 = vector.multi_reduction <add>, %660, %cst_458 [1] : vector<16x16xf32> to vector<16xf32>
    %662 = vector.shape_cast %661 : vector<16xf32> to vector<16x1xf32>
    %663 = tpu.reciprocal %662 {approx = true} : vector<16x1xf32> -> vector<16x1xf32>
    %664 = vector.broadcast %663 : vector<16x1xf32> to vector<16x16xf32>
    %665 = arith.mulf %660, %664 : vector<16x16xf32>
    %cst_459 = arith.constant dense<0.000000e+00> : vector<16x8xf32>
    %666 = tpu.matmul %665, %651, %cst_459 {dimension_numbers = #tpu.dot_dimension_numbers<[1], [0], [0], [1], [0, 0, 1, 1], [], []>} : vector<16x16xf32>, vector<16x8xf32>, vector<16x8xf32> -> vector<16x8xf32>
    %c13_460 = arith.constant 13 : index
    %c0_461 = arith.constant 0 : index
    %c0_462 = arith.constant 0 : index
    %667 = vector.load %arg11[%c13_460, %c0_461, %c0_462] : memref<16x64x8xf32, #tpu.memory_space<vmem>>, vector<1x64x8xf32>
    %668 = vector.shape_cast %667 : vector<1x64x8xf32> to vector<64x8xf32>
    %cst_463 = arith.constant dense<0.000000e+00> : vector<16x64xf32>
    %669 = tpu.matmul %666, %668, %cst_463 {dimension_numbers = #tpu.dot_dimension_numbers<[1], [1], [0], [0], [0, 0, 1, 0], [], []>} : vector<16x8xf32>, vector<64x8xf32>, vector<16x64xf32> -> vector<16x64xf32>
    %670 = arith.addf %630, %669 : vector<16x64xf32>
    %c14 = arith.constant 14 : index
    %c0_464 = arith.constant 0 : index
    %c0_465 = arith.constant 0 : index
    %671 = vector.load %arg5[%c14, %c0_464, %c0_465] : memref<16x8x64xf32, #tpu.memory_space<vmem>>, vector<1x8x64xf32>
    %672 = vector.shape_cast %671 : vector<1x8x64xf32> to vector<8x64xf32>
    %c14_466 = arith.constant 14 : index
    %c0_467 = arith.constant 0 : index
    %c0_468 = arith.constant 0 : index
    %673 = vector.load %arg6[%c14_466, %c0_467, %c0_468] : memref<16x1x8xf32, #tpu.memory_space<vmem>>, vector<1x1x8xf32>
    %674 = vector.shape_cast %673 : vector<1x1x8xf32> to vector<1x8xf32>
    %cst_469 = arith.constant dense<0.000000e+00> : vector<16x8xf32>
    %675 = tpu.matmul %429, %672, %cst_469 {dimension_numbers = #tpu.dot_dimension_numbers<[1], [1], [0], [0], [0, 0, 1, 0], [], []>} : vector<16x64xf32>, vector<8x64xf32>, vector<16x8xf32> -> vector<16x8xf32>
    %676 = vector.broadcast %674 : vector<1x8xf32> to vector<16x8xf32>
    %677 = arith.addf %675, %676 : vector<16x8xf32>
    %c14_470 = arith.constant 14 : index
    %c0_471 = arith.constant 0 : index
    %c0_472 = arith.constant 0 : index
    %678 = vector.load %arg7[%c14_470, %c0_471, %c0_472] : memref<16x8x64xf32, #tpu.memory_space<vmem>>, vector<1x8x64xf32>
    %679 = vector.shape_cast %678 : vector<1x8x64xf32> to vector<8x64xf32>
    %c14_473 = arith.constant 14 : index
    %c0_474 = arith.constant 0 : index
    %c0_475 = arith.constant 0 : index
    %680 = vector.load %arg8[%c14_473, %c0_474, %c0_475] : memref<16x1x8xf32, #tpu.memory_space<vmem>>, vector<1x1x8xf32>
    %681 = vector.shape_cast %680 : vector<1x1x8xf32> to vector<1x8xf32>
    %cst_476 = arith.constant dense<0.000000e+00> : vector<16x8xf32>
    %682 = tpu.matmul %429, %679, %cst_476 {dimension_numbers = #tpu.dot_dimension_numbers<[1], [1], [0], [0], [0, 0, 1, 0], [], []>} : vector<16x64xf32>, vector<8x64xf32>, vector<16x8xf32> -> vector<16x8xf32>
    %683 = vector.broadcast %681 : vector<1x8xf32> to vector<16x8xf32>
    %684 = arith.addf %682, %683 : vector<16x8xf32>
    %c14_477 = arith.constant 14 : index
    %c0_478 = arith.constant 0 : index
    %c0_479 = arith.constant 0 : index
    %685 = vector.load %arg9[%c14_477, %c0_478, %c0_479] : memref<16x8x64xf32, #tpu.memory_space<vmem>>, vector<1x8x64xf32>
    %686 = vector.shape_cast %685 : vector<1x8x64xf32> to vector<8x64xf32>
    %c14_480 = arith.constant 14 : index
    %c0_481 = arith.constant 0 : index
    %c0_482 = arith.constant 0 : index
    %687 = vector.load %arg10[%c14_480, %c0_481, %c0_482] : memref<16x1x8xf32, #tpu.memory_space<vmem>>, vector<1x1x8xf32>
    %688 = vector.shape_cast %687 : vector<1x1x8xf32> to vector<1x8xf32>
    %cst_483 = arith.constant dense<0.000000e+00> : vector<16x8xf32>
    %689 = tpu.matmul %429, %686, %cst_483 {dimension_numbers = #tpu.dot_dimension_numbers<[1], [1], [0], [0], [0, 0, 1, 0], [], []>} : vector<16x64xf32>, vector<8x64xf32>, vector<16x8xf32> -> vector<16x8xf32>
    %690 = vector.broadcast %688 : vector<1x8xf32> to vector<16x8xf32>
    %691 = arith.addf %689, %690 : vector<16x8xf32>
    %cst_484 = arith.constant dense<0.000000e+00> : vector<16x16xf32>
    %692 = tpu.matmul %677, %684, %cst_484 {dimension_numbers = #tpu.dot_dimension_numbers<[1], [1], [0], [0], [0, 0, 1, 0], [], []>} : vector<16x8xf32>, vector<16x8xf32>, vector<16x16xf32> -> vector<16x16xf32>
    %cst_485 = arith.constant 0.353553385 : f32
    %693 = vector.broadcast %cst_485 : f32 to vector<16x16xf32>
    %694 = arith.mulf %692, %693 : vector<16x16xf32>
    %695 = arith.addf %694, %25 : vector<16x16xf32>
    %cst_486 = arith.constant dense<0xFF800000> : vector<16xf32>
    %696 = vector.multi_reduction <maximumf>, %695, %cst_486 [1] : vector<16x16xf32> to vector<16xf32>
    %697 = vector.shape_cast %696 : vector<16xf32> to vector<16x1xf32>
    %698 = vector.broadcast %697 : vector<16x1xf32> to vector<16x16xf32>
    %699 = arith.subf %695, %698 : vector<16x16xf32>
    %700 = math.exp %699 : vector<16x16xf32>
    %cst_487 = arith.constant dense<0.000000e+00> : vector<16xf32>
    %701 = vector.multi_reduction <add>, %700, %cst_487 [1] : vector<16x16xf32> to vector<16xf32>
    %702 = vector.shape_cast %701 : vector<16xf32> to vector<16x1xf32>
    %703 = tpu.reciprocal %702 {approx = true} : vector<16x1xf32> -> vector<16x1xf32>
    %704 = vector.broadcast %703 : vector<16x1xf32> to vector<16x16xf32>
    %705 = arith.mulf %700, %704 : vector<16x16xf32>
    %cst_488 = arith.constant dense<0.000000e+00> : vector<16x8xf32>
    %706 = tpu.matmul %705, %691, %cst_488 {dimension_numbers = #tpu.dot_dimension_numbers<[1], [0], [0], [1], [0, 0, 1, 1], [], []>} : vector<16x16xf32>, vector<16x8xf32>, vector<16x8xf32> -> vector<16x8xf32>
    %c14_489 = arith.constant 14 : index
    %c0_490 = arith.constant 0 : index
    %c0_491 = arith.constant 0 : index
    %707 = vector.load %arg11[%c14_489, %c0_490, %c0_491] : memref<16x64x8xf32, #tpu.memory_space<vmem>>, vector<1x64x8xf32>
    %708 = vector.shape_cast %707 : vector<1x64x8xf32> to vector<64x8xf32>
    %cst_492 = arith.constant dense<0.000000e+00> : vector<16x64xf32>
    %709 = tpu.matmul %706, %708, %cst_492 {dimension_numbers = #tpu.dot_dimension_numbers<[1], [1], [0], [0], [0, 0, 1, 0], [], []>} : vector<16x8xf32>, vector<64x8xf32>, vector<16x64xf32> -> vector<16x64xf32>
    %710 = arith.addf %670, %709 : vector<16x64xf32>
    %c15 = arith.constant 15 : index
    %c0_493 = arith.constant 0 : index
    %c0_494 = arith.constant 0 : index
    %711 = vector.load %arg5[%c15, %c0_493, %c0_494] : memref<16x8x64xf32, #tpu.memory_space<vmem>>, vector<1x8x64xf32>
    %712 = vector.shape_cast %711 : vector<1x8x64xf32> to vector<8x64xf32>
    %c15_495 = arith.constant 15 : index
    %c0_496 = arith.constant 0 : index
    %c0_497 = arith.constant 0 : index
    %713 = vector.load %arg6[%c15_495, %c0_496, %c0_497] : memref<16x1x8xf32, #tpu.memory_space<vmem>>, vector<1x1x8xf32>
    %714 = vector.shape_cast %713 : vector<1x1x8xf32> to vector<1x8xf32>
    %cst_498 = arith.constant dense<0.000000e+00> : vector<16x8xf32>
    %715 = tpu.matmul %429, %712, %cst_498 {dimension_numbers = #tpu.dot_dimension_numbers<[1], [1], [0], [0], [0, 0, 1, 0], [], []>} : vector<16x64xf32>, vector<8x64xf32>, vector<16x8xf32> -> vector<16x8xf32>
    %716 = vector.broadcast %714 : vector<1x8xf32> to vector<16x8xf32>
    %717 = arith.addf %715, %716 : vector<16x8xf32>
    %c15_499 = arith.constant 15 : index
    %c0_500 = arith.constant 0 : index
    %c0_501 = arith.constant 0 : index
    %718 = vector.load %arg7[%c15_499, %c0_500, %c0_501] : memref<16x8x64xf32, #tpu.memory_space<vmem>>, vector<1x8x64xf32>
    %719 = vector.shape_cast %718 : vector<1x8x64xf32> to vector<8x64xf32>
    %c15_502 = arith.constant 15 : index
    %c0_503 = arith.constant 0 : index
    %c0_504 = arith.constant 0 : index
    %720 = vector.load %arg8[%c15_502, %c0_503, %c0_504] : memref<16x1x8xf32, #tpu.memory_space<vmem>>, vector<1x1x8xf32>
    %721 = vector.shape_cast %720 : vector<1x1x8xf32> to vector<1x8xf32>
    %cst_505 = arith.constant dense<0.000000e+00> : vector<16x8xf32>
    %722 = tpu.matmul %429, %719, %cst_505 {dimension_numbers = #tpu.dot_dimension_numbers<[1], [1], [0], [0], [0, 0, 1, 0], [], []>} : vector<16x64xf32>, vector<8x64xf32>, vector<16x8xf32> -> vector<16x8xf32>
    %723 = vector.broadcast %721 : vector<1x8xf32> to vector<16x8xf32>
    %724 = arith.addf %722, %723 : vector<16x8xf32>
    %c15_506 = arith.constant 15 : index
    %c0_507 = arith.constant 0 : index
    %c0_508 = arith.constant 0 : index
    %725 = vector.load %arg9[%c15_506, %c0_507, %c0_508] : memref<16x8x64xf32, #tpu.memory_space<vmem>>, vector<1x8x64xf32>
    %726 = vector.shape_cast %725 : vector<1x8x64xf32> to vector<8x64xf32>
    %c15_509 = arith.constant 15 : index
    %c0_510 = arith.constant 0 : index
    %c0_511 = arith.constant 0 : index
    %727 = vector.load %arg10[%c15_509, %c0_510, %c0_511] : memref<16x1x8xf32, #tpu.memory_space<vmem>>, vector<1x1x8xf32>
    %728 = vector.shape_cast %727 : vector<1x1x8xf32> to vector<1x8xf32>
    %cst_512 = arith.constant dense<0.000000e+00> : vector<16x8xf32>
    %729 = tpu.matmul %429, %726, %cst_512 {dimension_numbers = #tpu.dot_dimension_numbers<[1], [1], [0], [0], [0, 0, 1, 0], [], []>} : vector<16x64xf32>, vector<8x64xf32>, vector<16x8xf32> -> vector<16x8xf32>
    %730 = vector.broadcast %728 : vector<1x8xf32> to vector<16x8xf32>
    %731 = arith.addf %729, %730 : vector<16x8xf32>
    %cst_513 = arith.constant dense<0.000000e+00> : vector<16x16xf32>
    %732 = tpu.matmul %717, %724, %cst_513 {dimension_numbers = #tpu.dot_dimension_numbers<[1], [1], [0], [0], [0, 0, 1, 0], [], []>} : vector<16x8xf32>, vector<16x8xf32>, vector<16x16xf32> -> vector<16x16xf32>
    %cst_514 = arith.constant 0.353553385 : f32
    %733 = vector.broadcast %cst_514 : f32 to vector<16x16xf32>
    %734 = arith.mulf %732, %733 : vector<16x16xf32>
    %735 = arith.addf %734, %25 : vector<16x16xf32>
    %cst_515 = arith.constant dense<0xFF800000> : vector<16xf32>
    %736 = vector.multi_reduction <maximumf>, %735, %cst_515 [1] : vector<16x16xf32> to vector<16xf32>
    %737 = vector.shape_cast %736 : vector<16xf32> to vector<16x1xf32>
    %738 = vector.broadcast %737 : vector<16x1xf32> to vector<16x16xf32>
    %739 = arith.subf %735, %738 : vector<16x16xf32>
    %740 = math.exp %739 : vector<16x16xf32>
    %cst_516 = arith.constant dense<0.000000e+00> : vector<16xf32>
    %741 = vector.multi_reduction <add>, %740, %cst_516 [1] : vector<16x16xf32> to vector<16xf32>
    %742 = vector.shape_cast %741 : vector<16xf32> to vector<16x1xf32>
    %743 = tpu.reciprocal %742 {approx = true} : vector<16x1xf32> -> vector<16x1xf32>
    %744 = vector.broadcast %743 : vector<16x1xf32> to vector<16x16xf32>
    %745 = arith.mulf %740, %744 : vector<16x16xf32>
    %cst_517 = arith.constant dense<0.000000e+00> : vector<16x8xf32>
    %746 = tpu.matmul %745, %731, %cst_517 {dimension_numbers = #tpu.dot_dimension_numbers<[1], [0], [0], [1], [0, 0, 1, 1], [], []>} : vector<16x16xf32>, vector<16x8xf32>, vector<16x8xf32> -> vector<16x8xf32>
    %c15_518 = arith.constant 15 : index
    %c0_519 = arith.constant 0 : index
    %c0_520 = arith.constant 0 : index
    %747 = vector.load %arg11[%c15_518, %c0_519, %c0_520] : memref<16x64x8xf32, #tpu.memory_space<vmem>>, vector<1x64x8xf32>
    %748 = vector.shape_cast %747 : vector<1x64x8xf32> to vector<64x8xf32>
    %cst_521 = arith.constant dense<0.000000e+00> : vector<16x64xf32>
    %749 = tpu.matmul %746, %748, %cst_521 {dimension_numbers = #tpu.dot_dimension_numbers<[1], [1], [0], [0], [0, 0, 1, 0], [], []>} : vector<16x8xf32>, vector<64x8xf32>, vector<16x64xf32> -> vector<16x64xf32>
    %750 = arith.addf %710, %749 : vector<16x64xf32>
    %751 = vector.broadcast %431 : vector<1x64xf32> to vector<16x64xf32>
    %752 = arith.addf %750, %751 : vector<16x64xf32>
    %753 = arith.addf %429, %752 : vector<16x64xf32>
    %c1_522 = arith.constant 1 : index
    %c0_523 = arith.constant 0 : index
    %c0_524 = arith.constant 0 : index
    %754 = vector.load %arg13[%c1_522, %c0_523, %c0_524] : memref<2x1x64xf32, #tpu.memory_space<vmem>>, vector<1x1x64xf32>
    %755 = vector.shape_cast %754 : vector<1x1x64xf32> to vector<1x64xf32>
    %c1_525 = arith.constant 1 : index
    %c0_526 = arith.constant 0 : index
    %c0_527 = arith.constant 0 : index
    %756 = vector.load %arg14[%c1_525, %c0_526, %c0_527] : memref<2x1x64xf32, #tpu.memory_space<vmem>>, vector<1x1x64xf32>
    %757 = vector.shape_cast %756 : vector<1x1x64xf32> to vector<1x64xf32>
    %cst_528 = arith.constant dense<0.000000e+00> : vector<16xf32>
    %758 = vector.multi_reduction <add>, %753, %cst_528 [1] : vector<16x64xf32> to vector<16xf32>
    %759 = vector.shape_cast %758 : vector<16xf32> to vector<16x1xf32>
    %cst_529 = arith.constant 6.400000e+01 : f32
    %760 = vector.broadcast %cst_529 : f32 to vector<16x1xf32>
    %761 = arith.divf %759, %760 : vector<16x1xf32>
    %762 = vector.broadcast %761 : vector<16x1xf32> to vector<16x64xf32>
    %763 = arith.subf %753, %762 : vector<16x64xf32>
    %764 = arith.mulf %763, %763 : vector<16x64xf32>
    %cst_530 = arith.constant dense<0.000000e+00> : vector<16xf32>
    %765 = vector.multi_reduction <add>, %764, %cst_530 [1] : vector<16x64xf32> to vector<16xf32>
    %766 = vector.shape_cast %765 : vector<16xf32> to vector<16x1xf32>
    %cst_531 = arith.constant 6.400000e+01 : f32
    %767 = vector.broadcast %cst_531 : f32 to vector<16x1xf32>
    %768 = arith.divf %766, %767 : vector<16x1xf32>
    %769 = vector.broadcast %761 : vector<16x1xf32> to vector<16x64xf32>
    %770 = arith.subf %753, %769 : vector<16x64xf32>
    %cst_532 = arith.constant 9.99999996E-13 : f32
    %771 = vector.broadcast %cst_532 : f32 to vector<16x1xf32>
    %772 = arith.addf %768, %771 : vector<16x1xf32>
    %773 = math.rsqrt %772 : vector<16x1xf32>
    %774 = vector.broadcast %773 : vector<16x1xf32> to vector<16x64xf32>
    %775 = arith.mulf %770, %774 : vector<16x64xf32>
    %776 = vector.broadcast %755 : vector<1x64xf32> to vector<16x64xf32>
    %777 = arith.mulf %775, %776 : vector<16x64xf32>
    %778 = vector.broadcast %757 : vector<1x64xf32> to vector<16x64xf32>
    %779 = arith.addf %777, %778 : vector<16x64xf32>
    %c1_533 = arith.constant 1 : index
    %c0_534 = arith.constant 0 : index
    %c0_535 = arith.constant 0 : index
    %780 = vector.load %arg15[%c1_533, %c0_534, %c0_535] : memref<2x128x64xf32, #tpu.memory_space<vmem>>, vector<1x128x64xf32>
    %781 = vector.shape_cast %780 : vector<1x128x64xf32> to vector<128x64xf32>
    %c1_536 = arith.constant 1 : index
    %c0_537 = arith.constant 0 : index
    %c0_538 = arith.constant 0 : index
    %782 = vector.load %arg16[%c1_536, %c0_537, %c0_538] : memref<2x1x128xf32, #tpu.memory_space<vmem>>, vector<1x1x128xf32>
    %783 = vector.shape_cast %782 : vector<1x1x128xf32> to vector<1x128xf32>
    %cst_539 = arith.constant dense<0.000000e+00> : vector<16x128xf32>
    %784 = tpu.matmul %779, %781, %cst_539 {dimension_numbers = #tpu.dot_dimension_numbers<[1], [1], [0], [0], [0, 0, 1, 0], [], []>} : vector<16x64xf32>, vector<128x64xf32>, vector<16x128xf32> -> vector<16x128xf32>
    %785 = vector.broadcast %783 : vector<1x128xf32> to vector<16x128xf32>
    %786 = arith.addf %784, %785 : vector<16x128xf32>
    %cst_540 = arith.constant 5.000000e-01 : f32
    %787 = vector.broadcast %cst_540 : f32 to vector<16x128xf32>
    %788 = arith.mulf %787, %786 : vector<16x128xf32>
    %cst_541 = arith.constant 4.471500e-02 : f32
    %789 = vector.broadcast %cst_541 : f32 to vector<16x128xf32>
    %790 = arith.mulf %789, %786 : vector<16x128xf32>
    %791 = arith.mulf %790, %786 : vector<16x128xf32>
    %792 = arith.mulf %791, %786 : vector<16x128xf32>
    %793 = arith.addf %786, %792 : vector<16x128xf32>
    %cst_542 = arith.constant 0.797884583 : f32
    %794 = vector.broadcast %cst_542 : f32 to vector<16x128xf32>
    %795 = arith.mulf %794, %793 : vector<16x128xf32>
    %796 = math.tanh %795 : vector<16x128xf32>
    %cst_543 = arith.constant 1.000000e+00 : f32
    %797 = vector.broadcast %cst_543 : f32 to vector<16x128xf32>
    %798 = arith.addf %797, %796 : vector<16x128xf32>
    %799 = arith.mulf %788, %798 : vector<16x128xf32>
    %c1_544 = arith.constant 1 : index
    %c0_545 = arith.constant 0 : index
    %c0_546 = arith.constant 0 : index
    %800 = vector.load %arg17[%c1_544, %c0_545, %c0_546] : memref<2x64x128xf32, #tpu.memory_space<vmem>>, vector<1x64x128xf32>
    %801 = vector.shape_cast %800 : vector<1x64x128xf32> to vector<64x128xf32>
    %c1_547 = arith.constant 1 : index
    %c0_548 = arith.constant 0 : index
    %c0_549 = arith.constant 0 : index
    %802 = vector.load %arg18[%c1_547, %c0_548, %c0_549] : memref<2x1x64xf32, #tpu.memory_space<vmem>>, vector<1x1x64xf32>
    %803 = vector.shape_cast %802 : vector<1x1x64xf32> to vector<1x64xf32>
    %cst_550 = arith.constant dense<0.000000e+00> : vector<16x64xf32>
    %804 = tpu.matmul %799, %801, %cst_550 {dimension_numbers = #tpu.dot_dimension_numbers<[1], [1], [0], [0], [0, 0, 1, 0], [], []>} : vector<16x128xf32>, vector<64x128xf32>, vector<16x64xf32> -> vector<16x64xf32>
    %805 = vector.broadcast %803 : vector<1x64xf32> to vector<16x64xf32>
    %806 = arith.addf %804, %805 : vector<16x64xf32>
    %807 = arith.addf %779, %806 : vector<16x64xf32>
    %c1_551 = arith.constant 1 : index
    %c0_552 = arith.constant 0 : index
    %c0_553 = arith.constant 0 : index
    %808 = vector.load %arg19[%c1_551, %c0_552, %c0_553] : memref<2x1x64xf32, #tpu.memory_space<vmem>>, vector<1x1x64xf32>
    %809 = vector.shape_cast %808 : vector<1x1x64xf32> to vector<1x64xf32>
    %c1_554 = arith.constant 1 : index
    %c0_555 = arith.constant 0 : index
    %c0_556 = arith.constant 0 : index
    %810 = vector.load %arg20[%c1_554, %c0_555, %c0_556] : memref<2x1x64xf32, #tpu.memory_space<vmem>>, vector<1x1x64xf32>
    %811 = vector.shape_cast %810 : vector<1x1x64xf32> to vector<1x64xf32>
    %cst_557 = arith.constant dense<0.000000e+00> : vector<16xf32>
    %812 = vector.multi_reduction <add>, %807, %cst_557 [1] : vector<16x64xf32> to vector<16xf32>
    %813 = vector.shape_cast %812 : vector<16xf32> to vector<16x1xf32>
    %cst_558 = arith.constant 6.400000e+01 : f32
    %814 = vector.broadcast %cst_558 : f32 to vector<16x1xf32>
    %815 = arith.divf %813, %814 : vector<16x1xf32>
    %816 = vector.broadcast %815 : vector<16x1xf32> to vector<16x64xf32>
    %817 = arith.subf %807, %816 : vector<16x64xf32>
    %818 = arith.mulf %817, %817 : vector<16x64xf32>
    %cst_559 = arith.constant dense<0.000000e+00> : vector<16xf32>
    %819 = vector.multi_reduction <add>, %818, %cst_559 [1] : vector<16x64xf32> to vector<16xf32>
    %820 = vector.shape_cast %819 : vector<16xf32> to vector<16x1xf32>
    %cst_560 = arith.constant 6.400000e+01 : f32
    %821 = vector.broadcast %cst_560 : f32 to vector<16x1xf32>
    %822 = arith.divf %820, %821 : vector<16x1xf32>
    %823 = vector.broadcast %815 : vector<16x1xf32> to vector<16x64xf32>
    %824 = arith.subf %807, %823 : vector<16x64xf32>
    %cst_561 = arith.constant 9.99999996E-13 : f32
    %825 = vector.broadcast %cst_561 : f32 to vector<16x1xf32>
    %826 = arith.addf %822, %825 : vector<16x1xf32>
    %827 = math.rsqrt %826 : vector<16x1xf32>
    %828 = vector.broadcast %827 : vector<16x1xf32> to vector<16x64xf32>
    %829 = arith.mulf %824, %828 : vector<16x64xf32>
    %830 = vector.broadcast %809 : vector<1x64xf32> to vector<16x64xf32>
    %831 = arith.mulf %829, %830 : vector<16x64xf32>
    %832 = vector.broadcast %811 : vector<1x64xf32> to vector<16x64xf32>
    %833 = arith.addf %831, %832 : vector<16x64xf32>
    %c0_562 = arith.constant 0 : index
    %c0_563 = arith.constant 0 : index
    %834 = vector.load %arg28[%c0_562, %c0_563] : memref<1x64xf32, #tpu.memory_space<vmem>>, vector<1x64xf32>
    %c0_564 = arith.constant 0 : index
    %c0_565 = arith.constant 0 : index
    %835 = vector.load %arg2[%c0_564, %c0_565] : memref<16x16xf32, #tpu.memory_space<vmem>>, vector<16x16xf32>
    %c0_566 = arith.constant 0 : index
    %c0_567 = arith.constant 0 : index
    %c0_568 = arith.constant 0 : index
    %836 = vector.load %arg21[%c0_566, %c0_567, %c0_568] : memref<8x8x64xf32, #tpu.memory_space<vmem>>, vector<1x8x64xf32>
    %837 = vector.shape_cast %836 : vector<1x8x64xf32> to vector<8x64xf32>
    %c0_569 = arith.constant 0 : index
    %c0_570 = arith.constant 0 : index
    %c0_571 = arith.constant 0 : index
    %838 = vector.load %arg22[%c0_569, %c0_570, %c0_571] : memref<8x1x8xf32, #tpu.memory_space<vmem>>, vector<1x1x8xf32>
    %839 = vector.shape_cast %838 : vector<1x1x8xf32> to vector<1x8xf32>
    %cst_572 = arith.constant dense<0.000000e+00> : vector<16x8xf32>
    %840 = tpu.matmul %833, %837, %cst_572 {dimension_numbers = #tpu.dot_dimension_numbers<[1], [1], [0], [0], [0, 0, 1, 0], [], []>} : vector<16x64xf32>, vector<8x64xf32>, vector<16x8xf32> -> vector<16x8xf32>
    %841 = vector.broadcast %839 : vector<1x8xf32> to vector<16x8xf32>
    %842 = arith.addf %840, %841 : vector<16x8xf32>
    %c0_573 = arith.constant 0 : index
    %c0_574 = arith.constant 0 : index
    %c0_575 = arith.constant 0 : index
    %843 = vector.load %arg23[%c0_573, %c0_574, %c0_575] : memref<8x8x64xf32, #tpu.memory_space<vmem>>, vector<1x8x64xf32>
    %844 = vector.shape_cast %843 : vector<1x8x64xf32> to vector<8x64xf32>
    %c0_576 = arith.constant 0 : index
    %c0_577 = arith.constant 0 : index
    %c0_578 = arith.constant 0 : index
    %845 = vector.load %arg24[%c0_576, %c0_577, %c0_578] : memref<8x1x8xf32, #tpu.memory_space<vmem>>, vector<1x1x8xf32>
    %846 = vector.shape_cast %845 : vector<1x1x8xf32> to vector<1x8xf32>
    %cst_579 = arith.constant dense<0.000000e+00> : vector<16x8xf32>
    %847 = tpu.matmul %833, %844, %cst_579 {dimension_numbers = #tpu.dot_dimension_numbers<[1], [1], [0], [0], [0, 0, 1, 0], [], []>} : vector<16x64xf32>, vector<8x64xf32>, vector<16x8xf32> -> vector<16x8xf32>
    %848 = vector.broadcast %846 : vector<1x8xf32> to vector<16x8xf32>
    %849 = arith.addf %847, %848 : vector<16x8xf32>
    %c0_580 = arith.constant 0 : index
    %c0_581 = arith.constant 0 : index
    %c0_582 = arith.constant 0 : index
    %850 = vector.load %arg25[%c0_580, %c0_581, %c0_582] : memref<8x8x64xf32, #tpu.memory_space<vmem>>, vector<1x8x64xf32>
    %851 = vector.shape_cast %850 : vector<1x8x64xf32> to vector<8x64xf32>
    %c0_583 = arith.constant 0 : index
    %c0_584 = arith.constant 0 : index
    %c0_585 = arith.constant 0 : index
    %852 = vector.load %arg26[%c0_583, %c0_584, %c0_585] : memref<8x1x8xf32, #tpu.memory_space<vmem>>, vector<1x1x8xf32>
    %853 = vector.shape_cast %852 : vector<1x1x8xf32> to vector<1x8xf32>
    %cst_586 = arith.constant dense<0.000000e+00> : vector<16x8xf32>
    %854 = tpu.matmul %833, %851, %cst_586 {dimension_numbers = #tpu.dot_dimension_numbers<[1], [1], [0], [0], [0, 0, 1, 0], [], []>} : vector<16x64xf32>, vector<8x64xf32>, vector<16x8xf32> -> vector<16x8xf32>
    %855 = vector.broadcast %853 : vector<1x8xf32> to vector<16x8xf32>
    %856 = arith.addf %854, %855 : vector<16x8xf32>
    %cst_587 = arith.constant dense<0.000000e+00> : vector<16x16xf32>
    %857 = tpu.matmul %842, %849, %cst_587 {dimension_numbers = #tpu.dot_dimension_numbers<[1], [1], [0], [0], [0, 0, 1, 0], [], []>} : vector<16x8xf32>, vector<16x8xf32>, vector<16x16xf32> -> vector<16x16xf32>
    %cst_588 = arith.constant 0.353553385 : f32
    %858 = vector.broadcast %cst_588 : f32 to vector<16x16xf32>
    %859 = arith.mulf %857, %858 : vector<16x16xf32>
    %860 = arith.addf %859, %835 : vector<16x16xf32>
    %cst_589 = arith.constant dense<0xFF800000> : vector<16xf32>
    %861 = vector.multi_reduction <maximumf>, %860, %cst_589 [1] : vector<16x16xf32> to vector<16xf32>
    %862 = vector.shape_cast %861 : vector<16xf32> to vector<16x1xf32>
    %863 = vector.broadcast %862 : vector<16x1xf32> to vector<16x16xf32>
    %864 = arith.subf %860, %863 : vector<16x16xf32>
    %865 = math.exp %864 : vector<16x16xf32>
    %cst_590 = arith.constant dense<0.000000e+00> : vector<16xf32>
    %866 = vector.multi_reduction <add>, %865, %cst_590 [1] : vector<16x16xf32> to vector<16xf32>
    %867 = vector.shape_cast %866 : vector<16xf32> to vector<16x1xf32>
    %868 = tpu.reciprocal %867 {approx = true} : vector<16x1xf32> -> vector<16x1xf32>
    %869 = vector.broadcast %868 : vector<16x1xf32> to vector<16x16xf32>
    %870 = arith.mulf %865, %869 : vector<16x16xf32>
    %cst_591 = arith.constant dense<0.000000e+00> : vector<16x8xf32>
    %871 = tpu.matmul %870, %856, %cst_591 {dimension_numbers = #tpu.dot_dimension_numbers<[1], [0], [0], [1], [0, 0, 1, 1], [], []>} : vector<16x16xf32>, vector<16x8xf32>, vector<16x8xf32> -> vector<16x8xf32>
    %c0_592 = arith.constant 0 : index
    %c0_593 = arith.constant 0 : index
    %c0_594 = arith.constant 0 : index
    %872 = vector.load %arg27[%c0_592, %c0_593, %c0_594] : memref<8x64x8xf32, #tpu.memory_space<vmem>>, vector<1x64x8xf32>
    %873 = vector.shape_cast %872 : vector<1x64x8xf32> to vector<64x8xf32>
    %cst_595 = arith.constant dense<0.000000e+00> : vector<16x64xf32>
    %874 = tpu.matmul %871, %873, %cst_595 {dimension_numbers = #tpu.dot_dimension_numbers<[1], [1], [0], [0], [0, 0, 1, 0], [], []>} : vector<16x8xf32>, vector<64x8xf32>, vector<16x64xf32> -> vector<16x64xf32>
    %c1_596 = arith.constant 1 : index
    %c0_597 = arith.constant 0 : index
    %c0_598 = arith.constant 0 : index
    %875 = vector.load %arg21[%c1_596, %c0_597, %c0_598] : memref<8x8x64xf32, #tpu.memory_space<vmem>>, vector<1x8x64xf32>
    %876 = vector.shape_cast %875 : vector<1x8x64xf32> to vector<8x64xf32>
    %c1_599 = arith.constant 1 : index
    %c0_600 = arith.constant 0 : index
    %c0_601 = arith.constant 0 : index
    %877 = vector.load %arg22[%c1_599, %c0_600, %c0_601] : memref<8x1x8xf32, #tpu.memory_space<vmem>>, vector<1x1x8xf32>
    %878 = vector.shape_cast %877 : vector<1x1x8xf32> to vector<1x8xf32>
    %cst_602 = arith.constant dense<0.000000e+00> : vector<16x8xf32>
    %879 = tpu.matmul %833, %876, %cst_602 {dimension_numbers = #tpu.dot_dimension_numbers<[1], [1], [0], [0], [0, 0, 1, 0], [], []>} : vector<16x64xf32>, vector<8x64xf32>, vector<16x8xf32> -> vector<16x8xf32>
    %880 = vector.broadcast %878 : vector<1x8xf32> to vector<16x8xf32>
    %881 = arith.addf %879, %880 : vector<16x8xf32>
    %c1_603 = arith.constant 1 : index
    %c0_604 = arith.constant 0 : index
    %c0_605 = arith.constant 0 : index
    %882 = vector.load %arg23[%c1_603, %c0_604, %c0_605] : memref<8x8x64xf32, #tpu.memory_space<vmem>>, vector<1x8x64xf32>
    %883 = vector.shape_cast %882 : vector<1x8x64xf32> to vector<8x64xf32>
    %c1_606 = arith.constant 1 : index
    %c0_607 = arith.constant 0 : index
    %c0_608 = arith.constant 0 : index
    %884 = vector.load %arg24[%c1_606, %c0_607, %c0_608] : memref<8x1x8xf32, #tpu.memory_space<vmem>>, vector<1x1x8xf32>
    %885 = vector.shape_cast %884 : vector<1x1x8xf32> to vector<1x8xf32>
    %cst_609 = arith.constant dense<0.000000e+00> : vector<16x8xf32>
    %886 = tpu.matmul %833, %883, %cst_609 {dimension_numbers = #tpu.dot_dimension_numbers<[1], [1], [0], [0], [0, 0, 1, 0], [], []>} : vector<16x64xf32>, vector<8x64xf32>, vector<16x8xf32> -> vector<16x8xf32>
    %887 = vector.broadcast %885 : vector<1x8xf32> to vector<16x8xf32>
    %888 = arith.addf %886, %887 : vector<16x8xf32>
    %c1_610 = arith.constant 1 : index
    %c0_611 = arith.constant 0 : index
    %c0_612 = arith.constant 0 : index
    %889 = vector.load %arg25[%c1_610, %c0_611, %c0_612] : memref<8x8x64xf32, #tpu.memory_space<vmem>>, vector<1x8x64xf32>
    %890 = vector.shape_cast %889 : vector<1x8x64xf32> to vector<8x64xf32>
    %c1_613 = arith.constant 1 : index
    %c0_614 = arith.constant 0 : index
    %c0_615 = arith.constant 0 : index
    %891 = vector.load %arg26[%c1_613, %c0_614, %c0_615] : memref<8x1x8xf32, #tpu.memory_space<vmem>>, vector<1x1x8xf32>
    %892 = vector.shape_cast %891 : vector<1x1x8xf32> to vector<1x8xf32>
    %cst_616 = arith.constant dense<0.000000e+00> : vector<16x8xf32>
    %893 = tpu.matmul %833, %890, %cst_616 {dimension_numbers = #tpu.dot_dimension_numbers<[1], [1], [0], [0], [0, 0, 1, 0], [], []>} : vector<16x64xf32>, vector<8x64xf32>, vector<16x8xf32> -> vector<16x8xf32>
    %894 = vector.broadcast %892 : vector<1x8xf32> to vector<16x8xf32>
    %895 = arith.addf %893, %894 : vector<16x8xf32>
    %cst_617 = arith.constant dense<0.000000e+00> : vector<16x16xf32>
    %896 = tpu.matmul %881, %888, %cst_617 {dimension_numbers = #tpu.dot_dimension_numbers<[1], [1], [0], [0], [0, 0, 1, 0], [], []>} : vector<16x8xf32>, vector<16x8xf32>, vector<16x16xf32> -> vector<16x16xf32>
    %cst_618 = arith.constant 0.353553385 : f32
    %897 = vector.broadcast %cst_618 : f32 to vector<16x16xf32>
    %898 = arith.mulf %896, %897 : vector<16x16xf32>
    %899 = arith.addf %898, %835 : vector<16x16xf32>
    %cst_619 = arith.constant dense<0xFF800000> : vector<16xf32>
    %900 = vector.multi_reduction <maximumf>, %899, %cst_619 [1] : vector<16x16xf32> to vector<16xf32>
    %901 = vector.shape_cast %900 : vector<16xf32> to vector<16x1xf32>
    %902 = vector.broadcast %901 : vector<16x1xf32> to vector<16x16xf32>
    %903 = arith.subf %899, %902 : vector<16x16xf32>
    %904 = math.exp %903 : vector<16x16xf32>
    %cst_620 = arith.constant dense<0.000000e+00> : vector<16xf32>
    %905 = vector.multi_reduction <add>, %904, %cst_620 [1] : vector<16x16xf32> to vector<16xf32>
    %906 = vector.shape_cast %905 : vector<16xf32> to vector<16x1xf32>
    %907 = tpu.reciprocal %906 {approx = true} : vector<16x1xf32> -> vector<16x1xf32>
    %908 = vector.broadcast %907 : vector<16x1xf32> to vector<16x16xf32>
    %909 = arith.mulf %904, %908 : vector<16x16xf32>
    %cst_621 = arith.constant dense<0.000000e+00> : vector<16x8xf32>
    %910 = tpu.matmul %909, %895, %cst_621 {dimension_numbers = #tpu.dot_dimension_numbers<[1], [0], [0], [1], [0, 0, 1, 1], [], []>} : vector<16x16xf32>, vector<16x8xf32>, vector<16x8xf32> -> vector<16x8xf32>
    %c1_622 = arith.constant 1 : index
    %c0_623 = arith.constant 0 : index
    %c0_624 = arith.constant 0 : index
    %911 = vector.load %arg27[%c1_622, %c0_623, %c0_624] : memref<8x64x8xf32, #tpu.memory_space<vmem>>, vector<1x64x8xf32>
    %912 = vector.shape_cast %911 : vector<1x64x8xf32> to vector<64x8xf32>
    %cst_625 = arith.constant dense<0.000000e+00> : vector<16x64xf32>
    %913 = tpu.matmul %910, %912, %cst_625 {dimension_numbers = #tpu.dot_dimension_numbers<[1], [1], [0], [0], [0, 0, 1, 0], [], []>} : vector<16x8xf32>, vector<64x8xf32>, vector<16x64xf32> -> vector<16x64xf32>
    %914 = arith.addf %874, %913 : vector<16x64xf32>
    %c2_626 = arith.constant 2 : index
    %c0_627 = arith.constant 0 : index
    %c0_628 = arith.constant 0 : index
    %915 = vector.load %arg21[%c2_626, %c0_627, %c0_628] : memref<8x8x64xf32, #tpu.memory_space<vmem>>, vector<1x8x64xf32>
    %916 = vector.shape_cast %915 : vector<1x8x64xf32> to vector<8x64xf32>
    %c2_629 = arith.constant 2 : index
    %c0_630 = arith.constant 0 : index
    %c0_631 = arith.constant 0 : index
    %917 = vector.load %arg22[%c2_629, %c0_630, %c0_631] : memref<8x1x8xf32, #tpu.memory_space<vmem>>, vector<1x1x8xf32>
    %918 = vector.shape_cast %917 : vector<1x1x8xf32> to vector<1x8xf32>
    %cst_632 = arith.constant dense<0.000000e+00> : vector<16x8xf32>
    %919 = tpu.matmul %833, %916, %cst_632 {dimension_numbers = #tpu.dot_dimension_numbers<[1], [1], [0], [0], [0, 0, 1, 0], [], []>} : vector<16x64xf32>, vector<8x64xf32>, vector<16x8xf32> -> vector<16x8xf32>
    %920 = vector.broadcast %918 : vector<1x8xf32> to vector<16x8xf32>
    %921 = arith.addf %919, %920 : vector<16x8xf32>
    %c2_633 = arith.constant 2 : index
    %c0_634 = arith.constant 0 : index
    %c0_635 = arith.constant 0 : index
    %922 = vector.load %arg23[%c2_633, %c0_634, %c0_635] : memref<8x8x64xf32, #tpu.memory_space<vmem>>, vector<1x8x64xf32>
    %923 = vector.shape_cast %922 : vector<1x8x64xf32> to vector<8x64xf32>
    %c2_636 = arith.constant 2 : index
    %c0_637 = arith.constant 0 : index
    %c0_638 = arith.constant 0 : index
    %924 = vector.load %arg24[%c2_636, %c0_637, %c0_638] : memref<8x1x8xf32, #tpu.memory_space<vmem>>, vector<1x1x8xf32>
    %925 = vector.shape_cast %924 : vector<1x1x8xf32> to vector<1x8xf32>
    %cst_639 = arith.constant dense<0.000000e+00> : vector<16x8xf32>
    %926 = tpu.matmul %833, %923, %cst_639 {dimension_numbers = #tpu.dot_dimension_numbers<[1], [1], [0], [0], [0, 0, 1, 0], [], []>} : vector<16x64xf32>, vector<8x64xf32>, vector<16x8xf32> -> vector<16x8xf32>
    %927 = vector.broadcast %925 : vector<1x8xf32> to vector<16x8xf32>
    %928 = arith.addf %926, %927 : vector<16x8xf32>
    %c2_640 = arith.constant 2 : index
    %c0_641 = arith.constant 0 : index
    %c0_642 = arith.constant 0 : index
    %929 = vector.load %arg25[%c2_640, %c0_641, %c0_642] : memref<8x8x64xf32, #tpu.memory_space<vmem>>, vector<1x8x64xf32>
    %930 = vector.shape_cast %929 : vector<1x8x64xf32> to vector<8x64xf32>
    %c2_643 = arith.constant 2 : index
    %c0_644 = arith.constant 0 : index
    %c0_645 = arith.constant 0 : index
    %931 = vector.load %arg26[%c2_643, %c0_644, %c0_645] : memref<8x1x8xf32, #tpu.memory_space<vmem>>, vector<1x1x8xf32>
    %932 = vector.shape_cast %931 : vector<1x1x8xf32> to vector<1x8xf32>
    %cst_646 = arith.constant dense<0.000000e+00> : vector<16x8xf32>
    %933 = tpu.matmul %833, %930, %cst_646 {dimension_numbers = #tpu.dot_dimension_numbers<[1], [1], [0], [0], [0, 0, 1, 0], [], []>} : vector<16x64xf32>, vector<8x64xf32>, vector<16x8xf32> -> vector<16x8xf32>
    %934 = vector.broadcast %932 : vector<1x8xf32> to vector<16x8xf32>
    %935 = arith.addf %933, %934 : vector<16x8xf32>
    %cst_647 = arith.constant dense<0.000000e+00> : vector<16x16xf32>
    %936 = tpu.matmul %921, %928, %cst_647 {dimension_numbers = #tpu.dot_dimension_numbers<[1], [1], [0], [0], [0, 0, 1, 0], [], []>} : vector<16x8xf32>, vector<16x8xf32>, vector<16x16xf32> -> vector<16x16xf32>
    %cst_648 = arith.constant 0.353553385 : f32
    %937 = vector.broadcast %cst_648 : f32 to vector<16x16xf32>
    %938 = arith.mulf %936, %937 : vector<16x16xf32>
    %939 = arith.addf %938, %835 : vector<16x16xf32>
    %cst_649 = arith.constant dense<0xFF800000> : vector<16xf32>
    %940 = vector.multi_reduction <maximumf>, %939, %cst_649 [1] : vector<16x16xf32> to vector<16xf32>
    %941 = vector.shape_cast %940 : vector<16xf32> to vector<16x1xf32>
    %942 = vector.broadcast %941 : vector<16x1xf32> to vector<16x16xf32>
    %943 = arith.subf %939, %942 : vector<16x16xf32>
    %944 = math.exp %943 : vector<16x16xf32>
    %cst_650 = arith.constant dense<0.000000e+00> : vector<16xf32>
    %945 = vector.multi_reduction <add>, %944, %cst_650 [1] : vector<16x16xf32> to vector<16xf32>
    %946 = vector.shape_cast %945 : vector<16xf32> to vector<16x1xf32>
    %947 = tpu.reciprocal %946 {approx = true} : vector<16x1xf32> -> vector<16x1xf32>
    %948 = vector.broadcast %947 : vector<16x1xf32> to vector<16x16xf32>
    %949 = arith.mulf %944, %948 : vector<16x16xf32>
    %cst_651 = arith.constant dense<0.000000e+00> : vector<16x8xf32>
    %950 = tpu.matmul %949, %935, %cst_651 {dimension_numbers = #tpu.dot_dimension_numbers<[1], [0], [0], [1], [0, 0, 1, 1], [], []>} : vector<16x16xf32>, vector<16x8xf32>, vector<16x8xf32> -> vector<16x8xf32>
    %c2_652 = arith.constant 2 : index
    %c0_653 = arith.constant 0 : index
    %c0_654 = arith.constant 0 : index
    %951 = vector.load %arg27[%c2_652, %c0_653, %c0_654] : memref<8x64x8xf32, #tpu.memory_space<vmem>>, vector<1x64x8xf32>
    %952 = vector.shape_cast %951 : vector<1x64x8xf32> to vector<64x8xf32>
    %cst_655 = arith.constant dense<0.000000e+00> : vector<16x64xf32>
    %953 = tpu.matmul %950, %952, %cst_655 {dimension_numbers = #tpu.dot_dimension_numbers<[1], [1], [0], [0], [0, 0, 1, 0], [], []>} : vector<16x8xf32>, vector<64x8xf32>, vector<16x64xf32> -> vector<16x64xf32>
    %954 = arith.addf %914, %953 : vector<16x64xf32>
    %c3_656 = arith.constant 3 : index
    %c0_657 = arith.constant 0 : index
    %c0_658 = arith.constant 0 : index
    %955 = vector.load %arg21[%c3_656, %c0_657, %c0_658] : memref<8x8x64xf32, #tpu.memory_space<vmem>>, vector<1x8x64xf32>
    %956 = vector.shape_cast %955 : vector<1x8x64xf32> to vector<8x64xf32>
    %c3_659 = arith.constant 3 : index
    %c0_660 = arith.constant 0 : index
    %c0_661 = arith.constant 0 : index
    %957 = vector.load %arg22[%c3_659, %c0_660, %c0_661] : memref<8x1x8xf32, #tpu.memory_space<vmem>>, vector<1x1x8xf32>
    %958 = vector.shape_cast %957 : vector<1x1x8xf32> to vector<1x8xf32>
    %cst_662 = arith.constant dense<0.000000e+00> : vector<16x8xf32>
    %959 = tpu.matmul %833, %956, %cst_662 {dimension_numbers = #tpu.dot_dimension_numbers<[1], [1], [0], [0], [0, 0, 1, 0], [], []>} : vector<16x64xf32>, vector<8x64xf32>, vector<16x8xf32> -> vector<16x8xf32>
    %960 = vector.broadcast %958 : vector<1x8xf32> to vector<16x8xf32>
    %961 = arith.addf %959, %960 : vector<16x8xf32>
    %c3_663 = arith.constant 3 : index
    %c0_664 = arith.constant 0 : index
    %c0_665 = arith.constant 0 : index
    %962 = vector.load %arg23[%c3_663, %c0_664, %c0_665] : memref<8x8x64xf32, #tpu.memory_space<vmem>>, vector<1x8x64xf32>
    %963 = vector.shape_cast %962 : vector<1x8x64xf32> to vector<8x64xf32>
    %c3_666 = arith.constant 3 : index
    %c0_667 = arith.constant 0 : index
    %c0_668 = arith.constant 0 : index
    %964 = vector.load %arg24[%c3_666, %c0_667, %c0_668] : memref<8x1x8xf32, #tpu.memory_space<vmem>>, vector<1x1x8xf32>
    %965 = vector.shape_cast %964 : vector<1x1x8xf32> to vector<1x8xf32>
    %cst_669 = arith.constant dense<0.000000e+00> : vector<16x8xf32>
    %966 = tpu.matmul %833, %963, %cst_669 {dimension_numbers = #tpu.dot_dimension_numbers<[1], [1], [0], [0], [0, 0, 1, 0], [], []>} : vector<16x64xf32>, vector<8x64xf32>, vector<16x8xf32> -> vector<16x8xf32>
    %967 = vector.broadcast %965 : vector<1x8xf32> to vector<16x8xf32>
    %968 = arith.addf %966, %967 : vector<16x8xf32>
    %c3_670 = arith.constant 3 : index
    %c0_671 = arith.constant 0 : index
    %c0_672 = arith.constant 0 : index
    %969 = vector.load %arg25[%c3_670, %c0_671, %c0_672] : memref<8x8x64xf32, #tpu.memory_space<vmem>>, vector<1x8x64xf32>
    %970 = vector.shape_cast %969 : vector<1x8x64xf32> to vector<8x64xf32>
    %c3_673 = arith.constant 3 : index
    %c0_674 = arith.constant 0 : index
    %c0_675 = arith.constant 0 : index
    %971 = vector.load %arg26[%c3_673, %c0_674, %c0_675] : memref<8x1x8xf32, #tpu.memory_space<vmem>>, vector<1x1x8xf32>
    %972 = vector.shape_cast %971 : vector<1x1x8xf32> to vector<1x8xf32>
    %cst_676 = arith.constant dense<0.000000e+00> : vector<16x8xf32>
    %973 = tpu.matmul %833, %970, %cst_676 {dimension_numbers = #tpu.dot_dimension_numbers<[1], [1], [0], [0], [0, 0, 1, 0], [], []>} : vector<16x64xf32>, vector<8x64xf32>, vector<16x8xf32> -> vector<16x8xf32>
    %974 = vector.broadcast %972 : vector<1x8xf32> to vector<16x8xf32>
    %975 = arith.addf %973, %974 : vector<16x8xf32>
    %cst_677 = arith.constant dense<0.000000e+00> : vector<16x16xf32>
    %976 = tpu.matmul %961, %968, %cst_677 {dimension_numbers = #tpu.dot_dimension_numbers<[1], [1], [0], [0], [0, 0, 1, 0], [], []>} : vector<16x8xf32>, vector<16x8xf32>, vector<16x16xf32> -> vector<16x16xf32>
    %cst_678 = arith.constant 0.353553385 : f32
    %977 = vector.broadcast %cst_678 : f32 to vector<16x16xf32>
    %978 = arith.mulf %976, %977 : vector<16x16xf32>
    %979 = arith.addf %978, %835 : vector<16x16xf32>
    %cst_679 = arith.constant dense<0xFF800000> : vector<16xf32>
    %980 = vector.multi_reduction <maximumf>, %979, %cst_679 [1] : vector<16x16xf32> to vector<16xf32>
    %981 = vector.shape_cast %980 : vector<16xf32> to vector<16x1xf32>
    %982 = vector.broadcast %981 : vector<16x1xf32> to vector<16x16xf32>
    %983 = arith.subf %979, %982 : vector<16x16xf32>
    %984 = math.exp %983 : vector<16x16xf32>
    %cst_680 = arith.constant dense<0.000000e+00> : vector<16xf32>
    %985 = vector.multi_reduction <add>, %984, %cst_680 [1] : vector<16x16xf32> to vector<16xf32>
    %986 = vector.shape_cast %985 : vector<16xf32> to vector<16x1xf32>
    %987 = tpu.reciprocal %986 {approx = true} : vector<16x1xf32> -> vector<16x1xf32>
    %988 = vector.broadcast %987 : vector<16x1xf32> to vector<16x16xf32>
    %989 = arith.mulf %984, %988 : vector<16x16xf32>
    %cst_681 = arith.constant dense<0.000000e+00> : vector<16x8xf32>
    %990 = tpu.matmul %989, %975, %cst_681 {dimension_numbers = #tpu.dot_dimension_numbers<[1], [0], [0], [1], [0, 0, 1, 1], [], []>} : vector<16x16xf32>, vector<16x8xf32>, vector<16x8xf32> -> vector<16x8xf32>
    %c3_682 = arith.constant 3 : index
    %c0_683 = arith.constant 0 : index
    %c0_684 = arith.constant 0 : index
    %991 = vector.load %arg27[%c3_682, %c0_683, %c0_684] : memref<8x64x8xf32, #tpu.memory_space<vmem>>, vector<1x64x8xf32>
    %992 = vector.shape_cast %991 : vector<1x64x8xf32> to vector<64x8xf32>
    %cst_685 = arith.constant dense<0.000000e+00> : vector<16x64xf32>
    %993 = tpu.matmul %990, %992, %cst_685 {dimension_numbers = #tpu.dot_dimension_numbers<[1], [1], [0], [0], [0, 0, 1, 0], [], []>} : vector<16x8xf32>, vector<64x8xf32>, vector<16x64xf32> -> vector<16x64xf32>
    %994 = arith.addf %954, %993 : vector<16x64xf32>
    %c4_686 = arith.constant 4 : index
    %c0_687 = arith.constant 0 : index
    %c0_688 = arith.constant 0 : index
    %995 = vector.load %arg21[%c4_686, %c0_687, %c0_688] : memref<8x8x64xf32, #tpu.memory_space<vmem>>, vector<1x8x64xf32>
    %996 = vector.shape_cast %995 : vector<1x8x64xf32> to vector<8x64xf32>
    %c4_689 = arith.constant 4 : index
    %c0_690 = arith.constant 0 : index
    %c0_691 = arith.constant 0 : index
    %997 = vector.load %arg22[%c4_689, %c0_690, %c0_691] : memref<8x1x8xf32, #tpu.memory_space<vmem>>, vector<1x1x8xf32>
    %998 = vector.shape_cast %997 : vector<1x1x8xf32> to vector<1x8xf32>
    %cst_692 = arith.constant dense<0.000000e+00> : vector<16x8xf32>
    %999 = tpu.matmul %833, %996, %cst_692 {dimension_numbers = #tpu.dot_dimension_numbers<[1], [1], [0], [0], [0, 0, 1, 0], [], []>} : vector<16x64xf32>, vector<8x64xf32>, vector<16x8xf32> -> vector<16x8xf32>
    %1000 = vector.broadcast %998 : vector<1x8xf32> to vector<16x8xf32>
    %1001 = arith.addf %999, %1000 : vector<16x8xf32>
    %c4_693 = arith.constant 4 : index
    %c0_694 = arith.constant 0 : index
    %c0_695 = arith.constant 0 : index
    %1002 = vector.load %arg23[%c4_693, %c0_694, %c0_695] : memref<8x8x64xf32, #tpu.memory_space<vmem>>, vector<1x8x64xf32>
    %1003 = vector.shape_cast %1002 : vector<1x8x64xf32> to vector<8x64xf32>
    %c4_696 = arith.constant 4 : index
    %c0_697 = arith.constant 0 : index
    %c0_698 = arith.constant 0 : index
    %1004 = vector.load %arg24[%c4_696, %c0_697, %c0_698] : memref<8x1x8xf32, #tpu.memory_space<vmem>>, vector<1x1x8xf32>
    %1005 = vector.shape_cast %1004 : vector<1x1x8xf32> to vector<1x8xf32>
    %cst_699 = arith.constant dense<0.000000e+00> : vector<16x8xf32>
    %1006 = tpu.matmul %833, %1003, %cst_699 {dimension_numbers = #tpu.dot_dimension_numbers<[1], [1], [0], [0], [0, 0, 1, 0], [], []>} : vector<16x64xf32>, vector<8x64xf32>, vector<16x8xf32> -> vector<16x8xf32>
    %1007 = vector.broadcast %1005 : vector<1x8xf32> to vector<16x8xf32>
    %1008 = arith.addf %1006, %1007 : vector<16x8xf32>
    %c4_700 = arith.constant 4 : index
    %c0_701 = arith.constant 0 : index
    %c0_702 = arith.constant 0 : index
    %1009 = vector.load %arg25[%c4_700, %c0_701, %c0_702] : memref<8x8x64xf32, #tpu.memory_space<vmem>>, vector<1x8x64xf32>
    %1010 = vector.shape_cast %1009 : vector<1x8x64xf32> to vector<8x64xf32>
    %c4_703 = arith.constant 4 : index
    %c0_704 = arith.constant 0 : index
    %c0_705 = arith.constant 0 : index
    %1011 = vector.load %arg26[%c4_703, %c0_704, %c0_705] : memref<8x1x8xf32, #tpu.memory_space<vmem>>, vector<1x1x8xf32>
    %1012 = vector.shape_cast %1011 : vector<1x1x8xf32> to vector<1x8xf32>
    %cst_706 = arith.constant dense<0.000000e+00> : vector<16x8xf32>
    %1013 = tpu.matmul %833, %1010, %cst_706 {dimension_numbers = #tpu.dot_dimension_numbers<[1], [1], [0], [0], [0, 0, 1, 0], [], []>} : vector<16x64xf32>, vector<8x64xf32>, vector<16x8xf32> -> vector<16x8xf32>
    %1014 = vector.broadcast %1012 : vector<1x8xf32> to vector<16x8xf32>
    %1015 = arith.addf %1013, %1014 : vector<16x8xf32>
    %cst_707 = arith.constant dense<0.000000e+00> : vector<16x16xf32>
    %1016 = tpu.matmul %1001, %1008, %cst_707 {dimension_numbers = #tpu.dot_dimension_numbers<[1], [1], [0], [0], [0, 0, 1, 0], [], []>} : vector<16x8xf32>, vector<16x8xf32>, vector<16x16xf32> -> vector<16x16xf32>
    %cst_708 = arith.constant 0.353553385 : f32
    %1017 = vector.broadcast %cst_708 : f32 to vector<16x16xf32>
    %1018 = arith.mulf %1016, %1017 : vector<16x16xf32>
    %1019 = arith.addf %1018, %835 : vector<16x16xf32>
    %cst_709 = arith.constant dense<0xFF800000> : vector<16xf32>
    %1020 = vector.multi_reduction <maximumf>, %1019, %cst_709 [1] : vector<16x16xf32> to vector<16xf32>
    %1021 = vector.shape_cast %1020 : vector<16xf32> to vector<16x1xf32>
    %1022 = vector.broadcast %1021 : vector<16x1xf32> to vector<16x16xf32>
    %1023 = arith.subf %1019, %1022 : vector<16x16xf32>
    %1024 = math.exp %1023 : vector<16x16xf32>
    %cst_710 = arith.constant dense<0.000000e+00> : vector<16xf32>
    %1025 = vector.multi_reduction <add>, %1024, %cst_710 [1] : vector<16x16xf32> to vector<16xf32>
    %1026 = vector.shape_cast %1025 : vector<16xf32> to vector<16x1xf32>
    %1027 = tpu.reciprocal %1026 {approx = true} : vector<16x1xf32> -> vector<16x1xf32>
    %1028 = vector.broadcast %1027 : vector<16x1xf32> to vector<16x16xf32>
    %1029 = arith.mulf %1024, %1028 : vector<16x16xf32>
    %cst_711 = arith.constant dense<0.000000e+00> : vector<16x8xf32>
    %1030 = tpu.matmul %1029, %1015, %cst_711 {dimension_numbers = #tpu.dot_dimension_numbers<[1], [0], [0], [1], [0, 0, 1, 1], [], []>} : vector<16x16xf32>, vector<16x8xf32>, vector<16x8xf32> -> vector<16x8xf32>
    %c4_712 = arith.constant 4 : index
    %c0_713 = arith.constant 0 : index
    %c0_714 = arith.constant 0 : index
    %1031 = vector.load %arg27[%c4_712, %c0_713, %c0_714] : memref<8x64x8xf32, #tpu.memory_space<vmem>>, vector<1x64x8xf32>
    %1032 = vector.shape_cast %1031 : vector<1x64x8xf32> to vector<64x8xf32>
    %cst_715 = arith.constant dense<0.000000e+00> : vector<16x64xf32>
    %1033 = tpu.matmul %1030, %1032, %cst_715 {dimension_numbers = #tpu.dot_dimension_numbers<[1], [1], [0], [0], [0, 0, 1, 0], [], []>} : vector<16x8xf32>, vector<64x8xf32>, vector<16x64xf32> -> vector<16x64xf32>
    %1034 = arith.addf %994, %1033 : vector<16x64xf32>
    %c5_716 = arith.constant 5 : index
    %c0_717 = arith.constant 0 : index
    %c0_718 = arith.constant 0 : index
    %1035 = vector.load %arg21[%c5_716, %c0_717, %c0_718] : memref<8x8x64xf32, #tpu.memory_space<vmem>>, vector<1x8x64xf32>
    %1036 = vector.shape_cast %1035 : vector<1x8x64xf32> to vector<8x64xf32>
    %c5_719 = arith.constant 5 : index
    %c0_720 = arith.constant 0 : index
    %c0_721 = arith.constant 0 : index
    %1037 = vector.load %arg22[%c5_719, %c0_720, %c0_721] : memref<8x1x8xf32, #tpu.memory_space<vmem>>, vector<1x1x8xf32>
    %1038 = vector.shape_cast %1037 : vector<1x1x8xf32> to vector<1x8xf32>
    %cst_722 = arith.constant dense<0.000000e+00> : vector<16x8xf32>
    %1039 = tpu.matmul %833, %1036, %cst_722 {dimension_numbers = #tpu.dot_dimension_numbers<[1], [1], [0], [0], [0, 0, 1, 0], [], []>} : vector<16x64xf32>, vector<8x64xf32>, vector<16x8xf32> -> vector<16x8xf32>
    %1040 = vector.broadcast %1038 : vector<1x8xf32> to vector<16x8xf32>
    %1041 = arith.addf %1039, %1040 : vector<16x8xf32>
    %c5_723 = arith.constant 5 : index
    %c0_724 = arith.constant 0 : index
    %c0_725 = arith.constant 0 : index
    %1042 = vector.load %arg23[%c5_723, %c0_724, %c0_725] : memref<8x8x64xf32, #tpu.memory_space<vmem>>, vector<1x8x64xf32>
    %1043 = vector.shape_cast %1042 : vector<1x8x64xf32> to vector<8x64xf32>
    %c5_726 = arith.constant 5 : index
    %c0_727 = arith.constant 0 : index
    %c0_728 = arith.constant 0 : index
    %1044 = vector.load %arg24[%c5_726, %c0_727, %c0_728] : memref<8x1x8xf32, #tpu.memory_space<vmem>>, vector<1x1x8xf32>
    %1045 = vector.shape_cast %1044 : vector<1x1x8xf32> to vector<1x8xf32>
    %cst_729 = arith.constant dense<0.000000e+00> : vector<16x8xf32>
    %1046 = tpu.matmul %833, %1043, %cst_729 {dimension_numbers = #tpu.dot_dimension_numbers<[1], [1], [0], [0], [0, 0, 1, 0], [], []>} : vector<16x64xf32>, vector<8x64xf32>, vector<16x8xf32> -> vector<16x8xf32>
    %1047 = vector.broadcast %1045 : vector<1x8xf32> to vector<16x8xf32>
    %1048 = arith.addf %1046, %1047 : vector<16x8xf32>
    %c5_730 = arith.constant 5 : index
    %c0_731 = arith.constant 0 : index
    %c0_732 = arith.constant 0 : index
    %1049 = vector.load %arg25[%c5_730, %c0_731, %c0_732] : memref<8x8x64xf32, #tpu.memory_space<vmem>>, vector<1x8x64xf32>
    %1050 = vector.shape_cast %1049 : vector<1x8x64xf32> to vector<8x64xf32>
    %c5_733 = arith.constant 5 : index
    %c0_734 = arith.constant 0 : index
    %c0_735 = arith.constant 0 : index
    %1051 = vector.load %arg26[%c5_733, %c0_734, %c0_735] : memref<8x1x8xf32, #tpu.memory_space<vmem>>, vector<1x1x8xf32>
    %1052 = vector.shape_cast %1051 : vector<1x1x8xf32> to vector<1x8xf32>
    %cst_736 = arith.constant dense<0.000000e+00> : vector<16x8xf32>
    %1053 = tpu.matmul %833, %1050, %cst_736 {dimension_numbers = #tpu.dot_dimension_numbers<[1], [1], [0], [0], [0, 0, 1, 0], [], []>} : vector<16x64xf32>, vector<8x64xf32>, vector<16x8xf32> -> vector<16x8xf32>
    %1054 = vector.broadcast %1052 : vector<1x8xf32> to vector<16x8xf32>
    %1055 = arith.addf %1053, %1054 : vector<16x8xf32>
    %cst_737 = arith.constant dense<0.000000e+00> : vector<16x16xf32>
    %1056 = tpu.matmul %1041, %1048, %cst_737 {dimension_numbers = #tpu.dot_dimension_numbers<[1], [1], [0], [0], [0, 0, 1, 0], [], []>} : vector<16x8xf32>, vector<16x8xf32>, vector<16x16xf32> -> vector<16x16xf32>
    %cst_738 = arith.constant 0.353553385 : f32
    %1057 = vector.broadcast %cst_738 : f32 to vector<16x16xf32>
    %1058 = arith.mulf %1056, %1057 : vector<16x16xf32>
    %1059 = arith.addf %1058, %835 : vector<16x16xf32>
    %cst_739 = arith.constant dense<0xFF800000> : vector<16xf32>
    %1060 = vector.multi_reduction <maximumf>, %1059, %cst_739 [1] : vector<16x16xf32> to vector<16xf32>
    %1061 = vector.shape_cast %1060 : vector<16xf32> to vector<16x1xf32>
    %1062 = vector.broadcast %1061 : vector<16x1xf32> to vector<16x16xf32>
    %1063 = arith.subf %1059, %1062 : vector<16x16xf32>
    %1064 = math.exp %1063 : vector<16x16xf32>
    %cst_740 = arith.constant dense<0.000000e+00> : vector<16xf32>
    %1065 = vector.multi_reduction <add>, %1064, %cst_740 [1] : vector<16x16xf32> to vector<16xf32>
    %1066 = vector.shape_cast %1065 : vector<16xf32> to vector<16x1xf32>
    %1067 = tpu.reciprocal %1066 {approx = true} : vector<16x1xf32> -> vector<16x1xf32>
    %1068 = vector.broadcast %1067 : vector<16x1xf32> to vector<16x16xf32>
    %1069 = arith.mulf %1064, %1068 : vector<16x16xf32>
    %cst_741 = arith.constant dense<0.000000e+00> : vector<16x8xf32>
    %1070 = tpu.matmul %1069, %1055, %cst_741 {dimension_numbers = #tpu.dot_dimension_numbers<[1], [0], [0], [1], [0, 0, 1, 1], [], []>} : vector<16x16xf32>, vector<16x8xf32>, vector<16x8xf32> -> vector<16x8xf32>
    %c5_742 = arith.constant 5 : index
    %c0_743 = arith.constant 0 : index
    %c0_744 = arith.constant 0 : index
    %1071 = vector.load %arg27[%c5_742, %c0_743, %c0_744] : memref<8x64x8xf32, #tpu.memory_space<vmem>>, vector<1x64x8xf32>
    %1072 = vector.shape_cast %1071 : vector<1x64x8xf32> to vector<64x8xf32>
    %cst_745 = arith.constant dense<0.000000e+00> : vector<16x64xf32>
    %1073 = tpu.matmul %1070, %1072, %cst_745 {dimension_numbers = #tpu.dot_dimension_numbers<[1], [1], [0], [0], [0, 0, 1, 0], [], []>} : vector<16x8xf32>, vector<64x8xf32>, vector<16x64xf32> -> vector<16x64xf32>
    %1074 = arith.addf %1034, %1073 : vector<16x64xf32>
    %c6_746 = arith.constant 6 : index
    %c0_747 = arith.constant 0 : index
    %c0_748 = arith.constant 0 : index
    %1075 = vector.load %arg21[%c6_746, %c0_747, %c0_748] : memref<8x8x64xf32, #tpu.memory_space<vmem>>, vector<1x8x64xf32>
    %1076 = vector.shape_cast %1075 : vector<1x8x64xf32> to vector<8x64xf32>
    %c6_749 = arith.constant 6 : index
    %c0_750 = arith.constant 0 : index
    %c0_751 = arith.constant 0 : index
    %1077 = vector.load %arg22[%c6_749, %c0_750, %c0_751] : memref<8x1x8xf32, #tpu.memory_space<vmem>>, vector<1x1x8xf32>
    %1078 = vector.shape_cast %1077 : vector<1x1x8xf32> to vector<1x8xf32>
    %cst_752 = arith.constant dense<0.000000e+00> : vector<16x8xf32>
    %1079 = tpu.matmul %833, %1076, %cst_752 {dimension_numbers = #tpu.dot_dimension_numbers<[1], [1], [0], [0], [0, 0, 1, 0], [], []>} : vector<16x64xf32>, vector<8x64xf32>, vector<16x8xf32> -> vector<16x8xf32>
    %1080 = vector.broadcast %1078 : vector<1x8xf32> to vector<16x8xf32>
    %1081 = arith.addf %1079, %1080 : vector<16x8xf32>
    %c6_753 = arith.constant 6 : index
    %c0_754 = arith.constant 0 : index
    %c0_755 = arith.constant 0 : index
    %1082 = vector.load %arg23[%c6_753, %c0_754, %c0_755] : memref<8x8x64xf32, #tpu.memory_space<vmem>>, vector<1x8x64xf32>
    %1083 = vector.shape_cast %1082 : vector<1x8x64xf32> to vector<8x64xf32>
    %c6_756 = arith.constant 6 : index
    %c0_757 = arith.constant 0 : index
    %c0_758 = arith.constant 0 : index
    %1084 = vector.load %arg24[%c6_756, %c0_757, %c0_758] : memref<8x1x8xf32, #tpu.memory_space<vmem>>, vector<1x1x8xf32>
    %1085 = vector.shape_cast %1084 : vector<1x1x8xf32> to vector<1x8xf32>
    %cst_759 = arith.constant dense<0.000000e+00> : vector<16x8xf32>
    %1086 = tpu.matmul %833, %1083, %cst_759 {dimension_numbers = #tpu.dot_dimension_numbers<[1], [1], [0], [0], [0, 0, 1, 0], [], []>} : vector<16x64xf32>, vector<8x64xf32>, vector<16x8xf32> -> vector<16x8xf32>
    %1087 = vector.broadcast %1085 : vector<1x8xf32> to vector<16x8xf32>
    %1088 = arith.addf %1086, %1087 : vector<16x8xf32>
    %c6_760 = arith.constant 6 : index
    %c0_761 = arith.constant 0 : index
    %c0_762 = arith.constant 0 : index
    %1089 = vector.load %arg25[%c6_760, %c0_761, %c0_762] : memref<8x8x64xf32, #tpu.memory_space<vmem>>, vector<1x8x64xf32>
    %1090 = vector.shape_cast %1089 : vector<1x8x64xf32> to vector<8x64xf32>
    %c6_763 = arith.constant 6 : index
    %c0_764 = arith.constant 0 : index
    %c0_765 = arith.constant 0 : index
    %1091 = vector.load %arg26[%c6_763, %c0_764, %c0_765] : memref<8x1x8xf32, #tpu.memory_space<vmem>>, vector<1x1x8xf32>
    %1092 = vector.shape_cast %1091 : vector<1x1x8xf32> to vector<1x8xf32>
    %cst_766 = arith.constant dense<0.000000e+00> : vector<16x8xf32>
    %1093 = tpu.matmul %833, %1090, %cst_766 {dimension_numbers = #tpu.dot_dimension_numbers<[1], [1], [0], [0], [0, 0, 1, 0], [], []>} : vector<16x64xf32>, vector<8x64xf32>, vector<16x8xf32> -> vector<16x8xf32>
    %1094 = vector.broadcast %1092 : vector<1x8xf32> to vector<16x8xf32>
    %1095 = arith.addf %1093, %1094 : vector<16x8xf32>
    %cst_767 = arith.constant dense<0.000000e+00> : vector<16x16xf32>
    %1096 = tpu.matmul %1081, %1088, %cst_767 {dimension_numbers = #tpu.dot_dimension_numbers<[1], [1], [0], [0], [0, 0, 1, 0], [], []>} : vector<16x8xf32>, vector<16x8xf32>, vector<16x16xf32> -> vector<16x16xf32>
    %cst_768 = arith.constant 0.353553385 : f32
    %1097 = vector.broadcast %cst_768 : f32 to vector<16x16xf32>
    %1098 = arith.mulf %1096, %1097 : vector<16x16xf32>
    %1099 = arith.addf %1098, %835 : vector<16x16xf32>
    %cst_769 = arith.constant dense<0xFF800000> : vector<16xf32>
    %1100 = vector.multi_reduction <maximumf>, %1099, %cst_769 [1] : vector<16x16xf32> to vector<16xf32>
    %1101 = vector.shape_cast %1100 : vector<16xf32> to vector<16x1xf32>
    %1102 = vector.broadcast %1101 : vector<16x1xf32> to vector<16x16xf32>
    %1103 = arith.subf %1099, %1102 : vector<16x16xf32>
    %1104 = math.exp %1103 : vector<16x16xf32>
    %cst_770 = arith.constant dense<0.000000e+00> : vector<16xf32>
    %1105 = vector.multi_reduction <add>, %1104, %cst_770 [1] : vector<16x16xf32> to vector<16xf32>
    %1106 = vector.shape_cast %1105 : vector<16xf32> to vector<16x1xf32>
    %1107 = tpu.reciprocal %1106 {approx = true} : vector<16x1xf32> -> vector<16x1xf32>
    %1108 = vector.broadcast %1107 : vector<16x1xf32> to vector<16x16xf32>
    %1109 = arith.mulf %1104, %1108 : vector<16x16xf32>
    %cst_771 = arith.constant dense<0.000000e+00> : vector<16x8xf32>
    %1110 = tpu.matmul %1109, %1095, %cst_771 {dimension_numbers = #tpu.dot_dimension_numbers<[1], [0], [0], [1], [0, 0, 1, 1], [], []>} : vector<16x16xf32>, vector<16x8xf32>, vector<16x8xf32> -> vector<16x8xf32>
    %c6_772 = arith.constant 6 : index
    %c0_773 = arith.constant 0 : index
    %c0_774 = arith.constant 0 : index
    %1111 = vector.load %arg27[%c6_772, %c0_773, %c0_774] : memref<8x64x8xf32, #tpu.memory_space<vmem>>, vector<1x64x8xf32>
    %1112 = vector.shape_cast %1111 : vector<1x64x8xf32> to vector<64x8xf32>
    %cst_775 = arith.constant dense<0.000000e+00> : vector<16x64xf32>
    %1113 = tpu.matmul %1110, %1112, %cst_775 {dimension_numbers = #tpu.dot_dimension_numbers<[1], [1], [0], [0], [0, 0, 1, 0], [], []>} : vector<16x8xf32>, vector<64x8xf32>, vector<16x64xf32> -> vector<16x64xf32>
    %1114 = arith.addf %1074, %1113 : vector<16x64xf32>
    %c7_776 = arith.constant 7 : index
    %c0_777 = arith.constant 0 : index
    %c0_778 = arith.constant 0 : index
    %1115 = vector.load %arg21[%c7_776, %c0_777, %c0_778] : memref<8x8x64xf32, #tpu.memory_space<vmem>>, vector<1x8x64xf32>
    %1116 = vector.shape_cast %1115 : vector<1x8x64xf32> to vector<8x64xf32>
    %c7_779 = arith.constant 7 : index
    %c0_780 = arith.constant 0 : index
    %c0_781 = arith.constant 0 : index
    %1117 = vector.load %arg22[%c7_779, %c0_780, %c0_781] : memref<8x1x8xf32, #tpu.memory_space<vmem>>, vector<1x1x8xf32>
    %1118 = vector.shape_cast %1117 : vector<1x1x8xf32> to vector<1x8xf32>
    %cst_782 = arith.constant dense<0.000000e+00> : vector<16x8xf32>
    %1119 = tpu.matmul %833, %1116, %cst_782 {dimension_numbers = #tpu.dot_dimension_numbers<[1], [1], [0], [0], [0, 0, 1, 0], [], []>} : vector<16x64xf32>, vector<8x64xf32>, vector<16x8xf32> -> vector<16x8xf32>
    %1120 = vector.broadcast %1118 : vector<1x8xf32> to vector<16x8xf32>
    %1121 = arith.addf %1119, %1120 : vector<16x8xf32>
    %c7_783 = arith.constant 7 : index
    %c0_784 = arith.constant 0 : index
    %c0_785 = arith.constant 0 : index
    %1122 = vector.load %arg23[%c7_783, %c0_784, %c0_785] : memref<8x8x64xf32, #tpu.memory_space<vmem>>, vector<1x8x64xf32>
    %1123 = vector.shape_cast %1122 : vector<1x8x64xf32> to vector<8x64xf32>
    %c7_786 = arith.constant 7 : index
    %c0_787 = arith.constant 0 : index
    %c0_788 = arith.constant 0 : index
    %1124 = vector.load %arg24[%c7_786, %c0_787, %c0_788] : memref<8x1x8xf32, #tpu.memory_space<vmem>>, vector<1x1x8xf32>
    %1125 = vector.shape_cast %1124 : vector<1x1x8xf32> to vector<1x8xf32>
    %cst_789 = arith.constant dense<0.000000e+00> : vector<16x8xf32>
    %1126 = tpu.matmul %833, %1123, %cst_789 {dimension_numbers = #tpu.dot_dimension_numbers<[1], [1], [0], [0], [0, 0, 1, 0], [], []>} : vector<16x64xf32>, vector<8x64xf32>, vector<16x8xf32> -> vector<16x8xf32>
    %1127 = vector.broadcast %1125 : vector<1x8xf32> to vector<16x8xf32>
    %1128 = arith.addf %1126, %1127 : vector<16x8xf32>
    %c7_790 = arith.constant 7 : index
    %c0_791 = arith.constant 0 : index
    %c0_792 = arith.constant 0 : index
    %1129 = vector.load %arg25[%c7_790, %c0_791, %c0_792] : memref<8x8x64xf32, #tpu.memory_space<vmem>>, vector<1x8x64xf32>
    %1130 = vector.shape_cast %1129 : vector<1x8x64xf32> to vector<8x64xf32>
    %c7_793 = arith.constant 7 : index
    %c0_794 = arith.constant 0 : index
    %c0_795 = arith.constant 0 : index
    %1131 = vector.load %arg26[%c7_793, %c0_794, %c0_795] : memref<8x1x8xf32, #tpu.memory_space<vmem>>, vector<1x1x8xf32>
    %1132 = vector.shape_cast %1131 : vector<1x1x8xf32> to vector<1x8xf32>
    %cst_796 = arith.constant dense<0.000000e+00> : vector<16x8xf32>
    %1133 = tpu.matmul %833, %1130, %cst_796 {dimension_numbers = #tpu.dot_dimension_numbers<[1], [1], [0], [0], [0, 0, 1, 0], [], []>} : vector<16x64xf32>, vector<8x64xf32>, vector<16x8xf32> -> vector<16x8xf32>
    %1134 = vector.broadcast %1132 : vector<1x8xf32> to vector<16x8xf32>
    %1135 = arith.addf %1133, %1134 : vector<16x8xf32>
    %cst_797 = arith.constant dense<0.000000e+00> : vector<16x16xf32>
    %1136 = tpu.matmul %1121, %1128, %cst_797 {dimension_numbers = #tpu.dot_dimension_numbers<[1], [1], [0], [0], [0, 0, 1, 0], [], []>} : vector<16x8xf32>, vector<16x8xf32>, vector<16x16xf32> -> vector<16x16xf32>
    %cst_798 = arith.constant 0.353553385 : f32
    %1137 = vector.broadcast %cst_798 : f32 to vector<16x16xf32>
    %1138 = arith.mulf %1136, %1137 : vector<16x16xf32>
    %1139 = arith.addf %1138, %835 : vector<16x16xf32>
    %cst_799 = arith.constant dense<0xFF800000> : vector<16xf32>
    %1140 = vector.multi_reduction <maximumf>, %1139, %cst_799 [1] : vector<16x16xf32> to vector<16xf32>
    %1141 = vector.shape_cast %1140 : vector<16xf32> to vector<16x1xf32>
    %1142 = vector.broadcast %1141 : vector<16x1xf32> to vector<16x16xf32>
    %1143 = arith.subf %1139, %1142 : vector<16x16xf32>
    %1144 = math.exp %1143 : vector<16x16xf32>
    %cst_800 = arith.constant dense<0.000000e+00> : vector<16xf32>
    %1145 = vector.multi_reduction <add>, %1144, %cst_800 [1] : vector<16x16xf32> to vector<16xf32>
    %1146 = vector.shape_cast %1145 : vector<16xf32> to vector<16x1xf32>
    %1147 = tpu.reciprocal %1146 {approx = true} : vector<16x1xf32> -> vector<16x1xf32>
    %1148 = vector.broadcast %1147 : vector<16x1xf32> to vector<16x16xf32>
    %1149 = arith.mulf %1144, %1148 : vector<16x16xf32>
    %cst_801 = arith.constant dense<0.000000e+00> : vector<16x8xf32>
    %1150 = tpu.matmul %1149, %1135, %cst_801 {dimension_numbers = #tpu.dot_dimension_numbers<[1], [0], [0], [1], [0, 0, 1, 1], [], []>} : vector<16x16xf32>, vector<16x8xf32>, vector<16x8xf32> -> vector<16x8xf32>
    %c7_802 = arith.constant 7 : index
    %c0_803 = arith.constant 0 : index
    %c0_804 = arith.constant 0 : index
    %1151 = vector.load %arg27[%c7_802, %c0_803, %c0_804] : memref<8x64x8xf32, #tpu.memory_space<vmem>>, vector<1x64x8xf32>
    %1152 = vector.shape_cast %1151 : vector<1x64x8xf32> to vector<64x8xf32>
    %cst_805 = arith.constant dense<0.000000e+00> : vector<16x64xf32>
    %1153 = tpu.matmul %1150, %1152, %cst_805 {dimension_numbers = #tpu.dot_dimension_numbers<[1], [1], [0], [0], [0, 0, 1, 0], [], []>} : vector<16x8xf32>, vector<64x8xf32>, vector<16x64xf32> -> vector<16x64xf32>
    %1154 = arith.addf %1114, %1153 : vector<16x64xf32>
    %1155 = vector.broadcast %834 : vector<1x64xf32> to vector<16x64xf32>
    %1156 = arith.addf %1154, %1155 : vector<16x64xf32>
    %c0_806 = arith.constant 0 : index
    %c0_807 = arith.constant 0 : index
    %1157 = vector.load %arg29[%c0_806, %c0_807] : memref<128x64xf32, #tpu.memory_space<vmem>>, vector<128x64xf32>
    %c0_808 = arith.constant 0 : index
    %c0_809 = arith.constant 0 : index
    %1158 = vector.load %arg30[%c0_808, %c0_809] : memref<1x128xf32, #tpu.memory_space<vmem>>, vector<1x128xf32>
    %cst_810 = arith.constant dense<0.000000e+00> : vector<16x128xf32>
    %1159 = tpu.matmul %1156, %1157, %cst_810 {dimension_numbers = #tpu.dot_dimension_numbers<[1], [1], [0], [0], [0, 0, 1, 0], [], []>} : vector<16x64xf32>, vector<128x64xf32>, vector<16x128xf32> -> vector<16x128xf32>
    %1160 = vector.broadcast %1158 : vector<1x128xf32> to vector<16x128xf32>
    %1161 = arith.addf %1159, %1160 : vector<16x128xf32>
    %c0_811 = arith.constant 0 : index
    %c0_812 = arith.constant 0 : index
    %1162 = vector.load %arg31[%c0_811, %c0_812] : memref<16x128xf32, #tpu.memory_space<vmem>>, vector<16x128xf32>
    tpu.vector_store %arg31[%c0_811, %c0_812], %1161 {strides = array<i32>} : memref<16x128xf32, #tpu.memory_space<vmem>>, vector<16x128xf32>,
    return
  }
}

</mosaic_0001>

<bundles_post_ra>
// kernel: improved_bert_forward.1
= control target key start
LH: loop header
LB: loop body
LE: loop exit
PB: predicated region body
PF: predicated region fallthrough
CT: control target
= control target key end

     0   :  { %vm134_vm0 = vcmask 523264   ;;  %s19272_s6 = smov 5   ;;  %s19273_s10 = smov 7   ;;  %vm445_vm1 = vcmask 64512   ;;  %vm537_vm3 = vcmask 130048   ;;  %s21356_s0 = inlined_call_operand.smem [shape: u32[32], index: -1, kind: input, shape index: {}] }
   0x1   :  { %s1_s5 = sld [smem:[%s21356_s0]]   ;;  %s19274_s14 = smov 9   ;;  %vm19389_vm2 = vmpackc.low %vm445_vm1, %vm445_vm1 }
   0x2   :  { %s19318_s9 = sld [smem:[%s21356_s0 + %s19272_s6]]   ;;  %s19275_s18 = smov 3   ;;  %vm19924_vm4 = vmpackc.low %vm134_vm0, %vm134_vm0 }
   0x3   :  { %s19323_s13 = sld [smem:[%s21356_s0 + %s19273_s10]]   ;;  %s19276_s22 = smov 4  }
   0x4   :  { %s19328_s17 = sld [smem:[%s21356_s0 + %s19274_s14]]   ;;  %s19277_s26 = smov 8  }
   0x5   :  { %s14852_s21 = sld [smem:[%s21356_s0 + %s19275_s18]]   ;;  %s19278_s30 = smov 6  }
   0x6   :  { %s14853_s25 = sld [smem:[%s21356_s0 + %s19276_s22]]   ;;  %s19279_s4 = smov 10  }
   0x7   :  { %v130_v0 = vld [vmem:[%s1_s5] sm:$0xff]  ;;  %v131_v1 = vld [vmem:[%s1_s5 + $0x8] sm:$0xff]  ;;  %s19371_s29 = sld [smem:[%s21356_s0 + %s19277_s26]]   ;;  %s19280_s8 = smov 1  }
   0x8   :  { %v135_v2 = vsel %vm134_vm0, %v130_v0, 0.0  ;;  %v138_v3 = vsel %vm134_vm0, %v131_v1, 0.0  ;;  %v181_v14 = vld [vmem:[%s19318_s9] sm:$0xff]  ;;  %s19376_s3 = sld [smem:[%s21356_s0 + %s19278_s30]]   ;;  %s19281_s14 = smov 11  }
   0x9   :  { %136 = vadd.xlane.f32.xlu0 %v135_v2  ;;  %v273_v15 = vld [vmem:[%s19323_s13] sm:$0xff]  ;;  %16686 = vmatprep.subr.msk.mxu0 %vm134_vm0, %v181_v14  ;;  %v14907_v17 = vld [vmem:[%s19323_s13 + $0x8] sm:$0xff]  ;;  %s19381_s7 = sld [smem:[%s21356_s0 + %s19279_s4]]   ;;  %s19282_s19 = smov 12  }
   0xa   :  { %16691 = vmatprep.subr.msk.mxu1 %vm134_vm0, %v273_v15  ;;  %16687 = vmatpush3.xpose.msk.msra.mxu0 %vm134_vm0, %v181_v14  ;;  %v359_v16 = vld [vmem:[%s19328_s17] sm:$0xff]  ;;  %s19406_s12 = sld [smem:[%s21356_s0 + %s19280_s8]]   ;;  %v14901_v14 = vld [vmem:[%s19318_s9 + $0x8] sm:$0xff]  ;;  %s19283_s23 = smov 15  }
   0xb   :  { %16692 = vmatpush3.xpose.msk.msra.mxu1 %vm134_vm0, %v273_v15  ;;  %16696 = vmatprep.subr.msk.mxu0 %vm134_vm0, %v359_v16  ;;  %v14881_v25 = vld [vmem:[%s14852_s21] ss:$0 sm:$0xff]  ;;  %s19453_s18 = sld [smem:[%s21356_s0 + %s19281_s14]]   ;;  %s19284_s27 = smov 17  }
   0xc   :  { %16720 = vmatprep.subr.msk.mxu1 %vm134_vm0, %v14907_v17  ;;  %v14882_v27 = vld [vmem:[%s14853_s25] ss:$0 sm:$0xff]  ;;  %s19908_s22 = sld [smem:[%s21356_s0 + %s19282_s19]]   ;;  %s19285_s2 = smov 13  }
   0xd   :  { %139 = vadd.xlane.f32.xlu0 %v138_v3  ;;  %v14887_v34 = vld [vmem:[%s19371_s29] ss:$0 sm:$0xff]  ;;  %v14909_v44 = vld [vmem:[%s19371_s29 + $0x1] ss:$0 sm:$0xff]  ;;  %s19920_s26 = sld [smem:[%s21356_s0 + %s19283_s23]]   ;;  %s19286_s8 = smov 14  }
   0xe   :  { %v14883_v35 = vld [vmem:[%s19376_s3] ss:$0 sm:$0xff]  ;;  %s19981_s1 = sld [smem:[%s21356_s0 + %s19284_s27]]   ;;  %s19287_s15 = smov 16  }
   0xf   :  { %v14891_v43 = vld [vmem:[%s19381_s7] ss:$0 sm:$0xff]  ;;  %s19988_s6 = sld [smem:[%s21356_s0 + %s19285_s2]]   ;;  %s19288_s21 = smov 18  }
  0x10   :  { %v19409_v59 = vld [vmem:[%s19406_s12 + $0x8] sm:$0xff]  ;;  %v19412_v62 = vld [vmem:[%s19406_s12] sm:$0xff]  ;;  %s19993_s14 = sld [smem:[%s21356_s0 + %s19286_s8]]   ;;  %s19289_s27 = smov 19  }
  0x11   :  { %s20008_s20 = sld [smem:[%s21356_s0 + %s19287_s15]]   ;;  %s19290_s4 = smov 20  }
  0x12   :  { %s20014_s25 = sld [smem:[%s21356_s0 + %s19288_s21]]   ;;  %s19294_s11 = smov 22  }
  0x13   :  { %s20029_s2 = sld [smem:[%s21356_s0 + %s19289_s27]]   ;;  %s19295_s19 = smov 24  }
  0x14   :  { %s20034_s10 = sld [smem:[%s21356_s0 + %s19290_s4]]   ;;  %s19296_s24 = smov 26  }
  0x15   :  { %s20723_s16 = sld [smem:[%s21356_s0 + %s19294_s11]]   ;;  %s19297_s30 = smov 2  }
  0x16   :  { %s20728_s23 = sld [smem:[%s21356_s0 + %s19295_s19]]   ;;  %s19298_s8 = smov 27  }
  0x17   :  { %s20733_s28 = sld [smem:[%s21356_s0 + %s19296_s24]]   ;;  %s19302_s15 = smov 31  }
  0x18   :  { %s20754_s5 = sld [smem:[%s21356_s0 + %s19297_s30]]  }
  0x96   :  { %v137_v4 = vpop.xlane.xlu0 %136 }
  0x97   :  { %v142_v5 = vmul.f32 0.015625, %v137_v4 }
  0x99   :  { %v144_v6 = vsub.f32 %v130_v0, %v142_v5 }
  0x9a   :  { %v140_v7 = vpop.xlane.xlu0 %139 }
  0x9b   :  { %v143_v8 = vmul.f32 0.015625, %v140_v7  ;;  %v146_v9 = vmul.f32 %v144_v6, %v144_v6 }
  0x9d   :  { %v145_v10 = vsub.f32 %v131_v1, %v143_v8  ;;  %v148_v11 = vsel %vm134_vm0, %v146_v9, 0.0 }
  0x9e   :  { %149 = vadd.xlane.f32.xlu1 %v148_v11 }
  0x9f   :  { %v147_v12 = vmul.f32 %v145_v10, %v145_v10 }
  0xa1   :  { %v151_v13 = vsel %vm134_vm0, %v147_v12, 0.0 }
  0xa2   :  { %152 = vadd.xlane.f32.xlu1 %v151_v13 }
 0x12b   :  { %v150_v18 = vpop.xlane.xlu1 %149 }
 0x12c   :  { %v154_v19 = vmul.f32 0.015625, %v150_v18 }
 0x12e   :  { %v156_v20 = vadd.f32 1e-12, %v154_v19 }
 0x12f   :  { %v153_v21 = vpop.xlane.xlu1 %152 }
 0x130   :  { %19046 = vrsqrt.f32 %v156_v20  ;;  %v155_v22 = vmul.f32 0.015625, %v153_v21  ;;  %v14913_v21 = vld [vmem:[%s19328_s17 + $0x8] sm:$0xff] }
 0x132   :  { %v157_v23 = vadd.f32 1e-12, %v155_v22 }
 0x134   :  { %19048 = vrsqrt.f32 %v157_v23 }
 0x13a   :  { %v19047_v24 = vpop.eup %19046 }
 0x13b   :  { %v160_v26 = vmul.f32 %v19047_v24, %v144_v6  ;;  %v14903_v24 = vld [vmem:[%s19376_s3 + $0x1] ss:$0 sm:$0xff] }
 0x13d   :  { %v168_v28 = vmul.f32 %v14881_v25, %v160_v26 }
 0x13e   :  { %v19049_v29 = vpop.eup %19048 }
 0x13f   :  { %v19346_v30 = vadd.f32 %v14882_v27, %v168_v28  ;;  %v161_v31 = vmul.f32 %v19049_v29, %v145_v10  ;;  %v14915_v28 = vld [vmem:[%s19381_s7 + $0x1] ss:$0 sm:$0xff] }
 0x141   :  { %v169_v32 = vmul.f32 %v14881_v25, %v161_v31  ;;  %16688 = vmatprep.mubr.msk.f32.mxu0 %vm134_vm0, %v19346_v30  ;;  %16693 = vmatprep.mubr.msk.f32.mxu1 %vm134_vm0, %v19346_v30 }
 0x143   :  { %v19352_v33 = vadd.f32 %v14882_v27, %v169_v32 }
 0x145   :  { %16689 = vmatmul.mubr.msk.f32.vlgmr.msra.gmra.mrb[0].mxu0 %vm134_vm0, %v19352_v33  ;;  %16694 = vmatmul.mubr.msk.f32.vlgmr.msra.gmra.mrb[0].mxu1 %vm134_vm0, %v19352_v33 }
 0x146   :  { %16697 = vmatpush3.xpose.msk.msra.mxu0 %vm134_vm0, %v359_v16  ;;  %16698 = vmatprep.mubr.msk.f32.mxu0 %vm134_vm0, %v19346_v30 }
 0x147   :  { %16721 = vmatpush3.xpose.msk.msra.mxu1 %vm134_vm0, %v14907_v17  ;;  %16722 = vmatprep.mubr.msk.f32.mxu1 %vm134_vm0, %v19346_v30 }
 0x149   :  { %16699 = vmatmul.mubr.msk.f32.vlgmr.msra.gmra.mrb[2].mxu0 %vm134_vm0, %v19352_v33 }
 0x14a   :  { %16723 = vmatmul.mubr.msk.f32.vlgmr.msra.gmra.mrb[2].mxu1 %vm134_vm0, %v19352_v33 }
 0x218   :  { %v16690_v36 = vpop.f32.mrb[0].mxu0  ;;  %v16695_v37 = vpop.f32.mrb[0].mxu1 }
 0x219   :  { %v356_v38 = vadd.f32 %v16695_v37, %v14887_v34  ;;  %v264_v39 = vpop.f32.mrb[1].mxu0  ;;  %v350_v40 = vpop.f32.mrb[1].mxu1  ;;  %v270_v57 = vadd.f32 %v16690_v36, %v14883_v35 }
 0x21a   :  { %v265_v41 = vadd.f32 %v14883_v35, %v264_v39  ;;  %v351_v42 = vadd.f32 %v14887_v34, %v350_v40 }
 0x21c   :  { %v17981_v46 = vpack.c.bf16 %v356_v38, %v351_v42  ;;  %v16700_v47 = vpop.f32.mrb[2].mxu0  ;;  %16705 = vmatprep.mubr.msk.f32.mxu0 %vm445_vm1, %v265_v41 }
 0x21d   :  { %v442_v48 = vadd.f32 %v16700_v47, %v14891_v43  ;;  %v16724_v49 = vpop.f32.mrb[2].mxu1  ;;  %v436_v50 = vpop.f32.mrb[3].mxu0 }
 0x21e   :  { %v822_v51 = vadd.f32 %v16724_v49, %v14909_v44  ;;  %v437_v52 = vadd.f32 %v14891_v43, %v436_v50  ;;  %v816_v53 = vpop.f32.mrb[3].mxu1  ;;  %17983 = vmatprep.subr.msk.bf16.mxu0 %vm19389_vm2, %v17981_v46 }
 0x21f   :  { %v817_v54 = vadd.f32 %v14909_v44, %v816_v53  ;;  %17986 = vmatpush3.bf16.xpose.msk.msra.mxu0 %vm19389_vm2, %v17981_v46 }
 0x220   :  { %v17987_v55 = vpack.c.bf16 %v442_v48, %v437_v52 }
 0x221   :  { %v17991_v56 = vpack.c.bf16 %v822_v51, %v817_v54 }
 0x222   :  { %17988 = vmatprep.subr.bf16.mxu0 %v17987_v55 }
 0x223   :  { %17993 = vmatprep.subr.msk.bf16.mxu1 %vm19389_vm2, %v17991_v56 }
 0x224   :  { %17996 = vmatpush3.bf16.xpose.msk.msra.mxu1 %vm19389_vm2, %v17991_v56  ;;  %v641_v56 = vld [vmem:[%s19453_s18] sm:$0xff] }
 0x226   :  { %16706 = vmatmul.mubr.msk.f32.vlgmr.msra.gmra.mrb[4].mxu0 %vm445_vm1, %v270_v57  ;;  %v642_v57 = vld [vmem:[%s19453_s18 + $0x8] sm:$0xff] }
 0x227   :  { %17990 = vmatpush3.bf16.msra.mxu0 %v17987_v55 }
 0x228   :  { %16715 = vmatprep.subr.msk.mxu0 %vm134_vm0, %v14901_v14 }
 0x2f9   :  { %v16707_v58 = vpop.f32.mrb[4].mxu0 }
 0x2fa   :  { %v534_v60 = vmul.f32 0.35355338, %v16707_v58  ;;  %v524_v61 = vpop.f32.mrb[5].mxu0  ;;  %v18025_v58 = vpack.c.bf16 %v642_v57, %v641_v56 }
 0x2fb   :  { %v533_v63 = vmul.f32 0.35355338, %v524_v61  ;;  %v14926_v61 = vld [vmem:[%s19453_s18 + $0x48] sm:$0xff] }
 0x2fc   :  { %v536_v0 = vadd.f32 %v534_v60, %v19409_v59  ;;  %v14925_v60 = vld [vmem:[%s19453_s18 + $0x40] sm:$0xff] }
 0x2fd   :  { %v535_v1 = vadd.f32 %v533_v63, %v19412_v62  ;;  %v14927_v63 = vld [vmem:[%s19453_s18 + $0x50] sm:$0xff] }
 0x2fe   :  { %v541_v2 = vsel %vm537_vm3, %v536_v0, -inf }
 0x2ff   :  { %542 = vmax.xlane.f32.xlu1 %v541_v2  ;;  %v538_v3 = vsel %vm537_vm3, %v535_v1, -inf }
 0x300   :  { %539 = vmax.xlane.f32.xlu0 %v538_v3  ;;  %v14929_v3 = vld [vmem:[%s19453_s18 + $0x60] sm:$0xff] }
 0x38c   :  { %v543_v4 = vpop.xlane.xlu1 %542 }
 0x38d   :  { %v545_v5 = vsub.f32 %v536_v0, %v543_v4  ;;  %v540_v6 = vpop.xlane.xlu0 %539  ;;  %v18001_v0 = vpack.c.bf16 %v14926_v61, %v14925_v60  ;;  %v14930_v4 = vld [vmem:[%s19453_s18 + $0x68] sm:$0xff] }
 0x38e   :  { %v544_v7 = vsub.f32 %v535_v1, %v540_v6  ;;  %v14928_v1 = vld [vmem:[%s19453_s18 + $0x58] sm:$0xff]  ;;  %v14931_v6 = vld [vmem:[%s19453_s18 + $0x70] sm:$0xff] }
 0x38f   :  { %v548_v8 = vmul.f32 1.442695, %v545_v5  ;;  %v18007_v2 = vpack.c.bf16 %v14928_v1, %v14927_v63  ;;  %18003 = vmatprep.subr.msk.bf16.mxu1 %vm19389_vm2, %v18001_v0  ;;  %v18013_v5 = vpack.c.bf16 %v14930_v4, %v14929_v3 }
 0x390   :  { %v546_v9 = vmul.f32 1.442695, %v544_v7  ;;  %v14932_v7 = vld [vmem:[%s19453_s18 + $0x78] sm:$0xff] }
 0x391   :  { %19050 = vpow2.f32 %v548_v8  ;;  %v18019_v8 = vpack.c.bf16 %v14932_v7, %v14931_v6  ;;  %v14995_v7 = vld [vmem:[%s19318_s9 + $0x18] sm:$0xff] }
 0x392   :  { %19052 = vpow2.f32 %v546_v9 }
 0x39b   :  { %v19051_v10 = vpop.eup %19050 }
 0x39c   :  { %v19053_v11 = vpop.eup %19052  ;;  %v553_v12 = vsel %vm537_vm3, %v19051_v10, 0.0 }
 0x39d   :  { %554 = vadd.xlane.f32.xlu1 %v553_v12  ;;  %v550_v13 = vsel %vm537_vm3, %v19053_v11, 0.0  ;;  %v643_v12 = vld [vmem:[%s19453_s18 + $0x10] sm:$0xff] }
 0x39e   :  { %551 = vadd.xlane.f32.xlu0 %v550_v13  ;;  %v644_v13 = vld [vmem:[%s19453_s18 + $0x18] sm:$0xff] }
 0x42a   :  { %v555_v15 = vpop.xlane.xlu1 %554 }
 0x42b   :  { %19054 = vrcp.f32 %v555_v15  ;;  %v552_v16 = vpop.xlane.xlu0 %551 }
 0x42c   :  { %19056 = vrcp.f32 %v552_v16 }
 0x435   :  { %v19055_v17 = vpop.eup %19054 }
 0x436   :  { %v19057_v18 = vpop.eup %19056  ;;  %v559_v20 = vmul.f32 %v19055_v17, %v19051_v10  ;;  %v18031_v17 = vpack.c.bf16 %v644_v13, %v643_v12  ;;  %v14980_v12 = vld [vmem:[%s19453_s18 + $0x98] sm:$0xff] }
 0x437   :  { %v558_v19 = vmul.f32 %v19057_v18, %v19053_v11  ;;  %v645_v18 = vld [vmem:[%s19453_s18 + $0x20] sm:$0xff] }
 0x439   :  { %16712 = vmatprep.mubr.msk.f32.mxu0 %vm537_vm3, %v558_v19  ;;  %v646_v19 = vld [vmem:[%s19453_s18 + $0x28] sm:$0xff] }
 0x43a   :  { %16713 = vmatmul.mubr.msk.f32.vlgmr.msra.gmra.mrb[6].mxu0 %vm537_vm3, %v559_v20  ;;  %v18037_v20 = vpack.c.bf16 %v646_v19, %v645_v18  ;;  %v14984_v18 = vld [vmem:[%s19453_s18 + $0xb8] sm:$0xff] }
 0x43b   :  { %16716 = vmatpush3.xpose.msk.msra.mxu0 %vm134_vm0, %v14901_v14  ;;  %16717 = vmatprep.mubr.msk.f32.mxu0 %vm134_vm0, %v19346_v30 }
 0x43c   :  { %16725 = vmatprep.subr.msk.mxu0 %vm134_vm0, %v14913_v21 }
 0x43e   :  { %16718 = vmatmul.mubr.msk.f32.vlgmr.msra.gmra.mrb[8].mxu0 %vm134_vm0, %v19352_v33 }
 0x43f   :  { %16726 = vmatpush3.xpose.msk.msra.mxu0 %vm134_vm0, %v14913_v21  ;;  %16727 = vmatprep.mubr.msk.f32.mxu0 %vm134_vm0, %v19346_v30  ;;  %v647_v21 = vld [vmem:[%s19453_s18 + $0x30] sm:$0xff] }
 0x442   :  { %16728 = vmatmul.mubr.msk.f32.vlgmr.msra.gmra.mrb[10].mxu0 %vm134_vm0, %v19352_v33 }
 0x50d   :  { %v19436_v22 = vpop.f32.mrb[6].mxu0 }
 0x50e   :  { %v19438_v23 = vpop.f32.mrb[7].mxu0 }
 0x511   :  { %v16719_v25 = vpop.f32.mrb[8].mxu0 }
 0x512   :  { %v728_v26 = vpop.f32.mrb[9].mxu0  ;;  %v734_v29 = vadd.f32 %v16719_v25, %v14903_v24 }
 0x513   :  { %v729_v27 = vadd.f32 %v14903_v24, %v728_v26  ;;  %v648_v24 = vld [vmem:[%s19453_s18 + $0x38] sm:$0xff] }
 0x514   :  { %v18043_v25 = vpack.c.bf16 %v648_v24, %v647_v21 }
 0x515   :  { %v16729_v31 = vpop.f32.mrb[10].mxu0  ;;  %16734 = vmatprep.mubr.msk.f32.mxu1 %vm445_vm1, %v729_v27 }
 0x516   :  { %v910_v32 = vadd.f32 %v16729_v31, %v14915_v28  ;;  %v904_v34 = vpop.f32.mrb[11].mxu0  ;;  %16735 = vmatmul.mubr.msk.f32.vlgmr.msra.gmra.mrb[4].mxu1 %vm445_vm1, %v734_v29 }
 0x517   :  { %v905_v35 = vadd.f32 %v14915_v28, %v904_v34  ;;  %18006 = vmatpush3.bf16.xpose.msk.msra.mxu1 %vm19389_vm2, %v18001_v0  ;;  %v14959_v28 = vld [vmem:[%s19323_s13 + $0x10] sm:$0xff] }
 0x518   :  { %18009 = vmatprep.subr.msk.bf16.mxu1 %vm19389_vm2, %v18007_v2 }
 0x519   :  { %v17997_v36 = vpack.c.bf16 %v910_v32, %v905_v35  ;;  %v14955_v32 = vld [vmem:[%s19376_s3 + $0x2] ss:$0 sm:$0xff] }
 0x51b   :  { %17998 = vmatprep.subr.bf16.mxu0 %v17997_v36 }
 0x51c   :  { %18000 = vmatpush3.bf16.msra.mxu0 %v17997_v36 }
 0x51d   :  { %18027 = vmatprep.subr.msk.bf16.mxu0 %vm19389_vm2, %v18025_v58 }
 0x51f   :  { %18012 = vmatpush3.bf16.xpose.msk.msra.mxu1 %vm19389_vm2, %v18007_v2 }
 0x520   :  { %18015 = vmatprep.subr.msk.bf16.mxu1 %vm19389_vm2, %v18013_v5 }
 0x527   :  { %18018 = vmatpush3.bf16.xpose.msk.msra.mxu1 %vm19389_vm2, %v18013_v5 }
 0x528   :  { %18021 = vmatprep.subr.msk.bf16.mxu1 %vm19389_vm2, %v18019_v8 }
 0x52f   :  { %18024 = vmatpush3.bf16.xpose.msk.msra.mxu1 %vm19389_vm2, %v18019_v8  ;;  %v14977_v8 = vld [vmem:[%s19453_s18 + $0x80] sm:$0xff] }
 0x5e9   :  { %v16736_v37 = vpop.f32.mrb[4].mxu1 }
 0x5ea   :  { %v1001_v38 = vmul.f32 0.35355338, %v16736_v37  ;;  %v991_v39 = vpop.f32.mrb[5].mxu1  ;;  %v14961_v37 = vld [vmem:[%s19371_s29 + $0x2] ss:$0 sm:$0xff] }
 0x5eb   :  { %v1000_v40 = vmul.f32 0.35355338, %v991_v39 }
 0x5ec   :  { %v1003_v41 = vadd.f32 %v1001_v38, %v19409_v59 }
 0x5ed   :  { %v1002_v42 = vadd.f32 %v1000_v40, %v19412_v62 }
 0x5ee   :  { %v1007_v43 = vsel %vm537_vm3, %v1003_v41, -inf }
 0x5ef   :  { %1008 = vmax.xlane.f32.xlu1 %v1007_v43  ;;  %v1004_v44 = vsel %vm537_vm3, %v1002_v42, -inf }
 0x5f0   :  { %1005 = vmax.xlane.f32.xlu0 %v1004_v44 }
 0x67c   :  { %v1009_v46 = vpop.xlane.xlu1 %1008 }
 0x67d   :  { %v1011_v47 = vsub.f32 %v1003_v41, %v1009_v46  ;;  %v1006_v48 = vpop.xlane.xlu0 %1005 }
 0x67e   :  { %v1010_v49 = vsub.f32 %v1002_v42, %v1006_v48  ;;  %v14967_v42 = vld [vmem:[%s19381_s7 + $0x2] ss:$0 sm:$0xff] }
 0x67f   :  { %v1014_v50 = vmul.f32 1.442695, %v1011_v47 }
 0x680   :  { %v1012_v51 = vmul.f32 1.442695, %v1010_v49 }
 0x681   :  { %19058 = vpow2.f32 %v1014_v50 }
 0x682   :  { %19060 = vpow2.f32 %v1012_v51 }
 0x68b   :  { %v19059_v52 = vpop.eup %19058 }
 0x68c   :  { %v19061_v53 = vpop.eup %19060  ;;  %v1019_v54 = vsel %vm537_vm3, %v19059_v52, 0.0 }
 0x68d   :  { %1020 = vadd.xlane.f32.xlu1 %v1019_v54  ;;  %v1016_v55 = vsel %vm537_vm3, %v19061_v53, 0.0 }
 0x68e   :  { %1017 = vadd.xlane.f32.xlu0 %v1016_v55 }
 0x71a   :  { %v1021_v9 = vpop.xlane.xlu1 %1020 }
 0x71b   :  { %19062 = vrcp.f32 %v1021_v9  ;;  %v1018_v10 = vpop.xlane.xlu0 %1017  ;;  %v14978_v9 = vld [vmem:[%s19453_s18 + $0x88] sm:$0xff] }
 0x71c   :  { %19064 = vrcp.f32 %v1018_v10  ;;  %v14979_v10 = vld [vmem:[%s19453_s18 + $0x90] sm:$0xff] }
 0x71d   :  { %v18065_v13 = vpack.c.bf16 %v14980_v12, %v14979_v10  ;;  %v15020_v10 = vld [vmem:[%s19453_s18 + $0xc8] sm:$0xff] }
 0x725   :  { %v19063_v11 = vpop.eup %19062 }
 0x726   :  { %v19065_v14 = vpop.eup %19064  ;;  %v1025_v16 = vmul.f32 %v19063_v11, %v19059_v52  ;;  %v18059_v11 = vpack.c.bf16 %v14978_v9, %v14977_v8  ;;  %v15037_v8 = vld [vmem:[%s19318_s9 + $0x20] sm:$0xff] }
 0x727   :  { %v1024_v15 = vmul.f32 %v19065_v14, %v19061_v53  ;;  %v14981_v14 = vld [vmem:[%s19453_s18 + $0xa0] sm:$0xff] }
 0x728   :  { %v15019_v9 = vld [vmem:[%s19453_s18 + $0xc0] sm:$0xff] }
 0x729   :  { %16741 = vmatprep.mubr.msk.f32.mxu0 %vm537_vm3, %v1024_v15  ;;  %v14982_v15 = vld [vmem:[%s19453_s18 + $0xa8] sm:$0xff]  ;;  %v18093_v12 = vpack.c.bf16 %v15020_v10, %v15019_v9  ;;  %v15061_v10 = vld [vmem:[%s19453_s18 + $0x100] sm:$0xff] }
 0x72a   :  { %16742 = vmatmul.mubr.msk.f32.vlgmr.msra.gmra.mrb[12].mxu0 %vm537_vm3, %v1025_v16  ;;  %v18071_v16 = vpack.c.bf16 %v14982_v15, %v14981_v14  ;;  %v15023_v15 = vld [vmem:[%s19453_s18 + $0xe0] sm:$0xff]  ;;  %v15079_v9 = vld [vmem:[%s19318_s9 + $0x28] sm:$0xff] }
 0x72b   :  { %18030 = vmatpush3.bf16.xpose.msk.msra.mxu0 %vm19389_vm2, %v18025_v58  ;;  %16779 = vmatprep.mubr.msk.f32.mxu0 %vm445_vm1, %v19438_v23  ;;  %v14953_v23 = vld [vmem:[%s19318_s9 + $0x10] sm:$0xff] }
 0x72c   :  { %18033 = vmatprep.subr.msk.bf16.mxu0 %vm19389_vm2, %v18031_v17  ;;  %16782 = vmatprep.subr.msk.mxu1 %vm134_vm0, %v14953_v23 }
 0x733   :  { %18036 = vmatpush3.bf16.xpose.msk.msra.mxu0 %vm19389_vm2, %v18031_v17  ;;  %v14983_v17 = vld [vmem:[%s19453_s18 + $0xb0] sm:$0xff] }
 0x734   :  { %18039 = vmatprep.subr.msk.bf16.mxu0 %vm19389_vm2, %v18037_v20  ;;  %v18077_v19 = vpack.c.bf16 %v14984_v18, %v14983_v17  ;;  %v15025_v18 = vld [vmem:[%s19453_s18 + $0xf0] sm:$0xff] }
 0x73b   :  { %18042 = vmatpush3.bf16.xpose.msk.msra.mxu0 %vm19389_vm2, %v18037_v20 }
 0x73c   :  { %18045 = vmatprep.subr.msk.bf16.mxu0 %vm19389_vm2, %v18043_v25 }
 0x743   :  { %18048 = vmatpush3.bf16.xpose.msk.msra.mxu0 %vm19389_vm2, %v18043_v25 }
 0x744   :  { %18061 = vmatprep.subr.msk.bf16.mxu0 %vm19389_vm2, %v18059_v11 }
 0x74a   :  { %16780 = vmatmul.mubr.msk.f32.vlgmr.msra.gmra.mrb[14].mxu0 %vm445_vm1, %v19436_v22  ;;  %v14965_v22 = vld [vmem:[%s19328_s17 + $0x10] sm:$0xff] }
 0x74b   :  { %18064 = vmatpush3.bf16.xpose.msk.msra.mxu0 %vm19389_vm2, %v18059_v11  ;;  %v15021_v11 = vld [vmem:[%s19453_s18 + $0xd0] sm:$0xff] }
 0x74c   :  { %18067 = vmatprep.subr.msk.bf16.mxu0 %vm19389_vm2, %v18065_v13 }
 0x753   :  { %18070 = vmatpush3.bf16.xpose.msk.msra.mxu0 %vm19389_vm2, %v18065_v13  ;;  %v15022_v13 = vld [vmem:[%s19453_s18 + $0xd8] sm:$0xff] }
 0x754   :  { %18073 = vmatprep.subr.msk.bf16.mxu0 %vm19389_vm2, %v18071_v16  ;;  %v18099_v14 = vpack.c.bf16 %v15022_v13, %v15021_v11  ;;  %v15062_v11 = vld [vmem:[%s19453_s18 + $0x108] sm:$0xff] }
 0x755   :  { %v18127_v13 = vpack.c.bf16 %v15062_v11, %v15061_v10  ;;  %v15104_v10 = vld [vmem:[%s19453_s18 + $0x148] sm:$0xff]  ;;  %v15105_v11 = vld [vmem:[%s19453_s18 + $0x150] sm:$0xff] }
 0x75b   :  { %18076 = vmatpush3.bf16.xpose.msk.msra.mxu0 %vm19389_vm2, %v18071_v16  ;;  %v15024_v16 = vld [vmem:[%s19453_s18 + $0xe8] sm:$0xff] }
 0x75c   :  { %18079 = vmatprep.subr.msk.bf16.mxu0 %vm19389_vm2, %v18077_v19  ;;  %v18105_v17 = vpack.c.bf16 %v15024_v16, %v15023_v15  ;;  %v15065_v16 = vld [vmem:[%s19453_s18 + $0x120] sm:$0xff] }
 0x763   :  { %18082 = vmatpush3.bf16.xpose.msk.msra.mxu0 %vm19389_vm2, %v18077_v19  ;;  %v15026_v19 = vld [vmem:[%s19453_s18 + $0xf8] sm:$0xff] }
 0x764   :  { %18095 = vmatprep.subr.msk.bf16.mxu0 %vm19389_vm2, %v18093_v12 }
 0x7fd   :  { %v16743_v26 = vpop.f32.mrb[12].mxu0 }
 0x7fe   :  { %v1098_v27 = vpop.f32.mrb[13].mxu0 }
 0x7ff   :  { %16760 = vmatprep.mubr.msk.f32.mxu1 %vm445_vm1, %v1098_v27  ;;  %v15001_v27 = vld [vmem:[%s19323_s13 + $0x18] sm:$0xff] }
 0x800   :  { %16761 = vmatmul.mubr.msk.f32.vlgmr.msra.gmra.mrb[6].mxu1 %vm445_vm1, %v16743_v26 }
 0x801   :  { %16783 = vmatpush3.xpose.msk.msra.mxu1 %vm134_vm0, %v14953_v23  ;;  %16784 = vmatprep.mubr.msk.f32.mxu1 %vm134_vm0, %v19346_v30 }
 0x802   :  { %16787 = vmatprep.subr.msk.mxu1 %vm134_vm0, %v14959_v28 }
 0x804   :  { %16785 = vmatmul.mubr.msk.f32.vlgmr.msra.gmra.mrb[8].mxu1 %vm134_vm0, %v19352_v33 }
 0x805   :  { %16788 = vmatpush3.xpose.msk.msra.mxu1 %vm134_vm0, %v14959_v28  ;;  %16789 = vmatprep.mubr.msk.f32.mxu1 %vm134_vm0, %v19346_v30  ;;  %v15007_v28 = vld [vmem:[%s19328_s17 + $0x18] sm:$0xff] }
 0x806   :  { %16792 = vmatprep.subr.msk.mxu1 %vm134_vm0, %v14965_v22 }
 0x808   :  { %16790 = vmatmul.mubr.msk.f32.vlgmr.msra.gmra.mrb[10].mxu1 %vm134_vm0, %v19352_v33 }
 0x809   :  { %16793 = vmatpush3.xpose.msk.msra.mxu1 %vm134_vm0, %v14965_v22  ;;  %16794 = vmatprep.mubr.msk.f32.mxu1 %vm134_vm0, %v19346_v30 }
 0x80c   :  { %16795 = vmatmul.mubr.msk.f32.vlgmr.msra.gmra.mrb[12].mxu1 %vm134_vm0, %v19352_v33 }
 0x8d3   :  { %v19532_v29 = vpop.f32.mrb[6].mxu1 }
 0x8d4   :  { %v19534_v31 = vpop.f32.mrb[7].mxu1 }
 0x8d7   :  { %v16786_v34 = vpop.f32.mrb[8].mxu1 }
 0x8d8   :  { %v1405_v35 = vpop.f32.mrb[9].mxu1  ;;  %v1411_v50 = vadd.f32 %v16786_v34, %v14955_v32  ;;  %v14997_v34 = vld [vmem:[%s19376_s3 + $0x3] ss:$0 sm:$0xff] }
 0x8d9   :  { %v1406_v36 = vadd.f32 %v14955_v32, %v1405_v35 }
 0x8db   :  { %v16791_v38 = vpop.f32.mrb[10].mxu1  ;;  %16801 = vmatprep.mubr.msk.f32.mxu1 %vm445_vm1, %v1406_v36 }
 0x8dc   :  { %v1499_v39 = vadd.f32 %v16791_v38, %v14961_v37  ;;  %v1493_v40 = vpop.f32.mrb[11].mxu1  ;;  %v15003_v38 = vld [vmem:[%s19371_s29 + $0x3] ss:$0 sm:$0xff] }
 0x8dd   :  { %v1494_v41 = vadd.f32 %v14961_v37, %v1493_v40 }
 0x8df   :  { %v18049_v43 = vpack.c.bf16 %v1499_v39, %v1494_v41  ;;  %v16796_v44 = vpop.f32.mrb[12].mxu1 }
 0x8e0   :  { %v1587_v46 = vadd.f32 %v16796_v44, %v14967_v42  ;;  %v1581_v47 = vpop.f32.mrb[13].mxu1 }
 0x8e1   :  { %v1582_v48 = vadd.f32 %v14967_v42, %v1581_v47  ;;  %18051 = vmatprep.subr.msk.bf16.mxu1 %vm19389_vm2, %v18049_v43 }
 0x8e2   :  { %18054 = vmatpush3.bf16.xpose.msk.msra.mxu1 %vm19389_vm2, %v18049_v43  ;;  %v15009_v43 = vld [vmem:[%s19381_s7 + $0x3] ss:$0 sm:$0xff] }
 0x8e3   :  { %v18055_v49 = vpack.c.bf16 %v1587_v46, %v1582_v48 }
 0x8e5   :  { %18056 = vmatprep.subr.bf16.mxu1 %v18055_v49 }
 0x8e9   :  { %16802 = vmatmul.mubr.msk.f32.vlgmr.msra.gmra.mrb[14].mxu1 %vm445_vm1, %v1411_v50 }
 0x8ea   :  { %18058 = vmatpush3.bf16.msra.mxu1 %v18055_v49 }
 0x8eb   :  { %16830 = vmatprep.subr.msk.mxu1 %vm134_vm0, %v14995_v7 }
 0x9bc   :  { %v16803_v51 = vpop.f32.mrb[14].mxu1 }
 0x9bd   :  { %v1678_v52 = vmul.f32 0.35355338, %v16803_v51  ;;  %v1668_v53 = vpop.f32.mrb[15].mxu1 }
 0x9be   :  { %v1677_v54 = vmul.f32 0.35355338, %v1668_v53 }
 0x9bf   :  { %v1680_v55 = vadd.f32 %v1678_v52, %v19409_v59 }
 0x9c0   :  { %v1679_v56 = vadd.f32 %v1677_v54, %v19412_v62 }
 0x9c1   :  { %v1684_v57 = vsel %vm537_vm3, %v1680_v55, -inf }
 0x9c2   :  { %1685 = vmax.xlane.f32.xlu1 %v1684_v57  ;;  %v1681_v58 = vsel %vm537_vm3, %v1679_v56, -inf }
 0x9c3   :  { %1682 = vmax.xlane.f32.xlu0 %v1681_v58 }
 0xa4f   :  { %v1686_v60 = vpop.xlane.xlu1 %1685 }
 0xa50   :  { %v1688_v61 = vsub.f32 %v1680_v55, %v1686_v60  ;;  %v1683_v63 = vpop.xlane.xlu0 %1682 }
 0xa51   :  { %v1687_v0 = vsub.f32 %v1679_v56, %v1683_v63 }
 0xa52   :  { %v1691_v1 = vmul.f32 1.442695, %v1688_v61 }
 0xa53   :  { %v1689_v2 = vmul.f32 1.442695, %v1687_v0 }
 0xa54   :  { %19066 = vpow2.f32 %v1691_v1 }
 0xa55   :  { %19068 = vpow2.f32 %v1689_v2 }
 0xa5e   :  { %v19067_v3 = vpop.eup %19066 }
 0xa5f   :  { %v19069_v4 = vpop.eup %19068  ;;  %v1696_v5 = vsel %vm537_vm3, %v19067_v3, 0.0 }
 0xa60   :  { %1697 = vadd.xlane.f32.xlu1 %v1696_v5  ;;  %v1693_v6 = vsel %vm537_vm3, %v19069_v4, 0.0 }
 0xa61   :  { %1694 = vadd.xlane.f32.xlu0 %v1693_v6 }
 0xaed   :  { %v1698_v20 = vpop.xlane.xlu1 %1697 }
 0xaee   :  { %19070 = vrcp.f32 %v1698_v20  ;;  %v1695_v21 = vpop.xlane.xlu0 %1694  ;;  %v18111_v20 = vpack.c.bf16 %v15026_v19, %v15025_v18  ;;  %v15067_v19 = vld [vmem:[%s19453_s18 + $0x130] sm:$0xff] }
 0xaef   :  { %19072 = vrcp.f32 %v1695_v21 }
 0xaf8   :  { %v19071_v24 = vpop.eup %19070 }
 0xaf9   :  { %v19073_v25 = vpop.eup %19072  ;;  %v1702_v26 = vmul.f32 %v19071_v24, %v19067_v3 }
 0xafa   :  { %v1701_v23 = vmul.f32 %v19073_v25, %v19069_v4 }
 0xafc   :  { %16808 = vmatprep.mubr.msk.f32.mxu1 %vm537_vm3, %v1701_v23 }
 0xafd   :  { %16809 = vmatmul.mubr.msk.f32.vlgmr.msra.gmra.mrb[16].mxu1 %vm537_vm3, %v1702_v26 }
 0xafe   :  { %16831 = vmatpush3.xpose.msk.msra.mxu1 %vm134_vm0, %v14995_v7  ;;  %16832 = vmatprep.mubr.msk.f32.mxu1 %vm134_vm0, %v19346_v30 }
 0xaff   :  { %16835 = vmatprep.subr.msk.mxu1 %vm134_vm0, %v15001_v27 }
 0xb01   :  { %16833 = vmatmul.mubr.msk.f32.vlgmr.msra.gmra.mrb[18].mxu1 %vm134_vm0, %v19352_v33 }
 0xb02   :  { %16836 = vmatpush3.xpose.msk.msra.mxu1 %vm134_vm0, %v15001_v27  ;;  %16837 = vmatprep.mubr.msk.f32.mxu1 %vm134_vm0, %v19346_v30 }
 0xb03   :  { %16840 = vmatprep.subr.msk.mxu1 %vm134_vm0, %v15007_v28 }
 0xb05   :  { %16838 = vmatmul.mubr.msk.f32.vlgmr.msra.gmra.mrb[20].mxu1 %vm134_vm0, %v19352_v33 }
 0xb06   :  { %16841 = vmatpush3.xpose.msk.msra.mxu1 %vm134_vm0, %v15007_v28  ;;  %16842 = vmatprep.mubr.msk.f32.mxu1 %vm134_vm0, %v19346_v30  ;;  %v15043_v28 = vld [vmem:[%s19323_s13 + $0x20] sm:$0xff] }
 0xb09   :  { %16843 = vmatmul.mubr.msk.f32.vlgmr.msra.gmra.mrb[22].mxu1 %vm134_vm0, %v19352_v33 }
 0xbd0   :  { %v16810_v22 = vpop.f32.mrb[16].mxu1 }
 0xbd1   :  { %v1775_v32 = vpop.f32.mrb[17].mxu1 }
 0xbd2   :  { %16827 = vmatprep.mubr.msk.f32.mxu0 %vm445_vm1, %v1775_v32 }
 0xbd3   :  { %16828 = vmatmul.mubr.msk.f32.vlgmr.msra.gmra.mrb[14].mxu0 %vm445_vm1, %v16810_v22  ;;  %v15049_v22 = vld [vmem:[%s19328_s17 + $0x20] sm:$0xff] }
 0xbd4   :  { %v16834_v35 = vpop.f32.mrb[18].mxu1  ;;  %18098 = vmatpush3.bf16.xpose.msk.msra.mxu0 %vm19389_vm2, %v18093_v12  ;;  %v15063_v12 = vld [vmem:[%s19453_s18 + $0x110] sm:$0xff] }
 0xbd5   :  { %v1979_v36 = vpop.f32.mrb[19].mxu1  ;;  %v1985_v51 = vadd.f32 %v16834_v35, %v14997_v34  ;;  %18101 = vmatprep.subr.msk.bf16.mxu0 %vm19389_vm2, %v18099_v14  ;;  %v15039_v35 = vld [vmem:[%s19376_s3 + $0x4] ss:$0 sm:$0xff] }
 0xbd6   :  { %v1980_v37 = vadd.f32 %v14997_v34, %v1979_v36 }
 0xbd8   :  { %v16839_v39 = vpop.f32.mrb[20].mxu1  ;;  %16849 = vmatprep.mubr.msk.f32.mxu1 %vm445_vm1, %v1980_v37 }
 0xbd9   :  { %v2073_v40 = vadd.f32 %v16839_v39, %v15003_v38  ;;  %v2067_v41 = vpop.f32.mrb[21].mxu1  ;;  %v15045_v39 = vld [vmem:[%s19371_s29 + $0x4] ss:$0 sm:$0xff] }
 0xbda   :  { %v2068_v42 = vadd.f32 %v15003_v38, %v2067_v41 }
 0xbdc   :  { %v18083_v44 = vpack.c.bf16 %v2073_v40, %v2068_v42  ;;  %v16844_v46 = vpop.f32.mrb[22].mxu1  ;;  %18104 = vmatpush3.bf16.xpose.msk.msra.mxu0 %vm19389_vm2, %v18099_v14  ;;  %v15064_v14 = vld [vmem:[%s19453_s18 + $0x118] sm:$0xff] }
 0xbdd   :  { %v2161_v47 = vadd.f32 %v16844_v46, %v15009_v43  ;;  %v2155_v48 = vpop.f32.mrb[23].mxu1  ;;  %18107 = vmatprep.subr.msk.bf16.mxu0 %vm19389_vm2, %v18105_v17  ;;  %v18133_v15 = vpack.c.bf16 %v15064_v14, %v15063_v12 }
 0xbde   :  { %v2156_v49 = vadd.f32 %v15009_v43, %v2155_v48  ;;  %18085 = vmatprep.subr.msk.bf16.mxu1 %vm19389_vm2, %v18083_v44 }
 0xbdf   :  { %18088 = vmatpush3.bf16.xpose.msk.msra.mxu1 %vm19389_vm2, %v18083_v44  ;;  %v15051_v44 = vld [vmem:[%s19381_s7 + $0x4] ss:$0 sm:$0xff] }
 0xbe0   :  { %v18089_v50 = vpack.c.bf16 %v2161_v47, %v2156_v49 }
 0xbe2   :  { %18090 = vmatprep.subr.bf16.mxu1 %v18089_v50 }
 0xbe4   :  { %18110 = vmatpush3.bf16.xpose.msk.msra.mxu0 %vm19389_vm2, %v18105_v17  ;;  %v15066_v17 = vld [vmem:[%s19453_s18 + $0x128] sm:$0xff] }
 0xbe5   :  { %18113 = vmatprep.subr.msk.bf16.mxu0 %vm19389_vm2, %v18111_v20  ;;  %v18139_v18 = vpack.c.bf16 %v15066_v17, %v15065_v16  ;;  %v15108_v16 = vld [vmem:[%s19453_s18 + $0x168] sm:$0xff] }
 0xbe6   :  { %16850 = vmatmul.mubr.msk.f32.vlgmr.msra.gmra.mrb[24].mxu1 %vm445_vm1, %v1985_v51 }
 0xbe7   :  { %18092 = vmatpush3.bf16.msra.mxu1 %v18089_v50 }
 0xbe8   :  { %16878 = vmatprep.subr.msk.mxu1 %vm134_vm0, %v15037_v8 }
 0xbec   :  { %18116 = vmatpush3.bf16.xpose.msk.msra.mxu0 %vm19389_vm2, %v18111_v20  ;;  %v15068_v20 = vld [vmem:[%s19453_s18 + $0x138] sm:$0xff] }
 0xbed   :  { %18129 = vmatprep.subr.msk.bf16.mxu0 %vm19389_vm2, %v18127_v13 }
 0xcb9   :  { %v16851_v52 = vpop.f32.mrb[24].mxu1 }
 0xcba   :  { %v2252_v53 = vmul.f32 0.35355338, %v16851_v52  ;;  %v2242_v54 = vpop.f32.mrb[25].mxu1 }
 0xcbb   :  { %v2251_v55 = vmul.f32 0.35355338, %v2242_v54 }
 0xcbc   :  { %v2254_v56 = vadd.f32 %v2252_v53, %v19409_v59 }
 0xcbd   :  { %v2253_v57 = vadd.f32 %v2251_v55, %v19412_v62 }
 0xcbe   :  { %v2258_v58 = vsel %vm537_vm3, %v2254_v56, -inf }
 0xcbf   :  { %2259 = vmax.xlane.f32.xlu1 %v2258_v58  ;;  %v2255_v60 = vsel %vm537_vm3, %v2253_v57, -inf }
 0xcc0   :  { %2256 = vmax.xlane.f32.xlu0 %v2255_v60 }
 0xd4c   :  { %v2260_v61 = vpop.xlane.xlu1 %2259 }
 0xd4d   :  { %v2262_v63 = vsub.f32 %v2254_v56, %v2260_v61  ;;  %v2257_v0 = vpop.xlane.xlu0 %2256 }
 0xd4e   :  { %v2261_v1 = vsub.f32 %v2253_v57, %v2257_v0 }
 0xd4f   :  { %v2265_v2 = vmul.f32 1.442695, %v2262_v63 }
 0xd50   :  { %v2263_v3 = vmul.f32 1.442695, %v2261_v1 }
 0xd51   :  { %19074 = vpow2.f32 %v2265_v2 }
 0xd52   :  { %19076 = vpow2.f32 %v2263_v3 }
 0xd5b   :  { %v19075_v4 = vpop.eup %19074 }
 0xd5c   :  { %v19077_v5 = vpop.eup %19076  ;;  %v2270_v6 = vsel %vm537_vm3, %v19075_v4, 0.0 }
 0xd5d   :  { %2271 = vadd.xlane.f32.xlu1 %v2270_v6  ;;  %v2267_v7 = vsel %vm537_vm3, %v19077_v5, 0.0 }
 0xd5e   :  { %2268 = vadd.xlane.f32.xlu0 %v2267_v7 }
 0xdea   :  { %v2272_v21 = vpop.xlane.xlu1 %2271 }
 0xdeb   :  { %19078 = vrcp.f32 %v2272_v21  ;;  %v2269_v24 = vpop.xlane.xlu0 %2268  ;;  %v18145_v21 = vpack.c.bf16 %v15068_v20, %v15067_v19  ;;  %v15110_v19 = vld [vmem:[%s19453_s18 + $0x178] sm:$0xff] }
 0xdec   :  { %19080 = vrcp.f32 %v2269_v24 }
 0xdf5   :  { %v19079_v25 = vpop.eup %19078 }
 0xdf6   :  { %v19081_v23 = vpop.eup %19080  ;;  %v2276_v27 = vmul.f32 %v19079_v25, %v19075_v4 }
 0xdf7   :  { %v2275_v26 = vmul.f32 %v19081_v23, %v19077_v5 }
 0xdf9   :  { %16856 = vmatprep.mubr.msk.f32.mxu1 %vm537_vm3, %v2275_v26 }
 0xdfa   :  { %16857 = vmatmul.mubr.msk.f32.vlgmr.msra.gmra.mrb[26].mxu1 %vm537_vm3, %v2276_v27 }
 0xdfb   :  { %16879 = vmatpush3.xpose.msk.msra.mxu1 %vm134_vm0, %v15037_v8  ;;  %16880 = vmatprep.mubr.msk.f32.mxu1 %vm134_vm0, %v19346_v30 }
 0xdfc   :  { %16883 = vmatprep.subr.msk.mxu1 %vm134_vm0, %v15043_v28 }
 0xdfe   :  { %16881 = vmatmul.mubr.msk.f32.vlgmr.msra.gmra.mrb[28].mxu1 %vm134_vm0, %v19352_v33 }
 0xdff   :  { %16884 = vmatpush3.xpose.msk.msra.mxu1 %vm134_vm0, %v15043_v28  ;;  %16885 = vmatprep.mubr.msk.f32.mxu1 %vm134_vm0, %v19346_v30 }
 0xe00   :  { %16888 = vmatprep.subr.msk.mxu1 %vm134_vm0, %v15049_v22 }
 0xe02   :  { %16886 = vmatmul.mubr.msk.f32.vlgmr.msra.gmra.mrb[30].mxu1 %vm134_vm0, %v19352_v33 }
 0xe03   :  { %16889 = vmatpush3.xpose.msk.msra.mxu1 %vm134_vm0, %v15049_v22  ;;  %16890 = vmatprep.mubr.msk.f32.mxu1 %vm134_vm0, %v19346_v30  ;;  %v15085_v22 = vld [vmem:[%s19323_s13 + $0x28] sm:$0xff] }
 0xe06   :  { %16891 = vmatmul.mubr.msk.f32.vlgmr.msra.gmra.mrb[32].mxu1 %vm134_vm0, %v19352_v33 }
 0xecd   :  { %v16858_v32 = vpop.f32.mrb[26].mxu1 }
 0xece   :  { %v2349_v34 = vpop.f32.mrb[27].mxu1 }
 0xecf   :  { %16875 = vmatprep.mubr.msk.f32.mxu0 %vm445_vm1, %v2349_v34 }
 0xed0   :  { %16876 = vmatmul.mubr.msk.f32.vlgmr.msra.gmra.mrb[14].mxu0 %vm445_vm1, %v16858_v32  ;;  %v15091_v32 = vld [vmem:[%s19328_s17 + $0x28] sm:$0xff] }
 0xed1   :  { %v16882_v36 = vpop.f32.mrb[28].mxu1  ;;  %18132 = vmatpush3.bf16.xpose.msk.msra.mxu0 %vm19389_vm2, %v18127_v13  ;;  %v15106_v13 = vld [vmem:[%s19453_s18 + $0x158] sm:$0xff] }
 0xed2   :  { %v2553_v37 = vpop.f32.mrb[29].mxu1  ;;  %v2559_v52 = vadd.f32 %v16882_v36, %v15039_v35  ;;  %18135 = vmatprep.subr.msk.bf16.mxu0 %vm19389_vm2, %v18133_v15  ;;  %v15081_v36 = vld [vmem:[%s19376_s3 + $0x5] ss:$0 sm:$0xff]  ;;  %v18167_v14 = vpack.c.bf16 %v15106_v13, %v15105_v11  ;;  %v15146_v11 = vld [vmem:[%s19453_s18 + $0x188] sm:$0xff] }
 0xed3   :  { %v2554_v38 = vadd.f32 %v15039_v35, %v2553_v37 }
 0xed5   :  { %v16887_v40 = vpop.f32.mrb[30].mxu1  ;;  %16897 = vmatprep.mubr.msk.f32.mxu1 %vm445_vm1, %v2554_v38 }
 0xed6   :  { %v2647_v41 = vadd.f32 %v16887_v40, %v15045_v39  ;;  %v2641_v42 = vpop.f32.mrb[31].mxu1  ;;  %v15087_v40 = vld [vmem:[%s19371_s29 + $0x5] ss:$0 sm:$0xff] }
 0xed7   :  { %v2642_v43 = vadd.f32 %v15045_v39, %v2641_v42 }
 0xed9   :  { %v18117_v46 = vpack.c.bf16 %v2647_v41, %v2642_v43  ;;  %v16892_v47 = vpop.f32.mrb[32].mxu1  ;;  %18138 = vmatpush3.bf16.xpose.msk.msra.mxu0 %vm19389_vm2, %v18133_v15  ;;  %v15107_v15 = vld [vmem:[%s19453_s18 + $0x160] sm:$0xff] }
 0xeda   :  { %v2735_v48 = vadd.f32 %v16892_v47, %v15051_v44  ;;  %v2729_v49 = vpop.f32.mrb[33].mxu1  ;;  %18141 = vmatprep.subr.msk.bf16.mxu0 %vm19389_vm2, %v18139_v18  ;;  %v18173_v17 = vpack.c.bf16 %v15108_v16, %v15107_v15  ;;  %v15149_v16 = vld [vmem:[%s19453_s18 + $0x1a0] sm:$0xff] }
 0xedb   :  { %v2730_v50 = vadd.f32 %v15051_v44, %v2729_v49  ;;  %18119 = vmatprep.subr.msk.bf16.mxu1 %vm19389_vm2, %v18117_v46 }
 0xedc   :  { %18122 = vmatpush3.bf16.xpose.msk.msra.mxu1 %vm19389_vm2, %v18117_v46  ;;  %v15093_v46 = vld [vmem:[%s19381_s7 + $0x5] ss:$0 sm:$0xff] }
 0xedd   :  { %v18123_v51 = vpack.c.bf16 %v2735_v48, %v2730_v50 }
 0xedf   :  { %18124 = vmatprep.subr.bf16.mxu1 %v18123_v51 }
 0xee1   :  { %18144 = vmatpush3.bf16.xpose.msk.msra.mxu0 %vm19389_vm2, %v18139_v18  ;;  %v15109_v18 = vld [vmem:[%s19453_s18 + $0x170] sm:$0xff] }
 0xee2   :  { %18147 = vmatprep.subr.msk.bf16.mxu0 %vm19389_vm2, %v18145_v21  ;;  %v18179_v20 = vpack.c.bf16 %v15110_v19, %v15109_v18  ;;  %v15151_v19 = vld [vmem:[%s19453_s18 + $0x1b0] sm:$0xff] }
 0xee3   :  { %16898 = vmatmul.mubr.msk.f32.vlgmr.msra.gmra.mrb[34].mxu1 %vm445_vm1, %v2559_v52 }
 0xee4   :  { %18126 = vmatpush3.bf16.msra.mxu1 %v18123_v51 }
 0xee5   :  { %16926 = vmatprep.subr.msk.mxu1 %vm134_vm0, %v15079_v9 }
 0xee9   :  { %18150 = vmatpush3.bf16.xpose.msk.msra.mxu0 %vm19389_vm2, %v18145_v21 }
 0xfb6   :  { %v16899_v53 = vpop.f32.mrb[34].mxu1 }
 0xfb7   :  { %v2826_v54 = vmul.f32 0.35355338, %v16899_v53  ;;  %v2816_v55 = vpop.f32.mrb[35].mxu1 }
 0xfb8   :  { %v2825_v56 = vmul.f32 0.35355338, %v2816_v55 }
 0xfb9   :  { %v2828_v57 = vadd.f32 %v2826_v54, %v19409_v59 }
 0xfba   :  { %v2827_v58 = vadd.f32 %v2825_v56, %v19412_v62 }
 0xfbb   :  { %v2832_v60 = vsel %vm537_vm3, %v2828_v57, -inf }
 0xfbc   :  { %2833 = vmax.xlane.f32.xlu1 %v2832_v60  ;;  %v2829_v61 = vsel %vm537_vm3, %v2827_v58, -inf }
 0xfbd   :  { %2830 = vmax.xlane.f32.xlu0 %v2829_v61 }
0x1049   :  { %v2834_v63 = vpop.xlane.xlu1 %2833 }
0x104a   :  { %v2836_v0 = vsub.f32 %v2828_v57, %v2834_v63  ;;  %v2831_v1 = vpop.xlane.xlu0 %2830 }
0x104b   :  { %v2835_v2 = vsub.f32 %v2827_v58, %v2831_v1 }
0x104c   :  { %v2839_v3 = vmul.f32 1.442695, %v2836_v0 }
0x104d   :  { %v2837_v4 = vmul.f32 1.442695, %v2835_v2 }
0x104e   :  { %19082 = vpow2.f32 %v2839_v3 }
0x104f   :  { %19084 = vpow2.f32 %v2837_v4 }
0x1058   :  { %v19083_v5 = vpop.eup %19082 }
0x1059   :  { %v19085_v6 = vpop.eup %19084  ;;  %v2844_v7 = vsel %vm537_vm3, %v19083_v5, 0.0 }
0x105a   :  { %2845 = vadd.xlane.f32.xlu1 %v2844_v7  ;;  %v2841_v8 = vsel %vm537_vm3, %v19085_v6, 0.0 }
0x105b   :  { %2842 = vadd.xlane.f32.xlu0 %v2841_v8  ;;  %v15121_v8 = vld [vmem:[%s19318_s9 + $0x30] sm:$0xff] }
0x10e7   :  { %v2846_v24 = vpop.xlane.xlu1 %2845 }
0x10e8   :  { %19086 = vrcp.f32 %v2846_v24  ;;  %v2843_v25 = vpop.xlane.xlu0 %2842 }
0x10e9   :  { %19088 = vrcp.f32 %v2843_v25 }
0x10f2   :  { %v19087_v23 = vpop.eup %19086 }
0x10f3   :  { %v19089_v26 = vpop.eup %19088  ;;  %v2850_v28 = vmul.f32 %v19087_v23, %v19083_v5 }
0x10f4   :  { %v2849_v27 = vmul.f32 %v19089_v26, %v19085_v6 }
0x10f6   :  { %16904 = vmatprep.mubr.msk.f32.mxu1 %vm537_vm3, %v2849_v27 }
0x10f7   :  { %16905 = vmatmul.mubr.msk.f32.vlgmr.msra.gmra.mrb[36].mxu1 %vm537_vm3, %v2850_v28  ;;  %v15127_v28 = vld [vmem:[%s19323_s13 + $0x30] sm:$0xff] }
0x10f8   :  { %16927 = vmatpush3.xpose.msk.msra.mxu1 %vm134_vm0, %v15079_v9  ;;  %16928 = vmatprep.mubr.msk.f32.mxu1 %vm134_vm0, %v19346_v30  ;;  %v15103_v9 = vld [vmem:[%s19453_s18 + $0x140] sm:$0xff] }
0x10f9   :  { %16931 = vmatprep.subr.msk.mxu1 %vm134_vm0, %v15085_v22  ;;  %v18161_v12 = vpack.c.bf16 %v15104_v10, %v15103_v9  ;;  %v15163_v9 = vld [vmem:[%s19318_s9 + $0x38] sm:$0xff]  ;;  %v15145_v10 = vld [vmem:[%s19453_s18 + $0x180] sm:$0xff] }
0x10fa   :  { %v18195_v13 = vpack.c.bf16 %v15146_v11, %v15145_v10  ;;  %v15187_v10 = vld [vmem:[%s19453_s18 + $0x1c0] sm:$0xff]  ;;  %v15188_v11 = vld [vmem:[%s19453_s18 + $0x1c8] sm:$0xff] }
0x10fb   :  { %16929 = vmatmul.mubr.msk.f32.vlgmr.msra.gmra.mrb[38].mxu1 %vm134_vm0, %v19352_v33  ;;  %18163 = vmatprep.subr.msk.bf16.mxu0 %vm19389_vm2, %v18161_v12 }
0x10fc   :  { %16932 = vmatpush3.xpose.msk.msra.mxu1 %vm134_vm0, %v15085_v22  ;;  %16933 = vmatprep.mubr.msk.f32.mxu1 %vm134_vm0, %v19346_v30  ;;  %v15133_v22 = vld [vmem:[%s19328_s17 + $0x30] sm:$0xff] }
0x10fd   :  { %16936 = vmatprep.subr.msk.mxu1 %vm134_vm0, %v15091_v32 }
0x10ff   :  { %16934 = vmatmul.mubr.msk.f32.vlgmr.msra.gmra.mrb[40].mxu1 %vm134_vm0, %v19352_v33 }
0x1100   :  { %16937 = vmatpush3.xpose.msk.msra.mxu1 %vm134_vm0, %v15091_v32  ;;  %16938 = vmatprep.mubr.msk.f32.mxu1 %vm134_vm0, %v19346_v30 }
0x1103   :  { %16939 = vmatmul.mubr.msk.f32.vlgmr.msra.gmra.mrb[42].mxu1 %vm134_vm0, %v19352_v33 }
0x11ca   :  { %v16906_v34 = vpop.f32.mrb[36].mxu1 }
0x11cb   :  { %v2923_v35 = vpop.f32.mrb[37].mxu1 }
0x11cc   :  { %16923 = vmatprep.mubr.msk.f32.mxu0 %vm445_vm1, %v2923_v35  ;;  %v15123_v35 = vld [vmem:[%s19376_s3 + $0x6] ss:$0 sm:$0xff] }
0x11cd   :  { %16924 = vmatmul.mubr.msk.f32.vlgmr.msra.gmra.mrb[14].mxu0 %vm445_vm1, %v16906_v34 }
0x11ce   :  { %v16930_v37 = vpop.f32.mrb[38].mxu1  ;;  %18166 = vmatpush3.bf16.xpose.msk.msra.mxu0 %vm19389_vm2, %v18161_v12  ;;  %v15147_v12 = vld [vmem:[%s19453_s18 + $0x190] sm:$0xff] }
0x11cf   :  { %v3127_v38 = vpop.f32.mrb[39].mxu1  ;;  %v3133_v53 = vadd.f32 %v16930_v37, %v15081_v36  ;;  %18169 = vmatprep.subr.msk.bf16.mxu0 %vm19389_vm2, %v18167_v14 }
0x11d0   :  { %v3128_v39 = vadd.f32 %v15081_v36, %v3127_v38 }
0x11d2   :  { %v16935_v41 = vpop.f32.mrb[40].mxu1  ;;  %16945 = vmatprep.mubr.msk.f32.mxu1 %vm445_vm1, %v3128_v39  ;;  %v15129_v39 = vld [vmem:[%s19371_s29 + $0x6] ss:$0 sm:$0xff] }
0x11d3   :  { %v3221_v42 = vadd.f32 %v16935_v41, %v15087_v40  ;;  %v3215_v43 = vpop.f32.mrb[41].mxu1 }
0x11d4   :  { %v3216_v44 = vadd.f32 %v15087_v40, %v3215_v43 }
0x11d6   :  { %v18151_v47 = vpack.c.bf16 %v3221_v42, %v3216_v44  ;;  %v16940_v48 = vpop.f32.mrb[42].mxu1  ;;  %18172 = vmatpush3.bf16.xpose.msk.msra.mxu0 %vm19389_vm2, %v18167_v14  ;;  %v15135_v44 = vld [vmem:[%s19381_s7 + $0x6] ss:$0 sm:$0xff]  ;;  %v15148_v14 = vld [vmem:[%s19453_s18 + $0x198] sm:$0xff] }
0x11d7   :  { %v3309_v49 = vadd.f32 %v16940_v48, %v15093_v46  ;;  %v3303_v50 = vpop.f32.mrb[43].mxu1  ;;  %18175 = vmatprep.subr.msk.bf16.mxu0 %vm19389_vm2, %v18173_v17  ;;  %v18201_v15 = vpack.c.bf16 %v15148_v14, %v15147_v12  ;;  %v15189_v12 = vld [vmem:[%s19453_s18 + $0x1d0] sm:$0xff]  ;;  %v15190_v14 = vld [vmem:[%s19453_s18 + $0x1d8] sm:$0xff] }
0x11d8   :  { %v3304_v51 = vadd.f32 %v15093_v46, %v3303_v50  ;;  %18153 = vmatprep.subr.msk.bf16.mxu1 %vm19389_vm2, %v18151_v47 }
0x11d9   :  { %18156 = vmatpush3.bf16.xpose.msk.msra.mxu1 %vm19389_vm2, %v18151_v47 }
0x11da   :  { %v18157_v52 = vpack.c.bf16 %v3309_v49, %v3304_v51 }
0x11dc   :  { %18158 = vmatprep.subr.bf16.mxu1 %v18157_v52 }
0x11de   :  { %18178 = vmatpush3.bf16.xpose.msk.msra.mxu0 %vm19389_vm2, %v18173_v17  ;;  %v15150_v17 = vld [vmem:[%s19453_s18 + $0x1a8] sm:$0xff] }
0x11df   :  { %18181 = vmatprep.subr.msk.bf16.mxu0 %vm19389_vm2, %v18179_v20  ;;  %v18207_v18 = vpack.c.bf16 %v15150_v17, %v15149_v16  ;;  %v15191_v16 = vld [vmem:[%s19453_s18 + $0x1e0] sm:$0xff]  ;;  %v15192_v17 = vld [vmem:[%s19453_s18 + $0x1e8] sm:$0xff] }
0x11e0   :  { %16946 = vmatmul.mubr.msk.f32.vlgmr.msra.gmra.mrb[44].mxu1 %vm445_vm1, %v3133_v53 }
0x11e1   :  { %18160 = vmatpush3.bf16.msra.mxu1 %v18157_v52 }
0x11e2   :  { %16974 = vmatprep.subr.msk.mxu1 %vm134_vm0, %v15121_v8 }
0x11e6   :  { %18184 = vmatpush3.bf16.xpose.msk.msra.mxu0 %vm19389_vm2, %v18179_v20  ;;  %v15152_v20 = vld [vmem:[%s19453_s18 + $0x1b8] sm:$0xff] }
0x11e7   :  { %18197 = vmatprep.subr.msk.bf16.mxu0 %vm19389_vm2, %v18195_v13 }
0x12b3   :  { %v16947_v54 = vpop.f32.mrb[44].mxu1 }
0x12b4   :  { %v3400_v55 = vmul.f32 0.35355338, %v16947_v54  ;;  %v3390_v56 = vpop.f32.mrb[45].mxu1 }
0x12b5   :  { %v3399_v57 = vmul.f32 0.35355338, %v3390_v56 }
0x12b6   :  { %v3402_v58 = vadd.f32 %v3400_v55, %v19409_v59 }
0x12b7   :  { %v3401_v60 = vadd.f32 %v3399_v57, %v19412_v62  ;;  %v19802_v57 = vld [vmem:[%s19406_s12 + $0x8] sm:$0xff] }
0x12b8   :  { %v3406_v61 = vsel %vm537_vm3, %v3402_v58, -inf }
0x12b9   :  { %3407 = vmax.xlane.f32.xlu1 %v3406_v61  ;;  %v3403_v63 = vsel %vm537_vm3, %v3401_v60, -inf }
0x12ba   :  { %3404 = vmax.xlane.f32.xlu0 %v3403_v63 }
0x1346   :  { %v3408_v0 = vpop.xlane.xlu1 %3407 }
0x1347   :  { %v3410_v1 = vsub.f32 %v3402_v58, %v3408_v0  ;;  %v3405_v2 = vpop.xlane.xlu0 %3404 }
0x1348   :  { %v3409_v3 = vsub.f32 %v3401_v60, %v3405_v2  ;;  %v19806_v60 = vld [vmem:[%s19406_s12] sm:$0xff] }
0x1349   :  { %v3413_v4 = vmul.f32 1.442695, %v3410_v1 }
0x134a   :  { %v3411_v5 = vmul.f32 1.442695, %v3409_v3 }
0x134b   :  { %19090 = vpow2.f32 %v3413_v4 }
0x134c   :  { %19092 = vpow2.f32 %v3411_v5 }
0x1355   :  { %v19091_v59 = vpop.eup %19090 }
0x1356   :  { %v19093_v62 = vpop.eup %19092  ;;  %v3418_v6 = vsel %vm537_vm3, %v19091_v59, 0.0 }
0x1357   :  { %3419 = vadd.xlane.f32.xlu1 %v3418_v6  ;;  %v3415_v7 = vsel %vm537_vm3, %v19093_v62, 0.0 }
0x1358   :  { %3416 = vadd.xlane.f32.xlu0 %v3415_v7 }
0x13e4   :  { %v3420_v21 = vpop.xlane.xlu1 %3419 }
0x13e5   :  { %19094 = vrcp.f32 %v3420_v21  ;;  %v3417_v24 = vpop.xlane.xlu0 %3416  ;;  %v18213_v21 = vpack.c.bf16 %v15152_v20, %v15151_v19  ;;  %v15193_v19 = vld [vmem:[%s19453_s18 + $0x1f0] sm:$0xff]  ;;  %v15194_v20 = vld [vmem:[%s19453_s18 + $0x1f8] sm:$0xff] }
0x13e6   :  { %19096 = vrcp.f32 %v3417_v24 }
0x13ef   :  { %v19095_v25 = vpop.eup %19094 }
0x13f0   :  { %v19097_v23 = vpop.eup %19096  ;;  %v3424_v27 = vmul.f32 %v19095_v25, %v19091_v59 }
0x13f1   :  { %v3423_v26 = vmul.f32 %v19097_v23, %v19093_v62 }
0x13f3   :  { %16952 = vmatprep.mubr.msk.f32.mxu1 %vm537_vm3, %v3423_v26 }
0x13f4   :  { %16953 = vmatmul.mubr.msk.f32.vlgmr.msra.gmra.mrb[46].mxu1 %vm537_vm3, %v3424_v27 }
0x13f5   :  { %16975 = vmatpush3.xpose.msk.msra.mxu1 %vm134_vm0, %v15121_v8  ;;  %16976 = vmatprep.mubr.msk.f32.mxu1 %vm134_vm0, %v19346_v30 }
0x13f6   :  { %16979 = vmatprep.subr.msk.mxu1 %vm134_vm0, %v15127_v28 }
0x13f8   :  { %16977 = vmatmul.mubr.msk.f32.vlgmr.msra.gmra.mrb[48].mxu1 %vm134_vm0, %v19352_v33 }
0x13f9   :  { %16980 = vmatpush3.xpose.msk.msra.mxu1 %vm134_vm0, %v15127_v28  ;;  %16981 = vmatprep.mubr.msk.f32.mxu1 %vm134_vm0, %v19346_v30 }
0x13fa   :  { %16984 = vmatprep.subr.msk.mxu1 %vm134_vm0, %v15133_v22 }
0x13fc   :  { %16982 = vmatmul.mubr.msk.f32.vlgmr.msra.gmra.mrb[50].mxu1 %vm134_vm0, %v19352_v33 }
0x13fd   :  { %16985 = vmatpush3.xpose.msk.msra.mxu1 %vm134_vm0, %v15133_v22  ;;  %16986 = vmatprep.mubr.msk.f32.mxu1 %vm134_vm0, %v19346_v30  ;;  %v15169_v22 = vld [vmem:[%s19323_s13 + $0x38] sm:$0xff] }
0x1400   :  { %16987 = vmatmul.mubr.msk.f32.vlgmr.msra.gmra.mrb[52].mxu1 %vm134_vm0, %v19352_v33 }
0x14c7   :  { %v16954_v32 = vpop.f32.mrb[46].mxu1 }
0x14c8   :  { %v3497_v34 = vpop.f32.mrb[47].mxu1 }
0x14c9   :  { %16971 = vmatprep.mubr.msk.f32.mxu0 %vm445_vm1, %v3497_v34 }
0x14ca   :  { %16972 = vmatmul.mubr.msk.f32.vlgmr.msra.gmra.mrb[14].mxu0 %vm445_vm1, %v16954_v32  ;;  %v15175_v32 = vld [vmem:[%s19328_s17 + $0x38] sm:$0xff] }
0x14cb   :  { %v16978_v36 = vpop.f32.mrb[48].mxu1  ;;  %18200 = vmatpush3.bf16.xpose.msk.msra.mxu0 %vm19389_vm2, %v18195_v13  ;;  %v18229_v13 = vpack.c.bf16 %v15188_v11, %v15187_v10  ;;  %v4837_v10 = vld [vmem:[%s19920_s26 + $0x68] sm:$0xff] }
0x14cc   :  { %v3701_v37 = vpop.f32.mrb[49].mxu1  ;;  %v3707_v52 = vadd.f32 %v16978_v36, %v15123_v35  ;;  %18203 = vmatprep.subr.msk.bf16.mxu0 %vm19389_vm2, %v18201_v15  ;;  %v15165_v36 = vld [vmem:[%s19376_s3 + $0x7] ss:$0 sm:$0xff] }
0x14cd   :  { %v3702_v38 = vadd.f32 %v15123_v35, %v3701_v37 }
0x14cf   :  { %v16983_v40 = vpop.f32.mrb[50].mxu1  ;;  %16993 = vmatprep.mubr.msk.f32.mxu1 %vm445_vm1, %v3702_v38 }
0x14d0   :  { %v3795_v41 = vadd.f32 %v16983_v40, %v15129_v39  ;;  %v3789_v42 = vpop.f32.mrb[51].mxu1  ;;  %v15171_v40 = vld [vmem:[%s19371_s29 + $0x7] ss:$0 sm:$0xff] }
0x14d1   :  { %v3790_v43 = vadd.f32 %v15129_v39, %v3789_v42 }
0x14d3   :  { %v18185_v46 = vpack.c.bf16 %v3795_v41, %v3790_v43  ;;  %v16988_v47 = vpop.f32.mrb[52].mxu1  ;;  %18206 = vmatpush3.bf16.xpose.msk.msra.mxu0 %vm19389_vm2, %v18201_v15  ;;  %v18235_v15 = vpack.c.bf16 %v15190_v14, %v15189_v12  ;;  %v4838_v12 = vld [vmem:[%s19920_s26 + $0x70] sm:$0xff] }
0x14d4   :  { %v3883_v48 = vadd.f32 %v16988_v47, %v15135_v44  ;;  %v3877_v49 = vpop.f32.mrb[53].mxu1  ;;  %18209 = vmatprep.subr.msk.bf16.mxu0 %vm19389_vm2, %v18207_v18 }
0x14d5   :  { %v3878_v50 = vadd.f32 %v15135_v44, %v3877_v49  ;;  %18187 = vmatprep.subr.msk.bf16.mxu1 %vm19389_vm2, %v18185_v46 }
0x14d6   :  { %18190 = vmatpush3.bf16.xpose.msk.msra.mxu1 %vm19389_vm2, %v18185_v46  ;;  %v15177_v46 = vld [vmem:[%s19381_s7 + $0x7] ss:$0 sm:$0xff] }
0x14d7   :  { %v18191_v51 = vpack.c.bf16 %v3883_v48, %v3878_v50 }
0x14d9   :  { %18192 = vmatprep.subr.bf16.mxu1 %v18191_v51 }
0x14db   :  { %18212 = vmatpush3.bf16.xpose.msk.msra.mxu0 %vm19389_vm2, %v18207_v18  ;;  %v18241_v18 = vpack.c.bf16 %v15192_v17, %v15191_v16  ;;  %v4995_v16 = vld [vmem:[%s19981_s1 + $0x8] sm:$0xff] }
0x14dc   :  { %18215 = vmatprep.subr.msk.bf16.mxu0 %vm19389_vm2, %v18213_v21 }
0x14dd   :  { %16994 = vmatmul.mubr.msk.f32.vlgmr.msra.gmra.mrb[54].mxu1 %vm445_vm1, %v3707_v52 }
0x14de   :  { %18194 = vmatpush3.bf16.msra.mxu1 %v18191_v51 }
0x14df   :  { %17022 = vmatprep.subr.msk.mxu1 %vm134_vm0, %v15163_v9 }
0x14e3   :  { %18218 = vmatpush3.bf16.xpose.msk.msra.mxu0 %vm19389_vm2, %v18213_v21  ;;  %v18247_v21 = vpack.c.bf16 %v15194_v20, %v15193_v19 }
0x14e4   :  { %18231 = vmatprep.subr.msk.bf16.mxu0 %vm19389_vm2, %v18229_v13 }
0x15b0   :  { %v16995_v53 = vpop.f32.mrb[54].mxu1 }
0x15b1   :  { %v3974_v54 = vmul.f32 0.35355338, %v16995_v53  ;;  %v3964_v55 = vpop.f32.mrb[55].mxu1 }
0x15b2   :  { %v3973_v56 = vmul.f32 0.35355338, %v3964_v55 }
0x15b3   :  { %v3976_v58 = vadd.f32 %v19802_v57, %v3974_v54 }
0x15b4   :  { %v3975_v61 = vadd.f32 %v19806_v60, %v3973_v56 }
0x15b5   :  { %v3980_v63 = vsel %vm537_vm3, %v3976_v58, -inf }
0x15b6   :  { %3981 = vmax.xlane.f32.xlu1 %v3980_v63  ;;  %v3977_v0 = vsel %vm537_vm3, %v3975_v61, -inf }
0x15b7   :  { %3978 = vmax.xlane.f32.xlu0 %v3977_v0 }
0x1643   :  { %v3982_v1 = vpop.xlane.xlu1 %3981 }
0x1644   :  { %v3984_v2 = vsub.f32 %v3976_v58, %v3982_v1  ;;  %v3979_v3 = vpop.xlane.xlu0 %3978 }
0x1645   :  { %v3983_v4 = vsub.f32 %v3975_v61, %v3979_v3 }
0x1646   :  { %v3987_v5 = vmul.f32 1.442695, %v3984_v2 }
0x1647   :  { %v3985_v59 = vmul.f32 1.442695, %v3983_v4 }
0x1648   :  { %19098 = vpow2.f32 %v3987_v5 }
0x1649   :  { %19100 = vpow2.f32 %v3985_v59 }
0x1652   :  { %v19099_v62 = vpop.eup %19098 }
0x1653   :  { %v19101_v6 = vpop.eup %19100  ;;  %v3992_v7 = vsel %vm537_vm3, %v19099_v62, 0.0 }
0x1654   :  { %3993 = vadd.xlane.f32.xlu1 %v3992_v7  ;;  %v3989_v8 = vsel %vm537_vm3, %v19101_v6, 0.0 }
0x1655   :  { %3990 = vadd.xlane.f32.xlu0 %v3989_v8 }
0x16e1   :  { %v3994_v24 = vpop.xlane.xlu1 %3993 }
0x16e2   :  { %19102 = vrcp.f32 %v3994_v24  ;;  %v3991_v25 = vpop.xlane.xlu0 %3990 }
0x16e3   :  { %19104 = vrcp.f32 %v3991_v25 }
0x16ec   :  { %v19103_v23 = vpop.eup %19102 }
0x16ed   :  { %v19105_v26 = vpop.eup %19104  ;;  %v3998_v28 = vmul.f32 %v19103_v23, %v19099_v62 }
0x16ee   :  { %v3997_v27 = vmul.f32 %v19105_v26, %v19101_v6 }
0x16f0   :  { %17000 = vmatprep.mubr.msk.f32.mxu1 %vm537_vm3, %v3997_v27 }
0x16f1   :  { %17001 = vmatmul.mubr.msk.f32.vlgmr.msra.gmra.mrb[56].mxu1 %vm537_vm3, %v3998_v28 }
0x16f2   :  { %17023 = vmatpush3.xpose.msk.msra.mxu1 %vm134_vm0, %v15163_v9  ;;  %17024 = vmatprep.mubr.msk.f32.mxu1 %vm134_vm0, %v19346_v30 }
0x16f3   :  { %17027 = vmatprep.subr.msk.mxu1 %vm134_vm0, %v15169_v22 }
0x16f5   :  { %17025 = vmatmul.mubr.msk.f32.vlgmr.msra.gmra.mrb[58].mxu1 %vm134_vm0, %v19352_v33 }
0x16f6   :  { %17028 = vmatpush3.xpose.msk.msra.mxu1 %vm134_vm0, %v15169_v22  ;;  %17029 = vmatprep.mubr.msk.f32.mxu1 %vm134_vm0, %v19346_v30 }
0x16f7   :  { %17032 = vmatprep.subr.msk.mxu1 %vm134_vm0, %v15175_v32 }
0x16f9   :  { %17030 = vmatmul.mubr.msk.f32.vlgmr.msra.gmra.mrb[60].mxu1 %vm134_vm0, %v19352_v33 }
0x16fa   :  { %17033 = vmatpush3.xpose.msk.msra.mxu1 %vm134_vm0, %v15175_v32  ;;  %17034 = vmatprep.mubr.msk.f32.mxu1 %vm134_vm0, %v19346_v30 }
0x16fd   :  { %17035 = vmatmul.mubr.msk.f32.vlgmr.msra.gmra.mrb[62].mxu1 %vm134_vm0, %v19352_v33 }
0x17c4   :  { %v17002_v34 = vpop.f32.mrb[56].mxu1 }
0x17c5   :  { %v4071_v35 = vpop.f32.mrb[57].mxu1 }
0x17c6   :  { %17019 = vmatprep.mubr.msk.f32.mxu0 %vm445_vm1, %v4071_v35 }
0x17c7   :  { %17020 = vmatmul.mubr.msk.f32.vlgmr.msra.gmra.mrb[14].mxu0 %vm445_vm1, %v17002_v34  ;;  %v15205_v34 = vld [vmem:[%s19908_s22] ss:$0 sm:$0xff] }
0x17c8   :  { %v17026_v37 = vpop.f32.mrb[58].mxu1  ;;  %18234 = vmatpush3.bf16.xpose.msk.msra.mxu0 %vm19389_vm2, %v18229_v13  ;;  %v4839_v13 = vld [vmem:[%s19920_s26 + $0x78] sm:$0xff] }
0x17c9   :  { %v4275_v38 = vpop.f32.mrb[59].mxu1  ;;  %v4281_v53 = vadd.f32 %v17026_v37, %v15165_v36  ;;  %18237 = vmatprep.subr.msk.bf16.mxu0 %vm19389_vm2, %v18235_v15  ;;  %v18295_v14 = vpack.c.bf16 %v4839_v13, %v4838_v12 }
0x17ca   :  { %v4276_v39 = vadd.f32 %v15165_v36, %v4275_v38 }
0x17cc   :  { %v17031_v41 = vpop.f32.mrb[60].mxu1  ;;  %17041 = vmatprep.mubr.msk.f32.mxu1 %vm445_vm1, %v4276_v39 }
0x17cd   :  { %v4369_v42 = vadd.f32 %v17031_v41, %v15171_v40  ;;  %v4363_v43 = vpop.f32.mrb[61].mxu1 }
0x17ce   :  { %v4364_v44 = vadd.f32 %v15171_v40, %v4363_v43 }
0x17d0   :  { %v18219_v47 = vpack.c.bf16 %v4369_v42, %v4364_v44  ;;  %v17036_v48 = vpop.f32.mrb[62].mxu1  ;;  %18240 = vmatpush3.bf16.xpose.msk.msra.mxu0 %vm19389_vm2, %v18235_v15  ;;  %v4994_v15 = vld [vmem:[%s19981_s1] sm:$0xff] }
0x17d1   :  { %v4457_v49 = vadd.f32 %v17036_v48, %v15177_v46  ;;  %v4451_v50 = vpop.f32.mrb[63].mxu1  ;;  %18243 = vmatprep.subr.msk.bf16.mxu0 %vm19389_vm2, %v18241_v18  ;;  %v18301_v17 = vpack.c.bf16 %v4995_v16, %v4994_v15 }
0x17d2   :  { %v4452_v51 = vadd.f32 %v15177_v46, %v4451_v50  ;;  %18221 = vmatprep.subr.msk.bf16.mxu1 %vm19389_vm2, %v18219_v47  ;;  %v4829_v50 = vld [vmem:[%s19920_s26 + $0x28] sm:$0xff] }
0x17d3   :  { %18224 = vmatpush3.bf16.xpose.msk.msra.mxu1 %vm19389_vm2, %v18219_v47  ;;  %v4827_v47 = vld [vmem:[%s19920_s26 + $0x18] sm:$0xff] }
0x17d4   :  { %v18225_v52 = vpack.c.bf16 %v4457_v49, %v4452_v51  ;;  %v4828_v49 = vld [vmem:[%s19920_s26 + $0x20] sm:$0xff] }
0x17d5   :  { %v18265_v51 = vpack.c.bf16 %v4829_v50, %v4828_v49 }
0x17d6   :  { %18226 = vmatprep.subr.bf16.mxu1 %v18225_v52 }
0x17d8   :  { %18246 = vmatpush3.bf16.xpose.msk.msra.mxu0 %vm19389_vm2, %v18241_v18 }
0x17d9   :  { %18249 = vmatprep.subr.msk.bf16.mxu0 %vm19389_vm2, %v18247_v21 }
0x17da   :  { %17042 = vmatmul.mubr.msk.f32.vlgmr.msra.gmra.mrb[64].mxu1 %vm445_vm1, %v4281_v53  ;;  %v4831_v53 = vld [vmem:[%s19920_s26 + $0x38] sm:$0xff] }
0x17db   :  { %18228 = vmatpush3.bf16.msra.mxu1 %v18225_v52  ;;  %v4830_v52 = vld [vmem:[%s19920_s26 + $0x30] sm:$0xff] }
0x17e0   :  { %18252 = vmatpush3.bf16.xpose.msk.msra.mxu0 %vm19389_vm2, %v18247_v21 }
0x18ad   :  { %v17043_v54 = vpop.f32.mrb[64].mxu1 }
0x18ae   :  { %v4548_v55 = vmul.f32 0.35355338, %v17043_v54  ;;  %v4538_v56 = vpop.f32.mrb[65].mxu1  ;;  %v18271_v54 = vpack.c.bf16 %v4831_v53, %v4830_v52 }
0x18af   :  { %v4547_v58 = vmul.f32 0.35355338, %v4538_v56  ;;  %v4833_v56 = vld [vmem:[%s19920_s26 + $0x48] sm:$0xff] }
0x18b0   :  { %v4550_v61 = vadd.f32 %v19802_v57, %v4548_v55  ;;  %v4832_v55 = vld [vmem:[%s19920_s26 + $0x40] sm:$0xff] }
0x18b1   :  { %v4549_v63 = vadd.f32 %v19806_v60, %v4547_v58  ;;  %v18277_v58 = vpack.c.bf16 %v4833_v56, %v4832_v55 }
0x18b2   :  { %v4554_v0 = vsel %vm537_vm3, %v4550_v61, -inf }
0x18b3   :  { %4555 = vmax.xlane.f32.xlu1 %v4554_v0  ;;  %v4551_v1 = vsel %vm537_vm3, %v4549_v63, -inf }
0x18b4   :  { %4552 = vmax.xlane.f32.xlu0 %v4551_v1 }
0x1940   :  { %v4556_v2 = vpop.xlane.xlu1 %4555 }
0x1941   :  { %v4558_v3 = vsub.f32 %v4550_v61, %v4556_v2  ;;  %v4553_v4 = vpop.xlane.xlu0 %4552  ;;  %v4834_v61 = vld [vmem:[%s19920_s26 + $0x50] sm:$0xff] }
0x1942   :  { %v4557_v5 = vsub.f32 %v4549_v63, %v4553_v4  ;;  %v4835_v63 = vld [vmem:[%s19920_s26 + $0x58] sm:$0xff] }
0x1943   :  { %v4561_v59 = vmul.f32 1.442695, %v4558_v3  ;;  %v18283_v0 = vpack.c.bf16 %v4835_v63, %v4834_v61 }
0x1944   :  { %v4559_v62 = vmul.f32 1.442695, %v4557_v5 }
0x1945   :  { %19106 = vpow2.f32 %v4561_v59 }
0x1946   :  { %19108 = vpow2.f32 %v4559_v62 }
0x194f   :  { %v19107_v6 = vpop.eup %19106 }
0x1950   :  { %v19109_v7 = vpop.eup %19108  ;;  %v4566_v8 = vsel %vm537_vm3, %v19107_v6, 0.0 }
0x1951   :  { %4567 = vadd.xlane.f32.xlu1 %v4566_v8  ;;  %v4563_v9 = vsel %vm537_vm3, %v19109_v7, 0.0 }
0x1952   :  { %4564 = vadd.xlane.f32.xlu0 %v4563_v9  ;;  %v4836_v9 = vld [vmem:[%s19920_s26 + $0x60] sm:$0xff] }
0x1953   :  { %v18289_v11 = vpack.c.bf16 %v4837_v10, %v4836_v9 }
0x19de   :  { %v4568_v24 = vpop.xlane.xlu1 %4567 }
0x19df   :  { %19110 = vrcp.f32 %v4568_v24  ;;  %v4565_v25 = vpop.xlane.xlu0 %4564 }
0x19e0   :  { %19112 = vrcp.f32 %v4565_v25 }
0x19e9   :  { %v19111_v23 = vpop.eup %19110 }
0x19ea   :  { %v19113_v26 = vpop.eup %19112  ;;  %v4572_v28 = vmul.f32 %v19111_v23, %v19107_v6 }
0x19eb   :  { %v4571_v27 = vmul.f32 %v19113_v26, %v19109_v7  ;;  %v15206_v26 = vld [vmem:[%s19988_s6] ss:$0 sm:$0xff] }
0x19ed   :  { %17048 = vmatprep.mubr.msk.f32.mxu1 %vm537_vm3, %v4571_v27 }
0x19ee   :  { %17049 = vmatmul.mubr.msk.f32.vlgmr.msra.gmra.mrb[66].mxu1 %vm537_vm3, %v4572_v28 }
0x1ac1   :  { %v17050_v22 = vpop.f32.mrb[66].mxu1 }
0x1ac2   :  { %v4645_v32 = vpop.f32.mrb[67].mxu1 }
0x1ac3   :  { %17067 = vmatprep.mubr.msk.f32.mxu0 %vm445_vm1, %v4645_v32  ;;  %v15207_v32 = vld [vmem:[%s19993_s14] ss:$0 sm:$0xff] }
0x1ac4   :  { %17068 = vmatmul.mubr.msk.f32.vlgmr.msra.gmra.mrb[14].mxu0 %vm445_vm1, %v17050_v22 }
0x1b97   :  { %v17069_v35 = vpop.f32.mrb[14].mxu0 }
0x1b98   :  { %v18973_v36 = vadd.f32 %v17069_v35, %v19532_v29  ;;  %v4759_v37 = vpop.f32.mrb[15].mxu0  ;;  %v4825_v29 = vld [vmem:[%s19920_s26 + $0x8] sm:$0xff] }
0x1b99   :  { %v18974_v38 = vadd.f32 %v4759_v37, %v19534_v31  ;;  %v4826_v31 = vld [vmem:[%s19920_s26 + $0x10] sm:$0xff] }
0x1b9a   :  { %v4777_v39 = vadd.f32 %v18973_v36, %v15205_v34  ;;  %v18259_v48 = vpack.c.bf16 %v4827_v47, %v4826_v31  ;;  %v15208_v31 = vld [vmem:[%s20008_s20] ss:$0 sm:$0xff] }
0x1b9b   :  { %v4776_v40 = vadd.f32 %v18974_v38, %v15205_v34  ;;  %v4996_v38 = vld [vmem:[%s19981_s1 + $0x10] sm:$0xff] }
0x1b9c   :  { %v4779_v41 = vadd.f32 %v4777_v39, %v19352_v33  ;;  %v4824_v33 = vld [vmem:[%s19920_s26] sm:$0xff]  ;;  %v4997_v39 = vld [vmem:[%s19981_s1 + $0x18] sm:$0xff] }
0x1b9d   :  { %v4778_v42 = vadd.f32 %v4776_v40, %v19346_v30  ;;  %v18253_v46 = vpack.c.bf16 %v4825_v29, %v4824_v33  ;;  %v18305_v40 = vpack.c.bf16 %v4997_v39, %v4996_v38  ;;  %v5001_v33 = vld [vmem:[%s19981_s1 + $0x38] sm:$0xff]  ;;  %v15228_v38 = vld [vmem:[%s20029_s2] ss:$0 sm:$0xff] }
0x1b9e   :  { %v4785_v43 = vsel %vm134_vm0, %v4779_v41, 0.0 }
0x1b9f   :  { %4786 = vadd.xlane.f32.xlu1 %v4785_v43  ;;  %v4782_v44 = vsel %vm134_vm0, %v4778_v42, 0.0  ;;  %18255 = vmatprep.subr.msk.bf16.mxu1 %vm19924_vm4, %v18253_v46 }
0x1ba0   :  { %4783 = vadd.xlane.f32.xlu0 %v4782_v44  ;;  %18258 = vmatpush3.bf16.xpose.msk.msra.mxu1 %vm19924_vm4, %v18253_v46  ;;  %v5000_v44 = vld [vmem:[%s19981_s1 + $0x30] sm:$0xff] }
0x1ba1   :  { %18261 = vmatprep.subr.msk.bf16.mxu1 %vm19924_vm4, %v18259_v48  ;;  %v18313_v29 = vpack.c.bf16 %v5001_v33, %v5000_v44 }
0x1ba8   :  { %18264 = vmatpush3.bf16.xpose.msk.msra.mxu1 %vm19924_vm4, %v18259_v48 }
0x1ba9   :  { %18267 = vmatprep.subr.msk.bf16.mxu1 %vm19924_vm4, %v18265_v51 }
0x1bb0   :  { %18270 = vmatpush3.bf16.xpose.msk.msra.mxu1 %vm19924_vm4, %v18265_v51 }
0x1bb1   :  { %18273 = vmatprep.subr.msk.bf16.mxu1 %vm19924_vm4, %v18271_v54 }
0x1bb8   :  { %18276 = vmatpush3.bf16.xpose.msk.msra.mxu1 %vm19924_vm4, %v18271_v54 }
0x1bb9   :  { %18279 = vmatprep.subr.msk.bf16.mxu1 %vm19924_vm4, %v18277_v58 }
0x1bc0   :  { %18282 = vmatpush3.bf16.xpose.msk.msra.mxu1 %vm19924_vm4, %v18277_v58 }
0x1bc1   :  { %18285 = vmatprep.subr.msk.bf16.mxu1 %vm19924_vm4, %v18283_v0 }
0x1bc8   :  { %18288 = vmatpush3.bf16.xpose.msk.msra.mxu1 %vm19924_vm4, %v18283_v0 }
0x1bc9   :  { %18291 = vmatprep.subr.msk.bf16.mxu1 %vm19924_vm4, %v18289_v11 }
0x1bd0   :  { %18294 = vmatpush3.bf16.xpose.msk.msra.mxu1 %vm19924_vm4, %v18289_v11 }
0x1bd1   :  { %18297 = vmatprep.subr.msk.bf16.mxu1 %vm19924_vm4, %v18295_v14 }
0x1bd8   :  { %18300 = vmatpush3.bf16.xpose.msk.msra.mxu1 %vm19924_vm4, %v18295_v14 }
0x1bd9   :  { %18302 = vmatprep.subr.bf16.mxu1 %v18301_v17 }
0x1c2c   :  { %v4787_v1 = vpop.xlane.xlu1 %4786 }
0x1c2d   :  { %v4789_v2 = vmul.f32 0.015625, %v4787_v1  ;;  %v4784_v3 = vpop.xlane.xlu0 %4783 }
0x1c2e   :  { %v4788_v4 = vmul.f32 0.015625, %v4784_v3 }
0x1c2f   :  { %v4791_v5 = vsub.f32 %v4779_v41, %v4789_v2  ;;  %v4998_v41 = vld [vmem:[%s19981_s1 + $0x20] sm:$0xff] }
0x1c30   :  { %v4790_v59 = vsub.f32 %v4778_v42, %v4788_v4  ;;  %v4999_v42 = vld [vmem:[%s19981_s1 + $0x28] sm:$0xff] }
0x1c31   :  { %v4793_v62 = vmul.f32 %v4791_v5, %v4791_v5  ;;  %v18309_v43 = vpack.c.bf16 %v4999_v42, %v4998_v41  ;;  %v15229_v42 = vld [vmem:[%s20034_s10] ss:$0 sm:$0xff] }
0x1c32   :  { %v4792_v6 = vmul.f32 %v4790_v59, %v4790_v59 }
0x1c33   :  { %v4797_v7 = vsel %vm134_vm0, %v4793_v62, 0.0 }
0x1c34   :  { %4798 = vadd.xlane.f32.xlu1 %v4797_v7  ;;  %v4794_v8 = vsel %vm134_vm0, %v4792_v6, 0.0  ;;  %v15227_v6 = vld [vmem:[%s20014_s25] ss:$0 sm:$0xff] }
0x1c35   :  { %4795 = vadd.xlane.f32.xlu0 %v4794_v8 }
0x1cc1   :  { %v4799_v18 = vpop.xlane.xlu1 %4798 }
0x1cc2   :  { %v4801_v19 = vmul.f32 0.015625, %v4799_v18  ;;  %v4796_v20 = vpop.xlane.xlu0 %4795 }
0x1cc3   :  { %v4800_v21 = vmul.f32 0.015625, %v4796_v20 }
0x1cc4   :  { %v4803_v24 = vadd.f32 1e-12, %v4801_v19 }
0x1cc5   :  { %v4802_v25 = vadd.f32 1e-12, %v4800_v21 }
0x1cc6   :  { %19114 = vrsqrt.f32 %v4803_v24 }
0x1cc7   :  { %19116 = vrsqrt.f32 %v4802_v25 }
0x1cd0   :  { %v19115_v23 = vpop.eup %19114 }
0x1cd1   :  { %v19117_v27 = vpop.eup %19116  ;;  %v4807_v28 = vmul.f32 %v19115_v23, %v4791_v5 }
0x1cd2   :  { %v4806_v22 = vmul.f32 %v19117_v27, %v4790_v59  ;;  %v15237_v27 = vld [vmem:[%s19323_s13 + $0x40] sm:$0xff] }
0x1cd3   :  { %v4815_v34 = vmul.f32 %v15206_v26, %v4807_v28 }
0x1cd4   :  { %v4814_v35 = vmul.f32 %v15206_v26, %v4806_v22  ;;  %v15231_v26 = vld [vmem:[%s19318_s9 + $0x40] sm:$0xff] }
0x1cd5   :  { %v4823_v37 = vadd.f32 %v15207_v32, %v4815_v34 }
0x1cd6   :  { %v4822_v36 = vadd.f32 %v15207_v32, %v4814_v35 }
0x1cd8   :  { %17102 = vmatprep.mubr.msk.f32.mxu1 %vm134_vm0, %v4822_v36 }
0x1cd9   :  { %17103 = vmatmul.mubr.msk.f32.vlgmr.msra.gmra.mrb[68].mxu1 %vm134_vm0, %v4823_v37 }
0x1cda   :  { %18304 = vmatpush3.bf16.xpose.msra.mxu1 %v18301_v17 }
0x1cdb   :  { %18306 = vmatprep.subr.bf16.mxu1 %v18305_v40 }
0x1ce2   :  { %18308 = vmatpush3.bf16.xpose.msra.mxu1 %v18305_v40 }
0x1ce3   :  { %18310 = vmatprep.subr.bf16.mxu1 %v18309_v43 }
0x1cea   :  { %18312 = vmatpush3.bf16.xpose.msra.mxu1 %v18309_v43 }
0x1ceb   :  { %18314 = vmatprep.subr.bf16.mxu1 %v18313_v29 }
0x1cf2   :  { %18316 = vmatpush3.bf16.xpose.msra.mxu1 %v18313_v29 }
0x1cf3   :  { %17124 = vmatprep.subr.msk.mxu1 %vm134_vm0, %v15231_v26 }
0x1dac   :  { %v17104_v46 = vpop.f32.mrb[68].mxu1 }
0x1dad   :  { %v4973_v47 = vadd.f32 %v17104_v46, %v15208_v31  ;;  %v4967_v48 = vpop.f32.mrb[69].mxu1  ;;  %v15233_v46 = vld [vmem:[%s19376_s3 + $0x8] ss:$0 sm:$0xff] }
0x1dae   :  { %v4968_v49 = vadd.f32 %v15208_v31, %v4967_v48  ;;  %v15243_v31 = vld [vmem:[%s19328_s17 + $0x40] sm:$0xff] }
0x1daf   :  { %v4979_v50 = vmul.f32 0.044715, %v4973_v47  ;;  %v4977_v5 = vmul.f32 0.5, %v4973_v47 }
0x1db0   :  { %v4978_v51 = vmul.f32 0.044715, %v4968_v49  ;;  %v4976_v3 = vmul.f32 0.5, %v4968_v49 }
0x1db1   :  { %v4981_v52 = vmul.f32 %v4979_v50, %v4973_v47  ;;  %v15239_v50 = vld [vmem:[%s19371_s29 + $0x8] ss:$0 sm:$0xff] }
0x1db2   :  { %v4980_v53 = vmul.f32 %v4978_v51, %v4968_v49 }
0x1db3   :  { %v4983_v54 = vmul.f32 %v4981_v52, %v4973_v47 }
0x1db4   :  { %v4982_v55 = vmul.f32 %v4980_v53, %v4968_v49 }
0x1db5   :  { %v4985_v56 = vadd.f32 %v4983_v54, %v4973_v47 }
0x1db6   :  { %v4984_v58 = vadd.f32 %v4982_v55, %v4968_v49  ;;  %v15245_v55 = vld [vmem:[%s19381_s7 + $0x8] ss:$0 sm:$0xff] }
0x1db7   :  { %v4987_v61 = vmul.f32 0.7978846, %v4985_v56 }
0x1db8   :  { %v4986_v63 = vmul.f32 0.7978846, %v4984_v58 }
0x1db9   :  { %19118 = vtanh.f32 %v4987_v61 }
0x1dba   :  { %19120 = vtanh.f32 %v4986_v63 }
0x1dc3   :  { %v19119_v0 = vpop.eup %19118 }
0x1dc4   :  { %v19121_v1 = vpop.eup %19120  ;;  %v4991_v2 = vadd.f32 1.0, %v19119_v0  ;;  %v15269_v0 = vld [vmem:[%s19323_s13 + $0x48] sm:$0xff] }
0x1dc5   :  { %v4990_v4 = vadd.f32 1.0, %v19121_v1 }
0x1dc6   :  { %v4993_v62 = vmul.f32 %v4991_v2, %v4977_v5 }
0x1dc7   :  { %v4992_v59 = vmul.f32 %v4990_v4, %v4976_v3 }
0x1dc9   :  { %17121 = vmatprep.mubr.f32.mxu1 %v4992_v59 }
0x1dca   :  { %17122 = vmatmul.mubr.f32.vlgmr.msra.gmra.mrb[70].mxu1 %v4993_v62 }
0x1dcb   :  { %17125 = vmatpush3.xpose.msk.msra.mxu1 %vm134_vm0, %v15231_v26 }
0x1dcc   :  { %17129 = vmatprep.subr.msk.mxu1 %vm134_vm0, %v15237_v27 }
0x1e9d   :  { %v17123_v7 = vpop.f32.mrb[70].mxu1 }
0x1e9e   :  { %v5081_v8 = vadd.f32 %v17123_v7, %v15227_v6  ;;  %v5075_v9 = vpop.f32.mrb[71].mxu1 }
0x1e9f   :  { %v5076_v10 = vadd.f32 %v15227_v6, %v5075_v9  ;;  %v15271_v6 = vld [vmem:[%s19371_s29 + $0x9] ss:$0 sm:$0xff] }
0x1ea0   :  { %v5085_v11 = vadd.f32 %v5081_v8, %v4823_v37 }
0x1ea1   :  { %v5084_v12 = vadd.f32 %v5076_v10, %v4822_v36 }
0x1ea2   :  { %v5091_v13 = vsel %vm134_vm0, %v5085_v11, 0.0 }
0x1ea3   :  { %5092 = vadd.xlane.f32.xlu1 %v5091_v13  ;;  %v5088_v14 = vsel %vm134_vm0, %v5084_v12, 0.0 }
0x1ea4   :  { %5089 = vadd.xlane.f32.xlu0 %v5088_v14 }
0x1f30   :  { %v5093_v15 = vpop.xlane.xlu1 %5092 }
0x1f31   :  { %v5095_v16 = vmul.f32 0.015625, %v5093_v15  ;;  %v5090_v17 = vpop.xlane.xlu0 %5089 }
0x1f32   :  { %v5094_v18 = vmul.f32 0.015625, %v5090_v17 }
0x1f33   :  { %v5097_v19 = vsub.f32 %v5085_v11, %v5095_v16 }
0x1f34   :  { %v5096_v20 = vsub.f32 %v5084_v12, %v5094_v18 }
0x1f35   :  { %v5099_v21 = vmul.f32 %v5097_v19, %v5097_v19 }
0x1f36   :  { %v5098_v24 = vmul.f32 %v5096_v20, %v5096_v20 }
0x1f37   :  { %v5103_v25 = vsel %vm134_vm0, %v5099_v21, 0.0 }
0x1f38   :  { %5104 = vadd.xlane.f32.xlu1 %v5103_v25  ;;  %v5100_v23 = vsel %vm134_vm0, %v5098_v24, 0.0 }
0x1f39   :  { %5101 = vadd.xlane.f32.xlu0 %v5100_v23 }
0x1fc5   :  { %v5105_v28 = vpop.xlane.xlu1 %5104 }
0x1fc6   :  { %v5107_v22 = vmul.f32 0.015625, %v5105_v28  ;;  %v5102_v32 = vpop.xlane.xlu0 %5101 }
0x1fc7   :  { %v5106_v34 = vmul.f32 0.015625, %v5102_v32 }
0x1fc8   :  { %v5109_v35 = vadd.f32 1e-12, %v5107_v22 }
0x1fc9   :  { %v5108_v36 = vadd.f32 1e-12, %v5106_v34 }
0x1fca   :  { %19122 = vrsqrt.f32 %v5109_v35 }
0x1fcb   :  { %19124 = vrsqrt.f32 %v5108_v36 }
0x1fd4   :  { %v19123_v37 = vpop.eup %19122 }
0x1fd5   :  { %v19125_v39 = vpop.eup %19124  ;;  %v5113_v40 = vmul.f32 %v19123_v37, %v5097_v19  ;;  %v15275_v37 = vld [vmem:[%s19328_s17 + $0x48] sm:$0xff] }
0x1fd6   :  { %v5112_v41 = vmul.f32 %v19125_v39, %v5096_v20 }
0x1fd7   :  { %v5121_v43 = vmul.f32 %v15228_v38, %v5113_v40 }
0x1fd8   :  { %v5120_v44 = vmul.f32 %v15228_v38, %v5112_v41  ;;  %v15315_v38 = vld [vmem:[%s19318_s9 + $0x50] sm:$0xff]  ;;  %v15265_v41 = vld [vmem:[%s19376_s3 + $0x9] ss:$0 sm:$0xff] }
0x1fd9   :  { %v20040_v29 = vadd.f32 %v15229_v42, %v5121_v43 }
0x1fda   :  { %v20038_v33 = vadd.f32 %v15229_v42, %v5120_v44 }
0x1fdc   :  { %17126 = vmatprep.mubr.msk.f32.mxu1 %vm134_vm0, %v20038_v33 }
0x1fdd   :  { %17127 = vmatmul.mubr.msk.f32.vlgmr.msra.gmra.mrb[72].mxu1 %vm134_vm0, %v20040_v29 }
0x1fde   :  { %17130 = vmatpush3.xpose.msk.msra.mxu1 %vm134_vm0, %v15237_v27  ;;  %17131 = vmatprep.mubr.msk.f32.mxu1 %vm134_vm0, %v20038_v33  ;;  %v15263_v27 = vld [vmem:[%s19318_s9 + $0x48] sm:$0xff] }
0x1fdf   :  { %17134 = vmatprep.subr.msk.mxu1 %vm134_vm0, %v15243_v31 }
0x1fe1   :  { %17132 = vmatmul.mubr.msk.f32.vlgmr.msra.gmra.mrb[74].mxu1 %vm134_vm0, %v20040_v29 }
0x1fe2   :  { %17135 = vmatpush3.xpose.msk.msra.mxu1 %vm134_vm0, %v15243_v31  ;;  %17136 = vmatprep.mubr.msk.f32.mxu1 %vm134_vm0, %v20038_v33  ;;  %v15277_v31 = vld [vmem:[%s19381_s7 + $0x9] ss:$0 sm:$0xff] }
0x1fe5   :  { %17137 = vmatmul.mubr.msk.f32.vlgmr.msra.gmra.mrb[76].mxu1 %vm134_vm0, %v20040_v29 }
0x20b0   :  { %v17128_v47 = vpop.f32.mrb[72].mxu1 }
0x20b1   :  { %v5217_v48 = vpop.f32.mrb[73].mxu1  ;;  %v5223_v3 = vadd.f32 %v17128_v47, %v15233_v46 }
0x20b2   :  { %v5218_v49 = vadd.f32 %v15233_v46, %v5217_v48  ;;  %v15321_v48 = vld [vmem:[%s19323_s13 + $0x50] sm:$0xff] }
0x20b4   :  { %v17133_v51 = vpop.f32.mrb[74].mxu1  ;;  %17143 = vmatprep.mubr.msk.f32.mxu1 %vm445_vm1, %v5218_v49 }
0x20b5   :  { %v5311_v52 = vadd.f32 %v17133_v51, %v15239_v50  ;;  %v5305_v53 = vpop.f32.mrb[75].mxu1 }
0x20b6   :  { %v5306_v54 = vadd.f32 %v15239_v50, %v5305_v53  ;;  %v15327_v53 = vld [vmem:[%s19328_s17 + $0x50] sm:$0xff] }
0x20b8   :  { %v18317_v56 = vpack.c.bf16 %v5311_v52, %v5306_v54  ;;  %v17138_v58 = vpop.f32.mrb[76].mxu1 }
0x20b9   :  { %v5399_v61 = vadd.f32 %v17138_v58, %v15245_v55  ;;  %v5393_v63 = vpop.f32.mrb[77].mxu1 }
0x20ba   :  { %v5394_v1 = vadd.f32 %v15245_v55, %v5393_v63  ;;  %18319 = vmatprep.subr.msk.bf16.mxu1 %vm19389_vm2, %v18317_v56 }
0x20bb   :  { %18322 = vmatpush3.bf16.xpose.msk.msra.mxu1 %vm19389_vm2, %v18317_v56  ;;  %v15317_v56 = vld [vmem:[%s19376_s3 + $0xa] ss:$0 sm:$0xff] }
0x20bc   :  { %v18323_v2 = vpack.c.bf16 %v5399_v61, %v5394_v1  ;;  %17158 = vmatprep.subr.msk.mxu1 %vm134_vm0, %v15269_v0 }
0x20be   :  { %18324 = vmatprep.subr.bf16.mxu0 %v18323_v2 }
0x20bf   :  { %18326 = vmatpush3.bf16.msra.mxu0 %v18323_v2 }
0x20c0   :  { %17153 = vmatprep.subr.msk.mxu0 %vm134_vm0, %v15263_v27 }
0x20c2   :  { %17144 = vmatmul.mubr.msk.f32.vlgmr.msra.gmra.mrb[78].mxu1 %vm445_vm1, %v5223_v3 }
0x20c3   :  { %17159 = vmatpush3.xpose.msk.msra.mxu1 %vm134_vm0, %v15269_v0  ;;  %17160 = vmatprep.mubr.msk.f32.mxu1 %vm134_vm0, %v20038_v33  ;;  %v15323_v0 = vld [vmem:[%s19371_s29 + $0xa] ss:$0 sm:$0xff] }
0x20c6   :  { %17161 = vmatmul.mubr.msk.f32.vlgmr.msra.gmra.mrb[80].mxu1 %vm134_vm0, %v20040_v29 }
0x2195   :  { %v17145_v4 = vpop.f32.mrb[78].mxu1 }
0x2196   :  { %v5490_v5 = vmul.f32 0.35355338, %v17145_v4  ;;  %v5480_v59 = vpop.f32.mrb[79].mxu1 }
0x2197   :  { %v5489_v62 = vmul.f32 0.35355338, %v5480_v59 }
0x2198   :  { %v5492_v7 = vadd.f32 %v19802_v57, %v5490_v5  ;;  %v15329_v5 = vld [vmem:[%s19381_s7 + $0xa] ss:$0 sm:$0xff] }
0x2199   :  { %v17162_v8 = vpop.f32.mrb[80].mxu1  ;;  %v5491_v9 = vadd.f32 %v19806_v60, %v5489_v62 }
0x219a   :  { %v5778_v10 = vadd.f32 %v17162_v8, %v15271_v6  ;;  %v5772_v11 = vpop.f32.mrb[81].mxu1  ;;  %v5496_v12 = vsel %vm537_vm3, %v5492_v7, -inf }
0x219b   :  { %v5773_v13 = vadd.f32 %v15271_v6, %v5772_v11  ;;  %5497 = vmax.xlane.f32.xlu1 %v5496_v12  ;;  %v5493_v14 = vsel %vm537_vm3, %v5491_v9, -inf }
0x219c   :  { %5494 = vmax.xlane.f32.xlu0 %v5493_v14 }
0x219d   :  { %v18327_v15 = vpack.c.bf16 %v5778_v10, %v5773_v13 }
0x219f   :  { %18329 = vmatprep.subr.msk.bf16.mxu1 %vm19389_vm2, %v18327_v15 }
0x21a0   :  { %18332 = vmatpush3.bf16.xpose.msk.msra.mxu1 %vm19389_vm2, %v18327_v15 }
0x21a1   :  { %17220 = vmatprep.subr.msk.mxu1 %vm134_vm0, %v15315_v38 }
0x2228   :  { %v5498_v16 = vpop.xlane.xlu1 %5497 }
0x2229   :  { %v5500_v17 = vsub.f32 %v5492_v7, %v5498_v16  ;;  %v5495_v18 = vpop.xlane.xlu0 %5494 }
0x222a   :  { %v5499_v19 = vsub.f32 %v5491_v9, %v5495_v18 }
0x222b   :  { %v5503_v20 = vmul.f32 1.442695, %v5500_v17 }
0x222c   :  { %v5501_v21 = vmul.f32 1.442695, %v5499_v19 }
0x222d   :  { %19126 = vpow2.f32 %v5503_v20 }
0x222e   :  { %19128 = vpow2.f32 %v5501_v21 }
0x2237   :  { %v19127_v24 = vpop.eup %19126 }
0x2238   :  { %v19129_v25 = vpop.eup %19128  ;;  %v5508_v23 = vsel %vm537_vm3, %v19127_v24, 0.0 }
0x2239   :  { %5509 = vadd.xlane.f32.xlu1 %v5508_v23  ;;  %v5505_v26 = vsel %vm537_vm3, %v19129_v25, 0.0 }
0x223a   :  { %5506 = vadd.xlane.f32.xlu0 %v5505_v26 }
0x22c6   :  { %v5510_v28 = vpop.xlane.xlu1 %5509 }
0x22c7   :  { %19130 = vrcp.f32 %v5510_v28  ;;  %v5507_v22 = vpop.xlane.xlu0 %5506  ;;  %v15357_v28 = vld [vmem:[%s19318_s9 + $0x58] sm:$0xff] }
0x22c8   :  { %19132 = vrcp.f32 %v5507_v22 }
0x22d1   :  { %v19131_v32 = vpop.eup %19130 }
0x22d2   :  { %v19133_v34 = vpop.eup %19132  ;;  %v5514_v36 = vmul.f32 %v19131_v32, %v19127_v24 }
0x22d3   :  { %v5513_v35 = vmul.f32 %v19133_v34, %v19129_v25 }
0x22d5   :  { %17150 = vmatprep.mubr.msk.f32.mxu0 %vm537_vm3, %v5513_v35 }
0x22d6   :  { %17151 = vmatmul.mubr.msk.f32.vlgmr.msra.gmra.mrb[16].mxu0 %vm537_vm3, %v5514_v36 }
0x22d7   :  { %17154 = vmatpush3.xpose.msk.msra.mxu0 %vm134_vm0, %v15263_v27  ;;  %17155 = vmatprep.mubr.msk.f32.mxu0 %vm134_vm0, %v20038_v33 }
0x22d8   :  { %17163 = vmatprep.subr.msk.mxu0 %vm134_vm0, %v15275_v37 }
0x22da   :  { %17156 = vmatmul.mubr.msk.f32.vlgmr.msra.gmra.mrb[18].mxu0 %vm134_vm0, %v20040_v29 }
0x22db   :  { %17164 = vmatpush3.xpose.msk.msra.mxu0 %vm134_vm0, %v15275_v37  ;;  %17165 = vmatprep.mubr.msk.f32.mxu0 %vm134_vm0, %v20038_v33 }
0x22de   :  { %17166 = vmatmul.mubr.msk.f32.vlgmr.msra.gmra.mrb[20].mxu0 %vm134_vm0, %v20040_v29 }
0x23a9   :  { %v20103_v39 = vpop.f32.mrb[16].mxu0 }
0x23aa   :  { %v20105_v40 = vpop.f32.mrb[17].mxu0 }
0x23ad   :  { %v17157_v42 = vpop.f32.mrb[18].mxu0 }
0x23ae   :  { %v5684_v43 = vpop.f32.mrb[19].mxu0  ;;  %v5690_v46 = vadd.f32 %v17157_v42, %v15265_v41 }
0x23af   :  { %v5685_v44 = vadd.f32 %v15265_v41, %v5684_v43  ;;  %v15369_v41 = vld [vmem:[%s19328_s17 + $0x58] sm:$0xff] }
0x23b1   :  { %v17167_v47 = vpop.f32.mrb[20].mxu0  ;;  %17172 = vmatprep.mubr.msk.f32.mxu1 %vm445_vm1, %v5685_v44  ;;  %v15359_v44 = vld [vmem:[%s19376_s3 + $0xb] ss:$0 sm:$0xff] }
0x23b2   :  { %v5866_v49 = vadd.f32 %v17167_v47, %v15277_v31  ;;  %v5860_v50 = vpop.f32.mrb[21].mxu0  ;;  %17173 = vmatmul.mubr.msk.f32.vlgmr.msra.gmra.mrb[82].mxu1 %vm445_vm1, %v5690_v46 }
0x23b3   :  { %v5861_v51 = vadd.f32 %v15277_v31, %v5860_v50  ;;  %17221 = vmatpush3.xpose.msk.msra.mxu1 %vm134_vm0, %v15315_v38  ;;  %17222 = vmatprep.mubr.msk.f32.mxu1 %vm134_vm0, %v20038_v33  ;;  %v15363_v38 = vld [vmem:[%s19323_s13 + $0x58] sm:$0xff] }
0x23b4   :  { %17225 = vmatprep.subr.msk.mxu1 %vm134_vm0, %v15321_v48 }
0x23b5   :  { %v18333_v52 = vpack.c.bf16 %v5866_v49, %v5861_v51 }
0x23b6   :  { %17223 = vmatmul.mubr.msk.f32.vlgmr.msra.gmra.mrb[84].mxu1 %vm134_vm0, %v20040_v29 }
0x23b7   :  { %17226 = vmatpush3.xpose.msk.msra.mxu1 %vm134_vm0, %v15321_v48  ;;  %18334 = vmatprep.subr.bf16.mxu0 %v18333_v52  ;;  %v15365_v48 = vld [vmem:[%s19371_s29 + $0xb] ss:$0 sm:$0xff] }
0x23b8   :  { %17227 = vmatprep.mubr.msk.f32.mxu1 %vm134_vm0, %v20038_v33  ;;  %18336 = vmatpush3.bf16.msra.mxu0 %v18333_v52 }
0x23b9   :  { %17230 = vmatprep.subr.msk.mxu1 %vm134_vm0, %v15327_v53 }
0x23ba   :  { %17228 = vmatmul.mubr.msk.f32.vlgmr.msra.gmra.mrb[86].mxu1 %vm134_vm0, %v20040_v29 }
0x23bb   :  { %17231 = vmatpush3.xpose.msk.msra.mxu1 %vm134_vm0, %v15327_v53  ;;  %17232 = vmatprep.mubr.msk.f32.mxu1 %vm134_vm0, %v20038_v33  ;;  %v15371_v53 = vld [vmem:[%s19381_s7 + $0xb] ss:$0 sm:$0xff] }
0x23be   :  { %17233 = vmatmul.mubr.msk.f32.vlgmr.msra.gmra.mrb[88].mxu1 %vm134_vm0, %v20040_v29 }
0x2485   :  { %v20130_v54 = vpop.f32.mrb[82].mxu1 }
0x2486   :  { %v20132_v55 = vpop.f32.mrb[83].mxu1 }
0x2489   :  { %v17224_v58 = vpop.f32.mrb[84].mxu1 }
0x248a   :  { %v6361_v61 = vpop.f32.mrb[85].mxu1  ;;  %v6367_v10 = vadd.f32 %v17224_v58, %v15317_v56 }
0x248b   :  { %v6362_v63 = vadd.f32 %v15317_v56, %v6361_v61 }
0x248d   :  { %v17229_v1 = vpop.f32.mrb[86].mxu1  ;;  %17239 = vmatprep.mubr.msk.f32.mxu1 %vm445_vm1, %v6362_v63 }
0x248e   :  { %v6455_v2 = vadd.f32 %v17229_v1, %v15323_v0  ;;  %v6449_v3 = vpop.f32.mrb[87].mxu1 }
0x248f   :  { %v6450_v4 = vadd.f32 %v15323_v0, %v6449_v3 }
0x2491   :  { %v18385_v59 = vpack.c.bf16 %v6455_v2, %v6450_v4  ;;  %v17234_v62 = vpop.f32.mrb[88].mxu1 }
0x2492   :  { %v6543_v6 = vadd.f32 %v17234_v62, %v15329_v5  ;;  %v6537_v7 = vpop.f32.mrb[89].mxu1  ;;  %v20186_v62 = vld [vmem:[%s19406_s12 + $0x8] sm:$0xff] }
0x2493   :  { %v6538_v8 = vadd.f32 %v15329_v5, %v6537_v7  ;;  %18387 = vmatprep.subr.msk.bf16.mxu1 %vm19389_vm2, %v18385_v59  ;;  %v20190_v7 = vld [vmem:[%s19406_s12] sm:$0xff]  ;;  %s19300_s12 = smov 28  }
0x2494   :  { %18390 = vmatpush3.bf16.xpose.msk.msra.mxu1 %vm19389_vm2, %v18385_v59 }
0x2495   :  { %v18391_v9 = vpack.c.bf16 %v6543_v6, %v6538_v8 }
0x2497   :  { %18392 = vmatprep.subr.bf16.mxu1 %v18391_v9 }
0x249b   :  { %17240 = vmatmul.mubr.msk.f32.vlgmr.msra.gmra.mrb[90].mxu1 %vm445_vm1, %v6367_v10 }
0x249c   :  { %18394 = vmatpush3.bf16.msra.mxu1 %v18391_v9 }
0x249d   :  { %17268 = vmatprep.subr.msk.mxu1 %vm134_vm0, %v15357_v28 }
0x256e   :  { %v17241_v11 = vpop.f32.mrb[90].mxu1 }
0x256f   :  { %v6634_v12 = vmul.f32 0.35355338, %v17241_v11  ;;  %v6624_v13 = vpop.f32.mrb[91].mxu1 }
0x2570   :  { %v6633_v14 = vmul.f32 0.35355338, %v6624_v13 }
0x2571   :  { %v6636_v15 = vadd.f32 %v19802_v57, %v6634_v12 }
0x2572   :  { %v6635_v16 = vadd.f32 %v19806_v60, %v6633_v14 }
0x2573   :  { %v6640_v17 = vsel %vm537_vm3, %v6636_v15, -inf }
0x2574   :  { %6641 = vmax.xlane.f32.xlu1 %v6640_v17  ;;  %v6637_v18 = vsel %vm537_vm3, %v6635_v16, -inf }
0x2575   :  { %6638 = vmax.xlane.f32.xlu0 %v6637_v18 }
0x2601   :  { %v6642_v19 = vpop.xlane.xlu1 %6641 }
0x2602   :  { %v6644_v20 = vsub.f32 %v6636_v15, %v6642_v19  ;;  %v6639_v21 = vpop.xlane.xlu0 %6638 }
0x2603   :  { %v6643_v24 = vsub.f32 %v6635_v16, %v6639_v21  ;;  %v15399_v21 = vld [vmem:[%s19318_s9 + $0x60] sm:$0xff] }
0x2604   :  { %v6647_v25 = vmul.f32 1.442695, %v6644_v20 }
0x2605   :  { %v6645_v23 = vmul.f32 1.442695, %v6643_v24 }
0x2606   :  { %19134 = vpow2.f32 %v6647_v25 }
0x2607   :  { %19136 = vpow2.f32 %v6645_v23 }
0x2610   :  { %v19135_v26 = vpop.eup %19134 }
0x2611   :  { %v19137_v27 = vpop.eup %19136  ;;  %v6652_v57 = vsel %vm537_vm3, %v19135_v26, 0.0 }
0x2612   :  { %6653 = vadd.xlane.f32.xlu1 %v6652_v57  ;;  %v6649_v60 = vsel %vm537_vm3, %v19137_v27, 0.0 }
0x2613   :  { %6650 = vadd.xlane.f32.xlu0 %v6649_v60  ;;  %v15405_v60 = vld [vmem:[%s19323_s13 + $0x60] sm:$0xff] }
0x269f   :  { %v6654_v22 = vpop.xlane.xlu1 %6653 }
0x26a0   :  { %19138 = vrcp.f32 %v6654_v22  ;;  %v6651_v32 = vpop.xlane.xlu0 %6650 }
0x26a1   :  { %19140 = vrcp.f32 %v6651_v32 }
0x26aa   :  { %v19139_v34 = vpop.eup %19138 }
0x26ab   :  { %v19141_v35 = vpop.eup %19140  ;;  %v6658_v37 = vmul.f32 %v19139_v34, %v19135_v26  ;;  %v15401_v34 = vld [vmem:[%s19376_s3 + $0xc] ss:$0 sm:$0xff] }
0x26ac   :  { %v6657_v36 = vmul.f32 %v19141_v35, %v19137_v27 }
0x26ae   :  { %17246 = vmatprep.mubr.msk.f32.mxu1 %vm537_vm3, %v6657_v36 }
0x26af   :  { %17247 = vmatmul.mubr.msk.f32.vlgmr.msra.gmra.mrb[92].mxu1 %vm537_vm3, %v6658_v37 }
0x26b0   :  { %17269 = vmatpush3.xpose.msk.msra.mxu1 %vm134_vm0, %v15357_v28  ;;  %17270 = vmatprep.mubr.msk.f32.mxu1 %vm134_vm0, %v20038_v33  ;;  %v15411_v28 = vld [vmem:[%s19328_s17 + $0x60] sm:$0xff] }
0x26b1   :  { %17273 = vmatprep.subr.msk.mxu1 %vm134_vm0, %v15363_v38 }
0x26b3   :  { %17271 = vmatmul.mubr.msk.f32.vlgmr.msra.gmra.mrb[94].mxu1 %vm134_vm0, %v20040_v29 }
0x26b4   :  { %17274 = vmatpush3.xpose.msk.msra.mxu1 %vm134_vm0, %v15363_v38  ;;  %17275 = vmatprep.mubr.msk.f32.mxu1 %vm134_vm0, %v20038_v33  ;;  %v15407_v38 = vld [vmem:[%s19371_s29 + $0xc] ss:$0 sm:$0xff] }
0x26b5   :  { %17278 = vmatprep.subr.msk.mxu1 %vm134_vm0, %v15369_v41 }
0x26b7   :  { %17276 = vmatmul.mubr.msk.f32.vlgmr.msra.gmra.mrb[96].mxu1 %vm134_vm0, %v20040_v29 }
0x26b8   :  { %17279 = vmatpush3.xpose.msk.msra.mxu1 %vm134_vm0, %v15369_v41  ;;  %17280 = vmatprep.mubr.msk.f32.mxu1 %vm134_vm0, %v20038_v33 }
0x26bb   :  { %17281 = vmatmul.mubr.msk.f32.vlgmr.msra.gmra.mrb[98].mxu1 %vm134_vm0, %v20040_v29 }
0x2782   :  { %v20172_v42 = vpop.f32.mrb[92].mxu1 }
0x2783   :  { %v20174_v43 = vpop.f32.mrb[93].mxu1 }
0x2786   :  { %v17272_v31 = vpop.f32.mrb[94].mxu1 }
0x2787   :  { %v6935_v46 = vpop.f32.mrb[95].mxu1  ;;  %v6941_v2 = vadd.f32 %v17272_v31, %v15359_v44 }
0x2788   :  { %v6936_v47 = vadd.f32 %v15359_v44, %v6935_v46 }
0x278a   :  { %v17277_v49 = vpop.f32.mrb[96].mxu1  ;;  %17287 = vmatprep.mubr.msk.f32.mxu1 %vm445_vm1, %v6936_v47  ;;  %v15413_v47 = vld [vmem:[%s19381_s7 + $0xc] ss:$0 sm:$0xff] }
0x278b   :  { %v7029_v50 = vadd.f32 %v17277_v49, %v15365_v48  ;;  %v7023_v51 = vpop.f32.mrb[97].mxu1 }
0x278c   :  { %v7024_v52 = vadd.f32 %v15365_v48, %v7023_v51 }
0x278e   :  { %v18419_v56 = vpack.c.bf16 %v7029_v50, %v7024_v52  ;;  %v17282_v58 = vpop.f32.mrb[98].mxu1 }
0x278f   :  { %v7117_v61 = vadd.f32 %v17282_v58, %v15371_v53  ;;  %v7111_v63 = vpop.f32.mrb[99].mxu1 }
0x2790   :  { %v7112_v0 = vadd.f32 %v15371_v53, %v7111_v63  ;;  %18421 = vmatprep.subr.msk.bf16.mxu1 %vm19389_vm2, %v18419_v56 }
0x2791   :  { %18424 = vmatpush3.bf16.xpose.msk.msra.mxu1 %vm19389_vm2, %v18419_v56 }
0x2792   :  { %v18425_v1 = vpack.c.bf16 %v7117_v61, %v7112_v0 }
0x2794   :  { %18426 = vmatprep.subr.bf16.mxu1 %v18425_v1 }
0x2798   :  { %17288 = vmatmul.mubr.msk.f32.vlgmr.msra.gmra.mrb[100].mxu1 %vm445_vm1, %v6941_v2 }
0x2799   :  { %18428 = vmatpush3.bf16.msra.mxu1 %v18425_v1 }
0x279a   :  { %17316 = vmatprep.subr.msk.mxu1 %vm134_vm0, %v15399_v21 }
0x286b   :  { %v17289_v3 = vpop.f32.mrb[100].mxu1 }
0x286c   :  { %v7208_v4 = vmul.f32 0.35355338, %v17289_v3  ;;  %v7198_v5 = vpop.f32.mrb[101].mxu1 }
0x286d   :  { %v7207_v59 = vmul.f32 0.35355338, %v7198_v5 }
0x286e   :  { %v7210_v6 = vadd.f32 %v20186_v62, %v7208_v4 }
0x286f   :  { %v7209_v8 = vadd.f32 %v20190_v7, %v7207_v59 }
0x2870   :  { %v7214_v9 = vsel %vm537_vm3, %v7210_v6, -inf }
0x2871   :  { %7215 = vmax.xlane.f32.xlu1 %v7214_v9  ;;  %v7211_v10 = vsel %vm537_vm3, %v7209_v8, -inf }
0x2872   :  { %7212 = vmax.xlane.f32.xlu0 %v7211_v10 }
0x28fe   :  { %v7216_v11 = vpop.xlane.xlu1 %7215 }
0x28ff   :  { %v7218_v12 = vsub.f32 %v7210_v6, %v7216_v11  ;;  %v7213_v13 = vpop.xlane.xlu0 %7212 }
0x2900   :  { %v7217_v14 = vsub.f32 %v7209_v8, %v7213_v13 }
0x2901   :  { %v7221_v15 = vmul.f32 1.442695, %v7218_v12 }
0x2902   :  { %v7219_v16 = vmul.f32 1.442695, %v7217_v14 }
0x2903   :  { %19142 = vpow2.f32 %v7221_v15  ;;  %v15441_v15 = vld [vmem:[%s19318_s9 + $0x68] sm:$0xff] }
0x2904   :  { %19144 = vpow2.f32 %v7219_v16 }
0x290d   :  { %v19143_v17 = vpop.eup %19142 }
0x290e   :  { %v19145_v18 = vpop.eup %19144  ;;  %v7226_v19 = vsel %vm537_vm3, %v19143_v17, 0.0 }
0x290f   :  { %7227 = vadd.xlane.f32.xlu1 %v7226_v19  ;;  %v7223_v20 = vsel %vm537_vm3, %v19145_v18, 0.0 }
0x2910   :  { %7224 = vadd.xlane.f32.xlu0 %v7223_v20 }
0x299c   :  { %v7228_v24 = vpop.xlane.xlu1 %7227 }
0x299d   :  { %19146 = vrcp.f32 %v7228_v24  ;;  %v7225_v25 = vpop.xlane.xlu0 %7224  ;;  %v15447_v24 = vld [vmem:[%s19323_s13 + $0x68] sm:$0xff] }
0x299e   :  { %19148 = vrcp.f32 %v7225_v25  ;;  %v15453_v25 = vld [vmem:[%s19328_s17 + $0x68] sm:$0xff] }
0x29a7   :  { %v19147_v23 = vpop.eup %19146 }
0x29a8   :  { %v19149_v26 = vpop.eup %19148  ;;  %v7232_v57 = vmul.f32 %v19147_v23, %v19143_v17 }
0x29a9   :  { %v7231_v27 = vmul.f32 %v19149_v26, %v19145_v18 }
0x29ab   :  { %17294 = vmatprep.mubr.msk.f32.mxu1 %vm537_vm3, %v7231_v27  ;;  %v15443_v27 = vld [vmem:[%s19376_s3 + $0xd] ss:$0 sm:$0xff] }
0x29ac   :  { %17295 = vmatmul.mubr.msk.f32.vlgmr.msra.gmra.mrb[102].mxu1 %vm537_vm3, %v7232_v57 }
0x29ad   :  { %17317 = vmatpush3.xpose.msk.msra.mxu1 %vm134_vm0, %v15399_v21  ;;  %17318 = vmatprep.mubr.msk.f32.mxu1 %vm134_vm0, %v20038_v33 }
0x29ae   :  { %17321 = vmatprep.subr.msk.mxu1 %vm134_vm0, %v15405_v60 }
0x29b0   :  { %17319 = vmatmul.mubr.msk.f32.vlgmr.msra.gmra.mrb[104].mxu1 %vm134_vm0, %v20040_v29 }
0x29b1   :  { %17322 = vmatpush3.xpose.msk.msra.mxu1 %vm134_vm0, %v15405_v60  ;;  %17323 = vmatprep.mubr.msk.f32.mxu1 %vm134_vm0, %v20038_v33 }
0x29b2   :  { %17326 = vmatprep.subr.msk.mxu1 %vm134_vm0, %v15411_v28 }
0x29b4   :  { %17324 = vmatmul.mubr.msk.f32.vlgmr.msra.gmra.mrb[106].mxu1 %vm134_vm0, %v20040_v29 }
0x29b5   :  { %17327 = vmatpush3.xpose.msk.msra.mxu1 %vm134_vm0, %v15411_v28  ;;  %17328 = vmatprep.mubr.msk.f32.mxu1 %vm134_vm0, %v20038_v33 }
0x29b8   :  { %17329 = vmatmul.mubr.msk.f32.vlgmr.msra.gmra.mrb[108].mxu1 %vm134_vm0, %v20040_v29 }
0x2a7f   :  { %v20220_v22 = vpop.f32.mrb[102].mxu1 }
0x2a80   :  { %v20222_v32 = vpop.f32.mrb[103].mxu1 }
0x2a83   :  { %v17320_v35 = vpop.f32.mrb[104].mxu1 }
0x2a84   :  { %v7509_v36 = vpop.f32.mrb[105].mxu1  ;;  %v7515_v56 = vadd.f32 %v17320_v35, %v15401_v34 }
0x2a85   :  { %v7510_v37 = vadd.f32 %v15401_v34, %v7509_v36  ;;  %v15449_v34 = vld [vmem:[%s19371_s29 + $0xd] ss:$0 sm:$0xff] }
0x2a87   :  { %v17325_v41 = vpop.f32.mrb[106].mxu1  ;;  %17335 = vmatprep.mubr.msk.f32.mxu1 %vm445_vm1, %v7510_v37 }
0x2a88   :  { %v7603_v44 = vadd.f32 %v17325_v41, %v15407_v38  ;;  %v7597_v31 = vpop.f32.mrb[107].mxu1  ;;  %v15455_v41 = vld [vmem:[%s19381_s7 + $0xd] ss:$0 sm:$0xff] }
0x2a89   :  { %v7598_v46 = vadd.f32 %v15407_v38, %v7597_v31 }
0x2a8b   :  { %v18453_v48 = vpack.c.bf16 %v7603_v44, %v7598_v46  ;;  %v17330_v49 = vpop.f32.mrb[108].mxu1 }
0x2a8c   :  { %v7691_v50 = vadd.f32 %v17330_v49, %v15413_v47  ;;  %v7685_v51 = vpop.f32.mrb[109].mxu1 }
0x2a8d   :  { %v7686_v52 = vadd.f32 %v15413_v47, %v7685_v51  ;;  %18455 = vmatprep.subr.msk.bf16.mxu1 %vm19389_vm2, %v18453_v48 }
0x2a8e   :  { %18458 = vmatpush3.bf16.xpose.msk.msra.mxu1 %vm19389_vm2, %v18453_v48 }
0x2a8f   :  { %v18459_v53 = vpack.c.bf16 %v7691_v50, %v7686_v52 }
0x2a91   :  { %18460 = vmatprep.subr.bf16.mxu1 %v18459_v53 }
0x2a95   :  { %17336 = vmatmul.mubr.msk.f32.vlgmr.msra.gmra.mrb[110].mxu1 %vm445_vm1, %v7515_v56 }
0x2a96   :  { %18462 = vmatpush3.bf16.msra.mxu1 %v18459_v53 }
0x2a97   :  { %17364 = vmatprep.subr.msk.mxu1 %vm134_vm0, %v15441_v15 }
0x2b68   :  { %v17337_v58 = vpop.f32.mrb[110].mxu1 }
0x2b69   :  { %v7782_v61 = vmul.f32 0.35355338, %v17337_v58  ;;  %v7772_v63 = vpop.f32.mrb[111].mxu1 }
0x2b6a   :  { %v7781_v0 = vmul.f32 0.35355338, %v7772_v63 }
0x2b6b   :  { %v7784_v1 = vadd.f32 %v20186_v62, %v7782_v61 }
0x2b6c   :  { %v7783_v2 = vadd.f32 %v20190_v7, %v7781_v0 }
0x2b6d   :  { %v7788_v3 = vsel %vm537_vm3, %v7784_v1, -inf }
0x2b6e   :  { %7789 = vmax.xlane.f32.xlu1 %v7788_v3  ;;  %v7785_v4 = vsel %vm537_vm3, %v7783_v2, -inf }
0x2b6f   :  { %7786 = vmax.xlane.f32.xlu0 %v7785_v4 }
0x2bfb   :  { %v7790_v5 = vpop.xlane.xlu1 %7789 }
0x2bfc   :  { %v7792_v59 = vsub.f32 %v7784_v1, %v7790_v5  ;;  %v7787_v6 = vpop.xlane.xlu0 %7786 }
0x2bfd   :  { %v7791_v8 = vsub.f32 %v7783_v2, %v7787_v6 }
0x2bfe   :  { %v7795_v9 = vmul.f32 1.442695, %v7792_v59 }
0x2bff   :  { %v7793_v10 = vmul.f32 1.442695, %v7791_v8 }
0x2c00   :  { %19150 = vpow2.f32 %v7795_v9 }
0x2c01   :  { %19152 = vpow2.f32 %v7793_v10 }
0x2c0a   :  { %v19151_v11 = vpop.eup %19150 }
0x2c0b   :  { %v19153_v12 = vpop.eup %19152  ;;  %v7800_v13 = vsel %vm537_vm3, %v19151_v11, 0.0 }
0x2c0c   :  { %7801 = vadd.xlane.f32.xlu1 %v7800_v13  ;;  %v7797_v14 = vsel %vm537_vm3, %v19153_v12, 0.0 }
0x2c0d   :  { %7798 = vadd.xlane.f32.xlu0 %v7797_v14 }
0x2c99   :  { %v7802_v16 = vpop.xlane.xlu1 %7801 }
0x2c9a   :  { %19154 = vrcp.f32 %v7802_v16  ;;  %v7799_v17 = vpop.xlane.xlu0 %7798 }
0x2c9b   :  { %19156 = vrcp.f32 %v7799_v17 }
0x2ca4   :  { %v19155_v18 = vpop.eup %19154 }
0x2ca5   :  { %v19157_v19 = vpop.eup %19156  ;;  %v7806_v21 = vmul.f32 %v19155_v18, %v19151_v11  ;;  %v15483_v11 = vld [vmem:[%s19318_s9 + $0x70] sm:$0xff] }
0x2ca6   :  { %v7805_v20 = vmul.f32 %v19157_v19, %v19153_v12  ;;  %v15489_v18 = vld [vmem:[%s19323_s13 + $0x70] sm:$0xff] }
0x2ca7   :  { %v15495_v19 = vld [vmem:[%s19328_s17 + $0x70] sm:$0xff] }
0x2ca8   :  { %17342 = vmatprep.mubr.msk.f32.mxu1 %vm537_vm3, %v7805_v20 }
0x2ca9   :  { %17343 = vmatmul.mubr.msk.f32.vlgmr.msra.gmra.mrb[112].mxu1 %vm537_vm3, %v7806_v21 }
0x2caa   :  { %17365 = vmatpush3.xpose.msk.msra.mxu1 %vm134_vm0, %v15441_v15  ;;  %17366 = vmatprep.mubr.msk.f32.mxu1 %vm134_vm0, %v20038_v33 }
0x2cab   :  { %17369 = vmatprep.subr.msk.mxu1 %vm134_vm0, %v15447_v24 }
0x2cad   :  { %17367 = vmatmul.mubr.msk.f32.vlgmr.msra.gmra.mrb[114].mxu1 %vm134_vm0, %v20040_v29 }
0x2cae   :  { %17370 = vmatpush3.xpose.msk.msra.mxu1 %vm134_vm0, %v15447_v24  ;;  %17371 = vmatprep.mubr.msk.f32.mxu1 %vm134_vm0, %v20038_v33  ;;  %v15485_v24 = vld [vmem:[%s19376_s3 + $0xe] ss:$0 sm:$0xff] }
0x2caf   :  { %17374 = vmatprep.subr.msk.mxu1 %vm134_vm0, %v15453_v25 }
0x2cb1   :  { %17372 = vmatmul.mubr.msk.f32.vlgmr.msra.gmra.mrb[116].mxu1 %vm134_vm0, %v20040_v29 }
0x2cb2   :  { %17375 = vmatpush3.xpose.msk.msra.mxu1 %vm134_vm0, %v15453_v25  ;;  %17376 = vmatprep.mubr.msk.f32.mxu1 %vm134_vm0, %v20038_v33 }
0x2cb5   :  { %17377 = vmatmul.mubr.msk.f32.vlgmr.msra.gmra.mrb[118].mxu1 %vm134_vm0, %v20040_v29 }
0x2d7c   :  { %v20262_v23 = vpop.f32.mrb[112].mxu1 }
0x2d7d   :  { %v20264_v26 = vpop.f32.mrb[113].mxu1 }
0x2d80   :  { %v17368_v57 = vpop.f32.mrb[114].mxu1 }
0x2d81   :  { %v8083_v60 = vpop.f32.mrb[115].mxu1  ;;  %v8089_v50 = vadd.f32 %v17368_v57, %v15443_v27 }
0x2d82   :  { %v8084_v28 = vadd.f32 %v15443_v27, %v8083_v60  ;;  %v15491_v60 = vld [vmem:[%s19371_s29 + $0xe] ss:$0 sm:$0xff] }
0x2d84   :  { %v17373_v35 = vpop.f32.mrb[116].mxu1  ;;  %17383 = vmatprep.mubr.msk.f32.mxu1 %vm445_vm1, %v8084_v28 }
0x2d85   :  { %v8177_v36 = vadd.f32 %v17373_v35, %v15449_v34  ;;  %v8171_v37 = vpop.f32.mrb[117].mxu1 }
0x2d86   :  { %v8172_v38 = vadd.f32 %v15449_v34, %v8171_v37  ;;  %v15497_v37 = vld [vmem:[%s19381_s7 + $0xe] ss:$0 sm:$0xff] }
0x2d88   :  { %v18487_v44 = vpack.c.bf16 %v8177_v36, %v8172_v38  ;;  %v17378_v31 = vpop.f32.mrb[118].mxu1 }
0x2d89   :  { %v8265_v46 = vadd.f32 %v17378_v31, %v15455_v41  ;;  %v8259_v47 = vpop.f32.mrb[119].mxu1 }
0x2d8a   :  { %v8260_v48 = vadd.f32 %v15455_v41, %v8259_v47  ;;  %18489 = vmatprep.subr.msk.bf16.mxu1 %vm19389_vm2, %v18487_v44 }
0x2d8b   :  { %18492 = vmatpush3.bf16.xpose.msk.msra.mxu1 %vm19389_vm2, %v18487_v44 }
0x2d8c   :  { %v18493_v49 = vpack.c.bf16 %v8265_v46, %v8260_v48 }
0x2d8e   :  { %18494 = vmatprep.subr.bf16.mxu1 %v18493_v49 }
0x2d92   :  { %17384 = vmatmul.mubr.msk.f32.vlgmr.msra.gmra.mrb[120].mxu1 %vm445_vm1, %v8089_v50 }
0x2d93   :  { %18496 = vmatpush3.bf16.msra.mxu1 %v18493_v49 }
0x2d94   :  { %17412 = vmatprep.subr.msk.mxu1 %vm134_vm0, %v15483_v11 }
0x2e65   :  { %v17385_v51 = vpop.f32.mrb[120].mxu1 }
0x2e66   :  { %v8356_v52 = vmul.f32 0.35355338, %v17385_v51  ;;  %v8346_v53 = vpop.f32.mrb[121].mxu1 }
0x2e67   :  { %v8355_v56 = vmul.f32 0.35355338, %v8346_v53 }
0x2e68   :  { %v8358_v58 = vadd.f32 %v20186_v62, %v8356_v52 }
0x2e69   :  { %v8357_v61 = vadd.f32 %v20190_v7, %v8355_v56 }
0x2e6a   :  { %v8362_v63 = vsel %vm537_vm3, %v8358_v58, -inf }
0x2e6b   :  { %8363 = vmax.xlane.f32.xlu1 %v8362_v63  ;;  %v8359_v0 = vsel %vm537_vm3, %v8357_v61, -inf }
0x2e6c   :  { %8360 = vmax.xlane.f32.xlu0 %v8359_v0 }
0x2ef8   :  { %v8364_v1 = vpop.xlane.xlu1 %8363 }
0x2ef9   :  { %v8366_v2 = vsub.f32 %v8358_v58, %v8364_v1  ;;  %v8361_v3 = vpop.xlane.xlu0 %8360 }
0x2efa   :  { %v8365_v4 = vsub.f32 %v8357_v61, %v8361_v3 }
0x2efb   :  { %v8369_v5 = vmul.f32 1.442695, %v8366_v2 }
0x2efc   :  { %v8367_v59 = vmul.f32 1.442695, %v8365_v4 }
0x2efd   :  { %19158 = vpow2.f32 %v8369_v5  ;;  %v5957_v5 = vmul.f32 0.35355338, %v20130_v54  ;;  %v15525_v54 = vld [vmem:[%s19318_s9 + $0x78] sm:$0xff]  ;;  %s19291_s9 = smov 21  }
0x2efe   :  { %19160 = vpow2.f32 %v8367_v59  ;;  %v5956_v59 = vmul.f32 0.35355338, %v20132_v55 }
0x2f07   :  { %v19159_v6 = vpop.eup %19158 }
0x2f08   :  { %v19161_v8 = vpop.eup %19160  ;;  %v8374_v9 = vsel %vm537_vm3, %v19159_v6, 0.0 }
0x2f09   :  { %8375 = vadd.xlane.f32.xlu1 %v8374_v9  ;;  %v8371_v10 = vsel %vm537_vm3, %v19161_v8, 0.0 }
0x2f0a   :  { %8372 = vadd.xlane.f32.xlu0 %v8371_v10  ;;  %v5959_v10 = vadd.f32 %v20186_v62, %v5957_v5 }
0x2f96   :  { %v8376_v12 = vpop.xlane.xlu1 %8375 }
0x2f97   :  { %19162 = vrcp.f32 %v8376_v12  ;;  %v8373_v13 = vpop.xlane.xlu0 %8372  ;;  %v5958_v12 = vadd.f32 %v20190_v7, %v5956_v59  ;;  %v15527_v59 = vld [vmem:[%s19376_s3 + $0xf] ss:$0 sm:$0xff]  ;;  %s19292_s3 = smov 23  }
0x2f98   :  { %19164 = vrcp.f32 %v8373_v13  ;;  %v5963_v13 = vsel %vm537_vm3, %v5959_v10, -inf }
0x2fa1   :  { %v19163_v14 = vpop.eup %19162 }
0x2fa2   :  { %v19165_v15 = vpop.eup %19164  ;;  %v8380_v17 = vmul.f32 %v19163_v14, %v19159_v6  ;;  %v5960_v14 = vsel %vm537_vm3, %v5958_v12, -inf }
0x2fa3   :  { %v8379_v16 = vmul.f32 %v19165_v15, %v19161_v8 }
0x2fa5   :  { %17390 = vmatprep.mubr.msk.f32.mxu1 %vm537_vm3, %v8379_v16 }
0x2fa6   :  { %17391 = vmatmul.mubr.msk.f32.vlgmr.msra.gmra.mrb[122].mxu1 %vm537_vm3, %v8380_v17 }
0x2fa7   :  { %17413 = vmatpush3.xpose.msk.msra.mxu1 %vm134_vm0, %v15483_v11  ;;  %17414 = vmatprep.mubr.msk.f32.mxu1 %vm134_vm0, %v20038_v33 }
0x2fa8   :  { %17417 = vmatprep.subr.msk.mxu1 %vm134_vm0, %v15489_v18 }
0x2faa   :  { %17415 = vmatmul.mubr.msk.f32.vlgmr.msra.gmra.mrb[124].mxu1 %vm134_vm0, %v20040_v29 }
0x2fab   :  { %17418 = vmatpush3.xpose.msk.msra.mxu1 %vm134_vm0, %v15489_v18  ;;  %17419 = vmatprep.mubr.msk.f32.mxu1 %vm134_vm0, %v20038_v33 }
0x2fac   :  { %17422 = vmatprep.subr.msk.mxu1 %vm134_vm0, %v15495_v19 }
0x2fae   :  { %17420 = vmatmul.mubr.msk.f32.vlgmr.msra.gmra.mrb[126].mxu1 %vm134_vm0, %v20040_v29 }
0x2faf   :  { %17423 = vmatpush3.xpose.msk.msra.mxu1 %vm134_vm0, %v15495_v19  ;;  %17424 = vmatprep.mubr.msk.f32.mxu1 %vm134_vm0, %v20038_v33 }
0x2fb2   :  { %17425 = vmatmul.mubr.msk.f32.vlgmr.msra.gmra.mrb[128].mxu1 %vm134_vm0, %v20040_v29 }
0x3079   :  { %v20304_v20 = vpop.f32.mrb[122].mxu1 }
0x307a   :  { %v20306_v21 = vpop.f32.mrb[123].mxu1 }
0x307d   :  { %v17416_v25 = vpop.f32.mrb[124].mxu1 }
0x307e   :  { %v8657_v27 = vpop.f32.mrb[125].mxu1  ;;  %v8663_v48 = vadd.f32 %v17416_v25, %v15485_v24 }
0x307f   :  { %v8658_v57 = vadd.f32 %v15485_v24, %v8657_v27 }
0x3081   :  { %v17421_v28 = vpop.f32.mrb[126].mxu1  ;;  %17431 = vmatprep.mubr.msk.f32.mxu1 %vm445_vm1, %v8658_v57 }
0x3082   :  { %v8751_v34 = vadd.f32 %v17421_v28, %v15491_v60  ;;  %v8745_v35 = vpop.f32.mrb[127].mxu1 }
0x3083   :  { %v8746_v36 = vadd.f32 %v15491_v60, %v8745_v35 }
0x3085   :  { %v18521_v38 = vpack.c.bf16 %v8751_v34, %v8746_v36  ;;  %v17426_v41 = vpop.f32.mrb[128].mxu1  ;;  %v15531_v34 = vld [vmem:[%s19323_s13 + $0x78] sm:$0xff]  ;;  %s21039_s13 = sld [smem:[%s21356_s0 + %s19298_s8]]  }
0x3086   :  { %v8839_v44 = vadd.f32 %v17426_v41, %v15497_v37  ;;  %v8833_v31 = vpop.f32.mrb[129].mxu1 }
0x3087   :  { %v8834_v46 = vadd.f32 %v15497_v37, %v8833_v31  ;;  %18523 = vmatprep.subr.msk.bf16.mxu1 %vm19389_vm2, %v18521_v38  ;;  %v15288_v31 = vld [vmem:[%s19453_s18 + $0x248] sm:$0xff] }
0x3088   :  { %18526 = vmatpush3.bf16.xpose.msk.msra.mxu1 %vm19389_vm2, %v18521_v38  ;;  %v15537_v38 = vld [vmem:[%s19328_s17 + $0x78] sm:$0xff]  ;;  %s19299_s17 = smov 29  }
0x3089   :  { %v18527_v47 = vpack.c.bf16 %v8839_v44, %v8834_v46  ;;  %v15287_v44 = vld [vmem:[%s19453_s18 + $0x240] sm:$0xff] }
0x308a   :  { %v18337_v46 = vpack.c.bf16 %v15288_v31, %v15287_v44  ;;  %v15261_v44 = vld [vmem:[%s19453_s18 + $0x230] sm:$0xff]  ;;  %v15262_v31 = vld [vmem:[%s19453_s18 + $0x238] sm:$0xff] }
0x308b   :  { %18528 = vmatprep.subr.bf16.mxu1 %v18527_v47 }
0x308c   :  { %18339 = vmatprep.subr.msk.bf16.mxu0 %vm19389_vm2, %v18337_v46 }
0x308f   :  { %17432 = vmatmul.mubr.msk.f32.vlgmr.msra.gmra.mrb[130].mxu1 %vm445_vm1, %v8663_v48 }
0x3090   :  { %18530 = vmatpush3.bf16.msra.mxu1 %v18527_v47 }
0x3091   :  { %17460 = vmatprep.subr.msk.mxu1 %vm134_vm0, %v15525_v54 }
0x3162   :  { %v17433_v49 = vpop.f32.mrb[130].mxu1 }
0x3163   :  { %v8930_v50 = vmul.f32 0.35355338, %v17433_v49  ;;  %v8920_v51 = vpop.f32.mrb[131].mxu1 }
0x3164   :  { %v8929_v52 = vmul.f32 0.35355338, %v8920_v51  ;;  %v15290_v51 = vld [vmem:[%s19453_s18 + $0x258] sm:$0xff] }
0x3165   :  { %v8932_v53 = vadd.f32 %v20186_v62, %v8930_v50  ;;  %v15289_v50 = vld [vmem:[%s19453_s18 + $0x250] sm:$0xff] }
0x3166   :  { %v8931_v56 = vadd.f32 %v20190_v7, %v8929_v52 }
0x3167   :  { %v8936_v58 = vsel %vm537_vm3, %v8932_v53, -inf }
0x3168   :  { %8937 = vmax.xlane.f32.xlu1 %v8936_v58  ;;  %v8933_v61 = vsel %vm537_vm3, %v8931_v56, -inf  ;;  %v18343_v58 = vpack.c.bf16 %v15290_v51, %v15289_v50  ;;  %v15342_v50 = vld [vmem:[%s19453_s18 + $0x298] sm:$0xff] }
0x3169   :  { %8934 = vmax.xlane.f32.xlu0 %v8933_v61  ;;  %v15291_v61 = vld [vmem:[%s19453_s18 + $0x260] sm:$0xff] }
0x31f5   :  { %v8938_v63 = vpop.xlane.xlu1 %8937 }
0x31f6   :  { %v8940_v0 = vsub.f32 %v8932_v53, %v8938_v63  ;;  %v8935_v1 = vpop.xlane.xlu0 %8934  ;;  %v15292_v63 = vld [vmem:[%s19453_s18 + $0x268] sm:$0xff] }
0x31f7   :  { %v8939_v2 = vsub.f32 %v8931_v56, %v8935_v1  ;;  %v15293_v1 = vld [vmem:[%s19453_s18 + $0x270] sm:$0xff] }
0x31f8   :  { %v8943_v3 = vmul.f32 1.442695, %v8940_v0  ;;  %v18349_v0 = vpack.c.bf16 %v15292_v63, %v15291_v61  ;;  %v15382_v63 = vld [vmem:[%s19453_s18 + $0x2c8] sm:$0xff] }
0x31f9   :  { %v8941_v4 = vmul.f32 1.442695, %v8939_v2  ;;  %v15294_v2 = vld [vmem:[%s19453_s18 + $0x278] sm:$0xff] }
0x31fa   :  { %19166 = vpow2.f32 %v8943_v3  ;;  %v18355_v3 = vpack.c.bf16 %v15294_v2, %v15293_v1  ;;  %v15383_v1 = vld [vmem:[%s19453_s18 + $0x2d0] sm:$0xff]  ;;  %v15384_v2 = vld [vmem:[%s19453_s18 + $0x2d8] sm:$0xff] }
0x31fb   :  { %19168 = vpow2.f32 %v8941_v4 }
0x3204   :  { %v19167_v6 = vpop.eup %19166 }
0x3205   :  { %v19169_v8 = vpop.eup %19168  ;;  %v8948_v9 = vsel %vm537_vm3, %v19167_v6, 0.0 }
0x3206   :  { %8949 = vadd.xlane.f32.xlu1 %v8948_v9  ;;  %v8945_v11 = vsel %vm537_vm3, %v19169_v8, 0.0 }
0x3207   :  { %8946 = vadd.xlane.f32.xlu0 %v8945_v11 }
0x320a   :  { %5964 = vmax.xlane.f32.xlu1 %v5963_v13 }
0x320b   :  { %5961 = vmax.xlane.f32.xlu0 %v5960_v14 }
0x3293   :  { %v8950_v55 = vpop.xlane.xlu1 %8949 }
0x3294   :  { %19170 = vrcp.f32 %v8950_v55  ;;  %v8947_v15 = vpop.xlane.xlu0 %8946 }
0x3295   :  { %19172 = vrcp.f32 %v8947_v15 }
0x3297   :  { %v5965_v16 = vpop.xlane.xlu1 %5964 }
0x3298   :  { %v5967_v17 = vsub.f32 %v5959_v10, %v5965_v16  ;;  %v5962_v18 = vpop.xlane.xlu0 %5961  ;;  %v15533_v10 = vld [vmem:[%s19371_s29 + $0xf] ss:$0 sm:$0xff]  ;;  %s20681_s29 = sld [smem:[%s21356_s0 + %s19291_s9]]  }
0x3299   :  { %v5966_v19 = vsub.f32 %v5958_v12, %v5962_v18 }
0x329a   :  { %v5970_v24 = vmul.f32 1.442695, %v5967_v17 }
0x329b   :  { %v5968_v25 = vmul.f32 1.442695, %v5966_v19 }
0x329c   :  { %19174 = vpow2.f32 %v5970_v24 }
0x329d   :  { %19176 = vpow2.f32 %v5968_v25  ;;  %v15255_v25 = vld [vmem:[%s19453_s18 + $0x200] sm:$0xff] }
0x329e   :  { %v19171_v27 = vpop.eup %19170 }
0x329f   :  { %v19173_v57 = vpop.eup %19172  ;;  %v8954_v28 = vmul.f32 %v19171_v27, %v19167_v6  ;;  %v15256_v27 = vld [vmem:[%s19453_s18 + $0x208] sm:$0xff] }
0x32a0   :  { %v8953_v60 = vmul.f32 %v19173_v57, %v19169_v8  ;;  %v18361_v57 = vpack.c.bf16 %v15256_v27, %v15255_v25  ;;  %v15428_v25 = vld [vmem:[%s19453_s18 + $0x328] sm:$0xff] }
0x32a2   :  { %17438 = vmatprep.mubr.msk.f32.mxu1 %vm537_vm3, %v8953_v60  ;;  %v15257_v60 = vld [vmem:[%s19453_s18 + $0x210] sm:$0xff] }
0x32a3   :  { %17439 = vmatmul.mubr.msk.f32.vlgmr.msra.gmra.mrb[132].mxu1 %vm537_vm3, %v8954_v28  ;;  %v15258_v28 = vld [vmem:[%s19453_s18 + $0x218] sm:$0xff] }
0x32a4   :  { %17461 = vmatpush3.xpose.msk.msra.mxu1 %vm134_vm0, %v15525_v54  ;;  %17462 = vmatprep.mubr.msk.f32.mxu1 %vm134_vm0, %v20038_v33  ;;  %v15539_v54 = vld [vmem:[%s19381_s7 + $0xf] ss:$0 sm:$0xff]  ;;  %s21293_s7 = sld [smem:[%s21356_s0 + %s19299_s17]]  }
0x32a5   :  { %17465 = vmatprep.subr.msk.mxu1 %vm134_vm0, %v15531_v34 }
0x32a6   :  { %v19175_v35 = vpop.eup %19174 }
0x32a7   :  { %v19177_v36 = vpop.eup %19176  ;;  %17463 = vmatmul.mubr.msk.f32.vlgmr.msra.gmra.mrb[134].mxu1 %vm134_vm0, %v20040_v29  ;;  %v5975_v37 = vsel %vm537_vm3, %v19175_v35, 0.0 }
0x32a8   :  { %17466 = vmatpush3.xpose.msk.msra.mxu1 %vm134_vm0, %v15531_v34  ;;  %5976 = vadd.xlane.f32.xlu1 %v5975_v37  ;;  %v5972_v41 = vsel %vm537_vm3, %v19177_v36, 0.0  ;;  %v15259_v37 = vld [vmem:[%s19453_s18 + $0x220] sm:$0xff] }
0x32a9   :  { %17467 = vmatprep.mubr.msk.f32.mxu1 %vm134_vm0, %v20038_v33  ;;  %5973 = vadd.xlane.f32.xlu0 %v5972_v41 }
0x32aa   :  { %17470 = vmatprep.subr.msk.mxu1 %vm134_vm0, %v15537_v38  ;;  %v14692_v45 = vld [vmem:[%s21293_s7] sm:$0xff] }
0x32ab   :  { %17468 = vmatmul.mubr.msk.f32.vlgmr.msra.gmra.mrb[136].mxu1 %vm134_vm0, %v20040_v29 }
0x32ac   :  { %17471 = vmatpush3.xpose.msk.msra.mxu1 %vm134_vm0, %v15537_v38  ;;  %17472 = vmatprep.mubr.msk.f32.mxu1 %vm134_vm0, %v20038_v33  ;;  %v15260_v38 = vld [vmem:[%s19453_s18 + $0x228] sm:$0xff] }
0x32ad   :  { %v18373_v41 = vpack.c.bf16 %v15260_v38, %v15259_v37  ;;  %v15469_v38 = vld [vmem:[%s19453_s18 + $0x360] sm:$0xff] }
0x32af   :  { %17473 = vmatmul.mubr.msk.f32.vlgmr.msra.gmra.mrb[138].mxu1 %vm134_vm0, %v20040_v29 }
0x3335   :  { %v5977_v47 = vpop.xlane.xlu1 %5976 }
0x3336   :  { %19178 = vrcp.f32 %v5977_v47  ;;  %v5974_v48 = vpop.xlane.xlu0 %5973  ;;  %v15340_v47 = vld [vmem:[%s19453_s18 + $0x288] sm:$0xff] }
0x3337   :  { %19180 = vrcp.f32 %v5974_v48 }
0x3340   :  { %v19179_v49 = vpop.eup %19178 }
0x3341   :  { %v19181_v52 = vpop.eup %19180  ;;  %v5981_v56 = vmul.f32 %v19179_v49, %v19175_v35  ;;  %v15341_v49 = vld [vmem:[%s19453_s18 + $0x290] sm:$0xff] }
0x3342   :  { %v5980_v53 = vmul.f32 %v19181_v52, %v19177_v36  ;;  %v18367_v36 = vpack.c.bf16 %v15258_v28, %v15257_v60  ;;  %v18401_v51 = vpack.c.bf16 %v15342_v50, %v15341_v49  ;;  %v15343_v52 = vld [vmem:[%s19453_s18 + $0x2a0] sm:$0xff]  ;;  %v15466_v28 = vld [vmem:[%s19453_s18 + $0x348] sm:$0xff]  ;;  %v15510_v49 = vld [vmem:[%s19453_s18 + $0x398] sm:$0xff] }
0x3344   :  { %17179 = vmatprep.mubr.msk.f32.mxu0 %vm537_vm3, %v5980_v53  ;;  %v15344_v53 = vld [vmem:[%s19453_s18 + $0x2a8] sm:$0xff] }
0x3345   :  { %17180 = vmatmul.mubr.msk.f32.vlgmr.msra.gmra.mrb[22].mxu0 %vm537_vm3, %v5981_v56  ;;  %v18407_v56 = vpack.c.bf16 %v15344_v53, %v15343_v52  ;;  %v15512_v52 = vld [vmem:[%s19453_s18 + $0x3a8] sm:$0xff] }
0x3346   :  { %18342 = vmatpush3.bf16.xpose.msk.msra.mxu0 %vm19389_vm2, %v18337_v46  ;;  %v18379_v46 = vpack.c.bf16 %v15262_v31, %v15261_v44  ;;  %v15472_v31 = vld [vmem:[%s19453_s18 + $0x378] sm:$0xff] }
0x3347   :  { %18345 = vmatprep.subr.msk.bf16.mxu0 %vm19389_vm2, %v18343_v58 }
0x334e   :  { %18348 = vmatpush3.bf16.xpose.msk.msra.mxu0 %vm19389_vm2, %v18343_v58  ;;  %v15346_v58 = vld [vmem:[%s19453_s18 + $0x2b8] sm:$0xff] }
0x334f   :  { %18351 = vmatprep.subr.msk.bf16.mxu0 %vm19389_vm2, %v18349_v0 }
0x3356   :  { %18354 = vmatpush3.bf16.xpose.msk.msra.mxu0 %vm19389_vm2, %v18349_v0 }
0x3357   :  { %18357 = vmatprep.subr.msk.bf16.mxu0 %vm19389_vm2, %v18355_v3 }
0x335e   :  { %18360 = vmatpush3.bf16.xpose.msk.msra.mxu0 %vm19389_vm2, %v18355_v3  ;;  %v18435_v3 = vpack.c.bf16 %v15384_v2, %v15383_v1 }
0x335f   :  { %18363 = vmatprep.subr.msk.bf16.mxu0 %vm19389_vm2, %v18361_v57 }
0x3376   :  { %v20380_v4 = vpop.f32.mrb[132].mxu1 }
0x3377   :  { %v20382_v5 = vpop.f32.mrb[133].mxu1 }
0x337a   :  { %v17464_v6 = vpop.f32.mrb[134].mxu1 }
0x337b   :  { %v9231_v8 = vpop.f32.mrb[135].mxu1  ;;  %v9237_v24 = vadd.f32 %v17464_v6, %v15527_v59  ;;  %v15386_v6 = vld [vmem:[%s19453_s18 + $0x2e8] sm:$0xff] }
0x337c   :  { %v9232_v9 = vadd.f32 %v15527_v59, %v9231_v8  ;;  %v15385_v59 = vld [vmem:[%s19453_s18 + $0x2e0] sm:$0xff] }
0x337e   :  { %v17469_v11 = vpop.f32.mrb[136].mxu1  ;;  %17479 = vmatprep.mubr.msk.f32.mxu1 %vm445_vm1, %v9232_v9 }
0x337f   :  { %v9325_v12 = vadd.f32 %v17469_v11, %v15533_v10  ;;  %v9319_v13 = vpop.f32.mrb[137].mxu1 }
0x3380   :  { %v9320_v14 = vadd.f32 %v15533_v10, %v9319_v13 }
0x3382   :  { %v18555_v55 = vpack.c.bf16 %v9325_v12, %v9320_v14  ;;  %v17474_v15 = vpop.f32.mrb[138].mxu1 }
0x3383   :  { %v9413_v16 = vadd.f32 %v17474_v15, %v15539_v54  ;;  %v9407_v17 = vpop.f32.mrb[139].mxu1  ;;  %v15424_v15 = vld [vmem:[%s19453_s18 + $0x308] sm:$0xff] }
0x3384   :  { %v9408_v18 = vadd.f32 %v15539_v54, %v9407_v17  ;;  %18557 = vmatprep.subr.msk.bf16.mxu1 %vm19389_vm2, %v18555_v55  ;;  %v15388_v54 = vld [vmem:[%s19453_s18 + $0x2f8] sm:$0xff]  ;;  %v15425_v17 = vld [vmem:[%s19453_s18 + $0x310] sm:$0xff] }
0x3385   :  { %18560 = vmatpush3.bf16.xpose.msk.msra.mxu1 %vm19389_vm2, %v18555_v55  ;;  %v15423_v55 = vld [vmem:[%s19453_s18 + $0x300] sm:$0xff] }
0x3386   :  { %v18561_v19 = vpack.c.bf16 %v9413_v16, %v9408_v18  ;;  %v18463_v16 = vpack.c.bf16 %v15424_v15, %v15423_v55  ;;  %v15426_v18 = vld [vmem:[%s19453_s18 + $0x318] sm:$0xff] }
0x3388   :  { %18562 = vmatprep.subr.bf16.mxu1 %v18561_v19 }
0x338c   :  { %17480 = vmatmul.mubr.msk.f32.vlgmr.msra.gmra.mrb[140].mxu1 %vm445_vm1, %v9237_v24  ;;  %v15427_v24 = vld [vmem:[%s19453_s18 + $0x320] sm:$0xff] }
0x338d   :  { %18564 = vmatpush3.bf16.msra.mxu1 %v18561_v19  ;;  %v18469_v19 = vpack.c.bf16 %v15426_v18, %v15425_v17  ;;  %v18475_v27 = vpack.c.bf16 %v15428_v25, %v15427_v24  ;;  %v15567_v24 = vld [vmem:[%s19908_s22 + $0x1] ss:$0 sm:$0xff]  ;;  %s19293_s22 = smov 25  }
0x3418   :  { %v17181_v34 = vpop.f32.mrb[22].mxu0 }
0x3419   :  { %v6054_v35 = vpop.f32.mrb[23].mxu0 }
0x341a   :  { %17198 = vmatprep.mubr.msk.f32.mxu0 %vm445_vm1, %v6054_v35  ;;  %v15467_v35 = vld [vmem:[%s19453_s18 + $0x350] sm:$0xff] }
0x341b   :  { %17199 = vmatmul.mubr.msk.f32.vlgmr.msra.gmra.mrb[24].mxu0 %vm445_vm1, %v17181_v34 }
0x341c   :  { %18366 = vmatpush3.bf16.xpose.msk.msra.mxu0 %vm19389_vm2, %v18361_v57  ;;  %17217 = vmatprep.mubr.msk.f32.mxu0 %vm445_vm1, %v20105_v40  ;;  %v15339_v40 = vld [vmem:[%s19453_s18 + $0x280] sm:$0xff]  ;;  %v15430_v57 = vld [vmem:[%s19453_s18 + $0x338] sm:$0xff] }
0x341d   :  { %18369 = vmatprep.subr.msk.bf16.mxu0 %vm19389_vm2, %v18367_v36  ;;  %v18395_v48 = vpack.c.bf16 %v15340_v47, %v15339_v40  ;;  %v15508_v40 = vld [vmem:[%s19453_s18 + $0x388] sm:$0xff] }
0x3424   :  { %18372 = vmatpush3.bf16.xpose.msk.msra.mxu0 %vm19389_vm2, %v18367_v36  ;;  %v15468_v36 = vld [vmem:[%s19453_s18 + $0x358] sm:$0xff] }
0x3425   :  { %18375 = vmatprep.subr.msk.bf16.mxu0 %vm19389_vm2, %v18373_v41  ;;  %v18503_v37 = vpack.c.bf16 %v15468_v36, %v15467_v35  ;;  %v15572_v35 = vld [vmem:[%s19920_s26 + $0x80] sm:$0xff]  ;;  %v15573_v36 = vld [vmem:[%s19920_s26 + $0x88] sm:$0xff] }
0x342c   :  { %18378 = vmatpush3.bf16.xpose.msk.msra.mxu0 %vm19389_vm2, %v18373_v41  ;;  %v15470_v41 = vld [vmem:[%s19453_s18 + $0x368] sm:$0xff] }
0x342d   :  { %18381 = vmatprep.subr.msk.bf16.mxu0 %vm19389_vm2, %v18379_v46  ;;  %v18509_v44 = vpack.c.bf16 %v15470_v41, %v15469_v38  ;;  %v18589_v38 = vpack.c.bf16 %v15573_v36, %v15572_v35  ;;  %v15575_v41 = vld [vmem:[%s19920_s26 + $0x98] sm:$0xff]  ;;  %v15589_v35 = vld [vmem:[%s20008_s20 + $0x1] ss:$0 sm:$0xff]  ;;  %s14880_s20 = sld [smem:[%s21356_s0 + %s19302_s15]]  }
0x342f   :  { %18591 = vmatprep.subr.msk.bf16.mxu1 %vm19924_vm4, %v18589_v38 }
0x3434   :  { %18384 = vmatpush3.bf16.xpose.msk.msra.mxu0 %vm19389_vm2, %v18379_v46 }
0x3435   :  { %18397 = vmatprep.subr.msk.bf16.mxu0 %vm19389_vm2, %v18395_v48 }
0x343b   :  { %17218 = vmatmul.mubr.msk.f32.vlgmr.msra.gmra.mrb[24].mxu0 %vm445_vm1, %v20103_v39  ;;  %v15345_v39 = vld [vmem:[%s19453_s18 + $0x2b0] sm:$0xff] }
0x343c   :  { %18400 = vmatpush3.bf16.xpose.msk.msra.mxu0 %vm19389_vm2, %v18395_v48  ;;  %17265 = vmatprep.mubr.msk.f32.mxu0 %vm445_vm1, %v20174_v43  ;;  %v18413_v61 = vpack.c.bf16 %v15346_v58, %v15345_v39  ;;  %v15381_v43 = vld [vmem:[%s19453_s18 + $0x2c0] sm:$0xff]  ;;  %v15509_v48 = vld [vmem:[%s19453_s18 + $0x390] sm:$0xff] }
0x343d   :  { %18403 = vmatprep.subr.msk.bf16.mxu0 %vm19389_vm2, %v18401_v51  ;;  %v18429_v0 = vpack.c.bf16 %v15382_v63, %v15381_v43  ;;  %v18537_v50 = vpack.c.bf16 %v15510_v49, %v15509_v48  ;;  %v15582_v49 = vld [vmem:[%s19920_s26 + $0xd0] sm:$0xff] }
0x3444   :  { %18406 = vmatpush3.bf16.xpose.msk.msra.mxu0 %vm19389_vm2, %v18401_v51  ;;  %v15511_v51 = vld [vmem:[%s19453_s18 + $0x3a0] sm:$0xff] }
0x3445   :  { %18409 = vmatprep.subr.msk.bf16.mxu0 %vm19389_vm2, %v18407_v56  ;;  %v18543_v53 = vpack.c.bf16 %v15512_v52, %v15511_v51 }
0x344c   :  { %18412 = vmatpush3.bf16.xpose.msk.msra.mxu0 %vm19389_vm2, %v18407_v56  ;;  %v15513_v56 = vld [vmem:[%s19453_s18 + $0x3b0] sm:$0xff] }
0x344d   :  { %18415 = vmatprep.subr.msk.bf16.mxu0 %vm19389_vm2, %v18413_v61 }
0x3454   :  { %18418 = vmatpush3.bf16.xpose.msk.msra.mxu0 %vm19389_vm2, %v18413_v61 }
0x3455   :  { %18431 = vmatprep.subr.msk.bf16.mxu0 %vm19389_vm2, %v18429_v0 }
0x345b   :  { %17266 = vmatmul.mubr.msk.f32.vlgmr.msra.gmra.mrb[24].mxu0 %vm445_vm1, %v20172_v42  ;;  %v18441_v42 = vpack.c.bf16 %v15386_v6, %v15385_v59  ;;  %v15549_v59 = vld [vmem:[%s19453_s18 + $0x3c0] sm:$0xff]  ;;  %v15550_v6 = vld [vmem:[%s19453_s18 + $0x3c8] sm:$0xff] }
0x345c   :  { %18434 = vmatpush3.bf16.xpose.msk.msra.mxu0 %vm19389_vm2, %v18429_v0  ;;  %17313 = vmatprep.mubr.msk.f32.mxu0 %vm445_vm1, %v20222_v32 }
0x345d   :  { %18437 = vmatprep.subr.msk.bf16.mxu0 %vm19389_vm2, %v18435_v3 }
0x345f   :  { %v17481_v8 = vpop.f32.mrb[140].mxu1 }
0x3460   :  { %v9504_v9 = vmul.f32 0.35355338, %v17481_v8  ;;  %v9494_v10 = vpop.f32.mrb[141].mxu1  ;;  %v15551_v8 = vld [vmem:[%s19453_s18 + $0x3d0] sm:$0xff] }
0x3461   :  { %v9503_v11 = vmul.f32 0.35355338, %v9494_v10  ;;  %v15552_v10 = vld [vmem:[%s19453_s18 + $0x3d8] sm:$0xff] }
0x3462   :  { %v20466_v12 = vadd.f32 %v20186_v62, %v9504_v9  ;;  %v15387_v62 = vld [vmem:[%s19453_s18 + $0x2f0] sm:$0xff]  ;;  %v18565_v9 = vpack.c.bf16 %v15550_v6, %v15549_v59  ;;  %v15608_v6 = vld [vmem:[%s19981_s1 + $0x40] sm:$0xff] }
0x3463   :  { %v20469_v13 = vadd.f32 %v20190_v7, %v9503_v11  ;;  %v18447_v7 = vpack.c.bf16 %v15388_v54, %v15387_v62  ;;  %v18571_v11 = vpack.c.bf16 %v15552_v10, %v15551_v8  ;;  %v15609_v8 = vld [vmem:[%s19981_s1 + $0x48] sm:$0xff] }
0x3464   :  { %18440 = vmatpush3.bf16.xpose.msk.msra.mxu0 %vm19389_vm2, %v18435_v3  ;;  %v9510_v32 = vsel %vm537_vm3, %v20466_v12, -inf }
0x3465   :  { %9511 = vmax.xlane.f32.xlu1 %v9510_v32  ;;  %v9507_v14 = vsel %vm537_vm3, %v20469_v13, -inf  ;;  %18443 = vmatprep.subr.msk.bf16.mxu0 %vm19389_vm2, %v18441_v42  ;;  %v15555_v32 = vld [vmem:[%s19453_s18 + $0x3f0] sm:$0xff] }
0x3466   :  { %9508 = vmax.xlane.f32.xlu0 %v9507_v14  ;;  %v15556_v14 = vld [vmem:[%s19453_s18 + $0x3f8] sm:$0xff] }
0x3467   :  { %v18583_v62 = vpack.c.bf16 %v15556_v14, %v15555_v32 }
0x346c   :  { %18446 = vmatpush3.bf16.xpose.msk.msra.mxu0 %vm19389_vm2, %v18441_v42  ;;  %v15553_v42 = vld [vmem:[%s19453_s18 + $0x3e0] sm:$0xff] }
0x346d   :  { %18449 = vmatprep.subr.msk.bf16.mxu0 %vm19389_vm2, %v18447_v7 }
0x3474   :  { %18452 = vmatpush3.bf16.xpose.msk.msra.mxu0 %vm19389_vm2, %v18447_v7 }
0x3475   :  { %18465 = vmatprep.subr.msk.bf16.mxu0 %vm19389_vm2, %v18463_v16 }
0x347b   :  { %17314 = vmatmul.mubr.msk.f32.vlgmr.msra.gmra.mrb[24].mxu0 %vm445_vm1, %v20220_v22  ;;  %v15429_v22 = vld [vmem:[%s19453_s18 + $0x330] sm:$0xff] }
0x347c   :  { %18468 = vmatpush3.bf16.xpose.msk.msra.mxu0 %vm19389_vm2, %v18463_v16  ;;  %17361 = vmatprep.mubr.msk.f32.mxu0 %vm445_vm1, %v20264_v26  ;;  %v18481_v60 = vpack.c.bf16 %v15430_v57, %v15429_v22  ;;  %v15465_v26 = vld [vmem:[%s19453_s18 + $0x340] sm:$0xff] }
0x347d   :  { %18471 = vmatprep.subr.msk.bf16.mxu0 %vm19389_vm2, %v18469_v19  ;;  %v18497_v34 = vpack.c.bf16 %v15466_v28, %v15465_v26 }
0x3484   :  { %18474 = vmatpush3.bf16.xpose.msk.msra.mxu0 %vm19389_vm2, %v18469_v19 }
0x3485   :  { %18477 = vmatprep.subr.msk.bf16.mxu0 %vm19389_vm2, %v18475_v27 }
0x348c   :  { %18480 = vmatpush3.bf16.xpose.msk.msra.mxu0 %vm19389_vm2, %v18475_v27 }
0x348d   :  { %18483 = vmatprep.subr.msk.bf16.mxu0 %vm19389_vm2, %v18481_v60 }
0x3494   :  { %18486 = vmatpush3.bf16.xpose.msk.msra.mxu0 %vm19389_vm2, %v18481_v60 }
0x3495   :  { %18499 = vmatprep.subr.msk.bf16.mxu0 %vm19389_vm2, %v18497_v34 }
0x349b   :  { %17362 = vmatmul.mubr.msk.f32.vlgmr.msra.gmra.mrb[24].mxu0 %vm445_vm1, %v20262_v23  ;;  %v15471_v23 = vld [vmem:[%s19453_s18 + $0x370] sm:$0xff] }
0x349c   :  { %18502 = vmatpush3.bf16.xpose.msk.msra.mxu0 %vm19389_vm2, %v18497_v34  ;;  %17409 = vmatprep.mubr.msk.f32.mxu0 %vm445_vm1, %v20306_v21  ;;  %v18515_v46 = vpack.c.bf16 %v15472_v31, %v15471_v23  ;;  %v15507_v21 = vld [vmem:[%s19453_s18 + $0x380] sm:$0xff]  ;;  %v15578_v31 = vld [vmem:[%s19920_s26 + $0xb0] sm:$0xff] }
0x349d   :  { %18505 = vmatprep.subr.msk.bf16.mxu0 %vm19389_vm2, %v18503_v37  ;;  %v18531_v47 = vpack.c.bf16 %v15508_v40, %v15507_v21  ;;  %v15580_v40 = vld [vmem:[%s19920_s26 + $0xc0] sm:$0xff] }
0x34a4   :  { %18508 = vmatpush3.bf16.xpose.msk.msra.mxu0 %vm19389_vm2, %v18503_v37  ;;  %v15574_v37 = vld [vmem:[%s19920_s26 + $0x90] sm:$0xff] }
0x34a5   :  { %18511 = vmatprep.subr.msk.bf16.mxu0 %vm19389_vm2, %v18509_v44 }
0x34ac   :  { %18514 = vmatpush3.bf16.xpose.msk.msra.mxu0 %vm19389_vm2, %v18509_v44  ;;  %v18595_v44 = vpack.c.bf16 %v15575_v41, %v15574_v37 }
0x34ad   :  { %18517 = vmatprep.subr.msk.bf16.mxu0 %vm19389_vm2, %v18515_v46 }
0x34b4   :  { %18520 = vmatpush3.bf16.xpose.msk.msra.mxu0 %vm19389_vm2, %v18515_v46  ;;  %v15579_v46 = vld [vmem:[%s19920_s26 + $0xb8] sm:$0xff] }
0x34b5   :  { %18533 = vmatprep.subr.msk.bf16.mxu0 %vm19389_vm2, %v18531_v47  ;;  %v18607_v21 = vpack.c.bf16 %v15579_v46, %v15578_v31 }
0x34bb   :  { %17410 = vmatmul.mubr.msk.f32.vlgmr.msra.gmra.mrb[24].mxu0 %vm445_vm1, %v20304_v20  ;;  %v15514_v20 = vld [vmem:[%s19453_s18 + $0x3b8] sm:$0xff] }
0x34bc   :  { %18536 = vmatpush3.bf16.xpose.msk.msra.mxu0 %vm19389_vm2, %v18531_v47  ;;  %17457 = vmatprep.mubr.msk.f32.mxu0 %vm445_vm1, %v20382_v5  ;;  %v18549_v39 = vpack.c.bf16 %v15514_v20, %v15513_v56  ;;  %v15581_v47 = vld [vmem:[%s19920_s26 + $0xc8] sm:$0xff] }
0x34bd   :  { %18539 = vmatprep.subr.msk.bf16.mxu0 %vm19389_vm2, %v18537_v50  ;;  %v18613_v48 = vpack.c.bf16 %v15581_v47, %v15580_v40 }
0x34c4   :  { %18542 = vmatpush3.bf16.xpose.msk.msra.mxu0 %vm19389_vm2, %v18537_v50  ;;  %v15583_v50 = vld [vmem:[%s19920_s26 + $0xd8] sm:$0xff] }
0x34c5   :  { %18545 = vmatprep.subr.msk.bf16.mxu0 %vm19389_vm2, %v18543_v53  ;;  %v18619_v51 = vpack.c.bf16 %v15583_v50, %v15582_v49 }
0x34cc   :  { %18548 = vmatpush3.bf16.xpose.msk.msra.mxu0 %vm19389_vm2, %v18543_v53 }
0x34cd   :  { %18551 = vmatprep.subr.msk.bf16.mxu0 %vm19389_vm2, %v18549_v39 }
0x34d4   :  { %18554 = vmatpush3.bf16.xpose.msk.msra.mxu0 %vm19389_vm2, %v18549_v39 }
0x34d5   :  { %18567 = vmatprep.subr.msk.bf16.mxu0 %vm19389_vm2, %v18565_v9 }
0x34db   :  { %17458 = vmatmul.mubr.msk.f32.vlgmr.msra.gmra.mrb[24].mxu0 %vm445_vm1, %v20380_v4 }
0x34dc   :  { %18570 = vmatpush3.bf16.xpose.msk.msra.mxu0 %vm19389_vm2, %v18565_v9  ;;  %v18637_v9 = vpack.c.bf16 %v15609_v8, %v15608_v6 }
0x34dd   :  { %18573 = vmatprep.subr.msk.bf16.mxu0 %vm19389_vm2, %v18571_v11 }
0x34e4   :  { %18576 = vmatpush3.bf16.xpose.msk.msra.mxu0 %vm19389_vm2, %v18571_v11 }
0x34f2   :  { %v9512_v5 = vpop.xlane.xlu1 %9511 }
0x34f3   :  { %v9514_v58 = vsub.f32 %v20466_v12, %v9512_v5  ;;  %v9509_v61 = vpop.xlane.xlu0 %9508  ;;  %v15554_v12 = vld [vmem:[%s19453_s18 + $0x3e8] sm:$0xff]  ;;  %s20686_s18 = sld [smem:[%s21356_s0 + %s19292_s3]]  }
0x34f4   :  { %v9513_v43 = vsub.f32 %v20469_v13, %v9509_v61  ;;  %v18577_v13 = vpack.c.bf16 %v15554_v12, %v15553_v42 }
0x34f5   :  { %v9517_v63 = vmul.f32 1.442695, %v9514_v58 }
0x34f6   :  { %v9515_v0 = vmul.f32 1.442695, %v9513_v43  ;;  %18579 = vmatprep.subr.msk.bf16.mxu0 %vm19389_vm2, %v18577_v13 }
0x34f7   :  { %19182 = vpow2.f32 %v9517_v63  ;;  %18582 = vmatpush3.bf16.xpose.msk.msra.mxu0 %vm19389_vm2, %v18577_v13 }
0x34f8   :  { %19184 = vpow2.f32 %v9515_v0  ;;  %18585 = vmatprep.subr.msk.bf16.mxu0 %vm19389_vm2, %v18583_v62  ;;  %v15584_v0 = vld [vmem:[%s19920_s26 + $0xe0] sm:$0xff] }
0x34ff   :  { %18588 = vmatpush3.bf16.xpose.msk.msra.mxu0 %vm19389_vm2, %v18583_v62  ;;  %v15570_v62 = vld [vmem:[%s19988_s6 + $0x1] ss:$0 sm:$0xff]  ;;  %s20697_s6 = sld [smem:[%s21356_s0 + %s19293_s22]]  }
0x3501   :  { %v19183_v1 = vpop.eup %19182 }
0x3502   :  { %v19185_v2 = vpop.eup %19184  ;;  %v9522_v3 = vsel %vm537_vm3, %v19183_v1, 0.0 }
0x3503   :  { %9523 = vadd.xlane.f32.xlu1 %v9522_v3  ;;  %v9519_v4 = vsel %vm537_vm3, %v19185_v2, 0.0  ;;  %v15586_v3 = vld [vmem:[%s19920_s26 + $0xf0] sm:$0xff] }
0x3504   :  { %9520 = vadd.xlane.f32.xlu0 %v9519_v4  ;;  %v15587_v4 = vld [vmem:[%s19920_s26 + $0xf8] sm:$0xff] }
0x3505   :  { %v18631_v59 = vpack.c.bf16 %v15587_v4, %v15586_v3 }
0x3590   :  { %v9524_v54 = vpop.xlane.xlu1 %9523 }
0x3591   :  { %19186 = vrcp.f32 %v9524_v54  ;;  %v9521_v7 = vpop.xlane.xlu0 %9520 }
0x3592   :  { %19188 = vrcp.f32 %v9521_v7 }
0x359b   :  { %v19187_v55 = vpop.eup %19186 }
0x359c   :  { %v19189_v15 = vpop.eup %19188  ;;  %v9528_v17 = vmul.f32 %v19187_v55, %v19183_v1  ;;  %v15585_v1 = vld [vmem:[%s19920_s26 + $0xe8] sm:$0xff] }
0x359d   :  { %v9527_v16 = vmul.f32 %v19189_v15, %v19185_v2  ;;  %v18625_v2 = vpack.c.bf16 %v15585_v1, %v15584_v0  ;;  %v15571_v15 = vld [vmem:[%s19993_s14 + $0x1] ss:$0 sm:$0xff] }
0x359f   :  { %17486 = vmatprep.mubr.msk.f32.mxu1 %vm537_vm3, %v9527_v16 }
0x35a0   :  { %17487 = vmatmul.mubr.msk.f32.vlgmr.msra.gmra.mrb[142].mxu1 %vm537_vm3, %v9528_v17 }
0x35a1   :  { %18594 = vmatpush3.bf16.xpose.msk.msra.mxu1 %vm19924_vm4, %v18589_v38 }
0x35a2   :  { %18597 = vmatprep.subr.msk.bf16.mxu1 %vm19924_vm4, %v18595_v44 }
0x35a9   :  { %18600 = vmatpush3.bf16.xpose.msk.msra.mxu1 %vm19924_vm4, %v18595_v44 }
0x3673   :  { %v17488_v18 = vpop.f32.mrb[142].mxu1 }
0x3674   :  { %v9601_v19 = vpop.f32.mrb[143].mxu1 }
0x3675   :  { %17505 = vmatprep.mubr.msk.f32.mxu0 %vm445_vm1, %v9601_v19 }
0x3676   :  { %17506 = vmatmul.mubr.msk.f32.vlgmr.msra.gmra.mrb[24].mxu0 %vm445_vm1, %v17488_v18 }
0x3749   :  { %v17507_v25 = vpop.f32.mrb[24].mxu0 }
0x374a   :  { %v9733_v27 = vadd.f32 %v17507_v25, %v15567_v24  ;;  %v9715_v22 = vpop.f32.mrb[25].mxu0  ;;  %v15611_v25 = vld [vmem:[%s19981_s1 + $0x58] sm:$0xff] }
0x374b   :  { %v9732_v57 = vadd.f32 %v15567_v24, %v9715_v22  ;;  %v15610_v24 = vld [vmem:[%s19981_s1 + $0x50] sm:$0xff]  ;;  %v15612_v22 = vld [vmem:[%s19981_s1 + $0x60] sm:$0xff] }
0x374c   :  { %v9735_v60 = vadd.f32 %v9733_v27, %v20040_v29  ;;  %v15577_v29 = vld [vmem:[%s19920_s26 + $0xa8] sm:$0xff]  ;;  %v18641_v27 = vpack.c.bf16 %v15611_v25, %v15610_v24 }
0x374d   :  { %v9734_v26 = vadd.f32 %v9732_v57, %v20038_v33  ;;  %v15576_v33 = vld [vmem:[%s19920_s26 + $0xa0] sm:$0xff]  ;;  %v15613_v57 = vld [vmem:[%s19981_s1 + $0x68] sm:$0xff]  ;;  %s14877_s26 = sld [smem:[%s21356_s0 + %s19300_s12]]  }
0x374e   :  { %v9743_v28 = vsel %vm134_vm0, %v9735_v60, 0.0  ;;  %v18601_v23 = vpack.c.bf16 %v15577_v29, %v15576_v33 }
0x374f   :  { %9744 = vadd.xlane.f32.xlu1 %v9743_v28  ;;  %v9740_v34 = vsel %vm134_vm0, %v9734_v26, 0.0  ;;  %v15615_v28 = vld [vmem:[%s19981_s1 + $0x78] sm:$0xff] }
0x3750   :  { %9741 = vadd.xlane.f32.xlu0 %v9740_v34  ;;  %18603 = vmatprep.subr.msk.bf16.mxu1 %vm19924_vm4, %v18601_v23 }
0x3751   :  { %18606 = vmatpush3.bf16.xpose.msk.msra.mxu1 %vm19924_vm4, %v18601_v23 }
0x3752   :  { %18609 = vmatprep.subr.msk.bf16.mxu1 %vm19924_vm4, %v18607_v21 }
0x3759   :  { %18612 = vmatpush3.bf16.xpose.msk.msra.mxu1 %vm19924_vm4, %v18607_v21 }
0x375a   :  { %18615 = vmatprep.subr.msk.bf16.mxu1 %vm19924_vm4, %v18613_v48 }
0x3761   :  { %18618 = vmatpush3.bf16.xpose.msk.msra.mxu1 %vm19924_vm4, %v18613_v48 }
0x3762   :  { %18621 = vmatprep.subr.msk.bf16.mxu1 %vm19924_vm4, %v18619_v51 }
0x3769   :  { %18624 = vmatpush3.bf16.xpose.msk.msra.mxu1 %vm19924_vm4, %v18619_v51 }
0x376a   :  { %18627 = vmatprep.subr.msk.bf16.mxu1 %vm19924_vm4, %v18625_v2 }
0x3771   :  { %18630 = vmatpush3.bf16.xpose.msk.msra.mxu1 %vm19924_vm4, %v18625_v2 }
0x3772   :  { %18633 = vmatprep.subr.msk.bf16.mxu1 %vm19924_vm4, %v18631_v59 }
0x3779   :  { %18636 = vmatpush3.bf16.xpose.msk.msra.mxu1 %vm19924_vm4, %v18631_v59 }
0x377a   :  { %18638 = vmatprep.subr.bf16.mxu1 %v18637_v9 }
0x37dc   :  { %v9745_v52 = vpop.xlane.xlu1 %9744 }
0x37dd   :  { %v9747_v53 = vmul.f32 0.015625, %v9745_v52  ;;  %v9742_v56 = vpop.xlane.xlu0 %9741 }
0x37de   :  { %v9746_v20 = vmul.f32 0.015625, %v9742_v56 }
0x37df   :  { %v9749_v39 = vsub.f32 %v9735_v60, %v9747_v53  ;;  %v18645_v60 = vpack.c.bf16 %v15613_v57, %v15612_v22 }
0x37e0   :  { %v9748_v5 = vsub.f32 %v9734_v26, %v9746_v20  ;;  %v15614_v26 = vld [vmem:[%s19981_s1 + $0x70] sm:$0xff]  ;;  %s19301_s1 = smov 30  }
0x37e1   :  { %v9751_v58 = vmul.f32 %v9749_v39, %v9749_v39  ;;  %v18649_v34 = vpack.c.bf16 %v15615_v28, %v15614_v26  ;;  %v10275_v28 = vld [vmem:[%s20697_s6] sm:$0xff]  ;;  %s14879_s14 = sld [smem:[%s21356_s0 + %s19301_s1]]  }
0x37e2   :  { %v9750_v61 = vmul.f32 %v9748_v5, %v9748_v5 }
0x37e3   :  { %v9755_v43 = vsel %vm134_vm0, %v9751_v58, 0.0 }
0x37e4   :  { %9756 = vadd.xlane.f32.xlu1 %v9755_v43  ;;  %v9752_v63 = vsel %vm134_vm0, %v9750_v61, 0.0 }
0x37e5   :  { %9753 = vadd.xlane.f32.xlu0 %v9752_v63 }
0x37e7   :  { %v15945_v30 = vld [vmem:[%s14879_s14] ss:$0 sm:$0xff] }
0x3871   :  { %v9757_v10 = vpop.xlane.xlu1 %9756 }
0x3872   :  { %v9759_v11 = vmul.f32 0.015625, %v9757_v10  ;;  %v9754_v42 = vpop.xlane.xlu0 %9753 }
0x3873   :  { %v9758_v12 = vmul.f32 0.015625, %v9754_v42 }
0x3874   :  { %v9761_v13 = vadd.f32 1e-12, %v9759_v11 }
0x3875   :  { %v9760_v32 = vadd.f32 1e-12, %v9758_v12 }
0x3876   :  { %19190 = vrsqrt.f32 %v9761_v13 }
0x3877   :  { %19192 = vrsqrt.f32 %v9760_v32  ;;  %v10097_v32 = vld [vmem:[%s20681_s29] sm:$0xff] }
0x3880   :  { %v19191_v14 = vpop.eup %19190 }
0x3881   :  { %v19193_v54 = vpop.eup %19192  ;;  %v9765_v7 = vmul.f32 %v19191_v14, %v9749_v39  ;;  %v10189_v14 = vld [vmem:[%s20686_s18] sm:$0xff] }
0x3882   :  { %v9764_v55 = vmul.f32 %v19193_v54, %v9748_v5  ;;  %v15617_v5 = vld [vmem:[%s20014_s25 + $0x1] ss:$0 sm:$0xff] }
0x3883   :  { %v9773_v16 = vmul.f32 %v15570_v62, %v9765_v7 }
0x3884   :  { %v9772_v17 = vmul.f32 %v15570_v62, %v9764_v55 }
0x3885   :  { %v9781_v19 = vadd.f32 %v15571_v15, %v9773_v16 }
0x3886   :  { %v9780_v18 = vadd.f32 %v15571_v15, %v9772_v17 }
0x3888   :  { %17540 = vmatprep.mubr.msk.f32.mxu1 %vm134_vm0, %v9780_v18 }
0x3889   :  { %17541 = vmatmul.mubr.msk.f32.vlgmr.msra.gmra.mrb[144].mxu1 %vm134_vm0, %v9781_v19 }
0x388a   :  { %18640 = vmatpush3.bf16.xpose.msra.mxu1 %v18637_v9 }
0x388b   :  { %18642 = vmatprep.subr.bf16.mxu1 %v18641_v27 }
0x3892   :  { %18644 = vmatpush3.bf16.xpose.msra.mxu1 %v18641_v27  ;;  %v15621_v27 = vld [vmem:[%s20034_s10 + $0x1] ss:$0 sm:$0xff] }
0x3893   :  { %18646 = vmatprep.subr.bf16.mxu1 %v18645_v60 }
0x389a   :  { %18648 = vmatpush3.bf16.xpose.msra.mxu1 %v18645_v60 }
0x389b   :  { %18650 = vmatprep.subr.bf16.mxu1 %v18649_v34 }
0x38a2   :  { %18652 = vmatpush3.bf16.xpose.msra.mxu1 %v18649_v34  ;;  %v15622_v34 = vld [vmem:[%s20723_s16] ss:$0 sm:$0xff] }
0x38a3   :  { %17562 = vmatprep.subr.msk.mxu1 %vm134_vm0, %v10097_v32 }
0x395c   :  { %v17542_v36 = vpop.f32.mrb[144].mxu1 }
0x395d   :  { %v9933_v37 = vadd.f32 %v17542_v36, %v15589_v35  ;;  %v9927_v38 = vpop.f32.mrb[145].mxu1 }
0x395e   :  { %v9928_v41 = vadd.f32 %v15589_v35, %v9927_v38  ;;  %v15626_v38 = vld [vmem:[%s20728_s23] ss:$0 sm:$0xff] }
0x395f   :  { %v9939_v44 = vmul.f32 0.044715, %v9933_v37  ;;  %v9937_v56 = vmul.f32 0.5, %v9933_v37 }
0x3960   :  { %v9938_v33 = vmul.f32 0.044715, %v9928_v41  ;;  %v9936_v52 = vmul.f32 0.5, %v9928_v41 }
0x3961   :  { %v9941_v29 = vmul.f32 %v9939_v44, %v9933_v37 }
0x3962   :  { %v9940_v23 = vmul.f32 %v9938_v33, %v9928_v41 }
0x3963   :  { %v9943_v31 = vmul.f32 %v9941_v29, %v9933_v37 }
0x3964   :  { %v9942_v46 = vmul.f32 %v9940_v23, %v9928_v41  ;;  %v15630_v23 = vld [vmem:[%s20733_s28] ss:$0 sm:$0xff] }
0x3965   :  { %v9945_v21 = vadd.f32 %v9943_v31, %v9933_v37 }
0x3966   :  { %v9944_v40 = vadd.f32 %v9942_v46, %v9928_v41 }
0x3967   :  { %v9947_v47 = vmul.f32 0.7978846, %v9945_v21 }
0x3968   :  { %v9946_v48 = vmul.f32 0.7978846, %v9944_v40 }
0x3969   :  { %19194 = vtanh.f32 %v9947_v47  ;;  %v15646_v47 = vld [vmem:[%s20686_s18 + $0x8] sm:$0xff] }
0x396a   :  { %19196 = vtanh.f32 %v9946_v48 }
0x3973   :  { %v19195_v49 = vpop.eup %19194 }
0x3974   :  { %v19197_v50 = vpop.eup %19196  ;;  %v9951_v51 = vadd.f32 1.0, %v19195_v49 }
0x3975   :  { %v9950_v53 = vadd.f32 1.0, %v19197_v50 }
0x3976   :  { %v9953_v39 = vmul.f32 %v9951_v51, %v9937_v56 }
0x3977   :  { %v9952_v20 = vmul.f32 %v9950_v53, %v9936_v52  ;;  %v20757_v52 = vld [vmem:[%s20754_s5 + $0x8] sm:$0xff] }
0x3979   :  { %17559 = vmatprep.mubr.f32.mxu1 %v9952_v20  ;;  %v20760_v20 = vld [vmem:[%s20754_s5] sm:$0xff] }
0x397a   :  { %17560 = vmatmul.mubr.f32.vlgmr.msra.gmra.mrb[146].mxu1 %v9953_v39 }
0x397b   :  { %17563 = vmatpush3.xpose.msk.msra.mxu1 %vm134_vm0, %v10097_v32 }
0x397c   :  { %17567 = vmatprep.subr.msk.mxu1 %vm134_vm0, %v10189_v14 }
0x3a4d   :  { %v17561_v58 = vpop.f32.mrb[146].mxu1 }
0x3a4e   :  { %v10043_v61 = vadd.f32 %v17561_v58, %v15617_v5  ;;  %v10037_v43 = vpop.f32.mrb[147].mxu1 }
0x3a4f   :  { %v10038_v63 = vadd.f32 %v15617_v5, %v10037_v43  ;;  %v15648_v5 = vld [vmem:[%s20728_s23 + $0x1] ss:$0 sm:$0xff] }
0x3a50   :  { %v10047_v0 = vadd.f32 %v10043_v61, %v9781_v19 }
0x3a51   :  { %v10046_v1 = vadd.f32 %v10038_v63, %v9780_v18  ;;  %v15620_v18 = vld [vmem:[%s20029_s2 + $0x1] ss:$0 sm:$0xff] }
0x3a52   :  { %v10055_v2 = vsel %vm134_vm0, %v10047_v0, 0.0 }
0x3a53   :  { %10056 = vadd.xlane.f32.xlu1 %v10055_v2  ;;  %v10052_v3 = vsel %vm134_vm0, %v10046_v1, 0.0 }
0x3a54   :  { %10053 = vadd.xlane.f32.xlu0 %v10052_v3 }
0x3ae0   :  { %v10057_v4 = vpop.xlane.xlu1 %10056 }
0x3ae1   :  { %v10059_v59 = vmul.f32 0.015625, %v10057_v4  ;;  %v10054_v6 = vpop.xlane.xlu0 %10053 }
0x3ae2   :  { %v10058_v8 = vmul.f32 0.015625, %v10054_v6 }
0x3ae3   :  { %v10061_v9 = vsub.f32 %v10047_v0, %v10059_v59 }
0x3ae4   :  { %v10060_v10 = vsub.f32 %v10046_v1, %v10058_v8 }
0x3ae5   :  { %v10063_v11 = vmul.f32 %v10061_v9, %v10061_v9 }
0x3ae6   :  { %v10062_v42 = vmul.f32 %v10060_v10, %v10060_v10 }
0x3ae7   :  { %v10067_v12 = vsel %vm134_vm0, %v10063_v11, 0.0 }
0x3ae8   :  { %10068 = vadd.xlane.f32.xlu1 %v10067_v12  ;;  %v10064_v13 = vsel %vm134_vm0, %v10062_v42, 0.0 }
0x3ae9   :  { %10065 = vadd.xlane.f32.xlu0 %v10064_v13 }
0x3b75   :  { %v10069_v62 = vpop.xlane.xlu1 %10068 }
0x3b76   :  { %v10071_v54 = vmul.f32 0.015625, %v10069_v62  ;;  %v10066_v7 = vpop.xlane.xlu0 %10065 }
0x3b77   :  { %v10070_v55 = vmul.f32 0.015625, %v10066_v7 }
0x3b78   :  { %v10073_v15 = vadd.f32 1e-12, %v10071_v54 }
0x3b79   :  { %v10072_v16 = vadd.f32 1e-12, %v10070_v55 }
0x3b7a   :  { %19198 = vrsqrt.f32 %v10073_v15 }
0x3b7b   :  { %19200 = vrsqrt.f32 %v10072_v16 }
0x3b84   :  { %v19199_v17 = vpop.eup %19198 }
0x3b85   :  { %v19201_v19 = vpop.eup %19200  ;;  %v10077_v24 = vmul.f32 %v19199_v17, %v10061_v9  ;;  %v15652_v17 = vld [vmem:[%s20697_s6 + $0x8] sm:$0xff] }
0x3b86   :  { %v10076_v25 = vmul.f32 %v19201_v19, %v10060_v10 }
0x3b87   :  { %v10085_v22 = vmul.f32 %v15620_v18, %v10077_v24 }
0x3b88   :  { %v10084_v57 = vmul.f32 %v15620_v18, %v10076_v25  ;;  %v15692_v18 = vld [vmem:[%s20681_s29 + $0x10] sm:$0xff]  ;;  %v15642_v25 = vld [vmem:[%s20723_s16 + $0x1] ss:$0 sm:$0xff] }
0x3b89   :  { %v20702_v26 = vadd.f32 %v15621_v27, %v10085_v22 }
0x3b8a   :  { %v20700_v60 = vadd.f32 %v15621_v27, %v10084_v57 }
0x3b8c   :  { %17564 = vmatprep.mubr.msk.f32.mxu1 %vm134_vm0, %v20700_v60 }
0x3b8d   :  { %17565 = vmatmul.mubr.msk.f32.vlgmr.msra.gmra.mrb[148].mxu1 %vm134_vm0, %v20702_v26 }
0x3b8e   :  { %17568 = vmatpush3.xpose.msk.msra.mxu1 %vm134_vm0, %v10189_v14  ;;  %17569 = vmatprep.mubr.msk.f32.mxu1 %vm134_vm0, %v20700_v60  ;;  %v15640_v14 = vld [vmem:[%s20681_s29 + $0x8] sm:$0xff] }
0x3b8f   :  { %17572 = vmatprep.subr.msk.mxu1 %vm134_vm0, %v10275_v28 }
0x3b91   :  { %17570 = vmatmul.mubr.msk.f32.vlgmr.msra.gmra.mrb[150].mxu1 %vm134_vm0, %v20702_v26 }
0x3b92   :  { %17573 = vmatpush3.xpose.msk.msra.mxu1 %vm134_vm0, %v10275_v28  ;;  %17574 = vmatprep.mubr.msk.f32.mxu1 %vm134_vm0, %v20700_v60  ;;  %v15654_v28 = vld [vmem:[%s20733_s28 + $0x1] ss:$0 sm:$0xff] }
0x3b95   :  { %17575 = vmatmul.mubr.msk.f32.vlgmr.msra.gmra.mrb[152].mxu1 %vm134_vm0, %v20702_v26 }
0x3c60   :  { %v17566_v35 = vpop.f32.mrb[148].mxu1 }
0x3c61   :  { %v10180_v36 = vpop.f32.mrb[149].mxu1  ;;  %v10186_v50 = vadd.f32 %v17566_v35, %v15622_v34 }
0x3c62   :  { %v10181_v37 = vadd.f32 %v15622_v34, %v10180_v36  ;;  %v15698_v36 = vld [vmem:[%s20686_s18 + $0x10] sm:$0xff] }
0x3c64   :  { %v17571_v41 = vpop.f32.mrb[150].mxu1  ;;  %17581 = vmatprep.mubr.msk.f32.mxu1 %vm445_vm1, %v10181_v37 }
0x3c65   :  { %v10272_v44 = vadd.f32 %v17571_v41, %v15626_v38  ;;  %v10266_v33 = vpop.f32.mrb[151].mxu1 }
0x3c66   :  { %v10267_v29 = vadd.f32 %v15626_v38, %v10266_v33  ;;  %v15704_v33 = vld [vmem:[%s20697_s6 + $0x10] sm:$0xff] }
0x3c68   :  { %v18653_v31 = vpack.c.bf16 %v10272_v44, %v10267_v29  ;;  %v17576_v46 = vpop.f32.mrb[152].mxu1 }
0x3c69   :  { %v10358_v21 = vadd.f32 %v17576_v46, %v15630_v23  ;;  %v10352_v40 = vpop.f32.mrb[153].mxu1 }
0x3c6a   :  { %v10353_v48 = vadd.f32 %v15630_v23, %v10352_v40  ;;  %18655 = vmatprep.subr.msk.bf16.mxu1 %vm19389_vm2, %v18653_v31 }
0x3c6b   :  { %18658 = vmatpush3.bf16.xpose.msk.msra.mxu1 %vm19389_vm2, %v18653_v31  ;;  %v15694_v31 = vld [vmem:[%s20723_s16 + $0x2] ss:$0 sm:$0xff] }
0x3c6c   :  { %v18659_v49 = vpack.c.bf16 %v10358_v21, %v10353_v48  ;;  %17596 = vmatprep.subr.msk.mxu1 %vm134_vm0, %v15646_v47 }
0x3c6e   :  { %18660 = vmatprep.subr.bf16.mxu0 %v18659_v49 }
0x3c6f   :  { %18662 = vmatpush3.bf16.msra.mxu0 %v18659_v49 }
0x3c70   :  { %17591 = vmatprep.subr.msk.mxu0 %vm134_vm0, %v15640_v14 }
0x3c72   :  { %17582 = vmatmul.mubr.msk.f32.vlgmr.msra.gmra.mrb[154].mxu1 %vm445_vm1, %v10186_v50 }
0x3c73   :  { %17597 = vmatpush3.xpose.msk.msra.mxu1 %vm134_vm0, %v15646_v47  ;;  %17598 = vmatprep.mubr.msk.f32.mxu1 %vm134_vm0, %v20700_v60  ;;  %v15700_v47 = vld [vmem:[%s20728_s23 + $0x2] ss:$0 sm:$0xff] }
0x3c76   :  { %17599 = vmatmul.mubr.msk.f32.vlgmr.msra.gmra.mrb[156].mxu1 %vm134_vm0, %v20702_v26 }
0x3d45   :  { %v17583_v51 = vpop.f32.mrb[154].mxu1 }
0x3d46   :  { %v10449_v53 = vmul.f32 0.35355338, %v17583_v51  ;;  %v10439_v56 = vpop.f32.mrb[155].mxu1 }
0x3d47   :  { %v10448_v39 = vmul.f32 0.35355338, %v10439_v56 }
0x3d48   :  { %v10451_v58 = vadd.f32 %v10449_v53, %v20757_v52  ;;  %v15706_v53 = vld [vmem:[%s20733_s28 + $0x2] ss:$0 sm:$0xff] }
0x3d49   :  { %v17600_v61 = vpop.f32.mrb[156].mxu1  ;;  %v10450_v43 = vadd.f32 %v10448_v39, %v20760_v20 }
0x3d4a   :  { %v10736_v63 = vadd.f32 %v17600_v61, %v15648_v5  ;;  %v10730_v0 = vpop.f32.mrb[157].mxu1  ;;  %v10455_v1 = vsel %vm537_vm3, %v10451_v58, -inf }
0x3d4b   :  { %v10731_v2 = vadd.f32 %v15648_v5, %v10730_v0  ;;  %10456 = vmax.xlane.f32.xlu1 %v10455_v1  ;;  %v10452_v3 = vsel %vm537_vm3, %v10450_v43, -inf }
0x3d4c   :  { %10453 = vmax.xlane.f32.xlu0 %v10452_v3 }
0x3d4d   :  { %v18663_v4 = vpack.c.bf16 %v10736_v63, %v10731_v2 }
0x3d4f   :  { %18665 = vmatprep.subr.msk.bf16.mxu1 %vm19389_vm2, %v18663_v4 }
0x3d50   :  { %18668 = vmatpush3.bf16.xpose.msk.msra.mxu1 %vm19389_vm2, %v18663_v4 }
0x3d51   :  { %17658 = vmatprep.subr.msk.mxu1 %vm134_vm0, %v15692_v18 }
0x3dd8   :  { %v10457_v59 = vpop.xlane.xlu1 %10456 }
0x3dd9   :  { %v10459_v6 = vsub.f32 %v10451_v58, %v10457_v59  ;;  %v10454_v8 = vpop.xlane.xlu0 %10453 }
0x3dda   :  { %v10458_v9 = vsub.f32 %v10450_v43, %v10454_v8 }
0x3ddb   :  { %v10462_v10 = vmul.f32 1.442695, %v10459_v6 }
0x3ddc   :  { %v10460_v11 = vmul.f32 1.442695, %v10458_v9 }
0x3ddd   :  { %19202 = vpow2.f32 %v10462_v10 }
0x3dde   :  { %19204 = vpow2.f32 %v10460_v11 }
0x3de7   :  { %v19203_v42 = vpop.eup %19202 }
0x3de8   :  { %v19205_v12 = vpop.eup %19204  ;;  %v10467_v13 = vsel %vm537_vm3, %v19203_v42, 0.0 }
0x3de9   :  { %10468 = vadd.xlane.f32.xlu1 %v10467_v13  ;;  %v10464_v32 = vsel %vm537_vm3, %v19205_v12, 0.0 }
0x3dea   :  { %10465 = vadd.xlane.f32.xlu0 %v10464_v32 }
0x3e76   :  { %v10469_v62 = vpop.xlane.xlu1 %10468 }
0x3e77   :  { %19206 = vrcp.f32 %v10469_v62  ;;  %v10466_v54 = vpop.xlane.xlu0 %10465 }
0x3e78   :  { %19208 = vrcp.f32 %v10466_v54 }
0x3e81   :  { %v19207_v7 = vpop.eup %19206 }
0x3e82   :  { %v19209_v55 = vpop.eup %19208  ;;  %v10473_v16 = vmul.f32 %v19207_v7, %v19203_v42  ;;  %v15734_v7 = vld [vmem:[%s20681_s29 + $0x18] sm:$0xff] }
0x3e83   :  { %v10472_v15 = vmul.f32 %v19209_v55, %v19205_v12 }
0x3e85   :  { %17588 = vmatprep.mubr.msk.f32.mxu0 %vm537_vm3, %v10472_v15 }
0x3e86   :  { %17589 = vmatmul.mubr.msk.f32.vlgmr.msra.gmra.mrb[26].mxu0 %vm537_vm3, %v10473_v16 }
0x3e87   :  { %17592 = vmatpush3.xpose.msk.msra.mxu0 %vm134_vm0, %v15640_v14  ;;  %17593 = vmatprep.mubr.msk.f32.mxu0 %vm134_vm0, %v20700_v60 }
0x3e88   :  { %17601 = vmatprep.subr.msk.mxu0 %vm134_vm0, %v15652_v17 }
0x3e8a   :  { %17594 = vmatmul.mubr.msk.f32.vlgmr.msra.gmra.mrb[28].mxu0 %vm134_vm0, %v20702_v26 }
0x3e8b   :  { %17602 = vmatpush3.xpose.msk.msra.mxu0 %vm134_vm0, %v15652_v17  ;;  %17603 = vmatprep.mubr.msk.f32.mxu0 %vm134_vm0, %v20700_v60 }
0x3e8e   :  { %17604 = vmatmul.mubr.msk.f32.vlgmr.msra.gmra.mrb[30].mxu0 %vm134_vm0, %v20702_v26 }
0x3f59   :  { %v20791_v19 = vpop.f32.mrb[26].mxu0 }
0x3f5a   :  { %v20793_v24 = vpop.f32.mrb[27].mxu0 }
0x3f5d   :  { %v17595_v27 = vpop.f32.mrb[28].mxu0 }
0x3f5e   :  { %v10642_v22 = vpop.f32.mrb[29].mxu0  ;;  %v10648_v34 = vadd.f32 %v17595_v27, %v15642_v25  ;;  %v15740_v27 = vld [vmem:[%s20686_s18 + $0x18] sm:$0xff] }
0x3f5f   :  { %v10643_v57 = vadd.f32 %v15642_v25, %v10642_v22  ;;  %v15746_v22 = vld [vmem:[%s20697_s6 + $0x18] sm:$0xff] }
0x3f61   :  { %v17605_v35 = vpop.f32.mrb[30].mxu0  ;;  %17610 = vmatprep.mubr.msk.f32.mxu1 %vm445_vm1, %v10643_v57 }
0x3f62   :  { %v10824_v37 = vadd.f32 %v17605_v35, %v15654_v28  ;;  %v10818_v38 = vpop.f32.mrb[31].mxu0  ;;  %17611 = vmatmul.mubr.msk.f32.vlgmr.msra.gmra.mrb[158].mxu1 %vm445_vm1, %v10648_v34  ;;  %v15736_v34 = vld [vmem:[%s20723_s16 + $0x3] ss:$0 sm:$0xff] }
0x3f63   :  { %v10819_v41 = vadd.f32 %v15654_v28, %v10818_v38  ;;  %17659 = vmatpush3.xpose.msk.msra.mxu1 %vm134_vm0, %v15692_v18  ;;  %17660 = vmatprep.mubr.msk.f32.mxu1 %vm134_vm0, %v20700_v60  ;;  %v15742_v38 = vld [vmem:[%s20728_s23 + $0x3] ss:$0 sm:$0xff] }
0x3f64   :  { %17663 = vmatprep.subr.msk.mxu1 %vm134_vm0, %v15698_v36 }
0x3f65   :  { %v18669_v44 = vpack.c.bf16 %v10824_v37, %v10819_v41 }
0x3f66   :  { %17661 = vmatmul.mubr.msk.f32.vlgmr.msra.gmra.mrb[160].mxu1 %vm134_vm0, %v20702_v26 }
0x3f67   :  { %17664 = vmatpush3.xpose.msk.msra.mxu1 %vm134_vm0, %v15698_v36  ;;  %18670 = vmatprep.subr.bf16.mxu0 %v18669_v44 }
0x3f68   :  { %17665 = vmatprep.mubr.msk.f32.mxu1 %vm134_vm0, %v20700_v60  ;;  %18672 = vmatpush3.bf16.msra.mxu0 %v18669_v44 }
0x3f69   :  { %17668 = vmatprep.subr.msk.mxu1 %vm134_vm0, %v15704_v33 }
0x3f6a   :  { %17666 = vmatmul.mubr.msk.f32.vlgmr.msra.gmra.mrb[162].mxu1 %vm134_vm0, %v20702_v26 }
0x3f6b   :  { %17669 = vmatpush3.xpose.msk.msra.mxu1 %vm134_vm0, %v15704_v33  ;;  %17670 = vmatprep.mubr.msk.f32.mxu1 %vm134_vm0, %v20700_v60 }
0x3f6e   :  { %17671 = vmatmul.mubr.msk.f32.vlgmr.msra.gmra.mrb[164].mxu1 %vm134_vm0, %v20702_v26 }
0x4035   :  { %v20818_v29 = vpop.f32.mrb[158].mxu1 }
0x4036   :  { %v20820_v23 = vpop.f32.mrb[159].mxu1 }
0x4039   :  { %v17662_v46 = vpop.f32.mrb[160].mxu1 }
0x403a   :  { %v11319_v21 = vpop.f32.mrb[161].mxu1  ;;  %v11325_v63 = vadd.f32 %v17662_v46, %v15694_v31  ;;  %v15748_v46 = vld [vmem:[%s20733_s28 + $0x3] ss:$0 sm:$0xff] }
0x403b   :  { %v11320_v40 = vadd.f32 %v15694_v31, %v11319_v21 }
0x403d   :  { %v17667_v48 = vpop.f32.mrb[162].mxu1  ;;  %17677 = vmatprep.mubr.msk.f32.mxu1 %vm445_vm1, %v11320_v40 }
0x403e   :  { %v11413_v49 = vadd.f32 %v17667_v48, %v15700_v47  ;;  %v11407_v50 = vpop.f32.mrb[163].mxu1 }
0x403f   :  { %v11408_v51 = vadd.f32 %v15700_v47, %v11407_v50 }
0x4041   :  { %v18721_v56 = vpack.c.bf16 %v11413_v49, %v11408_v51  ;;  %v17672_v39 = vpop.f32.mrb[164].mxu1 }
0x4042   :  { %v11501_v5 = vadd.f32 %v17672_v39, %v15706_v53  ;;  %v11495_v58 = vpop.f32.mrb[165].mxu1 }
0x4043   :  { %v11496_v61 = vadd.f32 %v15706_v53, %v11495_v58  ;;  %18723 = vmatprep.subr.msk.bf16.mxu1 %vm19389_vm2, %v18721_v56 }
0x4044   :  { %18726 = vmatpush3.bf16.xpose.msk.msra.mxu1 %vm19389_vm2, %v18721_v56 }
0x4045   :  { %v18727_v43 = vpack.c.bf16 %v11501_v5, %v11496_v61 }
0x4047   :  { %18728 = vmatprep.subr.bf16.mxu1 %v18727_v43 }
0x404b   :  { %17678 = vmatmul.mubr.msk.f32.vlgmr.msra.gmra.mrb[166].mxu1 %vm445_vm1, %v11325_v63 }
0x404c   :  { %18730 = vmatpush3.bf16.msra.mxu1 %v18727_v43 }
0x404d   :  { %17706 = vmatprep.subr.msk.mxu1 %vm134_vm0, %v15734_v7 }
0x411e   :  { %v17679_v0 = vpop.f32.mrb[166].mxu1 }
0x411f   :  { %v11592_v1 = vmul.f32 0.35355338, %v17679_v0  ;;  %v11582_v2 = vpop.f32.mrb[167].mxu1 }
0x4120   :  { %v11591_v3 = vmul.f32 0.35355338, %v11582_v2 }
0x4121   :  { %v11594_v4 = vadd.f32 %v11592_v1, %v20757_v52 }
0x4122   :  { %v11593_v59 = vadd.f32 %v11591_v3, %v20760_v20 }
0x4123   :  { %v11598_v6 = vsel %vm537_vm3, %v11594_v4, -inf }
0x4124   :  { %11599 = vmax.xlane.f32.xlu1 %v11598_v6  ;;  %v11595_v8 = vsel %vm537_vm3, %v11593_v59, -inf }
0x4125   :  { %11596 = vmax.xlane.f32.xlu0 %v11595_v8 }
0x41b1   :  { %v11600_v9 = vpop.xlane.xlu1 %11599 }
0x41b2   :  { %v11602_v10 = vsub.f32 %v11594_v4, %v11600_v9  ;;  %v11597_v11 = vpop.xlane.xlu0 %11596 }
0x41b3   :  { %v11601_v42 = vsub.f32 %v11593_v59, %v11597_v11  ;;  %v15776_v11 = vld [vmem:[%s20681_s29 + $0x20] sm:$0xff] }
0x41b4   :  { %v11605_v12 = vmul.f32 1.442695, %v11602_v10 }
0x41b5   :  { %v11603_v13 = vmul.f32 1.442695, %v11601_v42 }
0x41b6   :  { %19210 = vpow2.f32 %v11605_v12 }
0x41b7   :  { %19212 = vpow2.f32 %v11603_v13 }
0x41c0   :  { %v19211_v32 = vpop.eup %19210 }
0x41c1   :  { %v19213_v14 = vpop.eup %19212  ;;  %v11610_v62 = vsel %vm537_vm3, %v19211_v32, 0.0 }
0x41c2   :  { %11611 = vadd.xlane.f32.xlu1 %v11610_v62  ;;  %v11607_v54 = vsel %vm537_vm3, %v19213_v14, 0.0 }
0x41c3   :  { %11608 = vadd.xlane.f32.xlu0 %v11607_v54  ;;  %v15782_v54 = vld [vmem:[%s20686_s18 + $0x20] sm:$0xff] }
0x424f   :  { %v11612_v55 = vpop.xlane.xlu1 %11611 }
0x4250   :  { %19214 = vrcp.f32 %v11612_v55  ;;  %v11609_v15 = vpop.xlane.xlu0 %11608 }
0x4251   :  { %19216 = vrcp.f32 %v11609_v15 }
0x425a   :  { %v19215_v16 = vpop.eup %19214 }
0x425b   :  { %v19217_v17 = vpop.eup %19216  ;;  %v11616_v25 = vmul.f32 %v19215_v16, %v19211_v32  ;;  %v15778_v16 = vld [vmem:[%s20723_s16 + $0x4] ss:$0 sm:$0xff] }
0x425c   :  { %v11615_v18 = vmul.f32 %v19217_v17, %v19213_v14 }
0x425e   :  { %17684 = vmatprep.mubr.msk.f32.mxu1 %vm537_vm3, %v11615_v18 }
0x425f   :  { %17685 = vmatmul.mubr.msk.f32.vlgmr.msra.gmra.mrb[168].mxu1 %vm537_vm3, %v11616_v25 }
0x4260   :  { %17707 = vmatpush3.xpose.msk.msra.mxu1 %vm134_vm0, %v15734_v7  ;;  %17708 = vmatprep.mubr.msk.f32.mxu1 %vm134_vm0, %v20700_v60  ;;  %v15788_v7 = vld [vmem:[%s20697_s6 + $0x20] sm:$0xff] }
0x4261   :  { %17711 = vmatprep.subr.msk.mxu1 %vm134_vm0, %v15740_v27 }
0x4263   :  { %17709 = vmatmul.mubr.msk.f32.vlgmr.msra.gmra.mrb[170].mxu1 %vm134_vm0, %v20702_v26 }
0x4264   :  { %17712 = vmatpush3.xpose.msk.msra.mxu1 %vm134_vm0, %v15740_v27  ;;  %17713 = vmatprep.mubr.msk.f32.mxu1 %vm134_vm0, %v20700_v60  ;;  %v15784_v27 = vld [vmem:[%s20728_s23 + $0x4] ss:$0 sm:$0xff] }
0x4265   :  { %17716 = vmatprep.subr.msk.mxu1 %vm134_vm0, %v15746_v22 }
0x4267   :  { %17714 = vmatmul.mubr.msk.f32.vlgmr.msra.gmra.mrb[172].mxu1 %vm134_vm0, %v20702_v26 }
0x4268   :  { %17717 = vmatpush3.xpose.msk.msra.mxu1 %vm134_vm0, %v15746_v22  ;;  %17718 = vmatprep.mubr.msk.f32.mxu1 %vm134_vm0, %v20700_v60 }
0x426b   :  { %17719 = vmatmul.mubr.msk.f32.vlgmr.msra.gmra.mrb[174].mxu1 %vm134_vm0, %v20702_v26 }
0x4332   :  { %v20860_v57 = vpop.f32.mrb[168].mxu1 }
0x4333   :  { %v20862_v28 = vpop.f32.mrb[169].mxu1 }
0x4336   :  { %v17710_v35 = vpop.f32.mrb[170].mxu1 }
0x4337   :  { %v11893_v36 = vpop.f32.mrb[171].mxu1  ;;  %v11899_v51 = vadd.f32 %v17710_v35, %v15736_v34 }
0x4338   :  { %v11894_v37 = vadd.f32 %v15736_v34, %v11893_v36 }
0x433a   :  { %v17715_v41 = vpop.f32.mrb[172].mxu1  ;;  %17725 = vmatprep.mubr.msk.f32.mxu1 %vm445_vm1, %v11894_v37  ;;  %v15790_v37 = vld [vmem:[%s20733_s28 + $0x4] ss:$0 sm:$0xff] }
0x433b   :  { %v11987_v44 = vadd.f32 %v17715_v41, %v15742_v38  ;;  %v11981_v33 = vpop.f32.mrb[173].mxu1 }
0x433c   :  { %v11982_v31 = vadd.f32 %v15742_v38, %v11981_v33 }
0x433e   :  { %v18755_v21 = vpack.c.bf16 %v11987_v44, %v11982_v31  ;;  %v17720_v40 = vpop.f32.mrb[174].mxu1 }
0x433f   :  { %v12075_v47 = vadd.f32 %v17720_v40, %v15748_v46  ;;  %v12069_v48 = vpop.f32.mrb[175].mxu1 }
0x4340   :  { %v12070_v49 = vadd.f32 %v15748_v46, %v12069_v48  ;;  %18757 = vmatprep.subr.msk.bf16.mxu1 %vm19389_vm2, %v18755_v21 }
0x4341   :  { %18760 = vmatpush3.bf16.xpose.msk.msra.mxu1 %vm19389_vm2, %v18755_v21 }
0x4342   :  { %v18761_v50 = vpack.c.bf16 %v12075_v47, %v12070_v49 }
0x4344   :  { %18762 = vmatprep.subr.bf16.mxu1 %v18761_v50 }
0x4348   :  { %17726 = vmatmul.mubr.msk.f32.vlgmr.msra.gmra.mrb[176].mxu1 %vm445_vm1, %v11899_v51 }
0x4349   :  { %18764 = vmatpush3.bf16.msra.mxu1 %v18761_v50 }
0x434a   :  { %17754 = vmatprep.subr.msk.mxu1 %vm134_vm0, %v15776_v11 }
0x441b   :  { %v17727_v53 = vpop.f32.mrb[176].mxu1 }
0x441c   :  { %v12166_v56 = vmul.f32 0.35355338, %v17727_v53  ;;  %v12156_v39 = vpop.f32.mrb[177].mxu1 }
0x441d   :  { %v12165_v5 = vmul.f32 0.35355338, %v12156_v39 }
0x441e   :  { %v12168_v58 = vadd.f32 %v12166_v56, %v20757_v52 }
0x441f   :  { %v12167_v61 = vadd.f32 %v12165_v5, %v20760_v20 }
0x4420   :  { %v12172_v43 = vsel %vm537_vm3, %v12168_v58, -inf }
0x4421   :  { %12173 = vmax.xlane.f32.xlu1 %v12172_v43  ;;  %v12169_v63 = vsel %vm537_vm3, %v12167_v61, -inf }
0x4422   :  { %12170 = vmax.xlane.f32.xlu0 %v12169_v63 }
0x44ae   :  { %v12174_v0 = vpop.xlane.xlu1 %12173 }
0x44af   :  { %v12176_v1 = vsub.f32 %v12168_v58, %v12174_v0  ;;  %v12171_v2 = vpop.xlane.xlu0 %12170 }
0x44b0   :  { %v12175_v3 = vsub.f32 %v12167_v61, %v12171_v2 }
0x44b1   :  { %v12179_v4 = vmul.f32 1.442695, %v12176_v1 }
0x44b2   :  { %v12177_v59 = vmul.f32 1.442695, %v12175_v3 }
0x44b3   :  { %19218 = vpow2.f32 %v12179_v4  ;;  %v15818_v4 = vld [vmem:[%s20681_s29 + $0x28] sm:$0xff] }
0x44b4   :  { %19220 = vpow2.f32 %v12177_v59 }
0x44bd   :  { %v19219_v6 = vpop.eup %19218 }
0x44be   :  { %v19221_v8 = vpop.eup %19220  ;;  %v12184_v9 = vsel %vm537_vm3, %v19219_v6, 0.0 }
0x44bf   :  { %12185 = vadd.xlane.f32.xlu1 %v12184_v9  ;;  %v12181_v10 = vsel %vm537_vm3, %v19221_v8, 0.0 }
0x44c0   :  { %12182 = vadd.xlane.f32.xlu0 %v12181_v10 }
0x454c   :  { %v12186_v42 = vpop.xlane.xlu1 %12185 }
0x454d   :  { %19222 = vrcp.f32 %v12186_v42  ;;  %v12183_v12 = vpop.xlane.xlu0 %12182  ;;  %v15824_v42 = vld [vmem:[%s20686_s18 + $0x28] sm:$0xff] }
0x454e   :  { %19224 = vrcp.f32 %v12183_v12  ;;  %v15830_v12 = vld [vmem:[%s20697_s6 + $0x28] sm:$0xff] }
0x4557   :  { %v19223_v13 = vpop.eup %19222 }
0x4558   :  { %v19225_v32 = vpop.eup %19224  ;;  %v12190_v62 = vmul.f32 %v19223_v13, %v19219_v6 }
0x4559   :  { %v12189_v14 = vmul.f32 %v19225_v32, %v19221_v8 }
0x455b   :  { %17732 = vmatprep.mubr.msk.f32.mxu1 %vm537_vm3, %v12189_v14  ;;  %v15820_v14 = vld [vmem:[%s20723_s16 + $0x5] ss:$0 sm:$0xff] }
0x455c   :  { %17733 = vmatmul.mubr.msk.f32.vlgmr.msra.gmra.mrb[178].mxu1 %vm537_vm3, %v12190_v62 }
0x455d   :  { %17755 = vmatpush3.xpose.msk.msra.mxu1 %vm134_vm0, %v15776_v11  ;;  %17756 = vmatprep.mubr.msk.f32.mxu1 %vm134_vm0, %v20700_v60 }
0x455e   :  { %17759 = vmatprep.subr.msk.mxu1 %vm134_vm0, %v15782_v54 }
0x4560   :  { %17757 = vmatmul.mubr.msk.f32.vlgmr.msra.gmra.mrb[180].mxu1 %vm134_vm0, %v20702_v26 }
0x4561   :  { %17760 = vmatpush3.xpose.msk.msra.mxu1 %vm134_vm0, %v15782_v54  ;;  %17761 = vmatprep.mubr.msk.f32.mxu1 %vm134_vm0, %v20700_v60 }
0x4562   :  { %17764 = vmatprep.subr.msk.mxu1 %vm134_vm0, %v15788_v7 }
0x4564   :  { %17762 = vmatmul.mubr.msk.f32.vlgmr.msra.gmra.mrb[182].mxu1 %vm134_vm0, %v20702_v26 }
0x4565   :  { %17765 = vmatpush3.xpose.msk.msra.mxu1 %vm134_vm0, %v15788_v7  ;;  %17766 = vmatprep.mubr.msk.f32.mxu1 %vm134_vm0, %v20700_v60 }
0x4568   :  { %17767 = vmatmul.mubr.msk.f32.vlgmr.msra.gmra.mrb[184].mxu1 %vm134_vm0, %v20702_v26 }
0x462f   :  { %v20902_v55 = vpop.f32.mrb[178].mxu1 }
0x4630   :  { %v20904_v15 = vpop.f32.mrb[179].mxu1 }
0x4633   :  { %v17758_v17 = vpop.f32.mrb[180].mxu1 }
0x4634   :  { %v12467_v18 = vpop.f32.mrb[181].mxu1  ;;  %v12473_v21 = vadd.f32 %v17758_v17, %v15778_v16 }
0x4635   :  { %v12468_v25 = vadd.f32 %v15778_v16, %v12467_v18  ;;  %v15826_v16 = vld [vmem:[%s20728_s23 + $0x5] ss:$0 sm:$0xff] }
0x4637   :  { %v17763_v22 = vpop.f32.mrb[182].mxu1  ;;  %17773 = vmatprep.mubr.msk.f32.mxu1 %vm445_vm1, %v12468_v25 }
0x4638   :  { %v12561_v34 = vadd.f32 %v17763_v22, %v15784_v27  ;;  %v12555_v35 = vpop.f32.mrb[183].mxu1  ;;  %v15832_v22 = vld [vmem:[%s20733_s28 + $0x5] ss:$0 sm:$0xff] }
0x4639   :  { %v12556_v36 = vadd.f32 %v15784_v27, %v12555_v35 }
0x463b   :  { %v18789_v38 = vpack.c.bf16 %v12561_v34, %v12556_v36  ;;  %v17768_v41 = vpop.f32.mrb[184].mxu1 }
0x463c   :  { %v12649_v44 = vadd.f32 %v17768_v41, %v15790_v37  ;;  %v12643_v33 = vpop.f32.mrb[185].mxu1 }
0x463d   :  { %v12644_v31 = vadd.f32 %v15790_v37, %v12643_v33  ;;  %18791 = vmatprep.subr.msk.bf16.mxu1 %vm19389_vm2, %v18789_v38 }
0x463e   :  { %18794 = vmatpush3.bf16.xpose.msk.msra.mxu1 %vm19389_vm2, %v18789_v38 }
0x463f   :  { %v18795_v46 = vpack.c.bf16 %v12649_v44, %v12644_v31 }
0x4641   :  { %18796 = vmatprep.subr.bf16.mxu1 %v18795_v46 }
0x4645   :  { %17774 = vmatmul.mubr.msk.f32.vlgmr.msra.gmra.mrb[186].mxu1 %vm445_vm1, %v12473_v21 }
0x4646   :  { %18798 = vmatpush3.bf16.msra.mxu1 %v18795_v46 }
0x4647   :  { %17802 = vmatprep.subr.msk.mxu1 %vm134_vm0, %v15818_v4 }
0x4718   :  { %v17775_v40 = vpop.f32.mrb[186].mxu1 }
0x4719   :  { %v12740_v47 = vmul.f32 0.35355338, %v17775_v40  ;;  %v12730_v48 = vpop.f32.mrb[187].mxu1 }
0x471a   :  { %v12739_v49 = vmul.f32 0.35355338, %v12730_v48 }
0x471b   :  { %v12742_v50 = vadd.f32 %v12740_v47, %v20757_v52 }
0x471c   :  { %v12741_v51 = vadd.f32 %v12739_v49, %v20760_v20 }
0x471d   :  { %v12746_v53 = vsel %vm537_vm3, %v12742_v50, -inf }
0x471e   :  { %12747 = vmax.xlane.f32.xlu1 %v12746_v53  ;;  %v12743_v56 = vsel %vm537_vm3, %v12741_v51, -inf }
0x471f   :  { %12744 = vmax.xlane.f32.xlu0 %v12743_v56 }
0x47ab   :  { %v12748_v39 = vpop.xlane.xlu1 %12747 }
0x47ac   :  { %v12750_v5 = vsub.f32 %v12742_v50, %v12748_v39  ;;  %v12745_v58 = vpop.xlane.xlu0 %12744 }
0x47ad   :  { %v12749_v61 = vsub.f32 %v12741_v51, %v12745_v58 }
0x47ae   :  { %v12753_v43 = vmul.f32 1.442695, %v12750_v5 }
0x47af   :  { %v12751_v63 = vmul.f32 1.442695, %v12749_v61 }
0x47b0   :  { %19226 = vpow2.f32 %v12753_v43 }
0x47b1   :  { %19228 = vpow2.f32 %v12751_v63 }
0x47ba   :  { %v19227_v0 = vpop.eup %19226 }
0x47bb   :  { %v19229_v1 = vpop.eup %19228  ;;  %v12758_v2 = vsel %vm537_vm3, %v19227_v0, 0.0 }
0x47bc   :  { %12759 = vadd.xlane.f32.xlu1 %v12758_v2  ;;  %v12755_v3 = vsel %vm537_vm3, %v19229_v1, 0.0 }
0x47bd   :  { %12756 = vadd.xlane.f32.xlu0 %v12755_v3 }
0x4849   :  { %v12760_v59 = vpop.xlane.xlu1 %12759 }
0x484a   :  { %19230 = vrcp.f32 %v12760_v59  ;;  %v12757_v6 = vpop.xlane.xlu0 %12756 }
0x484b   :  { %19232 = vrcp.f32 %v12757_v6 }
0x4854   :  { %v19231_v8 = vpop.eup %19230 }
0x4855   :  { %v19233_v9 = vpop.eup %19232  ;;  %v12764_v11 = vmul.f32 %v19231_v8, %v19227_v0  ;;  %v15860_v0 = vld [vmem:[%s20681_s29 + $0x30] sm:$0xff] }
0x4856   :  { %v12763_v10 = vmul.f32 %v19233_v9, %v19229_v1  ;;  %v15866_v8 = vld [vmem:[%s20686_s18 + $0x30] sm:$0xff] }
0x4857   :  { %v15872_v9 = vld [vmem:[%s20697_s6 + $0x30] sm:$0xff] }
0x4858   :  { %17780 = vmatprep.mubr.msk.f32.mxu1 %vm537_vm3, %v12763_v10 }
0x4859   :  { %17781 = vmatmul.mubr.msk.f32.vlgmr.msra.gmra.mrb[188].mxu1 %vm537_vm3, %v12764_v11 }
0x485a   :  { %17803 = vmatpush3.xpose.msk.msra.mxu1 %vm134_vm0, %v15818_v4  ;;  %17804 = vmatprep.mubr.msk.f32.mxu1 %vm134_vm0, %v20700_v60 }
0x485b   :  { %17807 = vmatprep.subr.msk.mxu1 %vm134_vm0, %v15824_v42 }
0x485d   :  { %17805 = vmatmul.mubr.msk.f32.vlgmr.msra.gmra.mrb[190].mxu1 %vm134_vm0, %v20702_v26 }
0x485e   :  { %17808 = vmatpush3.xpose.msk.msra.mxu1 %vm134_vm0, %v15824_v42  ;;  %17809 = vmatprep.mubr.msk.f32.mxu1 %vm134_vm0, %v20700_v60  ;;  %v15862_v42 = vld [vmem:[%s20723_s16 + $0x6] ss:$0 sm:$0xff] }
0x485f   :  { %17812 = vmatprep.subr.msk.mxu1 %vm134_vm0, %v15830_v12 }
0x4861   :  { %17810 = vmatmul.mubr.msk.f32.vlgmr.msra.gmra.mrb[192].mxu1 %vm134_vm0, %v20702_v26 }
0x4862   :  { %17813 = vmatpush3.xpose.msk.msra.mxu1 %vm134_vm0, %v15830_v12  ;;  %17814 = vmatprep.mubr.msk.f32.mxu1 %vm134_vm0, %v20700_v60 }
0x4865   :  { %17815 = vmatmul.mubr.msk.f32.vlgmr.msra.gmra.mrb[194].mxu1 %vm134_vm0, %v20702_v26 }
0x492c   :  { %v20944_v13 = vpop.f32.mrb[188].mxu1 }
0x492d   :  { %v20946_v32 = vpop.f32.mrb[189].mxu1 }
0x4930   :  { %v17806_v62 = vpop.f32.mrb[190].mxu1 }
0x4931   :  { %v13041_v54 = vpop.f32.mrb[191].mxu1  ;;  %v13047_v44 = vadd.f32 %v17806_v62, %v15820_v14 }
0x4932   :  { %v13042_v7 = vadd.f32 %v15820_v14, %v13041_v54  ;;  %v15868_v54 = vld [vmem:[%s20728_s23 + $0x6] ss:$0 sm:$0xff] }
0x4934   :  { %v17811_v17 = vpop.f32.mrb[192].mxu1  ;;  %17821 = vmatprep.mubr.msk.f32.mxu1 %vm445_vm1, %v13042_v7 }
0x4935   :  { %v13135_v18 = vadd.f32 %v17811_v17, %v15826_v16  ;;  %v13129_v25 = vpop.f32.mrb[193].mxu1 }
0x4936   :  { %v13130_v27 = vadd.f32 %v15826_v16, %v13129_v25  ;;  %v15874_v25 = vld [vmem:[%s20733_s28 + $0x6] ss:$0 sm:$0xff] }
0x4938   :  { %v18823_v34 = vpack.c.bf16 %v13135_v18, %v13130_v27  ;;  %v17816_v35 = vpop.f32.mrb[194].mxu1 }
0x4939   :  { %v13223_v36 = vadd.f32 %v17816_v35, %v15832_v22  ;;  %v13217_v37 = vpop.f32.mrb[195].mxu1 }
0x493a   :  { %v13218_v38 = vadd.f32 %v15832_v22, %v13217_v37  ;;  %18825 = vmatprep.subr.msk.bf16.mxu1 %vm19389_vm2, %v18823_v34 }
0x493b   :  { %18828 = vmatpush3.bf16.xpose.msk.msra.mxu1 %vm19389_vm2, %v18823_v34 }
0x493c   :  { %v18829_v41 = vpack.c.bf16 %v13223_v36, %v13218_v38 }
0x493e   :  { %18830 = vmatprep.subr.bf16.mxu1 %v18829_v41 }
0x4942   :  { %17822 = vmatmul.mubr.msk.f32.vlgmr.msra.gmra.mrb[196].mxu1 %vm445_vm1, %v13047_v44 }
0x4943   :  { %18832 = vmatpush3.bf16.msra.mxu1 %v18829_v41 }
0x4944   :  { %17850 = vmatprep.subr.msk.mxu1 %vm134_vm0, %v15860_v0 }
0x4a15   :  { %v17823_v33 = vpop.f32.mrb[196].mxu1 }
0x4a16   :  { %v13314_v31 = vmul.f32 0.35355338, %v17823_v33  ;;  %v13304_v46 = vpop.f32.mrb[197].mxu1 }
0x4a17   :  { %v13313_v21 = vmul.f32 0.35355338, %v13304_v46 }
0x4a18   :  { %v13316_v40 = vadd.f32 %v13314_v31, %v20757_v52 }
0x4a19   :  { %v13315_v47 = vadd.f32 %v13313_v21, %v20760_v20 }
0x4a1a   :  { %v13320_v48 = vsel %vm537_vm3, %v13316_v40, -inf }
0x4a1b   :  { %13321 = vmax.xlane.f32.xlu1 %v13320_v48  ;;  %v13317_v49 = vsel %vm537_vm3, %v13315_v47, -inf }
0x4a1c   :  { %13318 = vmax.xlane.f32.xlu0 %v13317_v49 }
0x4aa8   :  { %v13322_v50 = vpop.xlane.xlu1 %13321 }
0x4aa9   :  { %v13324_v51 = vsub.f32 %v13316_v40, %v13322_v50  ;;  %v13319_v53 = vpop.xlane.xlu0 %13318 }
0x4aaa   :  { %v13323_v56 = vsub.f32 %v13315_v47, %v13319_v53 }
0x4aab   :  { %v13327_v39 = vmul.f32 1.442695, %v13324_v51 }
0x4aac   :  { %v13325_v5 = vmul.f32 1.442695, %v13323_v56 }
0x4aad   :  { %19234 = vpow2.f32 %v13327_v39  ;;  %v10915_v39 = vmul.f32 0.35355338, %v20818_v29  ;;  %v15902_v29 = vld [vmem:[%s20681_s29 + $0x38] sm:$0xff] }
0x4aae   :  { %19236 = vpow2.f32 %v13325_v5  ;;  %v10914_v5 = vmul.f32 0.35355338, %v20820_v23 }
0x4ab7   :  { %v19235_v58 = vpop.eup %19234 }
0x4ab8   :  { %v19237_v61 = vpop.eup %19236  ;;  %v13332_v43 = vsel %vm537_vm3, %v19235_v58, 0.0 }
0x4ab9   :  { %13333 = vadd.xlane.f32.xlu1 %v13332_v43  ;;  %v13329_v63 = vsel %vm537_vm3, %v19237_v61, 0.0  ;;  %v10917_v43 = vadd.f32 %v10915_v39, %v20757_v52 }
0x4aba   :  { %13330 = vadd.xlane.f32.xlu0 %v13329_v63 }
0x4b46   :  { %v13334_v1 = vpop.xlane.xlu1 %13333 }
0x4b47   :  { %19238 = vrcp.f32 %v13334_v1  ;;  %v13331_v2 = vpop.xlane.xlu0 %13330 }
0x4b48   :  { %19240 = vrcp.f32 %v13331_v2  ;;  %v10921_v2 = vsel %vm537_vm3, %v10917_v43, -inf }
0x4b51   :  { %v19239_v3 = vpop.eup %19238 }
0x4b52   :  { %v19241_v4 = vpop.eup %19240  ;;  %v13338_v6 = vmul.f32 %v19239_v3, %v19235_v58 }
0x4b53   :  { %v13337_v59 = vmul.f32 %v19241_v4, %v19237_v61 }
0x4b55   :  { %17828 = vmatprep.mubr.msk.f32.mxu1 %vm537_vm3, %v13337_v59 }
0x4b56   :  { %17829 = vmatmul.mubr.msk.f32.vlgmr.msra.gmra.mrb[198].mxu1 %vm537_vm3, %v13338_v6 }
0x4b57   :  { %17851 = vmatpush3.xpose.msk.msra.mxu1 %vm134_vm0, %v15860_v0  ;;  %17852 = vmatprep.mubr.msk.f32.mxu1 %vm134_vm0, %v20700_v60  ;;  %v10916_v0 = vadd.f32 %v10914_v5, %v20760_v20  ;;  %v15910_v5 = vld [vmem:[%s20728_s23 + $0x7] ss:$0 sm:$0xff] }
0x4b58   :  { %17855 = vmatprep.subr.msk.mxu1 %vm134_vm0, %v15866_v8 }
0x4b59   :  { %v10918_v3 = vsel %vm537_vm3, %v10916_v0, -inf }
0x4b5a   :  { %17853 = vmatmul.mubr.msk.f32.vlgmr.msra.gmra.mrb[200].mxu1 %vm134_vm0, %v20702_v26 }
0x4b5b   :  { %17856 = vmatpush3.xpose.msk.msra.mxu1 %vm134_vm0, %v15866_v8  ;;  %17857 = vmatprep.mubr.msk.f32.mxu1 %vm134_vm0, %v20700_v60 }
0x4b5c   :  { %17860 = vmatprep.subr.msk.mxu1 %vm134_vm0, %v15872_v9 }
0x4b5e   :  { %17858 = vmatmul.mubr.msk.f32.vlgmr.msra.gmra.mrb[202].mxu1 %vm134_vm0, %v20702_v26 }
0x4b5f   :  { %17861 = vmatpush3.xpose.msk.msra.mxu1 %vm134_vm0, %v15872_v9  ;;  %17862 = vmatprep.mubr.msk.f32.mxu1 %vm134_vm0, %v20700_v60 }
0x4b62   :  { %17863 = vmatmul.mubr.msk.f32.vlgmr.msra.gmra.mrb[204].mxu1 %vm134_vm0, %v20702_v26 }
0x4c29   :  { %v20986_v10 = vpop.f32.mrb[198].mxu1 }
0x4c2a   :  { %v20988_v11 = vpop.f32.mrb[199].mxu1 }
0x4c2d   :  { %v17854_v12 = vpop.f32.mrb[200].mxu1 }
0x4c2e   :  { %v13615_v14 = vpop.f32.mrb[201].mxu1  ;;  %v13621_v38 = vadd.f32 %v17854_v12, %v15862_v42 }
0x4c2f   :  { %v13616_v62 = vadd.f32 %v15862_v42, %v13615_v14 }
0x4c31   :  { %v17859_v7 = vpop.f32.mrb[202].mxu1  ;;  %17869 = vmatprep.mubr.msk.f32.mxu1 %vm445_vm1, %v13616_v62 }
0x4c32   :  { %v13709_v16 = vadd.f32 %v17859_v7, %v15868_v54  ;;  %v13703_v17 = vpop.f32.mrb[203].mxu1 }
0x4c33   :  { %v13704_v18 = vadd.f32 %v15868_v54, %v13703_v17  ;;  %v15908_v54 = vld [vmem:[%s20686_s18 + $0x38] sm:$0xff] }
0x4c35   :  { %v18857_v27 = vpack.c.bf16 %v13709_v16, %v13704_v18  ;;  %v17864_v22 = vpop.f32.mrb[204].mxu1  ;;  %v15914_v18 = vld [vmem:[%s20697_s6 + $0x38] sm:$0xff] }
0x4c36   :  { %v13797_v34 = vadd.f32 %v17864_v22, %v15874_v25  ;;  %v13791_v35 = vpop.f32.mrb[205].mxu1  ;;  %v15665_v22 = vld [vmem:[%s21039_s13 + $0x48] sm:$0xff] }
0x4c37   :  { %v13792_v36 = vadd.f32 %v15874_v25, %v13791_v35  ;;  %18859 = vmatprep.subr.msk.bf16.mxu1 %vm19389_vm2, %v18857_v27 }
0x4c38   :  { %18862 = vmatpush3.bf16.xpose.msk.msra.mxu1 %vm19389_vm2, %v18857_v27  ;;  %v15664_v27 = vld [vmem:[%s21039_s13 + $0x40] sm:$0xff] }
0x4c39   :  { %v18863_v37 = vpack.c.bf16 %v13797_v34, %v13792_v36  ;;  %v18673_v34 = vpack.c.bf16 %v15665_v22, %v15664_v27  ;;  %v15666_v36 = vld [vmem:[%s21039_s13 + $0x50] sm:$0xff] }
0x4c3a   :  { %v15718_v22 = vld [vmem:[%s21039_s13 + $0x90] sm:$0xff] }
0x4c3b   :  { %18864 = vmatprep.subr.bf16.mxu1 %v18863_v37  ;;  %18675 = vmatprep.subr.msk.bf16.mxu0 %vm19389_vm2, %v18673_v34 }
0x4c3f   :  { %17870 = vmatmul.mubr.msk.f32.vlgmr.msra.gmra.mrb[206].mxu1 %vm445_vm1, %v13621_v38 }
0x4c40   :  { %18866 = vmatpush3.bf16.msra.mxu1 %v18863_v37  ;;  %v15667_v37 = vld [vmem:[%s21039_s13 + $0x58] sm:$0xff] }
0x4c41   :  { %17898 = vmatprep.subr.msk.mxu1 %vm134_vm0, %v15902_v29 }
0x4d12   :  { %v17871_v41 = vpop.f32.mrb[206].mxu1 }
0x4d13   :  { %v13888_v44 = vmul.f32 0.35355338, %v17871_v41  ;;  %v13878_v33 = vpop.f32.mrb[207].mxu1 }
0x4d14   :  { %v13887_v31 = vmul.f32 0.35355338, %v13878_v33  ;;  %v18679_v33 = vpack.c.bf16 %v15667_v37, %v15666_v36  ;;  %v15723_v37 = vld [vmem:[%s21039_s13 + $0xb8] sm:$0xff] }
0x4d15   :  { %v13890_v46 = vadd.f32 %v13888_v44, %v20757_v52 }
0x4d16   :  { %v13889_v21 = vadd.f32 %v13887_v31, %v20760_v20  ;;  %v15668_v31 = vld [vmem:[%s21039_s13 + $0x60] sm:$0xff] }
0x4d17   :  { %v13894_v40 = vsel %vm537_vm3, %v13890_v46, -inf }
0x4d18   :  { %13895 = vmax.xlane.f32.xlu1 %v13894_v40  ;;  %v13891_v47 = vsel %vm537_vm3, %v13889_v21, -inf  ;;  %v15670_v40 = vld [vmem:[%s21039_s13 + $0x70] sm:$0xff] }
0x4d19   :  { %13892 = vmax.xlane.f32.xlu0 %v13891_v47  ;;  %v15671_v47 = vld [vmem:[%s21039_s13 + $0x78] sm:$0xff] }
0x4da5   :  { %v13896_v48 = vpop.xlane.xlu1 %13895 }
0x4da6   :  { %v13898_v49 = vsub.f32 %v13890_v46, %v13896_v48  ;;  %v13893_v50 = vpop.xlane.xlu0 %13892  ;;  %v15669_v46 = vld [vmem:[%s21039_s13 + $0x68] sm:$0xff]  ;;  %v18691_v48 = vpack.c.bf16 %v15671_v47, %v15670_v40 }
0x4da7   :  { %v13897_v51 = vsub.f32 %v13889_v21, %v13893_v50  ;;  %v18685_v21 = vpack.c.bf16 %v15669_v46, %v15668_v31  ;;  %v15761_v31 = vld [vmem:[%s21039_s13 + $0xd8] sm:$0xff]  ;;  %v15763_v40 = vld [vmem:[%s21039_s13 + $0xe8] sm:$0xff] }
0x4da8   :  { %v13901_v53 = vmul.f32 1.442695, %v13898_v49 }
0x4da9   :  { %v13899_v56 = vmul.f32 1.442695, %v13897_v51  ;;  %v15904_v51 = vld [vmem:[%s20723_s16 + $0x7] ss:$0 sm:$0xff] }
0x4daa   :  { %19242 = vpow2.f32 %v13901_v53 }
0x4dab   :  { %19244 = vpow2.f32 %v13899_v56 }
0x4db4   :  { %v19243_v58 = vpop.eup %19242 }
0x4db5   :  { %v19245_v61 = vpop.eup %19244  ;;  %v13906_v63 = vsel %vm537_vm3, %v19243_v58, 0.0 }
0x4db6   :  { %13907 = vadd.xlane.f32.xlu1 %v13906_v63  ;;  %v13903_v1 = vsel %vm537_vm3, %v19245_v61, 0.0 }
0x4db7   :  { %13904 = vadd.xlane.f32.xlu0 %v13903_v1 }
0x4dba   :  { %10922 = vmax.xlane.f32.xlu1 %v10921_v2 }
0x4dbb   :  { %10919 = vmax.xlane.f32.xlu0 %v10918_v3 }
0x4e43   :  { %v13908_v23 = vpop.xlane.xlu1 %13907 }
0x4e44   :  { %19246 = vrcp.f32 %v13908_v23  ;;  %v13905_v52 = vpop.xlane.xlu0 %13904 }
0x4e45   :  { %19248 = vrcp.f32 %v13905_v52 }
0x4e47   :  { %v10923_v4 = vpop.xlane.xlu1 %10922 }
0x4e48   :  { %v10925_v20 = vsub.f32 %v10917_v43, %v10923_v4  ;;  %v10920_v59 = vpop.xlane.xlu0 %10919 }
0x4e49   :  { %v10924_v6 = vsub.f32 %v10916_v0, %v10920_v59  ;;  %v15916_v0 = vld [vmem:[%s20733_s28 + $0x7] ss:$0 sm:$0xff]  ;;  %v10556_v59 = vld [vmem:[%s21039_s13 + $0x8] sm:$0xff] }
0x4e4a   :  { %v10928_v8 = vmul.f32 1.442695, %v10925_v20  ;;  %v10555_v20 = vld [vmem:[%s21039_s13] sm:$0xff] }
0x4e4b   :  { %v10926_v9 = vmul.f32 1.442695, %v10924_v6  ;;  %v18697_v6 = vpack.c.bf16 %v10556_v59, %v10555_v20  ;;  %v15805_v20 = vld [vmem:[%s21039_s13 + $0x128] sm:$0xff] }
0x4e4c   :  { %19250 = vpow2.f32 %v10928_v8  ;;  %v10557_v8 = vld [vmem:[%s21039_s13 + $0x10] sm:$0xff] }
0x4e4d   :  { %19252 = vpow2.f32 %v10926_v9  ;;  %v10558_v9 = vld [vmem:[%s21039_s13 + $0x18] sm:$0xff] }
0x4e4e   :  { %v19247_v42 = vpop.eup %19246 }
0x4e4f   :  { %v19249_v12 = vpop.eup %19248  ;;  %v13912_v62 = vmul.f32 %v19247_v42, %v19243_v58 }
0x4e50   :  { %v13911_v14 = vmul.f32 %v19249_v12, %v19245_v61 }
0x4e52   :  { %17876 = vmatprep.mubr.msk.f32.mxu1 %vm537_vm3, %v13911_v14  ;;  %v18703_v14 = vpack.c.bf16 %v10558_v9, %v10557_v8  ;;  %v15843_v9 = vld [vmem:[%s21039_s13 + $0x148] sm:$0xff] }
0x4e53   :  { %17877 = vmatmul.mubr.msk.f32.vlgmr.msra.gmra.mrb[208].mxu1 %vm537_vm3, %v13912_v62  ;;  %v10559_v62 = vld [vmem:[%s21039_s13 + $0x20] sm:$0xff] }
0x4e54   :  { %17899 = vmatpush3.xpose.msk.msra.mxu1 %vm134_vm0, %v15902_v29  ;;  %17900 = vmatprep.mubr.msk.f32.mxu1 %vm134_vm0, %v20700_v60 }
0x4e55   :  { %17903 = vmatprep.subr.msk.mxu1 %vm134_vm0, %v15908_v54 }
0x4e56   :  { %v19251_v7 = vpop.eup %19250 }
0x4e57   :  { %v19253_v16 = vpop.eup %19252  ;;  %17901 = vmatmul.mubr.msk.f32.vlgmr.msra.gmra.mrb[210].mxu1 %vm134_vm0, %v20702_v26  ;;  %v10933_v17 = vsel %vm537_vm3, %v19251_v7, 0.0 }
0x4e58   :  { %17904 = vmatpush3.xpose.msk.msra.mxu1 %vm134_vm0, %v15908_v54  ;;  %10934 = vadd.xlane.f32.xlu1 %v10933_v17  ;;  %v10930_v25 = vsel %vm537_vm3, %v19253_v16, 0.0  ;;  %v10560_v54 = vld [vmem:[%s21039_s13 + $0x28] sm:$0xff]  ;;  %v10562_v17 = vld [vmem:[%s21039_s13 + $0x38] sm:$0xff] }
0x4e59   :  { %17905 = vmatprep.mubr.msk.f32.mxu1 %vm134_vm0, %v20700_v60  ;;  %10931 = vadd.xlane.f32.xlu0 %v10930_v25  ;;  %v15717_v25 = vld [vmem:[%s21039_s13 + $0x88] sm:$0xff] }
0x4e5a   :  { %17908 = vmatprep.subr.msk.mxu1 %vm134_vm0, %v15914_v18 }
0x4e5b   :  { %17906 = vmatmul.mubr.msk.f32.vlgmr.msra.gmra.mrb[212].mxu1 %vm134_vm0, %v20702_v26 }
0x4e5c   :  { %17909 = vmatpush3.xpose.msk.msra.mxu1 %vm134_vm0, %v15914_v18  ;;  %17910 = vmatprep.mubr.msk.f32.mxu1 %vm134_vm0, %v20700_v60 }
0x4e5f   :  { %17911 = vmatmul.mubr.msk.f32.vlgmr.msra.gmra.mrb[214].mxu1 %vm134_vm0, %v20702_v26 }
0x4ee5   :  { %v10935_v60 = vpop.xlane.xlu1 %10934 }
0x4ee6   :  { %19254 = vrcp.f32 %v10935_v60  ;;  %v10932_v26 = vpop.xlane.xlu0 %10931 }
0x4ee7   :  { %19256 = vrcp.f32 %v10932_v26  ;;  %v15720_v26 = vld [vmem:[%s21039_s13 + $0xa0] sm:$0xff] }
0x4ef0   :  { %v19255_v35 = vpop.eup %19254 }
0x4ef1   :  { %v19257_v38 = vpop.eup %19256  ;;  %v10939_v44 = vmul.f32 %v19255_v35, %v19251_v7  ;;  %v18709_v7 = vpack.c.bf16 %v10560_v54, %v10559_v62  ;;  %v15721_v35 = vld [vmem:[%s21039_s13 + $0xa8] sm:$0xff]  ;;  %v15846_v54 = vld [vmem:[%s21039_s13 + $0x160] sm:$0xff] }
0x4ef2   :  { %v10938_v41 = vmul.f32 %v19257_v38, %v19253_v16  ;;  %v10561_v16 = vld [vmem:[%s21039_s13 + $0x30] sm:$0xff]  ;;  %v18743_v36 = vpack.c.bf16 %v15721_v35, %v15720_v26  ;;  %v15889_v26 = vld [vmem:[%s21039_s13 + $0x1a8] sm:$0xff] }
0x4ef3   :  { %v18715_v18 = vpack.c.bf16 %v10562_v17, %v10561_v16  ;;  %v15849_v17 = vld [vmem:[%s21039_s13 + $0x178] sm:$0xff] }
0x4ef4   :  { %17617 = vmatprep.mubr.msk.f32.mxu0 %vm537_vm3, %v10938_v41  ;;  %v15759_v41 = vld [vmem:[%s21039_s13 + $0xc8] sm:$0xff] }
0x4ef5   :  { %17618 = vmatmul.mubr.msk.f32.vlgmr.msra.gmra.mrb[32].mxu0 %vm537_vm3, %v10939_v44 }
0x4ef6   :  { %18678 = vmatpush3.bf16.xpose.msk.msra.mxu0 %vm19389_vm2, %v18673_v34  ;;  %v15719_v34 = vld [vmem:[%s21039_s13 + $0x98] sm:$0xff] }
0x4ef7   :  { %18681 = vmatprep.subr.msk.bf16.mxu0 %vm19389_vm2, %v18679_v33  ;;  %v18737_v60 = vpack.c.bf16 %v15719_v34, %v15718_v22  ;;  %v15887_v22 = vld [vmem:[%s21039_s13 + $0x198] sm:$0xff] }
0x4efe   :  { %18684 = vmatpush3.bf16.xpose.msk.msra.mxu0 %vm19389_vm2, %v18679_v33  ;;  %v15760_v33 = vld [vmem:[%s21039_s13 + $0xd0] sm:$0xff] }
0x4eff   :  { %18687 = vmatprep.subr.msk.bf16.mxu0 %vm19389_vm2, %v18685_v21  ;;  %v18771_v46 = vpack.c.bf16 %v15761_v31, %v15760_v33 }
0x4f06   :  { %18690 = vmatpush3.bf16.xpose.msk.msra.mxu0 %vm19389_vm2, %v18685_v21  ;;  %v15762_v21 = vld [vmem:[%s21039_s13 + $0xe0] sm:$0xff] }
0x4f07   :  { %18693 = vmatprep.subr.msk.bf16.mxu0 %vm19389_vm2, %v18691_v48 }
0x4f0e   :  { %18696 = vmatpush3.bf16.xpose.msk.msra.mxu0 %vm19389_vm2, %v18691_v48 }
0x4f0f   :  { %18699 = vmatprep.subr.msk.bf16.mxu0 %vm19389_vm2, %v18697_v6 }
0x4f26   :  { %v21067_v49 = vpop.f32.mrb[208].mxu1 }
0x4f27   :  { %v21069_v50 = vpop.f32.mrb[209].mxu1 }
0x4f2a   :  { %v17902_v53 = vpop.f32.mrb[210].mxu1 }
0x4f2b   :  { %v14189_v56 = vpop.f32.mrb[211].mxu1  ;;  %v14195_v4 = vadd.f32 %v17902_v53, %v15904_v51 }
0x4f2c   :  { %v14190_v39 = vadd.f32 %v15904_v51, %v14189_v56  ;;  %v18777_v56 = vpack.c.bf16 %v15763_v40, %v15762_v21  ;;  %v15926_v21 = vld [vmem:[%s21039_s13 + $0x1c0] sm:$0xff]  ;;  %v15927_v40 = vld [vmem:[%s21039_s13 + $0x1c8] sm:$0xff] }
0x4f2e   :  { %v17907_v58 = vpop.f32.mrb[212].mxu1  ;;  %17917 = vmatprep.mubr.msk.f32.mxu1 %vm445_vm1, %v14190_v39 }
0x4f2f   :  { %v14283_v61 = vadd.f32 %v17907_v58, %v15910_v5  ;;  %v14277_v43 = vpop.f32.mrb[213].mxu1 }
0x4f30   :  { %v14278_v63 = vadd.f32 %v15910_v5, %v14277_v43  ;;  %v19271_v5 = vld [vmem:[%s20754_s5] sm:$0xff]  ;;  %v15764_v43 = vld [vmem:[%s21039_s13 + $0xf0] sm:$0xff] }
0x4f32   :  { %v18891_v1 = vpack.c.bf16 %v14283_v61, %v14278_v63  ;;  %v17912_v2 = vpop.f32.mrb[214].mxu1  ;;  %v15765_v63 = vld [vmem:[%s21039_s13 + $0xf8] sm:$0xff] }
0x4f33   :  { %v14371_v3 = vadd.f32 %v17912_v2, %v15916_v0  ;;  %v14365_v29 = vpop.f32.mrb[215].mxu1  ;;  %v15801_v2 = vld [vmem:[%s21039_s13 + $0x108] sm:$0xff] }
0x4f34   :  { %v14366_v23 = vadd.f32 %v15916_v0, %v14365_v29  ;;  %18893 = vmatprep.subr.msk.bf16.mxu1 %vm19389_vm2, %v18891_v1  ;;  %v18783_v0 = vpack.c.bf16 %v15765_v63, %v15764_v43  ;;  %v15802_v29 = vld [vmem:[%s21039_s13 + $0x110] sm:$0xff] }
0x4f35   :  { %18896 = vmatpush3.bf16.xpose.msk.msra.mxu1 %vm19389_vm2, %v18891_v1  ;;  %v15800_v1 = vld [vmem:[%s21039_s13 + $0x100] sm:$0xff] }
0x4f36   :  { %v18897_v52 = vpack.c.bf16 %v14371_v3, %v14366_v23  ;;  %v18799_v3 = vpack.c.bf16 %v15801_v2, %v15800_v1  ;;  %v15803_v23 = vld [vmem:[%s21039_s13 + $0x118] sm:$0xff] }
0x4f38   :  { %18898 = vmatprep.subr.bf16.mxu1 %v18897_v52 }
0x4f3c   :  { %17918 = vmatmul.mubr.msk.f32.vlgmr.msra.gmra.mrb[216].mxu1 %vm445_vm1, %v14195_v4  ;;  %v15804_v4 = vld [vmem:[%s21039_s13 + $0x120] sm:$0xff] }
0x4f3d   :  { %18900 = vmatpush3.bf16.msra.mxu1 %v18897_v52  ;;  %v18805_v52 = vpack.c.bf16 %v15803_v23, %v15802_v29  ;;  %v18811_v59 = vpack.c.bf16 %v15805_v20, %v15804_v4  ;;  %v14694_v29 = vld [vmem:[%s21293_s7 + $0x10] sm:$0xff]  ;;  %v14696_v20 = vld [vmem:[%s21293_s7 + $0x20] sm:$0xff] }
0x4fc8   :  { %v17619_v42 = vpop.f32.mrb[32].mxu0 }
0x4fc9   :  { %v11012_v12 = vpop.f32.mrb[33].mxu0 }
0x4fca   :  { %17636 = vmatprep.mubr.msk.f32.mxu0 %vm445_vm1, %v11012_v12  ;;  %v15844_v12 = vld [vmem:[%s21039_s13 + $0x150] sm:$0xff] }
0x4fcb   :  { %17637 = vmatmul.mubr.msk.f32.vlgmr.msra.gmra.mrb[34].mxu0 %vm445_vm1, %v17619_v42 }
0x4fcc   :  { %18702 = vmatpush3.bf16.xpose.msk.msra.mxu0 %vm19389_vm2, %v18697_v6  ;;  %17655 = vmatprep.mubr.msk.f32.mxu0 %vm445_vm1, %v20793_v24  ;;  %v15716_v24 = vld [vmem:[%s21039_s13 + $0x80] sm:$0xff]  ;;  %v15807_v6 = vld [vmem:[%s21039_s13 + $0x138] sm:$0xff] }
0x4fcd   :  { %18705 = vmatprep.subr.msk.bf16.mxu0 %vm19389_vm2, %v18703_v14  ;;  %v18731_v27 = vpack.c.bf16 %v15717_v25, %v15716_v24  ;;  %v15885_v24 = vld [vmem:[%s21039_s13 + $0x188] sm:$0xff] }
0x4fd4   :  { %18708 = vmatpush3.bf16.xpose.msk.msra.mxu0 %vm19389_vm2, %v18703_v14  ;;  %v15845_v14 = vld [vmem:[%s21039_s13 + $0x158] sm:$0xff] }
0x4fd5   :  { %18711 = vmatprep.subr.msk.bf16.mxu0 %vm19389_vm2, %v18709_v7  ;;  %v18839_v62 = vpack.c.bf16 %v15845_v14, %v15844_v12  ;;  %v14702_v14 = vld [vmem:[%s21293_s7 + $0x50] sm:$0xff] }
0x4fdc   :  { %18714 = vmatpush3.bf16.xpose.msk.msra.mxu0 %vm19389_vm2, %v18709_v7  ;;  %v15847_v7 = vld [vmem:[%s21039_s13 + $0x168] sm:$0xff] }
0x4fdd   :  { %18717 = vmatprep.subr.msk.bf16.mxu0 %vm19389_vm2, %v18715_v18  ;;  %v18845_v16 = vpack.c.bf16 %v15847_v7, %v15846_v54  ;;  %v14704_v7 = vld [vmem:[%s21293_s7 + $0x60] sm:$0xff] }
0x4fe4   :  { %18720 = vmatpush3.bf16.xpose.msk.msra.mxu0 %vm19389_vm2, %v18715_v18 }
0x4fe5   :  { %18733 = vmatprep.subr.msk.bf16.mxu0 %vm19389_vm2, %v18731_v27 }
0x4feb   :  { %17656 = vmatmul.mubr.msk.f32.vlgmr.msra.gmra.mrb[34].mxu0 %vm445_vm1, %v20791_v19  ;;  %v15722_v19 = vld [vmem:[%s21039_s13 + $0xb0] sm:$0xff] }
0x4fec   :  { %18736 = vmatpush3.bf16.xpose.msk.msra.mxu0 %vm19389_vm2, %v18731_v27  ;;  %17703 = vmatprep.mubr.msk.f32.mxu0 %vm445_vm1, %v20862_v28  ;;  %v18749_v38 = vpack.c.bf16 %v15723_v37, %v15722_v19  ;;  %v15758_v28 = vld [vmem:[%s21039_s13 + $0xc0] sm:$0xff]  ;;  %v15886_v27 = vld [vmem:[%s21039_s13 + $0x190] sm:$0xff] }
0x4fed   :  { %18739 = vmatprep.subr.msk.bf16.mxu0 %vm19389_vm2, %v18737_v60  ;;  %v18765_v44 = vpack.c.bf16 %v15759_v41, %v15758_v28  ;;  %v18873_v34 = vpack.c.bf16 %v15887_v22, %v15886_v27  ;;  %v15944_v27 = vld [vmem:[%s14877_s26] ss:$0 sm:$0xff] }
0x4ff4   :  { %18742 = vmatpush3.bf16.xpose.msk.msra.mxu0 %vm19389_vm2, %v18737_v60  ;;  %v15888_v60 = vld [vmem:[%s21039_s13 + $0x1a0] sm:$0xff] }
0x4ff5   :  { %18745 = vmatprep.subr.msk.bf16.mxu0 %vm19389_vm2, %v18743_v36  ;;  %v18879_v35 = vpack.c.bf16 %v15889_v26, %v15888_v60 }
0x4ffc   :  { %18748 = vmatpush3.bf16.xpose.msk.msra.mxu0 %vm19389_vm2, %v18743_v36  ;;  %v15890_v36 = vld [vmem:[%s21039_s13 + $0x1b0] sm:$0xff] }
0x4ffd   :  { %18751 = vmatprep.subr.msk.bf16.mxu0 %vm19389_vm2, %v18749_v38 }
0x5004   :  { %18754 = vmatpush3.bf16.xpose.msk.msra.mxu0 %vm19389_vm2, %v18749_v38 }
0x5005   :  { %18767 = vmatprep.subr.msk.bf16.mxu0 %vm19389_vm2, %v18765_v44 }
0x500b   :  { %17704 = vmatmul.mubr.msk.f32.vlgmr.msra.gmra.mrb[34].mxu0 %vm445_vm1, %v20860_v57  ;;  %v19270_v57 = vld [vmem:[%s20754_s5 + $0x8] sm:$0xff] }
0x500c   :  { %18770 = vmatpush3.bf16.xpose.msk.msra.mxu0 %vm19389_vm2, %v18765_v44  ;;  %17751 = vmatprep.mubr.msk.f32.mxu0 %vm445_vm1, %v20904_v15 }
0x500d   :  { %18773 = vmatprep.subr.msk.bf16.mxu0 %vm19389_vm2, %v18771_v46 }
0x500f   :  { %v17919_v47 = vpop.f32.mrb[216].mxu1 }
0x5010   :  { %v14462_v48 = vmul.f32 0.35355338, %v17919_v47  ;;  %v14452_v51 = vpop.f32.mrb[217].mxu1  ;;  %v15928_v47 = vld [vmem:[%s21039_s13 + $0x1d0] sm:$0xff] }
0x5011   :  { %v14461_v53 = vmul.f32 0.35355338, %v14452_v51  ;;  %v15929_v51 = vld [vmem:[%s21039_s13 + $0x1d8] sm:$0xff] }
0x5012   :  { %v21153_v39 = vadd.f32 %v19270_v57, %v14462_v48  ;;  %v18901_v48 = vpack.c.bf16 %v15927_v40, %v15926_v21  ;;  %v15931_v57 = vld [vmem:[%s21039_s13 + $0x1e8] sm:$0xff] }
0x5013   :  { %v21156_v58 = vadd.f32 %v19271_v5, %v14461_v53  ;;  %v18907_v53 = vpack.c.bf16 %v15929_v51, %v15928_v47  ;;  %v15932_v5 = vld [vmem:[%s21039_s13 + $0x1f0] sm:$0xff] }
0x5014   :  { %18776 = vmatpush3.bf16.xpose.msk.msra.mxu0 %vm19389_vm2, %v18771_v46  ;;  %v14468_v15 = vsel %vm537_vm3, %v21153_v39, -inf }
0x5015   :  { %14469 = vmax.xlane.f32.xlu1 %v14468_v15  ;;  %v14465_v61 = vsel %vm537_vm3, %v21156_v58, -inf  ;;  %18779 = vmatprep.subr.msk.bf16.mxu0 %vm19389_vm2, %v18777_v56 }
0x5016   :  { %14466 = vmax.xlane.f32.xlu0 %v14465_v61 }
0x501c   :  { %18782 = vmatpush3.bf16.xpose.msk.msra.mxu0 %vm19389_vm2, %v18777_v56  ;;  %v15930_v56 = vld [vmem:[%s21039_s13 + $0x1e0] sm:$0xff] }
0x501d   :  { %18785 = vmatprep.subr.msk.bf16.mxu0 %vm19389_vm2, %v18783_v0 }
0x5024   :  { %18788 = vmatpush3.bf16.xpose.msk.msra.mxu0 %vm19389_vm2, %v18783_v0 }
0x5025   :  { %18801 = vmatprep.subr.msk.bf16.mxu0 %vm19389_vm2, %v18799_v3 }
0x502b   :  { %17752 = vmatmul.mubr.msk.f32.vlgmr.msra.gmra.mrb[34].mxu0 %vm445_vm1, %v20902_v55  ;;  %v15806_v55 = vld [vmem:[%s21039_s13 + $0x130] sm:$0xff] }
0x502c   :  { %18804 = vmatpush3.bf16.xpose.msk.msra.mxu0 %vm19389_vm2, %v18799_v3  ;;  %17799 = vmatprep.mubr.msk.f32.mxu0 %vm445_vm1, %v20946_v32  ;;  %v18817_v8 = vpack.c.bf16 %v15807_v6, %v15806_v55  ;;  %v15842_v32 = vld [vmem:[%s21039_s13 + $0x140] sm:$0xff]  ;;  %v14693_v3 = vld [vmem:[%s21293_s7 + $0x8] sm:$0xff]  ;;  %v14698_v6 = vld [vmem:[%s21293_s7 + $0x30] sm:$0xff] }
0x502d   :  { %18807 = vmatprep.subr.msk.bf16.mxu0 %vm19389_vm2, %v18805_v52  ;;  %v18833_v42 = vpack.c.bf16 %v15843_v9, %v15842_v32  ;;  %v18925_v23 = vpack.c.bf16 %v14693_v3, %v14692_v45  ;;  %v14700_v9 = vld [vmem:[%s21293_s7 + $0x40] sm:$0xff] }
0x502f   :  { %18927 = vmatprep.subr.msk.bf16.mxu1 %vm19924_vm4, %v18925_v23 }
0x5034   :  { %18810 = vmatpush3.bf16.xpose.msk.msra.mxu0 %vm19389_vm2, %v18805_v52  ;;  %v14695_v52 = vld [vmem:[%s21293_s7 + $0x18] sm:$0xff] }
0x5035   :  { %18813 = vmatprep.subr.msk.bf16.mxu0 %vm19389_vm2, %v18811_v59  ;;  %v18931_v4 = vpack.c.bf16 %v14695_v52, %v14694_v29 }
0x503c   :  { %18816 = vmatpush3.bf16.xpose.msk.msra.mxu0 %vm19389_vm2, %v18811_v59  ;;  %v14697_v59 = vld [vmem:[%s21293_s7 + $0x28] sm:$0xff] }
0x503d   :  { %18819 = vmatprep.subr.msk.bf16.mxu0 %vm19389_vm2, %v18817_v8  ;;  %v18937_v55 = vpack.c.bf16 %v14697_v59, %v14696_v20 }
0x5044   :  { %18822 = vmatpush3.bf16.xpose.msk.msra.mxu0 %vm19389_vm2, %v18817_v8  ;;  %v14699_v8 = vld [vmem:[%s21293_s7 + $0x38] sm:$0xff] }
0x5045   :  { %18835 = vmatprep.subr.msk.bf16.mxu0 %vm19389_vm2, %v18833_v42  ;;  %v18943_v32 = vpack.c.bf16 %v14699_v8, %v14698_v6 }
0x504b   :  { %17800 = vmatmul.mubr.msk.f32.vlgmr.msra.gmra.mrb[34].mxu0 %vm445_vm1, %v20944_v13  ;;  %v15848_v13 = vld [vmem:[%s21039_s13 + $0x170] sm:$0xff] }
0x504c   :  { %18838 = vmatpush3.bf16.xpose.msk.msra.mxu0 %vm19389_vm2, %v18833_v42  ;;  %17847 = vmatprep.mubr.msk.f32.mxu0 %vm445_vm1, %v20988_v11  ;;  %v18851_v18 = vpack.c.bf16 %v15849_v17, %v15848_v13  ;;  %v15884_v11 = vld [vmem:[%s21039_s13 + $0x180] sm:$0xff]  ;;  %v14701_v42 = vld [vmem:[%s21293_s7 + $0x48] sm:$0xff]  ;;  %v14706_v17 = vld [vmem:[%s21293_s7 + $0x70] sm:$0xff] }
0x504d   :  { %18841 = vmatprep.subr.msk.bf16.mxu0 %vm19389_vm2, %v18839_v62  ;;  %v18867_v25 = vpack.c.bf16 %v15885_v24, %v15884_v11  ;;  %v18949_v12 = vpack.c.bf16 %v14701_v42, %v14700_v9 }
0x5054   :  { %18844 = vmatpush3.bf16.xpose.msk.msra.mxu0 %vm19389_vm2, %v18839_v62  ;;  %v14703_v62 = vld [vmem:[%s21293_s7 + $0x58] sm:$0xff] }
0x5055   :  { %18847 = vmatprep.subr.msk.bf16.mxu0 %vm19389_vm2, %v18845_v16  ;;  %v18955_v54 = vpack.c.bf16 %v14703_v62, %v14702_v14 }
0x505c   :  { %18850 = vmatpush3.bf16.xpose.msk.msra.mxu0 %vm19389_vm2, %v18845_v16  ;;  %v14705_v16 = vld [vmem:[%s21293_s7 + $0x68] sm:$0xff] }
0x505d   :  { %18853 = vmatprep.subr.msk.bf16.mxu0 %vm19389_vm2, %v18851_v18  ;;  %v18961_v13 = vpack.c.bf16 %v14705_v16, %v14704_v7 }
0x5064   :  { %18856 = vmatpush3.bf16.xpose.msk.msra.mxu0 %vm19389_vm2, %v18851_v18  ;;  %v14707_v18 = vld [vmem:[%s21293_s7 + $0x78] sm:$0xff] }
0x5065   :  { %18869 = vmatprep.subr.msk.bf16.mxu0 %vm19389_vm2, %v18867_v25  ;;  %v18967_v11 = vpack.c.bf16 %v14707_v18, %v14706_v17 }
0x506b   :  { %17848 = vmatmul.mubr.msk.f32.vlgmr.msra.gmra.mrb[34].mxu0 %vm445_vm1, %v20986_v10  ;;  %v15891_v10 = vld [vmem:[%s21039_s13 + $0x1b8] sm:$0xff] }
0x506c   :  { %18872 = vmatpush3.bf16.xpose.msk.msra.mxu0 %vm19389_vm2, %v18867_v25  ;;  %17895 = vmatprep.mubr.msk.f32.mxu0 %vm445_vm1, %v21069_v50  ;;  %v18885_v19 = vpack.c.bf16 %v15891_v10, %v15890_v36 }
0x506d   :  { %18875 = vmatprep.subr.msk.bf16.mxu0 %vm19389_vm2, %v18873_v34 }
0x5074   :  { %18878 = vmatpush3.bf16.xpose.msk.msra.mxu0 %vm19389_vm2, %v18873_v34 }
0x5075   :  { %18881 = vmatprep.subr.msk.bf16.mxu0 %vm19389_vm2, %v18879_v35 }
0x507c   :  { %18884 = vmatpush3.bf16.xpose.msk.msra.mxu0 %vm19389_vm2, %v18879_v35 }
0x507d   :  { %18887 = vmatprep.subr.msk.bf16.mxu0 %vm19389_vm2, %v18885_v19 }
0x5084   :  { %18890 = vmatpush3.bf16.xpose.msk.msra.mxu0 %vm19389_vm2, %v18885_v19 }
0x5085   :  { %18903 = vmatprep.subr.msk.bf16.mxu0 %vm19389_vm2, %v18901_v48 }
0x508b   :  { %17896 = vmatmul.mubr.msk.f32.vlgmr.msra.gmra.mrb[34].mxu0 %vm445_vm1, %v21067_v49 }
0x508c   :  { %18906 = vmatpush3.bf16.xpose.msk.msra.mxu0 %vm19389_vm2, %v18901_v48 }
0x508d   :  { %18909 = vmatprep.subr.msk.bf16.mxu0 %vm19389_vm2, %v18907_v53 }
0x5094   :  { %18912 = vmatpush3.bf16.xpose.msk.msra.mxu0 %vm19389_vm2, %v18907_v53 }
0x50a2   :  { %v14470_v50 = vpop.xlane.xlu1 %14469 }
0x50a3   :  { %v14472_v37 = vsub.f32 %v21153_v39, %v14470_v50  ;;  %v14467_v38 = vpop.xlane.xlu0 %14466  ;;  %v18913_v39 = vpack.c.bf16 %v15931_v57, %v15930_v56 }
0x50a4   :  { %v14471_v28 = vsub.f32 %v21156_v58, %v14467_v38  ;;  %v15933_v58 = vld [vmem:[%s21039_s13 + $0x1f8] sm:$0xff] }
0x50a5   :  { %v14475_v41 = vmul.f32 1.442695, %v14472_v37  ;;  %18915 = vmatprep.subr.msk.bf16.mxu0 %vm19389_vm2, %v18913_v39  ;;  %v18919_v15 = vpack.c.bf16 %v15933_v58, %v15932_v5 }
0x50a6   :  { %v14473_v44 = vmul.f32 1.442695, %v14471_v28  ;;  %18918 = vmatpush3.bf16.xpose.msk.msra.mxu0 %vm19389_vm2, %v18913_v39 }
0x50a7   :  { %19258 = vpow2.f32 %v14475_v41  ;;  %18921 = vmatprep.subr.msk.bf16.mxu0 %vm19389_vm2, %v18919_v15 }
0x50a8   :  { %19260 = vpow2.f32 %v14473_v44 }
0x50ae   :  { %18924 = vmatpush3.bf16.xpose.msk.msra.mxu0 %vm19389_vm2, %v18919_v15 }
0x50b1   :  { %v19259_v33 = vpop.eup %19258 }
0x50b2   :  { %v19261_v31 = vpop.eup %19260  ;;  %v14480_v46 = vsel %vm537_vm3, %v19259_v33, 0.0 }
0x50b3   :  { %14481 = vadd.xlane.f32.xlu1 %v14480_v46  ;;  %v14477_v49 = vsel %vm537_vm3, %v19261_v31, 0.0 }
0x50b4   :  { %14478 = vadd.xlane.f32.xlu0 %v14477_v49 }
0x5140   :  { %v14482_v61 = vpop.xlane.xlu1 %14481 }
0x5141   :  { %19262 = vrcp.f32 %v14482_v61  ;;  %v14479_v43 = vpop.xlane.xlu0 %14478 }
0x5142   :  { %19264 = vrcp.f32 %v14479_v43 }
0x514b   :  { %v19263_v63 = vpop.eup %19262 }
0x514c   :  { %v19265_v0 = vpop.eup %19264  ;;  %v14486_v2 = vmul.f32 %v19263_v63, %v19259_v33 }
0x514d   :  { %v14485_v1 = vmul.f32 %v19265_v0, %v19261_v31 }
0x514f   :  { %17924 = vmatprep.mubr.msk.f32.mxu1 %vm537_vm3, %v14485_v1 }
0x5150   :  { %17925 = vmatmul.mubr.msk.f32.vlgmr.msra.gmra.mrb[218].mxu1 %vm537_vm3, %v14486_v2 }
0x5151   :  { %18930 = vmatpush3.bf16.xpose.msk.msra.mxu1 %vm19924_vm4, %v18925_v23 }
0x5152   :  { %18933 = vmatprep.subr.msk.bf16.mxu1 %vm19924_vm4, %v18931_v4 }
0x5159   :  { %18936 = vmatpush3.bf16.xpose.msk.msra.mxu1 %vm19924_vm4, %v18931_v4 }
0x515a   :  { %18939 = vmatprep.subr.msk.bf16.mxu1 %vm19924_vm4, %v18937_v55 }
0x5161   :  { %18942 = vmatpush3.bf16.xpose.msk.msra.mxu1 %vm19924_vm4, %v18937_v55 }
0x5162   :  { %18945 = vmatprep.subr.msk.bf16.mxu1 %vm19924_vm4, %v18943_v32 }
0x5169   :  { %18948 = vmatpush3.bf16.xpose.msk.msra.mxu1 %vm19924_vm4, %v18943_v32 }
0x516a   :  { %18951 = vmatprep.subr.msk.bf16.mxu1 %vm19924_vm4, %v18949_v12 }
0x5171   :  { %18954 = vmatpush3.bf16.xpose.msk.msra.mxu1 %vm19924_vm4, %v18949_v12 }
0x5172   :  { %18957 = vmatprep.subr.msk.bf16.mxu1 %vm19924_vm4, %v18955_v54 }
0x5179   :  { %18960 = vmatpush3.bf16.xpose.msk.msra.mxu1 %vm19924_vm4, %v18955_v54 }
0x517a   :  { %18963 = vmatprep.subr.msk.bf16.mxu1 %vm19924_vm4, %v18961_v13 }
0x5181   :  { %18966 = vmatpush3.bf16.xpose.msk.msra.mxu1 %vm19924_vm4, %v18961_v13 }
0x5182   :  { %18969 = vmatprep.subr.msk.bf16.mxu1 %vm19924_vm4, %v18967_v11 }
0x5189   :  { %18972 = vmatpush3.bf16.xpose.msk.msra.mxu1 %vm19924_vm4, %v18967_v11 }
0x5223   :  { %v17926_v24 = vpop.f32.mrb[218].mxu1 }
0x5224   :  { %v14559_v25 = vpop.f32.mrb[219].mxu1 }
0x5225   :  { %17943 = vmatprep.mubr.msk.f32.mxu0 %vm445_vm1, %v14559_v25 }
0x5226   :  { %17944 = vmatmul.mubr.msk.f32.vlgmr.msra.gmra.mrb[34].mxu0 %vm445_vm1, %v17926_v24 }
0x52f9   :  { %v17945_v22 = vpop.f32.mrb[34].mxu0 }
0x52fa   :  { %v14673_v34 = vpop.f32.mrb[35].mxu0  ;;  %v14691_v26 = vadd.f32 %v17945_v22, %v15944_v27 }
0x52fb   :  { %v14690_v60 = vadd.f32 %v15944_v27, %v14673_v34 }
0x52fd   :  { %17978 = vmatprep.mubr.msk.f32.mxu1 %vm134_vm0, %v14690_v60 }
0x52fe   :  { %17979 = vmatmul.mubr.msk.f32.vlgmr.msra.gmra.mrb[220].mxu1 %vm134_vm0, %v14691_v26 }
0x53d1   :  { %v17980_v35 = vpop.f32.mrb[220].mxu1 }
0x53d2   :  { %v14841_v36 = vadd.f32 %v17980_v35, %v15945_v30  ;;  %v14835_v10 = vpop.f32.mrb[221].mxu1 }
0x53d3   :  { %v14836_v19 = vadd.f32 %v15945_v30, %v14835_v10 }
0x53d4   :  { %14845 = vst [vmem:[%s14880_s20 + $0x8] sm:$0xff] %v14841_v36 }
0x53d5   :  { %14844 = vst [vmem:[%s14880_s20] sm:$0xff] %v14836_v19 }

</bundles_post_ra>
